<compile_context>
chip_gen: v6e
topology: v6e:2x2x1
jax: 0.10.0
libtpu: 0.0.40
codegen_flags: <defaults>
</compile_context>

<pallas_src>
import numpy as np
import jax
import jax.numpy as jnp
from jax.experimental import pallas as pl
from jax.experimental.pallas import tpu as pltpu


def _cdiv(a: int, b: int) -> int:
    return -(-a // b)


def _round_up(a: int, b: int) -> int:
    return _cdiv(a, b) * b


def _freq_bands(n_freqs: int, log_space: bool) -> np.ndarray:
    """Frequency bands matching the PyTorch module (host-side numpy, float32)."""
    if log_space:
        bands = 2.0 ** np.linspace(0.0, n_freqs - 1, n_freqs)
    else:
        bands = np.linspace(2.0 ** 0.0, 2.0 ** (n_freqs - 1), n_freqs)
    return bands.astype(np.float32)


def _choose_group_size(d_input: int, d_output: int) -> int:
    """Original rows packed per kernel row.

    Prefer the smallest G with G*d_output a multiple of 128 (fully lane-dense stores), else 16
    (>=93% dense).  Bounded so the block-diagonal MXU matmul (K = G*d_input) stays well under the
    HBM-store roofline on all of v5e/v6e/v7x.
    """
    if d_input * 8 > 128:            # wide inputs are already reasonably lane-dense
        return 1
    for g in (8, 16, 32):
        if g * d_input <= 128 and (g * d_output) % 128 == 0:
            return g
    return 16 if 16 * d_input <= 128 else 8


def _encoding_constants(d_input: int, n_freqs: int, log_space: bool, group: int):
    """Host-built constants.

    Returns:
      s_mat:     (group*d_input, group*d_output) block-diagonal scale/scatter matrix such that
                 (x_grouped @ s_mat) holds, per group element, [x, f0*x, f0*x, f1*x, f1*x, ...].
      phase_row: (1, group*d_output) -- 0 for passthrough/sin columns, pi/2 for cos columns.
      keep_row:  (1, group*d_output) -- 1.0 for passthrough columns, 0.0 for encoded columns.
    """
    d_output = d_input * (1 + 2 * n_freqs)
    freqs = _freq_bands(n_freqs, log_space)

    scale_blocks = [np.ones(d_input, np.float32)]
    phase_blocks = [np.zeros(d_input, np.float32)]
    for f in freqs:
        scale_blocks.append(np.full(d_input, f, np.float32))      # sin(f*x)
        phase_blocks.append(np.zeros(d_input, np.float32))
        scale_blocks.append(np.full(d_input, f, np.float32))      # cos(f*x) = sin(f*x + pi/2)
        phase_blocks.append(np.full(d_input, np.float32(np.pi / 2)))
    scale = np.concatenate(scale_blocks)                          # (d_output,)
    phase1 = np.concatenate(phase_blocks)                         # (d_output,)
    src = np.tile(np.arange(d_input), 1 + 2 * n_freqs)            # input dim feeding each column

    s1 = np.zeros((d_input, d_output), np.float32)
    s1[src, np.arange(d_output)] = scale
    keep1 = np.zeros(d_output, np.float32)
    keep1[:d_input] = 1.0

    if group == 1:
        s_mat, phase, keep = s1, phase1, keep1
    else:
        s_mat = np.kron(np.eye(group, dtype=np.float32), s1)      # block-diagonal
        phase = np.tile(phase1, group)
        keep = np.tile(keep1, group)
    return s_mat, phase.reshape(1, -1), keep.reshape(1, -1)


def _posenc_kernel(x_ref, s_ref, phase_ref, keep_ref, o_ref):
    """One row tile.

    x_ref:     (tm, G*d_input)          -- G original rows per kernel row.
    s_ref:     (G*d_input, G*d_output)  -- block-diagonal scale/scatter matrix.
    phase_ref: (1, G*d_output)          -- 0 (passthrough / sin cols) or pi/2 (cos cols).
    keep_ref:  (1, G*d_output)          -- 1.0 for passthrough cols, 0.0 otherwise.
    o_ref:     (tm, G*d_output)
    """
    x = x_ref[...].astype(jnp.float32)
    # Column scatter + frequency scaling on the (otherwise idle) MXU; HIGHEST keeps f32 accuracy.
    arg = jnp.dot(x, s_ref[...], preferred_element_type=jnp.float32,
                  precision=jax.lax.Precision.HIGHEST)
    arg = arg + phase_ref[...]                      # broadcast add (VPU)
    enc = jnp.sin(arg)                              # single wide transcendental (EUP)
    keep = keep_ref[...]                            # {0,1} blend: passthrough columns stay = x
    out = keep * arg + (1.0 - keep) * enc
    o_ref[...] = out.astype(o_ref.dtype)            # one aligned, full-width store


def positional_encoder_ori(x, n_freqs: int, log_space: bool = False,
                           row_tile: int = 8192, out_dtype=None):
    """JAX/Pallas equivalent of PositionalEncoderOri.forward.

    x: array of shape (..., d_input). Returns (..., d_input * (1 + 2*n_freqs)).
    out_dtype: set to jnp.bfloat16 to halve the (dominant) output HBM traffic when the consumer
    tolerates it (the sin/cos math stays in f32 inside the kernel).
    """
    d_input = x.shape[-1]
    d_output = d_input * (1 + 2 * n_freqs)
    if out_dtype is None:
        out_dtype = x.dtype

    lead_shape = x.shape[:-1]
    x2 = x.reshape(-1, d_input)
    n = x2.shape[0]

    group = _choose_group_size(d_input, d_output)

    # Pad the row count to a multiple of `group` (input is only ~6% of traffic, pad is cheap).
    n_pad = _round_up(max(n, 1), group)
    if n_pad != n:
        # TODO(synk): the trailing out[:n] slice re-copies the output for non-divisible n; callers
        # that care should use row counts divisible by `group` (8/16/32).
        x2 = jnp.pad(x2, ((0, n_pad - n), (0, 0)))
    n_g = n_pad // group
    gd_in = group * d_input
    gd_out = group * d_output

    s_mat, phase_row, keep_row = _encoding_constants(d_input, n_freqs, log_space, group)

    # Row tile (in grouped rows): large to amortize the ~0.35us/step overhead, but always split
    # into >= 2 grid steps when possible so the 'parallel' axis shards across both v7x cores.
    if group == 1:
        row_tile = min(row_tile, 4096)          # un-grouped blocks pad to 128 lanes in VMEM
    cap = max(8, (row_tile // group) // 8 * 8)
    if n_g <= 8:
        tm = n_g
    else:
        tm = min(cap, _round_up(_cdiv(n_g, 2), 8))
    grid = (_cdiv(n_g, tm),)

    out = pl.pallas_call(
        _posenc_kernel,
        out_shape=jax.ShapeDtypeStruct((n_g, gd_out), out_dtype),
        grid=grid,
        in_specs=[
            pl.BlockSpec((tm, gd_in), lambda i: (i, 0)),
            pl.BlockSpec((gd_in, gd_out), lambda i: (0, 0)),
            pl.BlockSpec((1, gd_out), lambda i: (0, 0)),
            pl.BlockSpec((1, gd_out), lambda i: (0, 0)),
        ],
        out_specs=pl.BlockSpec((tm, gd_out), lambda i: (i, 0)),
        compiler_params=pltpu.CompilerParams(
            dimension_semantics=("parallel",),
            vmem_limit_bytes=32 * 1024 * 1024,
        ),
        cost_estimate=pl.CostEstimate(
            flops=2 * n_g * gd_in * gd_out,
            transcendentals=n_pad * d_output,
            bytes_accessed=4 * n_pad * (d_input + d_output),
        ),
    )(x2.reshape(n_g, gd_in), jnp.asarray(s_mat), jnp.asarray(phase_row), jnp.asarray(keep_row))

    out = out.reshape(n_pad, d_output)          # free row-major reshape
    if n_pad != n:
        out = out[:n]
    return out.reshape(*lead_shape, d_output)


def _posenc_reference(x, n_freqs: int, log_space: bool = False):
    """Pure-JAX reference mirroring the PyTorch module semantics."""
    parts = [x]
    for f in _freq_bands(n_freqs, log_space):
        parts.append(jnp.sin(x * f))
        parts.append(jnp.cos(x * f))
    return jnp.concatenate(parts, axis=-1)


if __name__ == "__main__":
    key = jax.random.PRNGKey(0)

    # Test 1: batch of NeRF-like 3D+1 points, linear freq bands (d_output=52 -> group=32, 13*128 lanes).
    batch, n_pts, d_input = 2, 128, 4
    n_freqs = 6
    x = jax.random.normal(key, (batch, n_pts, d_input), dtype=jnp.float32)
    out = jax.block_until_ready(positional_encoder_ori(x, n_freqs=n_freqs, log_space=False))
    ref = _posenc_reference(x, n_freqs=n_freqs, log_space=False)
    assert out.shape == (batch, n_pts, d_input * (1 + 2 * n_freqs)), out.shape
    assert jnp.allclose(out, ref, atol=1e-4, rtol=1e-5), "mismatch vs reference (test 1)"

    # Test 2: ragged row count (pad + slice path), log-space freqs, multi-block grid.
    x2 = jax.random.normal(jax.random.PRNGKey(1), (200, 3), dtype=jnp.float32)
    out2 = jax.block_until_ready(positional_encoder_ori(x2, n_freqs=4, log_space=True))
    ref2 = _posenc_reference(x2, n_freqs=4, log_space=True)
    assert out2.shape == (200, 3 * (1 + 2 * 4)), out2.shape
    assert jnp.allclose(out2, ref2, atol=1e-4, rtol=1e-5), "mismatch vs reference (test 2)"

    # Test 3: bf16 output (store-bound v5e/v6e lever), loose tolerance.
    out3 = jax.block_until_ready(
        positional_encoder_ori(x, n_freqs=n_freqs, out_dtype=jnp.bfloat16))
    assert out3.dtype == jnp.bfloat16
    assert jnp.allclose(out3.astype(jnp.float32), ref, atol=5e-2, rtol=5e-2), "bf16 mismatch"

    print("KERNEL_OK")
</pallas_src>

<mosaic_0001>
module attributes {stable_mosaic.version = 11 : i64} {
  func.func @_posenc_kernel(%arg0: i32, %arg1: memref<8x128xf32, #tpu.memory_space<vmem>>, %arg2: memref<128x1664xf32, #tpu.memory_space<vmem>>, %arg3: memref<1x1664xf32, #tpu.memory_space<vmem>>, %arg4: memref<1x1664xf32, #tpu.memory_space<vmem>>, %arg5: memref<8x1664xf32, #tpu.memory_space<vmem>>) attributes {dimension_semantics = [#tpu.dimension_semantics<parallel>], iteration_bounds = array<i64: 1>, scalar_prefetch = 0 : i64, scratch_operands = 0 : i64, tpu.core_type = #tpu.core_type<tc>, window_params = [{transform_indices = @transform_0, window_bounds = array<i64: 8, 128>}, {pipeline_mode = #tpu.pipeline_mode<synchronous>, transform_indices = @transform_1, window_bounds = array<i64: 128, 1664>}, {pipeline_mode = #tpu.pipeline_mode<synchronous>, transform_indices = @transform_2, window_bounds = array<i64: 1, 1664>}, {pipeline_mode = #tpu.pipeline_mode<synchronous>, transform_indices = @transform_3, window_bounds = array<i64: 1, 1664>}, {transform_indices = @transform_4, window_bounds = array<i64: 8, 1664>}]} {
    %c0 = arith.constant 0 : index
    %c0_0 = arith.constant 0 : index
    %0 = vector.load %arg1[%c0, %c0_0] : memref<8x128xf32, #tpu.memory_space<vmem>>, vector<8x128xf32>
    %c0_1 = arith.constant 0 : index
    %c0_2 = arith.constant 0 : index
    %1 = vector.load %arg2[%c0_1, %c0_2] : memref<128x1664xf32, #tpu.memory_space<vmem>>, vector<128x1664xf32>
    %cst = arith.constant dense<0.000000e+00> : vector<8x1664xf32>
    %2 = tpu.matmul %0, %1, %cst {dimension_numbers = #tpu.dot_dimension_numbers<[1], [0], [0], [1], [0, 0, 1, 1], [], []>, precision = #tpu.contract_precision<fp32>} : vector<8x128xf32>, vector<128x1664xf32>, vector<8x1664xf32> -> vector<8x1664xf32>
    %c0_3 = arith.constant 0 : index
    %c0_4 = arith.constant 0 : index
    %3 = vector.load %arg3[%c0_3, %c0_4] : memref<1x1664xf32, #tpu.memory_space<vmem>>, vector<1x1664xf32>
    %4 = vector.broadcast %3 : vector<1x1664xf32> to vector<8x1664xf32>
    %5 = arith.addf %2, %4 : vector<8x1664xf32>
    %6 = math.sin %5 : vector<8x1664xf32>
    %c0_5 = arith.constant 0 : index
    %c0_6 = arith.constant 0 : index
    %7 = vector.load %arg4[%c0_5, %c0_6] : memref<1x1664xf32, #tpu.memory_space<vmem>>, vector<1x1664xf32>
    %8 = vector.broadcast %7 : vector<1x1664xf32> to vector<8x1664xf32>
    %9 = arith.mulf %8, %5 : vector<8x1664xf32>
    %cst_7 = arith.constant 1.000000e+00 : f32
    %10 = vector.broadcast %cst_7 : f32 to vector<1x1664xf32>
    %11 = arith.subf %10, %7 : vector<1x1664xf32>
    %12 = vector.broadcast %11 : vector<1x1664xf32> to vector<8x1664xf32>
    %13 = arith.mulf %12, %6 : vector<8x1664xf32>
    %14 = arith.addf %9, %13 : vector<8x1664xf32>
    %c0_8 = arith.constant 0 : index
    %c0_9 = arith.constant 0 : index
    %15 = vector.load %arg5[%c0_8, %c0_9] : memref<8x1664xf32, #tpu.memory_space<vmem>>, vector<8x1664xf32>
    tpu.vector_store %arg5[%c0_8, %c0_9], %14 {strides = array<i32>} : memref<8x1664xf32, #tpu.memory_space<vmem>>, vector<8x1664xf32>,
    return
  }
  func.func @transform_0(%arg0: i32) -> (i32, i32) {
    %c0_i32 = arith.constant 0 : i32
    %c0_i32_0 = arith.constant 0 : i32
    return %arg0, %c0_i32 : i32, i32
  }
  func.func @transform_1(%arg0: i32) -> (i32, i32) {
    %c0_i32 = arith.constant 0 : i32
    %c0_i32_0 = arith.constant 0 : i32
    %c0_i32_1 = arith.constant 0 : i32
    return %c0_i32, %c0_i32_0 : i32, i32
  }
  func.func @transform_2(%arg0: i32) -> (i32, i32) {
    %c0_i32 = arith.constant 0 : i32
    %c0_i32_0 = arith.constant 0 : i32
    %c0_i32_1 = arith.constant 0 : i32
    return %c0_i32, %c0_i32_0 : i32, i32
  }
  func.func @transform_3(%arg0: i32) -> (i32, i32) {
    %c0_i32 = arith.constant 0 : i32
    %c0_i32_0 = arith.constant 0 : i32
    %c0_i32_1 = arith.constant 0 : i32
    return %c0_i32, %c0_i32_0 : i32, i32
  }
  func.func @transform_4(%arg0: i32) -> (i32, i32) {
    %c0_i32 = arith.constant 0 : i32
    %c0_i32_0 = arith.constant 0 : i32
    return %arg0, %c0_i32 : i32, i32
  }
}

</mosaic_0001>

<bundles_post_ra>
// kernel: tpu_custom_call.1
= control target key start
LH: loop header
LB: loop body
LE: loop exit
PB: predicated region body
PF: predicated region fallthrough
CT: control target
= control target key end

     0   :  { %9 = vsyncpa [#allocation3], 0  ;;  %s13463_s0 = inlined_call_operand.hbm [shape: f32[8,128], index: 0, kind: input, shape index: {}]   ;;  %s13464_s1 = inlined_call_operand.hbm [shape: f32[128,1664], index: 1, kind: input, shape index: {}]   ;;  %s13465_s2 = inlined_call_operand.hbm [shape: f32[1,1664], index: 2, kind: input, shape index: {}]   ;;  %s13466_s3 = inlined_call_operand.hbm [shape: f32[1,1664], index: 3, kind: input, shape index: {}]   ;;  %s13467_s4 = inlined_call_operand.hbm [shape: f32[8,1664], index: 4, kind: output, shape index: {}]  }
   0x1   :  { %10 = vsyncpa [#allocation6], 0 }
   0x2   :  { %11 = vsyncpa [#allocation9], 0 }
   0x3   :  { %12 = vsyncpa [#allocation4], 0  ;;  %s8273_s15 = smov [#allocation5]  }
   0x4   :  { %s28_s16 = sshll.u32 %s8273_s15, 4  ;;  %s29_s16 = int_to_ptr.vmem [resolvable:$true] %s28_s16 }
   0x5   :  { %s8173_s17 = scalar_lea.vmem %s29_s16, 26624  ;;  %p8178_p1 = scmp.lt.s32.totalorder %s29_s16, %s29_s16 }
   0x6   :  { %p8174_p0 = scmp.ne.s32.totalorder %s29_s16, %s8173_s17  ;;  %p8179_p2 = scmp.lt.s32.totalorder %s8173_s17, %s8173_s17 }
   0x8   :  { %p8180_p3 = por %p8179_p2, %p8178_p1 }
   0xa   :  { %p8181_p4 = pnand %p8180_p3, %p8174_p0 }
   0xc   :  { %8184 = shalt.err (!%p8181_p4)
}
   0xd   :  { %s8274_s18 = smov 1664   ;;  %s8275_s19 = smov 104  }
   0xe   :  { %34 = dma.hbm_to_vmem [thread:$0]  %s13464_s1, 26624, %s29_s16, [#allocation6], %s8274_s18, %s8274_s18, %s8275_s19  }
   0xf   :  { %s8276_s22 = smov [#allocation2]   ;;  %s8277_s24 = smov [#allocation7]  }
  0x10   :  { %s19_s23 = sshll.u32 %s8276_s22, 4  ;;  %s41_s25 = sshll.u32 %s8277_s24, 4  ;;  %s20_s23 = int_to_ptr.vmem [resolvable:$true] %s19_s23  ;;  %s42_s25 = int_to_ptr.vmem [resolvable:$true] %s41_s25 }
  0x11   :  { %s8193_s26 = scalar_lea.vmem %s20_s23, 128  ;;  %p8198_p6 = scmp.lt.s32.totalorder %s20_s23, %s20_s23 }
  0x12   :  { %p8194_p5 = scmp.ne.s32.totalorder %s20_s23, %s8193_s26  ;;  %p8199_p7 = scmp.lt.s32.totalorder %s8193_s26, %s8193_s26 }
  0x14   :  { %p8200_p8 = por %p8199_p7, %p8198_p6 }
  0x16   :  { %p8201_p9 = pnand %p8200_p8, %p8194_p5 }
  0x18   :  { %8204 = shalt.err (!%p8201_p9)
}
  0x19   :  { %22 = dma.hbm_to_vmem [thread:$0]  %s13463_s0, 128, %s20_s23, [#allocation3]  }
  0x1a   :  { %s8213_s29 = scalar_lea.vmem %s42_s25, 208  ;;  %s8217_s1 = scalar_lea.vmem %s42_s25, 224 }
  0x1b   :  { %p8214_p10 = scmp.ne.s32.totalorder %s42_s25, %s8213_s29  ;;  %p8218_p11 = scmp.lt.s32.totalorder %s42_s25, %s42_s25 }
  0x1c   :  { %p8219_p12 = scmp.lt.s32.totalorder %s8217_s1, %s8213_s29 }
  0x1e   :  { %p8220_p13 = por %p8219_p12, %p8218_p11 }
  0x20   :  { %p8221_p0 = pnand %p8220_p13, %p8214_p10 }
  0x22   :  { %8224 = shalt.err (!%p8221_p0)
}
  0x23   :  { %44 = dma.hbm_to_vmem [thread:$0]  %s13465_s2, 208, %s42_s25, [#allocation6]  }
  0x24   :  { %s8278_s6 = smov [#allocation8]  }
  0x25   :  { %s51_s7 = sshll.u32 %s8278_s6, 4  ;;  %s52_s7 = int_to_ptr.vmem [resolvable:$true] %s51_s7 }
  0x26   :  { %s8233_s8 = scalar_lea.vmem %s52_s7, 208  ;;  %s8237_s9 = scalar_lea.vmem %s52_s7, 224 }
  0x27   :  { %p8234_p1 = scmp.ne.s32.totalorder %s52_s7, %s8233_s8  ;;  %p8238_p2 = scmp.lt.s32.totalorder %s52_s7, %s52_s7 }
  0x28   :  { %p8239_p3 = scmp.lt.s32.totalorder %s8237_s9, %s8233_s8 }
  0x2a   :  { %p8240_p4 = por %p8239_p3, %p8238_p2 }
  0x2c   :  { %p8241_p5 = pnand %p8240_p4, %p8234_p1 }
  0x2e   :  { %8244 = shalt.err (!%p8241_p5)
}
  0x2f   :  { %54 = dma.hbm_to_vmem [thread:$0]  %s13466_s3, 208, %s52_s7, [#allocation9]  }
  0x30   :  { %8265 = dma.done.wait [#allocation3], 128  }
  0x31   :  { %8266 = vsyncadd [#allocation3], 4294967168 }
  0x32   :  { %8267 = dma.done.wait [#allocation6], 26832  }
  0x33   :  { %8268 = vsyncadd [#allocation6], 4294940464 }
  0x34   :  { %8269 = dma.done.wait [#allocation9], 208  }
  0x35   :  { %8270 = vsyncadd [#allocation9], 4294967088  ;;  %v13482_v0 = vmov 0.0   ;;  %v264_v1 = vld [vmem:[#allocation5 + $0x620] sm:$0xff]  ;;  %v263_v2 = vld [vmem:[#allocation5 + $0x618] sm:$0xff]  ;;  %s8287_s2 = smov [#allocation10]  }
  0x36   :  { %441 = vmatprep.mubr.f32.mxu0 %v13482_v0  ;;  %677 = vmatprep.mubr.f32.mxu1 %v13482_v0  ;;  %v251_v3 = vld [vmem:[#allocation5 + $0x5b8] sm:$0xff]  ;;  %v8327_v4 = vand.u32 4294901760, %v264_v1  ;;  %v8329_v5 = vand.u32 4294901760, %v263_v2  ;;  %v250_v7 = vld [vmem:[#allocation5 + $0x5b0] sm:$0xff]  ;;  %v237_v9 = vld [vmem:[#allocation5 + $0x548] sm:$0xff]  ;;  %s7664_s3 = sshll.u32 %s8287_s2, 4  ;;  %s7665_s3 = int_to_ptr.vmem [resolvable:$true] %s7664_s3 }
  0x37   :  { %v8331_v6 = vand.u32 4294901760, %v251_v3  ;;  %v238_v8 = vld [vmem:[#allocation5 + $0x550] sm:$0xff]  ;;  %v8333_v10 = vand.u32 4294901760, %v250_v7  ;;  %v8337_v12 = vand.u32 4294901760, %v237_v9  ;;  %v225_v13 = vld [vmem:[#allocation5 + $0x4e8] sm:$0xff]  ;;  %v224_v14 = vld [vmem:[#allocation5 + $0x4e0] sm:$0xff]  ;;  %p8250_p7 = scmp.lt.s32.totalorder %s7665_s3, %s7665_s3 }
  0x38   :  { %v8335_v11 = vand.u32 4294901760, %v238_v8  ;;  %v212_v15 = vld [vmem:[#allocation5 + $0x480] sm:$0xff]  ;;  %346 = vmatprep.subr.mxu0 %v8327_v4  ;;  %v8340_v16 = vand.u32 4294901760, %v225_v13  ;;  %v8342_v17 = vand.u32 4294901760, %v224_v14  ;;  %v8347_v19 = vsub.f32 %v264_v1, %v8327_v4  ;;  %v8349_v20 = vld [vmem:[#allocation5 + $0x478] sm:$0xff]  ;;  %v8353_v22 = vld [vmem:[#allocation5 + $0x410] sm:$0xff] }
  0x39   :  { %v8344_v18 = vand.u32 4294901760, %v212_v15  ;;  %v8351_v21 = vld [vmem:[#allocation5 + $0x418] sm:$0xff]  ;;  %348 = vmatpush1.msra.mxu0 %v8329_v5  ;;  %v8357_v23 = vand.u32 4294901760, %v8349_v20  ;;  %v8360_v24 = vsub.f32 %v263_v2, %v8329_v5  ;;  %v8366_v26 = vsub.f32 %v251_v3, %v8331_v6  ;;  %v8368_v27 = vld [vmem:[#allocation5 + $0x3b0] sm:$0xff]  ;;  %v8370_v28 = vld [vmem:[#allocation5 + $0x3a8] sm:$0xff]  ;;  %s8245_s11 = scalar_lea.vmem %s7665_s3, 1664 }
  0x3a   :  { %v8363_v25 = vand.u32 4294901760, %v8351_v21  ;;  %v8372_v29 = vld [vmem:[#allocation5 + $0x348] sm:$0xff]  ;;  %350 = vmatprep.subr.mxu0 %v8331_v6  ;;  %v13480_v30 = vand.u32 4294901760, %v8347_v19  ;;  %v8377_v31 = vand.u32 4294901760, %v8353_v22  ;;  %v8380_v32 = vsub.f32 %v250_v7, %v8333_v10  ;;  %v8394_v38 = vld [vmem:[#allocation5 + $0x340] sm:$0xff]  ;;  %v8428_v52 = vld [vmem:[#allocation5 + $0x2d8] sm:$0xff]  ;;  %p8246_p6 = scmp.ne.s32.totalorder %s7665_s3, %s8245_s11  ;;  %p8251_p8 = scmp.lt.s32.totalorder %s8245_s11, %s8245_s11 }
  0x3b   :  { %v8383_v33 = vand.u32 4294901760, %v8368_v27  ;;  %352 = vmatpush1.msra.mxu0 %v8333_v10  ;;  %v13479_v34 = vand.u32 4294901760, %v8360_v24  ;;  %v13477_v35 = vand.u32 4294901760, %v8366_v26  ;;  %v8389_v36 = vsub.f32 %v238_v8, %v8335_v11  ;;  %v8418_v47 = vld [vmem:[#allocation5 + $0x2e0] sm:$0xff]  ;;  %v8435_v57 = vld [vmem:[#allocation5 + $0x278] sm:$0xff]  ;;  %v8447_v62 = vld [vmem:[#allocation5 + $0x270] sm:$0xff] }
  0x3c   :  { %14142 = vst [vmem:[#allocation15_spill] sm:$0xff] %v8377_v31  ;;  %v8392_v37 = vand.u32 4294901760, %v8370_v28  ;;  %354 = vmatprep.subr.mxu0 %v8335_v11  ;;  %v456_v39 = vsub.f32 %v8347_v19, %v13480_v30  ;;  %v13475_v40 = vand.u32 4294901760, %v8380_v32  ;;  %v8402_v41 = vsub.f32 %v237_v9, %v8337_v12  ;;  %v8459_v7 = vld [vmem:[#allocation5 + $0x210] sm:$0xff]  ;;  %p8252_p9 = por %p8251_p8, %p8250_p7 }
  0x3d   :  { %14143 = vst [vmem:[#allocation16_spill] sm:$0xff] %v8383_v33  ;;  %v8405_v42 = vand.u32 4294901760, %v8372_v29  ;;  %356 = vmatpush1.msra.mxu0 %v8337_v12  ;;  %v462_v43 = vsub.f32 %v8360_v24, %v13479_v34  ;;  %v468_v44 = vsub.f32 %v8366_v26, %v13477_v35  ;;  %v13474_v45 = vand.u32 4294901760, %v8389_v36  ;;  %v8550_v35 = vld [vmem:[#allocation5 + $0xd8] sm:$0xff]  ;;  %v8560_v34 = vld [vmem:[#allocation5 + $0xd0] sm:$0xff] }
  0x3e   :  { %14144 = vst [vmem:[#allocation17_spill] sm:$0xff] %v8392_v37  ;;  %v8416_v46 = vsub.f32 %v225_v13, %v8340_v16  ;;  %358 = vmatprep.subr.mxu0 %v8340_v16  ;;  %v457_v48 = vand.u32 4294901760, %v456_v39  ;;  %v474_v49 = vsub.f32 %v8380_v32, %v13475_v40  ;;  %v13472_v50 = vand.u32 4294901760, %v8402_v41  ;;  %p8253_p10 = pnand %p8252_p9, %p8246_p6 }
  0x3f   :  { %14145 = vst [vmem:[#allocation18_spill] sm:$0xff] %v8405_v42  ;;  %v8426_v51 = vand.u32 4294901760, %v8394_v38  ;;  %360 = vmatpush1.msra.mxu0 %v8342_v17  ;;  %v463_v53 = vand.u32 4294901760, %v462_v43  ;;  %v469_v54 = vand.u32 4294901760, %v468_v44  ;;  %v480_v55 = vsub.f32 %v8389_v36, %v13474_v45  ;;  %v8537_v45 = vld [vmem:[#allocation5 + $0x138] sm:$0xff] }
  0x40   :  { %v13470_v56 = vand.u32 4294901760, %v8416_v46  ;;  %362 = vmatprep.subr.mxu0 %v8344_v18  ;;  %458 = vmatprep.subr.mxu1 %v457_v48  ;;  %v475_v58 = vand.u32 4294901760, %v474_v49  ;;  %v486_v59 = vsub.f32 %v8402_v41, %v13472_v50  ;;  %v8442_v60 = vsub.f32 %v224_v14, %v8342_v17 }
  0x41   :  { %14146 = vst [vmem:[#allocation19_spill] sm:$0xff] %v8426_v51  ;;  %v8445_v61 = vand.u32 4294901760, %v8418_v47  ;;  %364 = vmatpush1.msra.mxu0 %v8357_v23  ;;  %464 = vmatpush1.msra.mxu1 %v463_v53  ;;  %v481_v63 = vand.u32 4294901760, %v480_v55  ;;  %v8454_v2 = vsub.f32 %v212_v15, %v8344_v18  ;;  %v8457_v3 = vand.u32 4294901760, %v8428_v52  ;;  %v8470_v15 = vld [vmem:[#allocation5 + $0x208] sm:$0xff] }
  0x42   :  { %v492_v1 = vsub.f32 %v8416_v46, %v13470_v56  ;;  %366 = vmatprep.subr.mxu0 %v8363_v25  ;;  %470 = vmatprep.subr.mxu1 %v469_v54  ;;  %v487_v8 = vand.u32 4294901760, %v486_v59  ;;  %v13469_v9 = vand.u32 4294901760, %v8442_v60  ;;  %v8465_v13 = vsub.f32 %v8349_v20, %v8357_v23 }
  0x43   :  { %14147 = vst [vmem:[#allocation20_spill] sm:$0xff] %v8445_v61  ;;  %14148 = vst [vmem:[#allocation21_spill] sm:$0xff] %v8457_v3  ;;  %v8468_v14 = vand.u32 4294901760, %v8435_v57  ;;  %368 = vmatpush1.msra.mxu0 %v8377_v31  ;;  %476 = vmatpush1.msra.mxu1 %v475_v58  ;;  %v13468_v43 = vand.u32 4294901760, %v8454_v2  ;;  %v8476_v44 = vsub.f32 %v8351_v21, %v8363_v25  ;;  %v8479_v48 = vand.u32 4294901760, %v8447_v62  ;;  %v8493_v21 = vld [vmem:[#allocation5 + $0x1a8] sm:$0xff] }
  0x44   :  { %v493_v39 = vand.u32 4294901760, %v492_v1  ;;  %370 = vmatprep.subr.mxu0 %v8383_v33  ;;  %482 = vmatprep.subr.mxu1 %v481_v63  ;;  %v498_v20 = vsub.f32 %v8442_v60, %v13469_v9  ;;  %v13471_v49 = vand.u32 4294901760, %v8465_v13  ;;  %v8488_v53 = vsub.f32 %v8353_v22, %v8377_v31  ;;  %v8516_v9 = vld [vmem:[#allocation5 + $0x1a0] sm:$0xff] }
  0x45   :  { %14149 = vst [vmem:[#allocation22_spill] sm:$0xff] %v8468_v14  ;;  %14150 = vst [vmem:[#allocation23_spill] sm:$0xff] %v8479_v48  ;;  %v8491_v54 = vand.u32 4294901760, %v8459_v7  ;;  %372 = vmatpush1.msra.mxu0 %v8392_v37  ;;  %488 = vmatpush1.msra.mxu1 %v487_v8  ;;  %v504_v55 = vsub.f32 %v8454_v2, %v13468_v43  ;;  %v13473_v58 = vand.u32 4294901760, %v8476_v44  ;;  %v8505_v22 = vand.u32 4294901760, %v8470_v15 }
  0x46   :  { %v8502_v59 = vsub.f32 %v8368_v27, %v8383_v33  ;;  %374 = vmatprep.subr.mxu0 %v8405_v42  ;;  %494 = vmatprep.subr.mxu1 %v493_v39  ;;  %v499_v63 = vand.u32 4294901760, %v498_v20  ;;  %v510_v1 = vsub.f32 %v8465_v13, %v13471_v49  ;;  %v13476_v8 = vand.u32 4294901760, %v8488_v53  ;;  %v8526_v49 = vld [vmem:[#allocation5 + $0x140] sm:$0xff]  ;;  %v67_v33 = vld [vmem:[#allocation2] sm:$0xff] }
  0x47   :  { %14151 = vst [vmem:[#allocation24_spill] sm:$0xff] %v8491_v54  ;;  %14152 = vst [vmem:[#allocation25_spill] sm:$0xff] %v8505_v22  ;;  %v8514_v43 = vsub.f32 %v8370_v28, %v8392_v37  ;;  %376 = vmatpush1.msra.mxu0 %v8426_v51  ;;  %v505_v27 = vand.u32 4294901760, %v504_v55  ;;  %v516_v39 = vsub.f32 %v8476_v44, %v13473_v58  ;;  %v8524_v56 = vand.u32 4294901760, %v8493_v21 }
  0x48   :  { %v13478_v20 = vand.u32 4294901760, %v8502_v59  ;;  %500 = vmatpush1.msra.mxu1 %v499_v63  ;;  %378 = vmatprep.subr.mxu0 %v8445_v61  ;;  %v511_v28 = vand.u32 4294901760, %v510_v1  ;;  %v522_v50 = vsub.f32 %v8488_v53, %v13476_v8  ;;  %v8535_v58 = vsub.f32 %v8372_v29, %v8405_v42 }
  0x49   :  { %14153 = vst [vmem:[#allocation26_spill] sm:$0xff] %v8524_v56  ;;  %v13481_v55 = vand.u32 4294901760, %v8514_v43  ;;  %506 = vmatprep.subr.mxu1 %v505_v27  ;;  %380 = vmatpush1.msra.mxu0 %v8457_v3  ;;  %v517_v40 = vand.u32 4294901760, %v516_v39  ;;  %v8544_v1 = vand.u32 4294901760, %v8516_v9  ;;  %v8548_v8 = vsub.f32 %v8394_v38, %v8426_v51 }
  0x4a   :  { %v528_v63 = vsub.f32 %v8502_v59, %v13478_v20  ;;  %512 = vmatpush1.msra.mxu1 %v511_v28  ;;  %382 = vmatprep.subr.mxu0 %v8468_v14  ;;  %v523_v29 = vand.u32 4294901760, %v522_v50  ;;  %v13486_v39 = vand.u32 4294901760, %v8535_v58  ;;  %v8558_v20 = vand.u32 4294901760, %v8526_v49 }
  0x4b   :  { %14154 = vst [vmem:[#allocation27_spill] sm:$0xff] %v8544_v1  ;;  %v534_v27 = vsub.f32 %v8514_v43, %v13481_v55  ;;  %518 = vmatprep.subr.mxu1 %v517_v40  ;;  %384 = vmatpush1.msra.mxu0 %v8479_v48  ;;  %v13489_v28 = vand.u32 4294901760, %v8548_v8  ;;  %v8566_v50 = vsub.f32 %v8418_v47, %v8445_v61  ;;  %v8569_v30 = vand.u32 4294901760, %v8537_v45  ;;  %v8571_v55 = vld [vmem:[#allocation5 + $0x70] sm:$0xff] }
  0x4c   :  { %14155 = vst [vmem:[#allocation28_spill] sm:$0xff] %v8558_v20  ;;  %v529_v38 = vand.u32 4294901760, %v528_v63  ;;  %524 = vmatpush1.msra.mxu1 %v523_v29  ;;  %386 = vmatprep.subr.mxu0 %v8491_v54  ;;  %v540_v40 = vsub.f32 %v8535_v58, %v13486_v39  ;;  %v8579_v63 = vsub.f32 %v8428_v52, %v8457_v3  ;;  %v8582_v47 = vand.u32 4294901760, %v8550_v35  ;;  %v8596_v52 = vld [vmem:[#allocation5 + $0x68] sm:$0xff] }
  0x4d   :  { %14156 = vst [vmem:[#allocation29_spill] sm:$0xff] %v8569_v30  ;;  %v535_v0 = vand.u32 4294901760, %v534_v27  ;;  %388 = vmatpush1.msra.mxu0 %v8505_v22  ;;  %v546_v29 = vsub.f32 %v8548_v8, %v13489_v28  ;;  %v8591_v61 = vsub.f32 %v8435_v57, %v8468_v14  ;;  %v8594_v39 = vand.u32 4294901760, %v8560_v34  ;;  %v8607_v57 = vld [vmem:[#allocation5 + $0x8] sm:$0xff] }
  0x4e   :  { %14157 = vst [vmem:[#allocation30_spill] sm:$0xff] %v8582_v47  ;;  %530 = vmatprep.subr.mxu1 %v529_v38  ;;  %390 = vmatprep.subr.mxu0 %v8524_v56  ;;  %v541_v38 = vand.u32 4294901760, %v540_v40  ;;  %v8602_v28 = vsub.f32 %v8447_v62, %v8479_v48  ;;  %v8605_v27 = vand.u32 4294901760, %v8571_v55  ;;  %v14160_v51 = vand.u32 4294901760, %v8566_v50  ;;  %v8630_v40 = vld [vmem:[#allocation5] sm:$0xff] }
  0x4f   :  { %14158 = vst [vmem:[#allocation31_spill] sm:$0xff] %v8594_v39  ;;  %536 = vmatpush1.msra.mxu1 %v535_v0  ;;  %392 = vmatpush1.msra.mxu0 %v8544_v1  ;;  %v547_v14 = vand.u32 4294901760, %v546_v29  ;;  %v8616_v3 = vsub.f32 %v8459_v7, %v8491_v54  ;;  %v14161_v62 = vand.u32 4294901760, %v8579_v63  ;;  %v8624_v29 = vand.u32 4294901760, %v8596_v52 }
  0x50   :  { %14159 = vst [vmem:[#allocation32_spill] sm:$0xff] %v8605_v27  ;;  %v552_v0 = vsub.f32 %v8566_v50, %v14160_v51  ;;  %542 = vmatprep.subr.mxu1 %v541_v38  ;;  %394 = vmatprep.subr.mxu0 %v8558_v20  ;;  %v8628_v51 = vsub.f32 %v8470_v15, %v8505_v22  ;;  %v14162_v38 = vand.u32 4294901760, %v8591_v61  ;;  %v8638_v42 = vand.u32 4294901760, %v8607_v57 }
  0x51   :  { %v558_v48 = vsub.f32 %v8579_v63, %v14161_v62  ;;  %548 = vmatpush1.msra.mxu1 %v547_v14  ;;  %396 = vmatpush1.msra.mxu0 %v8569_v30  ;;  %v13508_v62 = vand.u32 4294901760, %v8616_v3  ;;  %v14163_v15 = vand.u32 4294901760, %v8602_v28  ;;  %v8654_v31 = vand.u32 4294901760, %v8630_v40 }
  0x52   :  { %v553_v7 = vand.u32 4294901760, %v552_v0  ;;  %v564_v54 = vsub.f32 %v8591_v61, %v14162_v38  ;;  %398 = vmatprep.subr.mxu0 %v8582_v47  ;;  %v8647_v0 = vsub.f32 %v8493_v21, %v8524_v56  ;;  %v14164_v21 = vand.u32 4294901760, %v8628_v51 }
  0x53   :  { %v559_v37 = vand.u32 4294901760, %v558_v48  ;;  %v570_v22 = vsub.f32 %v8602_v28, %v14163_v15  ;;  %400 = vmatpush1.msra.mxu0 %v8594_v39  ;;  %v576_v48 = vsub.f32 %v8616_v3, %v13508_v62  ;;  %v8658_v15 = vsub.f32 %v8516_v9, %v8544_v1 }
  0x54   :  { %554 = vmatprep.subr.mxu1 %v553_v7  ;;  %v565_v38 = vand.u32 4294901760, %v564_v54  ;;  %402 = vmatprep.subr.mxu0 %v8605_v27  ;;  %v582_v54 = vsub.f32 %v8628_v51, %v14164_v21  ;;  %v13511_v7 = vand.u32 4294901760, %v8647_v0  ;;  %v8667_v62 = vsub.f32 %v8526_v49, %v8558_v20 }
  0x55   :  { %560 = vmatpush1.msra.mxu1 %v559_v37  ;;  %v571_v14 = vand.u32 4294901760, %v570_v22  ;;  %v577_v56 = vand.u32 4294901760, %v576_v48  ;;  %404 = vmatpush1.msra.mxu0 %v8624_v29  ;;  %v13514_v9 = vand.u32 4294901760, %v8658_v15  ;;  %v8671_v37 = vand.u32 4294901760, %v67_v33 }
  0x56   :  { %566 = vmatprep.subr.mxu1 %v565_v38  ;;  %v8675_v22 = vsub.f32 %v8537_v45, %v8569_v30  ;;  %v583_v21 = vand.u32 4294901760, %v582_v54  ;;  %406 = vmatprep.subr.mxu0 %v8638_v42  ;;  %v588_v49 = vsub.f32 %v8647_v0, %v13511_v7  ;;  %v8684_v48 = vsub.f32 %v8550_v35, %v8582_v47 }
  0x57   :  { %14165 = vst [vmem:[#allocation33_spill] sm:$0xff] %v8671_v37  ;;  %572 = vmatpush1.msra.mxu1 %v571_v14  ;;  %408 = vmatpush1.msra.mxu0 %v8654_v31  ;;  %v594_v45 = vsub.f32 %v8658_v15, %v13514_v9  ;;  %v8691_v14 = vsub.f32 %v67_v33, %v8671_v37  ;;  %v14167_v35 = vand.u32 4294901760, %v8667_v62 }
  0x58   :  { %578 = vmatprep.subr.mxu1 %v577_v56  ;;  %v8696_v7 = vsub.f32 %v8560_v34, %v8594_v39  ;;  %v589_v38 = vand.u32 4294901760, %v588_v49  ;;  %687 = vmatprep.subr.mxu0 %v8347_v19  ;;  %v13521_v47 = vand.u32 4294901760, %v8684_v48  ;;  %v8705_v33 = vsub.f32 %v8571_v55, %v8605_v27 }
  0x59   :  { %14166 = vst [vmem:[#allocation34_spill] sm:$0xff] %v8691_v14  ;;  %584 = vmatpush1.msra.mxu1 %v583_v21  ;;  %v600_v56 = vsub.f32 %v8667_v62, %v14167_v35  ;;  %v595_v9 = vand.u32 4294901760, %v594_v45  ;;  %v8708_v54 = vand.u32 4294901760, %v8691_v14  ;;  %v14169_v34 = vand.u32 4294901760, %v8675_v22 }
  0x5a   :  { %v13522_v49 = vand.u32 4294901760, %v8696_v7  ;;  %590 = vmatprep.subr.mxu1 %v589_v38  ;;  %v612_v39 = vsub.f32 %v8684_v48, %v13521_v47  ;;  %v13528_v30 = vand.u32 4294901760, %v8705_v33  ;;  %v8720_v55 = vsub.f32 %v8596_v52, %v8624_v29 }
  0x5b   :  { %14168 = vst [vmem:[#allocation35_spill] sm:$0xff] %v8708_v54  ;;  %v606_v21 = vsub.f32 %v8675_v22, %v14169_v34  ;;  %v601_v35 = vand.u32 4294901760, %v600_v56  ;;  %596 = vmatpush1.msra.mxu1 %v595_v9  ;;  %v445_v45 = vsub.f32 %v8691_v14, %v8708_v54  ;;  %v8729_v56 = vsub.f32 %v8607_v57, %v8638_v42 }
  0x5c   :  { %14170 = vst [vmem:[#allocation36_spill] sm:$0xff] %v8720_v55  ;;  %v618_v38 = vsub.f32 %v8696_v7, %v13522_v49  ;;  %v613_v34 = vand.u32 4294901760, %v612_v39  ;;  %v624_v52 = vsub.f32 %v8705_v33, %v13528_v30  ;;  %v13527_v9 = vand.u32 4294901760, %v8720_v55  ;;  %v14185_v30 = vld [vmem:[#allocation26_spill] sm:$0xff] }
  0x5d   :  { %v607_v27 = vand.u32 4294901760, %v606_v21  ;;  %602 = vmatprep.subr.mxu1 %v601_v35  ;;  %v8737_v47 = vsub.f32 %v8630_v40, %v8654_v31  ;;  %v8739_v21 = vand.u32 4294901760, %v445_v45  ;;  %v13526_v54 = vand.u32 4294901760, %v8729_v56 }
  0x5e   :  { %v619_v49 = vand.u32 4294901760, %v618_v38  ;;  %v625_v57 = vand.u32 4294901760, %v624_v52  ;;  %v630_v39 = vsub.f32 %v8720_v55, %v13527_v9  ;;  %v14174_v52 = vld [vmem:[#allocation15_spill] sm:$0xff]  ;;  %v14184_v9 = vld [vmem:[#allocation25_spill] sm:$0xff] }
  0x5f   :  { %14171 = vst [vmem:[#allocation37_spill] sm:$0xff] %v8737_v47  ;;  %14172 = vst [vmem:[#allocation38_spill] sm:$0xff] %v8739_v21  ;;  %608 = vmatpush1.msra.mxu1 %v607_v27  ;;  %v13525_v35 = vand.u32 4294901760, %v8737_v47  ;;  %447 = vmatmul.mubr.f32.vlgmr.msra.gmra.mxu0 %v8739_v21  ;;  %v636_v40 = vsub.f32 %v8729_v56, %v13526_v54  ;;  %v14183_v54 = vld [vmem:[#allocation24_spill] sm:$0xff]  ;;  %v14186_v21 = vand.u32 4294901760, %v8347_v19  ;;  %v14194_v19 = vand.u32 4294901760, %v8389_v36 }
  0x60   :  { %614 = vmatprep.subr.mxu1 %v613_v34  ;;  %690 = vmatpush1.msra.mxu0 %v8360_v24  ;;  %v631_v27 = vand.u32 4294901760, %v630_v39  ;;  %v14173_v34 = vmov 0.0   ;;  %v14176_v39 = vld [vmem:[#allocation17_spill] sm:$0xff] }
  0x61   :  { %620 = vmatpush1.msra.mxu1 %v619_v49  ;;  %v642_v45 = vsub.f32 %v8737_v47, %v13525_v35  ;;  %693 = vmatprep.subr.mxu0 %v8366_v26  ;;  %v637_v38 = vand.u32 4294901760, %v636_v40  ;;  %v14177_v40 = vld [vmem:[#allocation18_spill] sm:$0xff]  ;;  %v14182_v35 = vld [vmem:[#allocation23_spill] sm:$0xff] }
  0x62   :  { %626 = vmatprep.subr.mxu1 %v625_v57  ;;  %813 = vmatprep.mubr.f32.mxu0 %v14173_v34  ;;  %v14175_v57 = vld [vmem:[#allocation16_spill] sm:$0xff] }
  0x63   :  { %696 = vmatpush1.msra.mxu0 %v8380_v32  ;;  %632 = vmatpush1.msra.mxu1 %v631_v27  ;;  %v643_v49 = vand.u32 4294901760, %v642_v45  ;;  %v14178_v27 = vld [vmem:[#allocation19_spill] sm:$0xff]  ;;  %v14179_v45 = vld [vmem:[#allocation20_spill] sm:$0xff] }
  0x64   :  { %699 = vmatprep.subr.mxu0 %v8389_v36  ;;  %638 = vmatprep.subr.mxu1 %v637_v38  ;;  %v14180_v38 = vld [vmem:[#allocation21_spill] sm:$0xff]  ;;  %v14199_v36 = vand.u32 4294901760, %v8454_v2 }
  0x65   :  { %702 = vmatpush1.msra.mxu0 %v8402_v41  ;;  %644 = vmatpush1.msra.mxu1 %v643_v49  ;;  %v14181_v49 = vld [vmem:[#allocation22_spill] sm:$0xff] }
  0x66   :  { %705 = vmatprep.subr.mxu0 %v8416_v46  ;;  %679 = vmatmul.mubr.f32.vlgmr.msra.gmra.mxu1 %v8671_v37  ;;  %v14187_v37 = vld [vmem:[#allocation29_spill] sm:$0xff] }
  0x67   :  { %708 = vmatpush1.msra.mxu0 %v8442_v60  ;;  %823 = vmatprep.subr.mxu1 %v8327_v4 }
  0x68   :  { %711 = vmatprep.subr.mxu0 %v8454_v2  ;;  %825 = vmatpush1.msra.mxu1 %v8329_v5  ;;  %v14203_v2 = vand.u32 4294901760, %v8502_v59 }
  0x69   :  { %714 = vmatpush1.msra.mxu0 %v8465_v13  ;;  %827 = vmatprep.subr.mxu1 %v8331_v6 }
  0x6a   :  { %717 = vmatprep.subr.mxu0 %v8476_v44  ;;  %829 = vmatpush1.msra.mxu1 %v8333_v10 }
  0x6b   :  { %720 = vmatpush1.msra.mxu0 %v8488_v53  ;;  %831 = vmatprep.subr.mxu1 %v8335_v11 }
  0x6c   :  { %723 = vmatprep.subr.mxu0 %v8502_v59  ;;  %833 = vmatpush1.msra.mxu1 %v8337_v12  ;;  %v14210_v59 = vand.u32 4294901760, %v8602_v28 }
  0x6d   :  { %726 = vmatpush1.msra.mxu0 %v8514_v43  ;;  %835 = vmatprep.subr.mxu1 %v8340_v16 }
  0x6e   :  { %729 = vmatprep.subr.mxu0 %v8535_v58  ;;  %837 = vmatpush1.msra.mxu1 %v8342_v17 }
  0x6f   :  { %732 = vmatpush1.msra.mxu0 %v8548_v8  ;;  %839 = vmatprep.subr.mxu1 %v8344_v18 }
  0x70   :  { %735 = vmatprep.subr.mxu0 %v8566_v50  ;;  %841 = vmatpush1.msra.mxu1 %v8357_v23 }
  0x71   :  { %738 = vmatpush1.msra.mxu0 %v8579_v63  ;;  %843 = vmatprep.subr.mxu1 %v8363_v25 }
  0x72   :  { %741 = vmatprep.subr.mxu0 %v8591_v61  ;;  %845 = vmatpush1.msra.mxu1 %v14174_v52 }
  0x73   :  { %744 = vmatpush1.msra.mxu0 %v8602_v28  ;;  %847 = vmatprep.subr.mxu1 %v14175_v57  ;;  %v226_v28 = vld [vmem:[#allocation5 + $0x4f0] sm:$0xff] }
  0x74   :  { %747 = vmatprep.subr.mxu0 %v8616_v3  ;;  %849 = vmatpush1.msra.mxu1 %v14176_v39 }
  0x75   :  { %750 = vmatpush1.msra.mxu0 %v8628_v51  ;;  %851 = vmatprep.subr.mxu1 %v14177_v40 }
  0x76   :  { %753 = vmatprep.subr.mxu0 %v8647_v0  ;;  %853 = vmatpush1.msra.mxu1 %v14178_v27 }
  0x77   :  { %756 = vmatpush1.msra.mxu0 %v8658_v15  ;;  %855 = vmatprep.subr.mxu1 %v14179_v45 }
  0x78   :  { %759 = vmatprep.subr.mxu0 %v8667_v62  ;;  %857 = vmatpush1.msra.mxu1 %v14180_v38 }
  0x79   :  { %762 = vmatpush1.msra.mxu0 %v8675_v22  ;;  %859 = vmatprep.subr.mxu1 %v14181_v49 }
  0x7a   :  { %765 = vmatprep.subr.mxu0 %v8684_v48  ;;  %861 = vmatpush1.msra.mxu1 %v14182_v35 }
  0x7b   :  { %768 = vmatpush1.msra.mxu0 %v8696_v7  ;;  %863 = vmatprep.subr.mxu1 %v14183_v54 }
  0x7c   :  { %771 = vmatprep.subr.mxu0 %v8705_v33  ;;  %865 = vmatpush1.msra.mxu1 %v14184_v9  ;;  %v14188_v9 = vand.u32 4294901760, %v8360_v24  ;;  %v14195_v24 = vand.u32 4294901760, %v8402_v41  ;;  %v14200_v41 = vand.u32 4294901760, %v8465_v13  ;;  %v265_v13 = vld [vmem:[#allocation5 + $0x628] sm:$0xff] }
  0x7d   :  { %774 = vmatpush1.msra.mxu0 %v8720_v55  ;;  %867 = vmatprep.subr.mxu1 %v14185_v30  ;;  %v14189_v55 = vld [vmem:[#allocation30_spill] sm:$0xff]  ;;  %v14190_v30 = vand.u32 4294901760, %v8366_v26  ;;  %v14196_v26 = vand.u32 4294901760, %v8416_v46  ;;  %v14201_v46 = vand.u32 4294901760, %v8476_v44  ;;  %v14206_v44 = vand.u32 4294901760, %v8548_v8 }
  0x7e   :  { %777 = vmatprep.subr.mxu0 %v8729_v56  ;;  %869 = vmatpush1.msra.mxu1 %v8544_v1  ;;  %v14191_v1 = vld [vmem:[#allocation31_spill] sm:$0xff]  ;;  %v239_v8 = vld [vmem:[#allocation5 + $0x558] sm:$0xff] }
  0x7f   :  { %780 = vmatpush1.msra.mxu0 %v8737_v47  ;;  %871 = vmatprep.subr.mxu1 %v8558_v20  ;;  %v14192_v47 = vand.u32 4294901760, %v8380_v32  ;;  %v14193_v20 = vld [vmem:[#allocation32_spill] sm:$0xff]  ;;  %v14198_v32 = vld [vmem:[#allocation35_spill] sm:$0xff] }
  0x80   :  { %816 = vmatmul.mubr.f32.vlgmr.msra.gmra.mxu0 %v8691_v14  ;;  %931 = vmatprep.subr.mxu0 %v14186_v21  ;;  %v8904_v21 = vand.u32 4294901760, %v239_v8 }
  0x81   :  { %873 = vmatpush1.msra.mxu1 %v14187_v37  ;;  %935 = vmatpush1.msra.mxu0 %v14188_v9  ;;  %v14214_v9 = vand.u32 4294901760, %v8658_v15  ;;  %v214_v15 = vld [vmem:[#allocation5 + $0x490] sm:$0xff] }
  0x82   :  { %875 = vmatprep.subr.mxu1 %v14189_v55  ;;  %939 = vmatprep.subr.mxu0 %v14190_v30  ;;  %v14197_v30 = vand.u32 4294901760, %v8442_v60  ;;  %v14202_v60 = vand.u32 4294901760, %v8488_v53  ;;  %v14209_v53 = vand.u32 4294901760, %v8591_v61  ;;  %v14212_v61 = vand.u32 4294901760, %v8628_v51  ;;  %14215 = vst [vmem:[#allocation15_spill] sm:$0xff] %v8904_v21 }
  0x83   :  { %877 = vmatpush1.msra.mxu1 %v14191_v1  ;;  %943 = vmatpush1.msra.mxu0 %v14192_v47 }
  0x84   :  { %879 = vmatprep.subr.mxu1 %v14193_v20  ;;  %947 = vmatprep.subr.mxu0 %v14194_v19 }
  0x85   :  { %881 = vmatpush1.msra.mxu1 %v8624_v29  ;;  %951 = vmatpush1.msra.mxu0 %v14195_v24 }
  0x86   :  { %883 = vmatprep.subr.mxu1 %v8638_v42  ;;  %955 = vmatprep.subr.mxu0 %v14196_v26  ;;  %v14219_v26 = vand.u32 4294901760, %v8684_v48 }
  0x87   :  { %885 = vmatpush1.msra.mxu1 %v8654_v31  ;;  %918 = vmatprep.mubr.f32.mxu1 %v14173_v34 }
  0x88   :  { %959 = vmatpush1.msra.mxu0 %v14197_v30  ;;  %922 = vmatmul.mubr.f32.vlgmr.msra.gmra.mxu1 %v14198_v32 }
  0x89   :  { %963 = vmatprep.subr.mxu0 %v14199_v36  ;;  %1097 = vmatprep.subr.mxu1 %v8327_v4  ;;  %v14204_v4 = vand.u32 4294901760, %v8514_v43  ;;  %v14221_v36 = vand.u32 4294901760, %v8696_v7  ;;  %v187_v7 = vld [vmem:[#allocation5 + $0x3b8] sm:$0xff] }
  0x8a   :  { %967 = vmatpush1.msra.mxu0 %v14200_v41  ;;  %1099 = vmatpush1.msra.mxu1 %v8329_v5  ;;  %v14205_v5 = vand.u32 4294901760, %v8535_v58  ;;  %v8932_v41 = vsub.f32 %v239_v8, %v8904_v21 }
  0x8b   :  { %971 = vmatprep.subr.mxu0 %v14201_v46  ;;  %1101 = vmatprep.subr.mxu1 %v8331_v6  ;;  %v266_v6 = vld [vmem:[#allocation5 + $0x630] sm:$0xff] }
  0x8c   :  { %975 = vmatpush1.msra.mxu0 %v14202_v60  ;;  %1103 = vmatpush1.msra.mxu1 %v8333_v10  ;;  %v252_v10 = vld [vmem:[#allocation5 + $0x5c0] sm:$0xff]  ;;  %v8867_v43 = vand.u32 4294901760, %v266_v6  ;;  %v8942_v60 = vand.u32 4294901760, %v214_v15  ;;  %v13537_v8 = vand.u32 4294901760, %v8932_v41 }
  0x8d   :  { %979 = vmatprep.subr.mxu0 %v14203_v2  ;;  %1105 = vmatprep.subr.mxu1 %v8335_v11  ;;  %v14207_v11 = vand.u32 4294901760, %v8566_v50  ;;  %v8874_v58 = vand.u32 4294901760, %v252_v10 }
  0x8e   :  { %983 = vmatpush1.msra.mxu0 %v14204_v4  ;;  %1107 = vmatpush1.msra.mxu1 %v8337_v12  ;;  %v14208_v12 = vand.u32 4294901760, %v8579_v63  ;;  %v8891_v63 = vsub.f32 %v266_v6, %v8867_v43  ;;  %14224 = vst [vmem:[#allocation19_spill] sm:$0xff] %v8942_v60  ;;  %v14226_v4 = vld [vmem:[#allocation36_spill] sm:$0xff] }
  0x8f   :  { %987 = vmatprep.subr.mxu0 %v14205_v5  ;;  %1109 = vmatprep.subr.mxu1 %v8340_v16  ;;  %v8869_v16 = vand.u32 4294901760, %v265_v13  ;;  %v8897_v47 = vsub.f32 %v252_v10, %v8874_v58  ;;  %v14228_v5 = vld [vmem:[#allocation25_spill] sm:$0xff]  ;;  %v14230_v10 = vand.u32 4294901760, %v8729_v56 }
  0x90   :  { %991 = vmatpush1.msra.mxu0 %v14206_v44  ;;  %1111 = vmatpush1.msra.mxu1 %v8342_v17  ;;  %v253_v17 = vld [vmem:[#allocation5 + $0x5c8] sm:$0xff]  ;;  %v13543_v19 = vand.u32 4294901760, %v8891_v63  ;;  %v188_v44 = vld [vmem:[#allocation5 + $0x3c0] sm:$0xff] }
  0x91   :  { %995 = vmatprep.subr.mxu0 %v14207_v11  ;;  %1113 = vmatprep.subr.mxu1 %v8344_v18  ;;  %v240_v18 = vld [vmem:[#allocation5 + $0x560] sm:$0xff]  ;;  %v8888_v50 = vand.u32 4294901760, %v253_v17  ;;  %v13539_v30 = vand.u32 4294901760, %v8897_v47 }
  0x92   :  { %999 = vmatpush1.msra.mxu0 %v14208_v12  ;;  %1115 = vmatpush1.msra.mxu1 %v8357_v23  ;;  %v14211_v23 = vand.u32 4294901760, %v8616_v3  ;;  %v14213_v3 = vand.u32 4294901760, %v8647_v0  ;;  %v8899_v51 = vand.u32 4294901760, %v240_v18  ;;  %v8909_v0 = vand.u32 4294901760, %v226_v28  ;;  %v14231_v11 = vld [vmem:[#allocation26_spill] sm:$0xff] }
  0x93   :  { %1003 = vmatprep.subr.mxu0 %v14209_v53  ;;  %1117 = vmatprep.subr.mxu1 %v8363_v25  ;;  %v8886_v25 = vsub.f32 %v265_v13, %v8869_v16  ;;  %v8917_v24 = vsub.f32 %v253_v17, %v8888_v50  ;;  %v8968_v12 = vsub.f32 %v8897_v47, %v13539_v30 }
  0x94   :  { %1007 = vmatpush1.msra.mxu0 %v14210_v59  ;;  %1119 = vmatpush1.msra.mxu1 %v14174_v52  ;;  %v227_v52 = vld [vmem:[#allocation5 + $0x4f8] sm:$0xff]  ;;  %14217 = vst [vmem:[#allocation16_spill] sm:$0xff] %v8909_v0  ;;  %v8940_v46 = vsub.f32 %v226_v28, %v8909_v0  ;;  %v14235_v28 = vld [vmem:[#allocation27_spill] sm:$0xff] }
  0x95   :  { %1011 = vmatprep.subr.mxu0 %v14211_v23  ;;  %1121 = vmatprep.subr.mxu1 %v14175_v57  ;;  %v14216_v57 = vand.u32 4294901760, %v8667_v62  ;;  %v200_v62 = vld [vmem:[#allocation5 + $0x420] sm:$0xff]  ;;  %v13540_v13 = vand.u32 4294901760, %v8917_v24  ;;  %v14232_v59 = vld [vmem:[#allocation37_spill] sm:$0xff]  ;;  %v8980_v23 = vand.u32 4294901760, %v187_v7 }
  0x96   :  { %1015 = vmatpush1.msra.mxu0 %v14212_v61  ;;  %1123 = vmatpush1.msra.mxu1 %v14176_v39  ;;  %v213_v39 = vld [vmem:[#allocation5 + $0x488] sm:$0xff]  ;;  %v8944_v2 = vand.u32 4294901760, %v200_v62  ;;  %v175_v61 = vld [vmem:[#allocation5 + $0x358] sm:$0xff] }
  0x97   :  { %1019 = vmatprep.subr.mxu0 %v14213_v3  ;;  %1125 = vmatprep.subr.mxu1 %v14177_v40  ;;  %v14218_v40 = vand.u32 4294901760, %v8675_v22  ;;  %v201_v22 = vld [vmem:[#allocation5 + $0x428] sm:$0xff]  ;;  %v8934_v48 = vand.u32 4294901760, %v213_v39  ;;  %14234 = vst [vmem:[#allocation22_spill] sm:$0xff] %v8980_v23  ;;  %v14236_v3 = vld [vmem:[#allocation33_spill] sm:$0xff] }
  0x98   :  { %1023 = vmatpush1.msra.mxu0 %v14214_v9  ;;  %1127 = vmatpush1.msra.mxu1 %v14178_v27  ;;  %v13542_v27 = vand.u32 4294901760, %v8886_v25  ;;  %14225 = vst [vmem:[#allocation20_spill] sm:$0xff] %v8944_v2  ;;  %v8959_v6 = vand.u32 4294901760, %v201_v22  ;;  %v8986_v9 = vsub.f32 %v200_v62, %v8944_v2  ;;  %v9001_v62 = vsub.f32 %v8917_v24, %v13540_v13 }
  0x99   :  { %1027 = vmatprep.subr.mxu0 %v14216_v57  ;;  %1129 = vmatprep.subr.mxu1 %v14179_v45  ;;  %v8922_v45 = vand.u32 4294901760, %v227_v52  ;;  %14222 = vst [vmem:[#allocation18_spill] sm:$0xff] %v8934_v48  ;;  %v8978_v56 = vsub.f32 %v213_v39, %v8934_v48  ;;  %v174_v57 = vld [vmem:[#allocation5 + $0x350] sm:$0xff]  ;;  %v8992_v39 = vsub.f32 %v214_v15, %v8942_v60  ;;  %v136_v15 = vld [vmem:[#allocation5 + $0x220] sm:$0xff] }
  0x9a   :  { %1031 = vmatpush1.msra.mxu0 %v14218_v40  ;;  %1131 = vmatpush1.msra.mxu1 %v14180_v38  ;;  %v8926_v38 = vsub.f32 %v240_v18, %v8899_v51  ;;  %14229 = vst [vmem:[#allocation21_spill] sm:$0xff] %v8959_v6  ;;  %v14233_v18 = vand.u32 4294901760, %v14232_v59  ;;  %v13541_v40 = vand.u32 4294901760, %v8940_v46  ;;  %v9027_v59 = vand.u32 4294901760, %v174_v57 }
  0x9b   :  { %1035 = vmatprep.subr.mxu0 %v14219_v26  ;;  %1133 = vmatprep.subr.mxu1 %v14181_v49  ;;  %14220 = vst [vmem:[#allocation17_spill] sm:$0xff] %v8922_v45  ;;  %v14223_v49 = vand.u32 4294901760, %v8705_v33  ;;  %v8952_v33 = vsub.f32 %v8891_v63, %v13543_v19  ;;  %v8972_v17 = vsub.f32 %v227_v52, %v8922_v45  ;;  %v8988_v52 = vand.u32 4294901760, %v188_v44  ;;  %v14238_v26 = vld [vmem:[#allocation28_spill] sm:$0xff] }
  0x9c   :  { %1039 = vmatpush1.msra.mxu0 %v14221_v36  ;;  %1135 = vmatpush1.msra.mxu1 %v14182_v35  ;;  %v14227_v35 = vand.u32 4294901760, %v14226_v4  ;;  %v13538_v53 = vand.u32 4294901760, %v8926_v38  ;;  %v161_v4 = vld [vmem:[#allocation5 + $0x2e8] sm:$0xff]  ;;  %14240 = vst [vmem:[#allocation29_spill] sm:$0xff] %v9027_v59  ;;  %v9067_v19 = vsub.f32 %v174_v57, %v9027_v59  ;;  %v9106_v14 = vand.u32 4294901760, %v136_v15 }
  0x9d   :  { %1043 = vmatprep.subr.mxu0 %v14223_v49  ;;  %1137 = vmatprep.subr.mxu1 %v14183_v54  ;;  %v8957_v54 = vsub.f32 %v8886_v25, %v13542_v27  ;;  %14237 = vst [vmem:[#allocation23_spill] sm:$0xff] %v8988_v52  ;;  %v1312_v36 = vand.u32 4294901760, %v8952_v33  ;;  %v9014_v33 = vand.u32 4294901760, %v175_v61  ;;  %v122_v49 = vld [vmem:[#allocation5 + $0x1b0] sm:$0xff] }
  0x9e   :  { %1047 = vmatpush1.msra.mxu0 %v14227_v35  ;;  %1139 = vmatpush1.msra.mxu1 %v14228_v5  ;;  %v9004_v35 = vsub.f32 %v201_v22, %v8959_v6  ;;  %v9012_v5 = vsub.f32 %v8926_v38, %v13538_v53  ;;  %v9025_v22 = vsub.f32 %v8932_v41, %v13537_v8  ;;  %v149_v8 = vld [vmem:[#allocation5 + $0x288] sm:$0xff] }
  0x9f   :  { %1051 = vmatprep.subr.mxu0 %v14230_v10  ;;  %1141 = vmatprep.subr.mxu1 %v14231_v11  ;;  %14239 = vst [vmem:[#allocation24_spill] sm:$0xff] %v9014_v33  ;;  %v13544_v10 = vand.u32 4294901760, %v8972_v17  ;;  %v148_v11 = vld [vmem:[#allocation5 + $0x280] sm:$0xff]  ;;  %v9041_v53 = vsub.f32 %v188_v44, %v8988_v52  ;;  %14245 = vst [vmem:[#allocation25_spill] sm:$0xff] %v9067_v19 }
  0xa0   :  { %1055 = vmatpush1.msra.mxu0 %v14233_v18  ;;  %1088 = vmatprep.mubr.f32.mxu0 %v14173_v34  ;;  %v162_v18 = vld [vmem:[#allocation5 + $0x2f0] sm:$0xff]  ;;  %v13549_v30 = vand.u32 4294901760, %v9004_v35  ;;  %v9047_v13 = vand.u32 4294901760, %v148_v11  ;;  %v1336_v27 = vand.u32 4294901760, %v9012_v5  ;;  %14247 = vst [vmem:[#allocation37_spill] sm:$0xff] %v9106_v14 }
  0xa1   :  { %1143 = vmatpush1.msra.mxu1 %v14235_v28  ;;  %1090 = vmatmul.mubr.f32.vlgmr.msra.gmra.mxu0 %v14236_v3  ;;  %v13545_v28 = vand.u32 4294901760, %v8978_v56  ;;  %v9058_v44 = vand.u32 4294901760, %v162_v18 }
  0xa2   :  { %1145 = vmatprep.subr.mxu1 %v14238_v26  ;;  %1201 = vmatprep.subr.mxu0 %v8867_v43  ;;  %v9038_v26 = vand.u32 4294901760, %v161_v4  ;;  %14242 = vst [vmem:[#allocation31_spill] sm:$0xff] %v9047_v13 }
  0xa3   :  { %1147 = vmatpush1.msra.mxu1 %v14187_v37  ;;  %1203 = vmatpush1.msra.mxu0 %v8869_v16  ;;  %v9020_v37 = vsub.f32 %v187_v7, %v8980_v23  ;;  %v13546_v7 = vand.u32 4294901760, %v8992_v39  ;;  %14243 = vst [vmem:[#allocation32_spill] sm:$0xff] %v9058_v44  ;;  %v9072_v5 = vsub.f32 %v8978_v56, %v13545_v28  ;;  %v135_v28 = vld [vmem:[#allocation5 + $0x218] sm:$0xff] }
  0xa4   :  { %1149 = vmatprep.subr.mxu1 %v14189_v55  ;;  %1205 = vmatprep.subr.mxu0 %v8888_v50  ;;  %v9035_v55 = vsub.f32 %v8940_v46, %v13541_v40  ;;  %14241 = vst [vmem:[#allocation30_spill] sm:$0xff] %v9038_v26  ;;  %v13552_v40 = vand.u32 4294901760, %v8986_v9  ;;  %v9085_v57 = vsub.f32 %v161_v4, %v9038_v26 }
  0xa5   :  { %1151 = vmatpush1.msra.mxu1 %v14191_v1  ;;  %1207 = vmatpush1.msra.mxu0 %v8874_v58  ;;  %v1324_v1 = vand.u32 4294901760, %v9001_v62  ;;  %v9061_v62 = vsub.f32 %v175_v61, %v9014_v33  ;;  %v9082_v61 = vsub.f32 %v8992_v39, %v13546_v7  ;;  %v1366_v7 = vand.u32 4294901760, %v9072_v5 }
  0xa6   :  { %1153 = vmatprep.subr.mxu1 %v14193_v20  ;;  %1209 = vmatprep.subr.mxu0 %v8899_v51  ;;  %v9056_v20 = vsub.f32 %v8972_v17, %v13544_v10  ;;  %v9074_v10 = vand.u32 4294901760, %v149_v8  ;;  %v9101_v4 = vsub.f32 %v8986_v9, %v13552_v40  ;;  %v14248_v40 = vand.u32 4294901760, %v8957_v54 }
  0xa7   :  { %1155 = vmatpush1.msra.mxu1 %v8624_v29  ;;  %1211 = vmatpush1.msra.mxu0 %v8904_v21  ;;  %14244 = vst [vmem:[#allocation36_spill] sm:$0xff] %v9061_v62  ;;  %v1342_v29 = vand.u32 4294901760, %v9025_v22  ;;  %v123_v22 = vld [vmem:[#allocation5 + $0x1b8] sm:$0xff]  ;;  %v14252_v5 = vand.u32 4294901760, %v8968_v12  ;;  %v96_v21 = vld [vmem:[#allocation5 + $0xe0] sm:$0xff] }
  0xa8   :  { %1157 = vmatprep.subr.mxu1 %v8638_v42  ;;  %1213 = vmatprep.subr.mxu0 %v8922_v45  ;;  %14246 = vst [vmem:[#allocation26_spill] sm:$0xff] %v9074_v10  ;;  %v1354_v42 = vand.u32 4294901760, %v9035_v55  ;;  %v9096_v55 = vsub.f32 %v148_v11, %v9047_v13  ;;  %v1348_v32 = vand.u32 4294901760, %v9056_v20  ;;  %v9110_v11 = vsub.f32 %v162_v18, %v9058_v44 }
  0xa9   :  { %1159 = vmatpush1.msra.mxu1 %v8654_v31  ;;  %1192 = vmatprep.mubr.f32.mxu1 %v14173_v34  ;;  %v9093_v31 = vsub.f32 %v9004_v35, %v13549_v30  ;;  %v9116_v45 = vand.u32 4294901760, %v135_v28  ;;  %v1360_v18 = vand.u32 4294901760, %v9082_v61  ;;  %v14251_v30 = vand.u32 4294901760, %v9041_v53 }
  0xaa   :  { %1215 = vmatpush1.msra.mxu0 %v8909_v0  ;;  %1194 = vmatmul.mubr.f32.vlgmr.msra.gmra.mxu1 %v14236_v3  ;;  %v109_v0 = vld [vmem:[#allocation5 + $0x148] sm:$0xff]  ;;  %v9128_v54 = vand.u32 4294901760, %v123_v22  ;;  %v14253_v61 = vand.u32 4294901760, %v9020_v37 }
  0xab   :  { %1217 = vmatprep.subr.mxu0 %v8942_v60  ;;  %1313 = vmatprep.subr.mxu1 %v1312_v36  ;;  %14249 = vst [vmem:[#allocation27_spill] sm:$0xff] %v9116_v45  ;;  %v9118_v36 = vand.u32 4294901760, %v122_v49  ;;  %v110_v60 = vld [vmem:[#allocation5 + $0x150] sm:$0xff]  ;;  %v1372_v20 = vand.u32 4294901760, %v9093_v31 }
  0xac   :  { %1219 = vmatpush1.msra.mxu0 %v8934_v48  ;;  %1319 = vmatpush1.msra.mxu1 %v14248_v40  ;;  %v9126_v48 = vsub.f32 %v9041_v53, %v14251_v30  ;;  %v9131_v40 = vsub.f32 %v149_v8, %v9074_v10  ;;  %v9143_v30 = vand.u32 4294901760, %v109_v0  ;;  %v14254_v8 = vand.u32 4294901760, %v9061_v62 }
  0xad   :  { %14250 = vst [vmem:[#allocation28_spill] sm:$0xff] %v9118_v36  ;;  %1221 = vmatprep.subr.mxu0 %v8959_v6  ;;  %1325 = vmatprep.subr.mxu1 %v1324_v1  ;;  %v1378_v1 = vand.u32 4294901760, %v9101_v4  ;;  %v9141_v6 = vsub.f32 %v9020_v37, %v14253_v61  ;;  %v97_v4 = vld [vmem:[#allocation5 + $0xe8] sm:$0xff]  ;;  %v9159_v61 = vsub.f32 %v135_v28, %v9116_v45  ;;  %v84_v28 = vld [vmem:[#allocation5 + $0x80] sm:$0xff] }
  0xae   :  { %1223 = vmatpush1.msra.mxu0 %v8944_v2  ;;  %1331 = vmatpush1.msra.mxu1 %v14252_v5  ;;  %v9149_v12 = vsub.f32 %v9061_v62, %v14254_v8  ;;  %v9151_v5 = vand.u32 4294901760, %v110_v60  ;;  %v9155_v2 = vsub.f32 %v136_v15, %v9106_v14  ;;  %v14256_v8 = vand.u32 4294901760, %v9067_v19 }
  0xaf   :  { %1225 = vmatprep.subr.mxu0 %v8988_v52  ;;  %1337 = vmatprep.subr.mxu1 %v1336_v27  ;;  %v9162_v27 = vsub.f32 %v122_v49, %v9118_v36  ;;  %v1384_v15 = vand.u32 4294901760, %v9126_v48  ;;  %v1390_v49 = vand.u32 4294901760, %v9141_v6  ;;  %v9181_v62 = vand.u32 4294901760, %v97_v4  ;;  %v83_v48 = vld [vmem:[#allocation5 + $0x78] sm:$0xff] }
  0xb0   :  { %1227 = vmatpush1.msra.mxu0 %v8980_v23  ;;  %1343 = vmatpush1.msra.mxu1 %v1342_v29  ;;  %v1401_v52 = vsub.f32 %v9067_v19, %v14256_v8  ;;  %v9171_v29 = vand.u32 4294901760, %v96_v21  ;;  %v9174_v23 = vsub.f32 %v123_v22, %v9128_v54  ;;  %v9179_v8 = vsub.f32 %v109_v0, %v9143_v30  ;;  %v71_v6 = vld [vmem:[#allocation5 + $0x18] sm:$0xff]  ;;  %v70_v19 = vld [vmem:[#allocation5 + $0x10] sm:$0xff] }
  0xb1   :  { %14255 = vst [vmem:[#allocation39_spill] sm:$0xff] %v9162_v27  ;;  %1229 = vmatprep.subr.mxu0 %v9014_v33  ;;  %1349 = vmatprep.subr.mxu1 %v1348_v32  ;;  %v1396_v31 = vand.u32 4294901760, %v9149_v12  ;;  %v14257_v22 = vand.u32 4294901760, %v9110_v11  ;;  %v9191_v0 = vsub.f32 %v110_v60, %v9151_v5  ;;  %v14258_v33 = vand.u32 4294901760, %v9085_v57 }
  0xb2   :  { %1231 = vmatpush1.msra.mxu0 %v9027_v59  ;;  %1355 = vmatpush1.msra.mxu1 %v1354_v42  ;;  %v1402_v32 = vand.u32 4294901760, %v1401_v52  ;;  %v9205_v42 = vsub.f32 %v96_v21, %v9171_v29  ;;  %v9207_v52 = vand.u32 4294901760, %v83_v48 }
  0xb3   :  { %1233 = vmatprep.subr.mxu0 %v9058_v44  ;;  %1361 = vmatprep.subr.mxu1 %v1360_v18  ;;  %v1407_v59 = vsub.f32 %v9110_v11, %v14257_v22  ;;  %v1413_v18 = vsub.f32 %v9085_v57, %v14258_v33  ;;  %v9197_v44 = vand.u32 4294901760, %v84_v28  ;;  %v14259_v22 = vand.u32 4294901760, %v9131_v40 }
  0xb4   :  { %1235 = vmatpush1.msra.mxu0 %v9038_v26  ;;  %1367 = vmatpush1.msra.mxu1 %v1366_v7  ;;  %14260 = vst [vmem:[#allocation40_spill] sm:$0xff] %v9205_v42  ;;  %v14261_v33 = vand.u32 4294901760, %v9096_v55  ;;  %v14262_v7 = vand.u32 4294901760, %v9155_v2 }
  0xb5   :  { %1237 = vmatprep.subr.mxu0 %v9074_v10  ;;  %1373 = vmatprep.subr.mxu1 %v1372_v20  ;;  %v1419_v60 = vsub.f32 %v9131_v40, %v14259_v22  ;;  %v9214_v10 = vand.u32 4294901760, %v71_v6  ;;  %v9218_v22 = vsub.f32 %v97_v4, %v9181_v62  ;;  %v1408_v21 = vand.u32 4294901760, %v1407_v59 }
  0xb6   :  { %1239 = vmatpush1.msra.mxu0 %v9047_v13  ;;  %1379 = vmatpush1.msra.mxu1 %v1378_v1  ;;  %v1425_v12 = vsub.f32 %v9096_v55, %v14261_v33  ;;  %v1431_v13 = vsub.f32 %v9155_v2, %v14262_v7  ;;  %v9224_v1 = vand.u32 4294901760, %v70_v19  ;;  %v1414_v33 = vand.u32 4294901760, %v1413_v18 }
  0xb7   :  { %1241 = vmatprep.subr.mxu0 %v9106_v14  ;;  %1385 = vmatprep.subr.mxu1 %v1384_v15  ;;  %v14263_v20 = vand.u32 4294901760, %v9159_v61  ;;  %v9232_v14 = vsub.f32 %v84_v28, %v9197_v44  ;;  %v1420_v59 = vand.u32 4294901760, %v1419_v60  ;;  %v9236_v15 = vsub.f32 %v83_v48, %v9207_v52 }
  0xb8   :  { %1243 = vmatpush1.msra.mxu0 %v9116_v45  ;;  %1391 = vmatpush1.msra.mxu1 %v1390_v49  ;;  %v14264_v7 = vand.u32 4294901760, %v9174_v23  ;;  %v1426_v18 = vand.u32 4294901760, %v1425_v12  ;;  %v14265_v28 = vand.u32 4294901760, %v9162_v27  ;;  %v9248_v60 = vsub.f32 %v71_v6, %v9214_v10 }
  0xb9   :  { %v1437_v4 = vsub.f32 %v9159_v61, %v14263_v20  ;;  %1245 = vmatprep.subr.mxu0 %v9128_v54  ;;  %1397 = vmatprep.subr.mxu1 %v1396_v31  ;;  %v1432_v48 = vand.u32 4294901760, %v1431_v13  ;;  %v14267_v49 = vand.u32 4294901760, %v9191_v0  ;;  %v13589_v6 = vand.u32 4294901760, %v9232_v14 }
  0xba   :  { %v1443_v26 = vsub.f32 %v9174_v23, %v14264_v7  ;;  %1247 = vmatpush1.msra.mxu0 %v9118_v36  ;;  %1403 = vmatpush1.msra.mxu1 %v1402_v32  ;;  %v1449_v20 = vsub.f32 %v9162_v27, %v14265_v28  ;;  %v9252_v7 = vsub.f32 %v70_v19, %v9224_v1  ;;  %v14268_v13 = vand.u32 4294901760, %v9179_v8 }
  0xbb   :  { %1249 = vmatprep.subr.mxu0 %v9151_v5  ;;  %1409 = vmatprep.subr.mxu1 %v1408_v21  ;;  %v1455_v32 = vsub.f32 %v9191_v0, %v14267_v49  ;;  %v1438_v28 = vand.u32 4294901760, %v1437_v4  ;;  %v14269_v12 = vand.u32 4294901760, %v9218_v22  ;;  %v13588_v4 = vand.u32 4294901760, %v9248_v60 }
  0xbc   :  { %14266 = vst [vmem:[#allocation41_spill] sm:$0xff] %v9252_v7  ;;  %1251 = vmatpush1.msra.mxu0 %v9143_v30  ;;  %1415 = vmatpush1.msra.mxu1 %v1414_v33  ;;  %v1444_v21 = vand.u32 4294901760, %v1443_v26  ;;  %v1461_v19 = vsub.f32 %v9179_v8, %v14268_v13  ;;  %v1450_v49 = vand.u32 4294901760, %v1449_v20  ;;  %v13587_v31 = vand.u32 4294901760, %v9252_v7 }
  0xbd   :  { %1253 = vmatprep.subr.mxu0 %v9181_v62  ;;  %1421 = vmatprep.subr.mxu1 %v1420_v59  ;;  %v1467_v33 = vsub.f32 %v9218_v22, %v14269_v12  ;;  %v1456_v26 = vand.u32 4294901760, %v1455_v32  ;;  %v14270_v59 = vand.u32 4294901760, %v9205_v42 }
  0xbe   :  { %1255 = vmatpush1.msra.mxu0 %v9171_v29  ;;  %1427 = vmatpush1.msra.mxu1 %v1426_v18  ;;  %v1479_v18 = vsub.f32 %v9232_v14, %v13589_v6  ;;  %v1462_v20 = vand.u32 4294901760, %v1461_v19  ;;  %v14272_v19 = vld [vmem:[#allocation38_spill] sm:$0xff] }
  0xbf   :  { %1257 = vmatprep.subr.mxu0 %v9197_v44  ;;  %1433 = vmatprep.subr.mxu1 %v1432_v48  ;;  %v1473_v13 = vsub.f32 %v9205_v42, %v14270_v59  ;;  %v14271_v48 = vand.u32 4294901760, %v9236_v15  ;;  %v1468_v12 = vand.u32 4294901760, %v1467_v33  ;;  %v14287_v6 = vld [vmem:[#allocation30_spill] sm:$0xff] }
  0xc0   :  { %1259 = vmatpush1.msra.mxu0 %v9207_v52  ;;  %1439 = vmatpush1.msra.mxu1 %v1438_v28  ;;  %v1491_v28 = vsub.f32 %v9248_v60, %v13588_v4  ;;  %v14286_v4 = vld [vmem:[#allocation32_spill] sm:$0xff] }
  0xc1   :  { %1261 = vmatprep.subr.mxu0 %v9214_v10  ;;  %1445 = vmatprep.subr.mxu1 %v1444_v21  ;;  %v1485_v32 = vsub.f32 %v9236_v15, %v14271_v48  ;;  %v1474_v59 = vand.u32 4294901760, %v1473_v13  ;;  %v1497_v21 = vsub.f32 %v9252_v7, %v13587_v31  ;;  %v1480_v48 = vand.u32 4294901760, %v1479_v18  ;;  %v14273_v13 = vld [vmem:[#allocation15_spill] sm:$0xff]  ;;  %v14274_v18 = vld [vmem:[#allocation36_spill] sm:$0xff]  ;;  %v14285_v31 = vld [vmem:[#allocation29_spill] sm:$0xff] }
  0xc2   :  { %1263 = vmatpush1.msra.mxu0 %v9224_v1  ;;  %1451 = vmatpush1.msra.mxu1 %v1450_v49  ;;  %v1492_v33 = vand.u32 4294901760, %v1491_v28  ;;  %v14278_v28 = vld [vmem:[#allocation19_spill] sm:$0xff] }
  0xc3   :  { %1296 = vmatprep.mubr.f32.mxu0 %v14173_v34  ;;  %1457 = vmatprep.subr.mxu1 %v1456_v26  ;;  %v1486_v49 = vand.u32 4294901760, %v1485_v32  ;;  %v1498_v26 = vand.u32 4294901760, %v1497_v21  ;;  %v14276_v32 = vld [vmem:[#allocation25_spill] sm:$0xff] }
  0xc4   :  { %1542 = vmatprep.subr.mxu0 %v8891_v63  ;;  %1302 = vmatmul.mubr.f32.vlgmr.msra.gmra.mxu0 %v14272_v19  ;;  %v14280_v21 = vld [vmem:[#allocation21_spill] sm:$0xff]  ;;  %v14288_v19 = vld [vmem:[#allocation26_spill] sm:$0xff] }
  0xc5   :  { %1463 = vmatpush1.msra.mxu1 %v1462_v20  ;;  %1545 = vmatpush1.msra.mxu0 %v8886_v25  ;;  %v14275_v20 = vld [vmem:[#allocation17_spill] sm:$0xff] }
  0xc6   :  { %1469 = vmatprep.subr.mxu1 %v1468_v12  ;;  %1548 = vmatprep.subr.mxu0 %v8917_v24  ;;  %v14277_v12 = vld [vmem:[#allocation16_spill] sm:$0xff] }
  0xc7   :  { %1475 = vmatpush1.msra.mxu1 %v1474_v59  ;;  %1551 = vmatpush1.msra.mxu0 %v8897_v47  ;;  %v14279_v59 = vld [vmem:[#allocation18_spill] sm:$0xff] }
  0xc8   :  { %1481 = vmatprep.subr.mxu1 %v1480_v48  ;;  %1554 = vmatprep.subr.mxu0 %v8926_v38  ;;  %v14281_v48 = vld [vmem:[#allocation20_spill] sm:$0xff] }
  0xc9   :  { %1487 = vmatpush1.msra.mxu1 %v1486_v49  ;;  %1557 = vmatpush1.msra.mxu0 %v8932_v41  ;;  %v14282_v49 = vld [vmem:[#allocation23_spill] sm:$0xff] }
  0xca   :  { %1493 = vmatprep.subr.mxu1 %v1492_v33  ;;  %1560 = vmatprep.subr.mxu0 %v8972_v17  ;;  %v14283_v33 = vld [vmem:[#allocation22_spill] sm:$0xff] }
  0xcb   :  { %1499 = vmatpush1.msra.mxu1 %v1498_v26  ;;  %1532 = vmatprep.mubr.f32.mxu1 %v14173_v34  ;;  %v14284_v26 = vld [vmem:[#allocation24_spill] sm:$0xff] }
  0xcc   :  { %1563 = vmatpush1.msra.mxu0 %v8940_v46  ;;  %1534 = vmatmul.mubr.f32.vlgmr.msra.gmra.mxu1 %v14236_v3  ;;  %v14289_v3 = vld [vmem:[#allocation31_spill] sm:$0xff] }
  0xcd   :  { %1566 = vmatprep.subr.mxu0 %v8992_v39  ;;  %1678 = vmatprep.subr.mxu1 %v8867_v43 }
  0xce   :  { %1569 = vmatpush1.msra.mxu0 %v8978_v56  ;;  %1680 = vmatpush1.msra.mxu1 %v8869_v16 }
  0xcf   :  { %1572 = vmatprep.subr.mxu0 %v9004_v35  ;;  %1682 = vmatprep.subr.mxu1 %v8888_v50 }
  0xd0   :  { %1575 = vmatpush1.msra.mxu0 %v8986_v9  ;;  %1684 = vmatpush1.msra.mxu1 %v8874_v58 }
  0xd1   :  { %1578 = vmatprep.subr.mxu0 %v9041_v53  ;;  %1686 = vmatprep.subr.mxu1 %v8899_v51 }
  0xd2   :  { %1581 = vmatpush1.msra.mxu0 %v9020_v37  ;;  %1688 = vmatpush1.msra.mxu1 %v14273_v13 }
  0xd3   :  { %1584 = vmatprep.subr.mxu0 %v14274_v18  ;;  %1690 = vmatprep.subr.mxu1 %v14275_v20 }
  0xd4   :  { %1587 = vmatpush1.msra.mxu0 %v14276_v32  ;;  %1692 = vmatpush1.msra.mxu1 %v14277_v12 }
  0xd5   :  { %1590 = vmatprep.subr.mxu0 %v9110_v11  ;;  %1694 = vmatprep.subr.mxu1 %v14278_v28 }
  0xd6   :  { %1593 = vmatpush1.msra.mxu0 %v9085_v57  ;;  %1696 = vmatpush1.msra.mxu1 %v14279_v59 }
  0xd7   :  { %1596 = vmatprep.subr.mxu0 %v9131_v40  ;;  %1698 = vmatprep.subr.mxu1 %v14280_v21 }
  0xd8   :  { %1599 = vmatpush1.msra.mxu0 %v9096_v55  ;;  %1700 = vmatpush1.msra.mxu1 %v14281_v48 }
  0xd9   :  { %1602 = vmatprep.subr.mxu0 %v9155_v2  ;;  %1702 = vmatprep.subr.mxu1 %v14282_v49 }
  0xda   :  { %1605 = vmatpush1.msra.mxu0 %v9159_v61  ;;  %1704 = vmatpush1.msra.mxu1 %v14283_v33 }
  0xdb   :  { %1608 = vmatprep.subr.mxu0 %v9174_v23  ;;  %1706 = vmatprep.subr.mxu1 %v14284_v26 }
  0xdc   :  { %1611 = vmatpush1.msra.mxu0 %v9162_v27  ;;  %1708 = vmatpush1.msra.mxu1 %v14285_v31  ;;  %v14290_v27 = vld [vmem:[#allocation37_spill] sm:$0xff] }
  0xdd   :  { %1614 = vmatprep.subr.mxu0 %v9191_v0  ;;  %1710 = vmatprep.subr.mxu1 %v14286_v4 }
  0xde   :  { %1617 = vmatpush1.msra.mxu0 %v9179_v8  ;;  %1712 = vmatpush1.msra.mxu1 %v14287_v6 }
  0xdf   :  { %1620 = vmatprep.subr.mxu0 %v9218_v22  ;;  %1714 = vmatprep.subr.mxu1 %v14288_v19 }
  0xe0   :  { %1623 = vmatpush1.msra.mxu0 %v9205_v42  ;;  %1716 = vmatpush1.msra.mxu1 %v14289_v3  ;;  %v14291_v42 = vld [vmem:[#allocation34_spill] sm:$0xff] }
  0xe1   :  { %1626 = vmatprep.subr.mxu0 %v9232_v14  ;;  %1718 = vmatprep.subr.mxu1 %v14290_v27  ;;  %v14292_v27 = vand.u32 4294901760, %v8891_v63  ;;  %v14296_v63 = vand.u32 4294901760, %v8926_v38  ;;  %v14301_v38 = vand.u32 4294901760, %v8992_v39  ;;  %v14305_v39 = vand.u32 4294901760, %v9041_v53  ;;  %v267_v53 = vld [vmem:[#allocation5 + $0x638] sm:$0xff] }
  0xe2   :  { %1629 = vmatpush1.msra.mxu0 %v9236_v15  ;;  %1720 = vmatpush1.msra.mxu1 %v9116_v45  ;;  %v14293_v45 = vand.u32 4294901760, %v8886_v25  ;;  %v14297_v25 = vand.u32 4294901760, %v8932_v41  ;;  %v14302_v41 = vand.u32 4294901760, %v8978_v56  ;;  %v14309_v56 = vand.u32 4294901760, %v9110_v11 }
  0xe3   :  { %1632 = vmatprep.subr.mxu0 %v9248_v60  ;;  %1722 = vmatprep.subr.mxu1 %v9128_v54  ;;  %v14312_v11 = vand.u32 4294901760, %v9096_v55  ;;  %v229_v55 = vld [vmem:[#allocation5 + $0x508] sm:$0xff] }
  0xe4   :  { %1635 = vmatpush1.msra.mxu0 %v9252_v7  ;;  %1668 = vmatprep.mubr.f32.mxu0 %v14173_v34  ;;  %v14294_v7 = vand.u32 4294901760, %v8917_v24  ;;  %v14298_v24 = vand.u32 4294901760, %v8972_v17  ;;  %v14303_v17 = vand.u32 4294901760, %v9004_v35  ;;  %v254_v35 = vld [vmem:[#allocation5 + $0x5d0] sm:$0xff] }
  0xe5   :  { %1724 = vmatpush1.msra.mxu1 %v9118_v36  ;;  %1671 = vmatmul.mubr.f32.vlgmr.msra.gmra.mxu0 %v14291_v42  ;;  %v14295_v36 = vand.u32 4294901760, %v8897_v47  ;;  %v14299_v47 = vand.u32 4294901760, %v8940_v46  ;;  %v14304_v46 = vand.u32 4294901760, %v8986_v9  ;;  %v255_v9 = vld [vmem:[#allocation5 + $0x5d8] sm:$0xff] }
  0xe6   :  { %1726 = vmatprep.subr.mxu1 %v9151_v5  ;;  %1786 = vmatprep.subr.mxu0 %v14292_v27  ;;  %v9413_v27 = vand.u32 4294901760, %v267_v53 }
  0xe7   :  { %1728 = vmatpush1.msra.mxu1 %v9143_v30  ;;  %1790 = vmatpush1.msra.mxu0 %v14293_v45  ;;  %v14300_v45 = vld [vmem:[#allocation35_spill] sm:$0xff] }
  0xe8   :  { %1730 = vmatprep.subr.mxu1 %v9181_v62  ;;  %1794 = vmatprep.subr.mxu0 %v14294_v7  ;;  %v14313_v7 = vand.u32 4294901760, %v9155_v2  ;;  %v9432_v2 = vsub.f32 %v267_v53, %v9413_v27 }
  0xe9   :  { %1732 = vmatpush1.msra.mxu1 %v9171_v29  ;;  %1798 = vmatpush1.msra.mxu0 %v14295_v36 }
  0xea   :  { %1734 = vmatprep.subr.mxu1 %v9197_v44  ;;  %1802 = vmatprep.subr.mxu0 %v14296_v63  ;;  %v216_v63 = vld [vmem:[#allocation5 + $0x4a0] sm:$0xff] }
  0xeb   :  { %1736 = vmatpush1.msra.mxu1 %v9207_v52  ;;  %1806 = vmatpush1.msra.mxu0 %v14297_v25 }
  0xec   :  { %1738 = vmatprep.subr.mxu1 %v9214_v10  ;;  %1810 = vmatprep.subr.mxu0 %v14298_v24  ;;  %v14321_v24 = vand.u32 4294901760, %v9179_v8 }
  0xed   :  { %1740 = vmatpush1.msra.mxu1 %v9224_v1  ;;  %1773 = vmatprep.mubr.f32.mxu1 %v14173_v34 }
  0xee   :  { %1814 = vmatpush1.msra.mxu0 %v14299_v47  ;;  %1777 = vmatmul.mubr.f32.vlgmr.msra.gmra.mxu1 %v14300_v45 }
  0xef   :  { %1818 = vmatprep.subr.mxu0 %v14301_v38  ;;  %1952 = vmatprep.subr.mxu1 %v8867_v43  ;;  %v14306_v43 = vand.u32 4294901760, %v9020_v37  ;;  %v14311_v37 = vand.u32 4294901760, %v9131_v40  ;;  %v9423_v40 = vand.u32 4294901760, %v254_v35  ;;  %v13603_v38 = vand.u32 4294901760, %v9432_v2 }
  0xf0   :  { %1822 = vmatpush1.msra.mxu0 %v14302_v41  ;;  %1954 = vmatpush1.msra.mxu1 %v8869_v16  ;;  %v14307_v16 = vand.u32 4294901760, %v14274_v18  ;;  %v241_v18 = vld [vmem:[#allocation5 + $0x568] sm:$0xff]  ;;  %v203_v41 = vld [vmem:[#allocation5 + $0x438] sm:$0xff] }
  0xf1   :  { %1826 = vmatprep.subr.mxu0 %v14303_v17  ;;  %1956 = vmatprep.subr.mxu1 %v8888_v50  ;;  %v14308_v50 = vand.u32 4294901760, %v14276_v32  ;;  %v14315_v32 = vand.u32 4294901760, %v9174_v23  ;;  %v215_v23 = vld [vmem:[#allocation5 + $0x498] sm:$0xff]  ;;  %v202_v17 = vld [vmem:[#allocation5 + $0x430] sm:$0xff] }
  0xf2   :  { %1830 = vmatpush1.msra.mxu0 %v14304_v46  ;;  %1958 = vmatpush1.msra.mxu1 %v8874_v58  ;;  %v268_v58 = vld [vmem:[#allocation5 + $0x640] sm:$0xff]  ;;  %v9464_v47 = vand.u32 4294901760, %v215_v23  ;;  %v14325_v46 = vld [vmem:[#allocation40_spill] sm:$0xff] }
  0xf3   :  { %1834 = vmatprep.subr.mxu0 %v14305_v39  ;;  %1960 = vmatprep.subr.mxu1 %v8899_v51  ;;  %v14310_v51 = vand.u32 4294901760, %v9085_v57  ;;  %v9411_v36 = vand.u32 4294901760, %v268_v58  ;;  %v242_v57 = vld [vmem:[#allocation5 + $0x570] sm:$0xff]  ;;  %v14328_v39 = vand.u32 4294901760, %v9232_v14  ;;  %v9492_v14 = vand.u32 4294901760, %v203_v41 }
  0xf4   :  { %1838 = vmatpush1.msra.mxu0 %v14306_v43  ;;  %1962 = vmatpush1.msra.mxu1 %v14273_v13  ;;  %v9421_v13 = vand.u32 4294901760, %v255_v9  ;;  %14324 = vst [vmem:[#allocation25_spill] sm:$0xff] %v9464_v47  ;;  %v14329_v43 = vld [vmem:[#allocation37_spill] sm:$0xff] }
  0xf5   :  { %1842 = vmatprep.subr.mxu0 %v14307_v16  ;;  %1964 = vmatprep.subr.mxu1 %v14275_v20  ;;  %v14314_v20 = vand.u32 4294901760, %v9159_v61  ;;  %14332 = vst [vmem:[#allocation19_spill] sm:$0xff] %v9492_v14 }
  0xf6   :  { %1846 = vmatpush1.msra.mxu0 %v14308_v50  ;;  %1966 = vmatpush1.msra.mxu1 %v14277_v12  ;;  %v9434_v12 = vand.u32 4294901760, %v242_v57  ;;  %v9453_v25 = vsub.f32 %v255_v9, %v9421_v13  ;;  %v9494_v9 = vand.u32 4294901760, %v202_v17 }
  0xf7   :  { %1850 = vmatprep.subr.mxu0 %v14309_v56  ;;  %1968 = vmatprep.subr.mxu1 %v14278_v28  ;;  %v228_v28 = vld [vmem:[#allocation5 + $0x500] sm:$0xff] }
  0xf8   :  { %1854 = vmatpush1.msra.mxu0 %v14310_v51  ;;  %1970 = vmatpush1.msra.mxu1 %v14279_v59  ;;  %v9437_v59 = vsub.f32 %v268_v58, %v9411_v36  ;;  %v9468_v8 = vsub.f32 %v242_v57, %v9434_v12  ;;  %v13601_v16 = vand.u32 4294901760, %v9453_v25  ;;  %v189_v58 = vld [vmem:[#allocation5 + $0x3c8] sm:$0xff]  ;;  %14333 = vst [vmem:[#allocation18_spill] sm:$0xff] %v9494_v9 }
  0xf9   :  { %1858 = vmatprep.subr.mxu0 %v14311_v37  ;;  %1972 = vmatprep.subr.mxu1 %v14280_v21  ;;  %v14316_v21 = vld [vmem:[#allocation39_spill] sm:$0xff]  ;;  %v14334_v37 = vand.u32 4294901760, %v9248_v60  ;;  %v9510_v57 = vsub.f32 %v9432_v2, %v13603_v38  ;;  %v14335_v60 = vld [vmem:[#allocation41_spill] sm:$0xff] }
  0xfa   :  { %1862 = vmatpush1.msra.mxu0 %v14312_v11  ;;  %1974 = vmatpush1.msra.mxu1 %v14281_v48  ;;  %v14317_v61 = vand.u32 4294901760, %v14316_v21  ;;  %v9442_v48 = vand.u32 4294901760, %v241_v18  ;;  %v14331_v56 = vld [vmem:[#allocation27_spill] sm:$0xff]  ;;  %v9505_v11 = vsub.f32 %v215_v23, %v9464_v47  ;;  %v14339_v21 = vld [vmem:[#allocation33_spill] sm:$0xff] }
  0xfb   :  { %1866 = vmatprep.subr.mxu0 %v14313_v7  ;;  %1976 = vmatprep.subr.mxu1 %v14282_v49  ;;  %v14319_v49 = vand.u32 4294901760, %v9191_v0  ;;  %v14323_v0 = vand.u32 4294901760, %v9218_v22  ;;  %v13599_v7 = vand.u32 4294901760, %v9468_v8 }
  0xfc   :  { %1870 = vmatpush1.msra.mxu0 %v14314_v20  ;;  %1978 = vmatpush1.msra.mxu1 %v14283_v33  ;;  %14318 = vst [vmem:[#allocation15_spill] sm:$0xff] %v9442_v48  ;;  %v9448_v33 = vsub.f32 %v254_v35, %v9423_v40  ;;  %v9474_v22 = vsub.f32 %v241_v18, %v9442_v48  ;;  %v190_v35 = vld [vmem:[#allocation5 + $0x3d0] sm:$0xff]  ;;  %v176_v18 = vld [vmem:[#allocation5 + $0x360] sm:$0xff]  ;;  %v14336_v20 = vand.u32 4294901760, %v14335_v60 }
  0xfd   :  { %1874 = vmatprep.subr.mxu0 %v14315_v32  ;;  %1980 = vmatprep.subr.mxu1 %v14284_v26  ;;  %v9450_v26 = vand.u32 4294901760, %v229_v55 }
  0xfe   :  { %1878 = vmatpush1.msra.mxu0 %v14317_v61  ;;  %1982 = vmatpush1.msra.mxu1 %v14285_v31  ;;  %v9458_v31 = vand.u32 4294901760, %v228_v28  ;;  %v13600_v50 = vand.u32 4294901760, %v9448_v33  ;;  %v9527_v61 = vsub.f32 %v9453_v25, %v13601_v16 }
  0xff   :  { %1882 = vmatprep.subr.mxu0 %v14319_v49  ;;  %1984 = vmatprep.subr.mxu1 %v14286_v4  ;;  %14320 = vst [vmem:[#allocation36_spill] sm:$0xff] %v9450_v26  ;;  %v13605_v4 = vand.u32 4294901760, %v9437_v59  ;;  %v9484_v53 = vsub.f32 %v229_v55, %v9450_v26  ;;  %v13597_v55 = vand.u32 4294901760, %v9474_v22  ;;  %v9534_v49 = vand.u32 4294901760, %v190_v35 }
 0x100   :  { %1886 = vmatpush1.msra.mxu0 %v14321_v24  ;;  %1986 = vmatpush1.msra.mxu1 %v14287_v6  ;;  %14322 = vst [vmem:[#allocation17_spill] sm:$0xff] %v9458_v31  ;;  %v14326_v6 = vand.u32 4294901760, %v14325_v46  ;;  %v9490_v51 = vsub.f32 %v228_v28, %v9458_v31  ;;  %v14338_v28 = vld [vmem:[#allocation28_spill] sm:$0xff]  ;;  %v9532_v23 = vsub.f32 %v9448_v33, %v13600_v50  ;;  %v9542_v46 = vand.u32 4294901760, %v176_v18 }
 0x101   :  { %1890 = vmatprep.subr.mxu0 %v14323_v0  ;;  %1988 = vmatprep.subr.mxu1 %v14288_v19  ;;  %v9476_v19 = vand.u32 4294901760, %v216_v63  ;;  %14340 = vst [vmem:[#allocation20_spill] sm:$0xff] %v9534_v49  ;;  %v177_v24 = vld [vmem:[#allocation5 + $0x368] sm:$0xff]  ;;  %v9540_v0 = vsub.f32 %v202_v17, %v9494_v9  ;;  %v9555_v17 = vsub.f32 %v9468_v8, %v13599_v7 }
 0x102   :  { %1894 = vmatpush1.msra.mxu0 %v14326_v6  ;;  %1990 = vmatpush1.msra.mxu1 %v14289_v3  ;;  %v14330_v3 = vand.u32 4294901760, %v9236_v15  ;;  %v9502_v15 = vsub.f32 %v9437_v59, %v13605_v4  ;;  %14341 = vst [vmem:[#allocation23_spill] sm:$0xff] %v9542_v46  ;;  %v13598_v6 = vand.u32 4294901760, %v9490_v51  ;;  %v125_v4 = vld [vmem:[#allocation5 + $0x1c8] sm:$0xff] }
 0x103   :  { %14327 = vst [vmem:[#allocation16_spill] sm:$0xff] %v9476_v19  ;;  %1898 = vmatprep.subr.mxu0 %v14328_v39  ;;  %1992 = vmatprep.subr.mxu1 %v14329_v43  ;;  %v9520_v32 = vsub.f32 %v216_v63, %v9476_v19  ;;  %v13596_v63 = vand.u32 4294901760, %v9484_v53  ;;  %v9546_v39 = vsub.f32 %v203_v41, %v9492_v14 }
 0x104   :  { %1902 = vmatpush1.msra.mxu0 %v14330_v3  ;;  %1994 = vmatpush1.msra.mxu1 %v14331_v56  ;;  %v2167_v43 = vand.u32 4294901760, %v9502_v15  ;;  %v13602_v3 = vand.u32 4294901760, %v9505_v11  ;;  %v9568_v56 = vand.u32 4294901760, %v177_v24 }
 0x105   :  { %1906 = vmatprep.subr.mxu0 %v14334_v37  ;;  %1996 = vmatprep.subr.mxu1 %v9128_v54  ;;  %v9516_v54 = vand.u32 4294901760, %v189_v58  ;;  %v164_v37 = vld [vmem:[#allocation5 + $0x300] sm:$0xff]  ;;  %v13604_v15 = vand.u32 4294901760, %v9520_v32  ;;  %v9578_v60 = vsub.f32 %v9484_v53, %v13596_v63  ;;  %v150_v63 = vld [vmem:[#allocation5 + $0x290] sm:$0xff] }
 0x106   :  { %1910 = vmatpush1.msra.mxu0 %v14336_v20  ;;  %1943 = vmatprep.mubr.f32.mxu0 %v14173_v34  ;;  %14342 = vst [vmem:[#allocation22_spill] sm:$0xff] %v9568_v56  ;;  %v9581_v20 = vsub.f32 %v190_v35, %v9534_v49  ;;  %v9598_v35 = vand.u32 4294901760, %v164_v37  ;;  %v9617_v16 = vsub.f32 %v177_v24, %v9568_v56 }
 0x107   :  { %14337 = vst [vmem:[#allocation21_spill] sm:$0xff] %v9516_v54  ;;  %1998 = vmatpush1.msra.mxu1 %v14338_v28  ;;  %1945 = vmatmul.mubr.f32.vlgmr.msra.gmra.mxu0 %v14339_v21  ;;  %v9561_v41 = vsub.f32 %v189_v58, %v9516_v54  ;;  %v2185_v58 = vand.u32 4294901760, %v9532_v23  ;;  %v9591_v28 = vsub.f32 %v9490_v51, %v13598_v6  ;;  %v13606_v23 = vand.u32 4294901760, %v9546_v39 }
 0x108   :  { %2000 = vmatprep.subr.mxu1 %v9151_v5  ;;  %2056 = vmatprep.subr.mxu0 %v9411_v36  ;;  %v2173_v5 = vand.u32 4294901760, %v9510_v57  ;;  %v163_v57 = vld [vmem:[#allocation5 + $0x2f8] sm:$0xff]  ;;  %14344 = vst [vmem:[#allocation29_spill] sm:$0xff] %v9598_v35  ;;  %v9605_v6 = vsub.f32 %v9505_v11, %v13602_v3  ;;  %v9649_v42 = vsub.f32 %v164_v37, %v9598_v35 }
 0x109   :  { %2002 = vmatpush1.msra.mxu1 %v9143_v30  ;;  %2058 = vmatpush1.msra.mxu0 %v9413_v27  ;;  %v9566_v30 = vsub.f32 %v9474_v22, %v13597_v55  ;;  %v13607_v55 = vand.u32 4294901760, %v9540_v0  ;;  %v2209_v24 = vand.u32 4294901760, %v9591_v28 }
 0x10a   :  { %2004 = vmatprep.subr.mxu1 %v9181_v62  ;;  %2060 = vmatprep.subr.mxu0 %v9421_v13  ;;  %v2179_v62 = vand.u32 4294901760, %v9527_v61  ;;  %v151_v61 = vld [vmem:[#allocation5 + $0x298] sm:$0xff]  ;;  %v2221_v28 = vand.u32 4294901760, %v9605_v6 }
 0x10b   :  { %2006 = vmatpush1.msra.mxu1 %v9171_v29  ;;  %2062 = vmatpush1.msra.mxu0 %v9423_v40  ;;  %v9586_v29 = vsub.f32 %v176_v18, %v9542_v46  ;;  %v9600_v18 = vand.u32 4294901760, %v163_v57  ;;  %v2197_v7 = vand.u32 4294901760, %v9566_v30  ;;  %v9622_v3 = vand.u32 4294901760, %v151_v61 }
 0x10c   :  { %2008 = vmatprep.subr.mxu1 %v9197_v44  ;;  %2064 = vmatprep.subr.mxu0 %v9434_v12  ;;  %v2191_v44 = vand.u32 4294901760, %v9555_v17  ;;  %v138_v17 = vld [vmem:[#allocation5 + $0x230] sm:$0xff]  ;;  %v9624_v30 = vand.u32 4294901760, %v150_v63 }
 0x10d   :  { %14343 = vst [vmem:[#allocation24_spill] sm:$0xff] %v9586_v29  ;;  %2010 = vmatpush1.msra.mxu1 %v9207_v52  ;;  %2066 = vmatpush1.msra.mxu0 %v9442_v48  ;;  %14345 = vst [vmem:[#allocation32_spill] sm:$0xff] %v9600_v18  ;;  %v9613_v52 = vsub.f32 %v9520_v32, %v13604_v15  ;;  %v137_v15 = vld [vmem:[#allocation5 + $0x228] sm:$0xff]  ;;  %v9643_v50 = vsub.f32 %v163_v57, %v9600_v18  ;;  %v9646_v45 = vand.u32 4294901760, %v138_v17 }
 0x10e   :  { %2012 = vmatprep.subr.mxu1 %v9214_v10  ;;  %2068 = vmatprep.subr.mxu0 %v9450_v26  ;;  %v2203_v10 = vand.u32 4294901760, %v9578_v60  ;;  %14346 = vst [vmem:[#allocation30_spill] sm:$0xff] %v9622_v3  ;;  %14347 = vst [vmem:[#allocation26_spill] sm:$0xff] %v9624_v30  ;;  %v9638_v60 = vsub.f32 %v9540_v0, %v13607_v55  ;;  %v9653_v38 = vand.u32 4294901760, %v137_v15  ;;  %v14364_v48 = vand.u32 4294901760, %v9649_v42 }
 0x10f   :  { %2014 = vmatpush1.msra.mxu1 %v9224_v1  ;;  %2047 = vmatprep.mubr.f32.mxu1 %v14173_v34  ;;  %v9633_v1 = vsub.f32 %v9546_v39, %v13606_v23  ;;  %14348 = vst [vmem:[#allocation31_spill] sm:$0xff] %v9646_v45  ;;  %v124_v23 = vld [vmem:[#allocation5 + $0x1c0] sm:$0xff]  ;;  %v2215_v55 = vand.u32 4294901760, %v9613_v52  ;;  %v9663_v37 = vsub.f32 %v150_v63, %v9624_v30  ;;  %v14355_v63 = vand.u32 4294901760, %v9586_v29 }
 0x110   :  { %2070 = vmatpush1.msra.mxu0 %v9458_v31  ;;  %2049 = vmatmul.mubr.f32.vlgmr.msra.gmra.mxu1 %v14339_v21  ;;  %14349 = vst [vmem:[#allocation39_spill] sm:$0xff] %v9653_v38  ;;  %v111_v31 = vld [vmem:[#allocation5 + $0x158] sm:$0xff] }
 0x111   :  { %2072 = vmatprep.subr.mxu0 %v9476_v19  ;;  %2168 = vmatprep.subr.mxu1 %v2167_v43  ;;  %v14350_v43 = vand.u32 4294901760, %v9561_v41  ;;  %v112_v19 = vld [vmem:[#allocation5 + $0x160] sm:$0xff]  ;;  %14351 = vst [vmem:[#allocation40_spill] sm:$0xff] %v9663_v37  ;;  %v2227_v6 = vand.u32 4294901760, %v9633_v1  ;;  %v9683_v26 = vsub.f32 %v9586_v29, %v14355_v63  ;;  %v99_v1 = vld [vmem:[#allocation5 + $0xf8] sm:$0xff]  ;;  %v9696_v63 = vsub.f32 %v137_v15, %v9653_v38 }
 0x112   :  { %2074 = vmatpush1.msra.mxu0 %v9464_v47  ;;  %2174 = vmatpush1.msra.mxu1 %v2173_v5  ;;  %v14352_v5 = vand.u32 4294901760, %v9581_v20  ;;  %v9670_v47 = vand.u32 4294901760, %v125_v4 }
 0x113   :  { %v9658_v57 = vsub.f32 %v9561_v41, %v14350_v43  ;;  %2076 = vmatprep.subr.mxu0 %v9492_v14  ;;  %2180 = vmatprep.subr.mxu1 %v2179_v62  ;;  %v9673_v43 = vsub.f32 %v151_v61, %v9622_v3  ;;  %v2233_v62 = vand.u32 4294901760, %v9638_v60  ;;  %v9678_v14 = vand.u32 4294901760, %v124_v23  ;;  %14358 = vst [vmem:[#allocation42_spill] sm:$0xff] %v9696_v63 }
 0x114   :  { %v9668_v52 = vsub.f32 %v9581_v20, %v14352_v5  ;;  %2078 = vmatpush1.msra.mxu0 %v9494_v9  ;;  %2186 = vmatpush1.msra.mxu1 %v2185_v58  ;;  %v98_v5 = vld [vmem:[#allocation5 + $0xf0] sm:$0xff]  ;;  %v9686_v61 = vand.u32 4294901760, %v112_v19  ;;  %v9689_v58 = vand.u32 4294901760, %v111_v31  ;;  %v9692_v60 = vsub.f32 %v138_v17, %v9646_v45 }
 0x115   :  { %14353 = vst [vmem:[#allocation37_spill] sm:$0xff] %v9673_v43  ;;  %14354 = vst [vmem:[#allocation27_spill] sm:$0xff] %v9678_v14  ;;  %2080 = vmatprep.subr.mxu0 %v9534_v49  ;;  %2192 = vmatprep.subr.mxu1 %v2191_v44  ;;  %v2245_v29 = vand.u32 4294901760, %v9658_v57  ;;  %v14359_v44 = vand.u32 4294901760, %v9617_v16  ;;  %v9709_v15 = vsub.f32 %v125_v4, %v9670_v47  ;;  %v9716_v9 = vand.u32 4294901760, %v99_v1 }
 0x116   :  { %14356 = vst [vmem:[#allocation41_spill] sm:$0xff] %v9689_v58  ;;  %14357 = vst [vmem:[#allocation28_spill] sm:$0xff] %v9692_v60  ;;  %2082 = vmatpush1.msra.mxu0 %v9516_v54  ;;  %2198 = vmatpush1.msra.mxu1 %v2197_v7  ;;  %v2239_v17 = vand.u32 4294901760, %v9668_v52  ;;  %v9706_v54 = vand.u32 4294901760, %v98_v5  ;;  %v86_v7 = vld [vmem:[#allocation5 + $0x90] sm:$0xff]  ;;  %v9713_v57 = vsub.f32 %v124_v23, %v9678_v14  ;;  %v85_v52 = vld [vmem:[#allocation5 + $0x88] sm:$0xff] }
 0x117   :  { %v2250_v49 = vsub.f32 %v9617_v16, %v14359_v44  ;;  %2084 = vmatprep.subr.mxu0 %v9568_v56  ;;  %2204 = vmatprep.subr.mxu1 %v2203_v10  ;;  %14361 = vst [vmem:[#allocation44_spill] sm:$0xff] %v9709_v15  ;;  %v2257_v44 = vand.u32 4294901760, %v9683_v26  ;;  %14363 = vst [vmem:[#allocation46_spill] sm:$0xff] %v9716_v9  ;;  %v2262_v4 = vsub.f32 %v9649_v42, %v14364_v48 }
 0x118   :  { %14360 = vst [vmem:[#allocation43_spill] sm:$0xff] %v9706_v54  ;;  %2086 = vmatpush1.msra.mxu0 %v9542_v46  ;;  %2210 = vmatpush1.msra.mxu1 %v2209_v24  ;;  %14362 = vst [vmem:[#allocation45_spill] sm:$0xff] %v9713_v57  ;;  %v9724_v46 = vsub.f32 %v111_v31, %v9689_v58  ;;  %v73_v24 = vld [vmem:[#allocation5 + $0x28] sm:$0xff]  ;;  %v9728_v26 = vsub.f32 %v112_v19, %v9686_v61  ;;  %v9734_v56 = vand.u32 4294901760, %v86_v7  ;;  %v72_v31 = vld [vmem:[#allocation5 + $0x20] sm:$0xff] }
 0x119   :  { %2088 = vmatprep.subr.mxu0 %v9598_v35  ;;  %2216 = vmatprep.subr.mxu1 %v2215_v55  ;;  %v2251_v10 = vand.u32 4294901760, %v2250_v49  ;;  %v14367_v35 = vand.u32 4294901760, %v9643_v50  ;;  %v14368_v23 = vand.u32 4294901760, %v9673_v43  ;;  %v9744_v49 = vand.u32 4294901760, %v85_v52 }
 0x11a   :  { %14365 = vst [vmem:[#allocation47_spill] sm:$0xff] %v9724_v46  ;;  %14366 = vst [vmem:[#allocation48_spill] sm:$0xff] %v9728_v26  ;;  %2090 = vmatpush1.msra.mxu0 %v9600_v18  ;;  %2222 = vmatpush1.msra.mxu1 %v2221_v28  ;;  %v9742_v18 = vsub.f32 %v98_v5, %v9706_v54  ;;  %v2263_v5 = vand.u32 4294901760, %v2262_v4  ;;  %v14372_v28 = vand.u32 4294901760, %v9692_v60 }
 0x11b   :  { %v2268_v55 = vsub.f32 %v9643_v50, %v14367_v35  ;;  %2092 = vmatprep.subr.mxu0 %v9622_v3  ;;  %2228 = vmatprep.subr.mxu1 %v2227_v6  ;;  %v2274_v19 = vsub.f32 %v9673_v43, %v14368_v23  ;;  %14370 = vst [vmem:[#allocation50_spill] sm:$0xff] %v9744_v49  ;;  %v14371_v35 = vand.u32 4294901760, %v9663_v37  ;;  %v9751_v3 = vand.u32 4294901760, %v73_v24 }
 0x11c   :  { %14369 = vst [vmem:[#allocation49_spill] sm:$0xff] %v9742_v18  ;;  %2094 = vmatpush1.msra.mxu0 %v9624_v30  ;;  %2234 = vmatpush1.msra.mxu1 %v2233_v62  ;;  %v9755_v23 = vsub.f32 %v99_v1, %v9716_v9  ;;  %v2286_v30 = vsub.f32 %v9692_v60, %v14372_v28  ;;  %v9761_v62 = vand.u32 4294901760, %v72_v31  ;;  %v14374_v6 = vand.u32 4294901760, %v9696_v63 }
 0x11d   :  { %v2280_v48 = vsub.f32 %v9663_v37, %v14371_v35  ;;  %2096 = vmatprep.subr.mxu0 %v9646_v45  ;;  %2240 = vmatprep.subr.mxu1 %v2239_v17  ;;  %v2269_v35 = vand.u32 4294901760, %v2268_v55  ;;  %v9769_v45 = vsub.f32 %v86_v7, %v9734_v56  ;;  %v2275_v17 = vand.u32 4294901760, %v2274_v19 }
 0x11e   :  { %14373 = vst [vmem:[#allocation51_spill] sm:$0xff] %v9761_v62  ;;  %2098 = vmatpush1.msra.mxu0 %v9653_v38  ;;  %2246 = vmatpush1.msra.mxu1 %v2245_v29  ;;  %v2292_v1 = vsub.f32 %v9696_v63, %v14374_v6  ;;  %v9773_v4 = vsub.f32 %v85_v52, %v9744_v49  ;;  %v14375_v28 = vand.u32 4294901760, %v9709_v15  ;;  %v14376_v7 = vand.u32 4294901760, %v9713_v57 }
 0x11f   :  { %2100 = vmatprep.subr.mxu0 %v9670_v47  ;;  %2252 = vmatprep.subr.mxu1 %v2251_v10  ;;  %v2281_v55 = vand.u32 4294901760, %v2280_v48  ;;  %v9785_v19 = vsub.f32 %v73_v24, %v9751_v3  ;;  %v2287_v52 = vand.u32 4294901760, %v2286_v30  ;;  %v14378_v29 = vand.u32 4294901760, %v9728_v26 }
 0x120   :  { %v2298_v43 = vsub.f32 %v9709_v15, %v14375_v28  ;;  %2102 = vmatpush1.msra.mxu0 %v9678_v14  ;;  %2258 = vmatpush1.msra.mxu1 %v2257_v44  ;;  %v2304_v6 = vsub.f32 %v9713_v57, %v14376_v7  ;;  %v9789_v28 = vsub.f32 %v72_v31, %v9761_v62  ;;  %v2293_v7 = vand.u32 4294901760, %v2292_v1 }
 0x121   :  { %2104 = vmatprep.subr.mxu0 %v9686_v61  ;;  %2264 = vmatprep.subr.mxu1 %v2263_v5  ;;  %v2310_v44 = vsub.f32 %v9728_v26, %v14378_v29  ;;  %v13646_v24 = vand.u32 4294901760, %v9769_v45  ;;  %v14379_v30 = vand.u32 4294901760, %v9724_v46  ;;  %v14380_v48 = vand.u32 4294901760, %v9755_v23 }
 0x122   :  { %14377 = vst [vmem:[#allocation52_spill] sm:$0xff] %v9789_v28  ;;  %2106 = vmatpush1.msra.mxu0 %v9689_v58  ;;  %2270 = vmatpush1.msra.mxu1 %v2269_v35  ;;  %v2299_v5 = vand.u32 4294901760, %v2298_v43  ;;  %v2305_v29 = vand.u32 4294901760, %v2304_v6  ;;  %v13645_v1 = vand.u32 4294901760, %v9785_v19  ;;  %v13644_v10 = vand.u32 4294901760, %v9789_v28 }
 0x123   :  { %2108 = vmatprep.subr.mxu0 %v9716_v9  ;;  %2276 = vmatprep.subr.mxu1 %v2275_v17  ;;  %v2316_v31 = vsub.f32 %v9724_v46, %v14379_v30  ;;  %v2322_v35 = vsub.f32 %v9755_v23, %v14380_v48  ;;  %v2311_v43 = vand.u32 4294901760, %v2310_v44  ;;  %v14381_v17 = vand.u32 4294901760, %v9742_v18 }
 0x124   :  { %2110 = vmatpush1.msra.mxu0 %v9706_v54  ;;  %2282 = vmatpush1.msra.mxu1 %v2281_v55  ;;  %v2334_v55 = vsub.f32 %v9769_v45, %v13646_v24  ;;  %v257_v24 = vld [vmem:[#allocation5 + $0x5e8] sm:$0xff] }
 0x125   :  { %2112 = vmatprep.subr.mxu0 %v9734_v56  ;;  %2288 = vmatprep.subr.mxu1 %v2287_v52  ;;  %v2328_v30 = vsub.f32 %v9742_v18, %v14381_v17  ;;  %v2317_v6 = vand.u32 4294901760, %v2316_v31  ;;  %v14382_v52 = vand.u32 4294901760, %v9773_v4  ;;  %v2323_v48 = vand.u32 4294901760, %v2322_v35  ;;  %v14383_v31 = vld [vmem:[#allocation38_spill] sm:$0xff] }
 0x126   :  { %2114 = vmatpush1.msra.mxu0 %v9744_v49  ;;  %2294 = vmatpush1.msra.mxu1 %v2293_v7  ;;  %v2346_v7 = vsub.f32 %v9785_v19, %v13645_v1  ;;  %v269_v1 = vld [vmem:[#allocation5 + $0x648] sm:$0xff] }
 0x127   :  { %2116 = vmatprep.subr.mxu0 %v9751_v3  ;;  %2300 = vmatprep.subr.mxu1 %v2299_v5  ;;  %v2340_v44 = vsub.f32 %v9773_v4, %v14382_v52  ;;  %v2329_v17 = vand.u32 4294901760, %v2328_v30  ;;  %v2352_v5 = vsub.f32 %v9789_v28, %v13644_v10  ;;  %v2335_v52 = vand.u32 4294901760, %v2334_v55  ;;  %v14384_v30 = vld [vmem:[#allocation15_spill] sm:$0xff]  ;;  %v14385_v55 = vld [vmem:[#allocation36_spill] sm:$0xff] }
 0x128   :  { %2118 = vmatpush1.msra.mxu0 %v9761_v62  ;;  %2306 = vmatpush1.msra.mxu1 %v2305_v29  ;;  %v2347_v35 = vand.u32 4294901760, %v2346_v7  ;;  %v14389_v7 = vld [vmem:[#allocation25_spill] sm:$0xff] }
 0x129   :  { %2151 = vmatprep.mubr.f32.mxu0 %v14173_v34  ;;  %2312 = vmatprep.subr.mxu1 %v2311_v43  ;;  %v2341_v29 = vand.u32 4294901760, %v2340_v44  ;;  %v2353_v43 = vand.u32 4294901760, %v2352_v5  ;;  %v14387_v44 = vld [vmem:[#allocation17_spill] sm:$0xff]  ;;  %v14391_v5 = vld [vmem:[#allocation19_spill] sm:$0xff] }
 0x12a   :  { %2397 = vmatprep.subr.mxu0 %v9437_v59  ;;  %2157 = vmatmul.mubr.f32.vlgmr.msra.gmra.mxu0 %v14383_v31  ;;  %v270_v10 = vld [vmem:[#allocation5 + $0x650] sm:$0xff]  ;;  %v14396_v31 = vld [vmem:[#allocation23_spill] sm:$0xff] }
 0x12b   :  { %2318 = vmatpush1.msra.mxu1 %v2317_v6  ;;  %2400 = vmatpush1.msra.mxu0 %v9432_v2  ;;  %v14386_v6 = vld [vmem:[#allocation24_spill] sm:$0xff] }
 0x12c   :  { %2324 = vmatprep.subr.mxu1 %v2323_v48  ;;  %2403 = vmatprep.subr.mxu0 %v9453_v25  ;;  %v14388_v48 = vld [vmem:[#allocation16_spill] sm:$0xff] }
 0x12d   :  { %2330 = vmatpush1.msra.mxu1 %v2329_v17  ;;  %2406 = vmatpush1.msra.mxu0 %v9448_v33  ;;  %v14390_v17 = vld [vmem:[#allocation37_spill] sm:$0xff] }
 0x12e   :  { %2336 = vmatprep.subr.mxu1 %v2335_v52  ;;  %2409 = vmatprep.subr.mxu0 %v9468_v8  ;;  %v14392_v52 = vld [vmem:[#allocation18_spill] sm:$0xff] }
 0x12f   :  { %2342 = vmatpush1.msra.mxu1 %v2341_v29  ;;  %2412 = vmatpush1.msra.mxu0 %v9474_v22  ;;  %v14393_v29 = vld [vmem:[#allocation20_spill] sm:$0xff] }
 0x130   :  { %2348 = vmatprep.subr.mxu1 %v2347_v35  ;;  %2415 = vmatprep.subr.mxu0 %v9484_v53  ;;  %v14394_v35 = vld [vmem:[#allocation21_spill] sm:$0xff] }
 0x131   :  { %2354 = vmatpush1.msra.mxu1 %v2353_v43  ;;  %2387 = vmatprep.mubr.f32.mxu1 %v14173_v34  ;;  %v14395_v43 = vld [vmem:[#allocation22_spill] sm:$0xff] }
 0x132   :  { %2418 = vmatpush1.msra.mxu0 %v9490_v51  ;;  %2389 = vmatmul.mubr.f32.vlgmr.msra.gmra.mxu1 %v14339_v21  ;;  %v256_v21 = vld [vmem:[#allocation5 + $0x5e0] sm:$0xff] }
 0x133   :  { %2421 = vmatprep.subr.mxu0 %v9520_v32  ;;  %2533 = vmatprep.subr.mxu1 %v9411_v36 }
 0x134   :  { %2424 = vmatpush1.msra.mxu0 %v9505_v11  ;;  %2535 = vmatpush1.msra.mxu1 %v9413_v27 }
 0x135   :  { %2427 = vmatprep.subr.mxu0 %v9546_v39  ;;  %2537 = vmatprep.subr.mxu1 %v9421_v13 }
 0x136   :  { %2430 = vmatpush1.msra.mxu0 %v9540_v0  ;;  %2539 = vmatpush1.msra.mxu1 %v9423_v40 }
 0x137   :  { %2433 = vmatprep.subr.mxu0 %v9581_v20  ;;  %2541 = vmatprep.subr.mxu1 %v9434_v12 }
 0x138   :  { %2436 = vmatpush1.msra.mxu0 %v9561_v41  ;;  %2543 = vmatpush1.msra.mxu1 %v14384_v30 }
 0x139   :  { %2439 = vmatprep.subr.mxu0 %v9617_v16  ;;  %2545 = vmatprep.subr.mxu1 %v14385_v55 }
 0x13a   :  { %2442 = vmatpush1.msra.mxu0 %v14386_v6  ;;  %2547 = vmatpush1.msra.mxu1 %v14387_v44 }
 0x13b   :  { %2445 = vmatprep.subr.mxu0 %v9649_v42  ;;  %2549 = vmatprep.subr.mxu1 %v14388_v48 }
 0x13c   :  { %2448 = vmatpush1.msra.mxu0 %v9643_v50  ;;  %2551 = vmatpush1.msra.mxu1 %v14389_v7 }
 0x13d   :  { %2451 = vmatprep.subr.mxu0 %v14390_v17  ;;  %2553 = vmatprep.subr.mxu1 %v14391_v5 }
 0x13e   :  { %2454 = vmatpush1.msra.mxu0 %v9663_v37  ;;  %2555 = vmatpush1.msra.mxu1 %v14392_v52  ;;  %v280_v52 = vlaneseq  ;;  %v9883_v37 = vand.u32 4294901760, %v256_v21 }
 0x13f   :  { %2457 = vmatprep.subr.mxu0 %v9692_v60  ;;  %2557 = vmatprep.subr.mxu1 %v14393_v29  ;;  %v14397_v29 = vld [vmem:[#allocation29_spill] sm:$0xff]  ;;  %v244_v60 = vld [vmem:[#allocation5 + $0x580] sm:$0xff] }
 0x140   :  { %2460 = vmatpush1.msra.mxu0 %v9696_v63  ;;  %2559 = vmatpush1.msra.mxu1 %v14394_v35  ;;  %v14398_v35 = vld [vmem:[#allocation32_spill] sm:$0xff]  ;;  %v9879_v63 = vand.u32 4294901760, %v257_v24  ;;  %14403 = vst [vmem:[#allocation17_spill] sm:$0xff] %v9883_v37 }
 0x141   :  { %2463 = vmatprep.subr.mxu0 %v9709_v15  ;;  %2561 = vmatprep.subr.mxu1 %v14395_v43  ;;  %v9875_v15 = vand.u32 4294901760, %v270_v10  ;;  %v9877_v43 = vand.u32 4294901760, %v269_v1 }
 0x142   :  { %2466 = vmatpush1.msra.mxu0 %v9713_v57  ;;  %2563 = vmatpush1.msra.mxu1 %v14396_v31  ;;  %14401 = vst [vmem:[#allocation24_spill] sm:$0xff] %v9879_v63  ;;  %v243_v57 = vld [vmem:[#allocation5 + $0x578] sm:$0xff] }
 0x143   :  { %2469 = vmatprep.subr.mxu0 %v9728_v26  ;;  %2565 = vmatprep.subr.mxu1 %v14397_v29  ;;  %14399 = vst [vmem:[#allocation15_spill] sm:$0xff] %v9875_v15  ;;  %14400 = vst [vmem:[#allocation36_spill] sm:$0xff] %v9877_v43  ;;  %v14402_v31 = vld [vmem:[#allocation30_spill] sm:$0xff]  ;;  %v9891_v26 = vand.u32 4294901760, %v244_v60  ;;  %v9893_v5 = vand.u32 4294901760, %v243_v57 }
 0x144   :  { %2472 = vmatpush1.msra.mxu0 %v9724_v46  ;;  %2567 = vmatpush1.msra.mxu1 %v14398_v35  ;;  %v14404_v29 = vld [vmem:[#allocation26_spill] sm:$0xff]  ;;  %v9887_v46 = vshrl.u32 %v280_v52, 7  ;;  %v14406_v35 = vld [vmem:[#allocation31_spill] sm:$0xff]  ;;  %v9904_v52 = vsub.f32 %v257_v24, %v9879_v63  ;;  %v230_v63 = vld [vmem:[#allocation5 + $0x510] sm:$0xff] }
 0x145   :  { %2475 = vmatprep.subr.mxu0 %v9755_v23  ;;  %2569 = vmatprep.subr.mxu1 %v14402_v31  ;;  %14407 = vst [vmem:[#allocation25_spill] sm:$0xff] %v9891_v26  ;;  %14408 = vst [vmem:[#allocation37_spill] sm:$0xff] %v9893_v5  ;;  %v9898_v31 = vsub.f32 %v269_v1, %v9877_v43  ;;  %v9919_v24 = vsub.f32 %v243_v57, %v9893_v5  ;;  %v14418_v57 = vand.u32 4294901760, %v9432_v2 }
 0x146   :  { %2478 = vmatpush1.msra.mxu0 %v9742_v18  ;;  %2571 = vmatpush1.msra.mxu1 %v14404_v29  ;;  %14405 = vst [vmem:[#allocation16_spill] sm:$0xff] %v9887_v46  ;;  %v9901_v18 = vsub.f32 %v270_v10, %v9875_v15  ;;  %14411 = vst [vmem:[#allocation54_spill] sm:$0xff] %v9904_v52  ;;  %v9914_v1 = vsub.s32 0, %v9887_v46  ;;  %v14414_v10 = vld [vmem:[#allocation34_spill] sm:$0xff]  ;;  %v9922_v43 = vsub.f32 %v244_v60, %v9891_v26  ;;  %v205_v15 = vld [vmem:[#allocation5 + $0x448] sm:$0xff] }
 0x147   :  { %2481 = vmatprep.subr.mxu0 %v9769_v45  ;;  %2573 = vmatprep.subr.mxu1 %v14406_v35  ;;  %14409 = vst [vmem:[#allocation26_spill] sm:$0xff] %v9898_v31  ;;  %v9909_v35 = vsub.f32 %v256_v21, %v9883_v37  ;;  %14415 = vst [vmem:[#allocation57_spill] sm:$0xff] %v9919_v24  ;;  %v9924_v21 = vld [vmem:[#allocation7] sm:$0xff]  ;;  %v14417_v37 = vand.u32 4294901760, %v9437_v59  ;;  %v9939_v26 = vsub.s32 1, %v9887_v46  ;;  %v14421_v59 = vand.u32 4294901760, %v9453_v25 }
 0x148   :  { %2484 = vmatpush1.msra.mxu0 %v9773_v4  ;;  %2575 = vmatpush1.msra.mxu1 %v9653_v38  ;;  %14410 = vst [vmem:[#allocation53_spill] sm:$0xff] %v9901_v18  ;;  %v231_v38 = vld [vmem:[#allocation5 + $0x518] sm:$0xff]  ;;  %14413 = vst [vmem:[#allocation56_spill] sm:$0xff] %v9914_v1  ;;  %v14426_v2 = vand.u32 4294901760, %v9901_v18  ;;  %v14428_v46 = vand.u32 4294901760, %v9904_v52  ;;  %v192_v25 = vld [vmem:[#allocation5 + $0x3e0] sm:$0xff] }
 0x149   :  { %2487 = vmatprep.subr.mxu0 %v9785_v19  ;;  %2577 = vmatprep.subr.mxu1 %v9670_v47  ;;  %14412 = vst [vmem:[#allocation55_spill] sm:$0xff] %v9909_v35  ;;  %14416 = vst [vmem:[#allocation58_spill] sm:$0xff] %v9922_v43  ;;  %v9935_v60 = vand.u32 4294901760, %v231_v38 }
 0x14a   :  { %2490 = vmatpush1.msra.mxu0 %v9789_v28  ;;  %2523 = vmatprep.mubr.f32.mxu0 %v14173_v34  ;;  %v217_v28 = vld [vmem:[#allocation5 + $0x4a8] sm:$0xff]  ;;  %14420 = vst [vmem:[#allocation60_spill] sm:$0xff] %v9939_v26 }
 0x14b   :  { %2579 = vmatpush1.msra.mxu1 %v9678_v14  ;;  %2526 = vmatmul.mubr.f32.vlgmr.msra.gmra.mxu0 %v14414_v10  ;;  %14419 = vst [vmem:[#allocation59_spill] sm:$0xff] %v9935_v60  ;;  %v218_v10 = vld [vmem:[#allocation5 + $0x4b0] sm:$0xff]  ;;  %v204_v14 = vld [vmem:[#allocation5 + $0x440] sm:$0xff]  ;;  %v9951_v5 = vand.u32 4294901760, %v217_v28 }
 0x14c   :  { %2581 = vmatprep.subr.mxu1 %v9686_v61  ;;  %2641 = vmatprep.subr.mxu0 %v14417_v37  ;;  %v9944_v37 = vand.u32 4294901760, %v230_v63 }
 0x14d   :  { %2583 = vmatpush1.msra.mxu1 %v9689_v58  ;;  %2645 = vmatpush1.msra.mxu0 %v14418_v57  ;;  %v14423_v57 = vand.u32 4294901760, %v9448_v33  ;;  %14424 = vst [vmem:[#allocation62_spill] sm:$0xff] %v9951_v5  ;;  %v14427_v33 = vand.u32 4294901760, %v9898_v31  ;;  %v9971_v58 = vsub.f32 %v9904_v52, %v14428_v46  ;;  %v9996_v52 = vand.u32 4294901760, %v205_v15 }
 0x14e   :  { %2585 = vmatprep.subr.mxu1 %v9716_v9  ;;  %2649 = vmatprep.subr.mxu0 %v14421_v59  ;;  %14422 = vst [vmem:[#allocation61_spill] sm:$0xff] %v9944_v37  ;;  %v191_v9 = vld [vmem:[#allocation5 + $0x3d8] sm:$0xff]  ;;  %v14425_v59 = vand.u32 4294901760, %v9468_v8  ;;  %v14429_v8 = vand.u32 4294901760, %v9474_v22  ;;  %v14434_v22 = vand.u32 4294901760, %v9484_v53  ;;  %v14440_v46 = vand.u32 4294901760, %v9922_v43 }
 0x14f   :  { %2587 = vmatpush1.msra.mxu1 %v9706_v54  ;;  %2653 = vmatpush1.msra.mxu0 %v14423_v57  ;;  %v9961_v54 = vsub.f32 %v9901_v18, %v14426_v2  ;;  %v9966_v57 = vsub.f32 %v9898_v31, %v14427_v33  ;;  %v9978_v2 = vand.u32 4294901760, %v204_v14  ;;  %v14432_v18 = vand.u32 4294901760, %v9909_v35  ;;  %14436 = vst [vmem:[#allocation67_spill] sm:$0xff] %v9996_v52 }
 0x150   :  { %2589 = vmatprep.subr.mxu1 %v9734_v56  ;;  %2657 = vmatprep.subr.mxu0 %v14425_v59  ;;  %v9976_v59 = vand.u32 4294901760, %v218_v10  ;;  %v9986_v31 = vsub.f32 %v231_v38, %v9935_v60  ;;  %v10003_v38 = vsub.f32 %v217_v28, %v9951_v5  ;;  %v10010_v53 = vsub.f32 %v9922_v43, %v14440_v46  ;;  %v165_v5 = vld [vmem:[#allocation5 + $0x308] sm:$0xff] }
 0x151   :  { %2591 = vmatpush1.msra.mxu1 %v9744_v49  ;;  %2661 = vmatpush1.msra.mxu0 %v14429_v8  ;;  %14431 = vst [vmem:[#allocation64_spill] sm:$0xff] %v9978_v2  ;;  %v9983_v33 = vsub.f32 %v9909_v35, %v14432_v18  ;;  %v9994_v8 = vsub.f32 %v230_v63, %v9944_v37  ;;  %v9998_v49 = vand.u32 4294901760, %v191_v9  ;;  %v10005_v18 = vand.u32 4294901760, %v192_v25  ;;  %v14443_v37 = vld [vmem:[#allocation35_spill] sm:$0xff] }
 0x152   :  { %14430 = vst [vmem:[#allocation63_spill] sm:$0xff] %v9976_v59  ;;  %14433 = vst [vmem:[#allocation65_spill] sm:$0xff] %v9986_v31  ;;  %2593 = vmatprep.subr.mxu1 %v9751_v3  ;;  %2665 = vmatprep.subr.mxu0 %v14434_v22  ;;  %v14441_v63 = vand.u32 4294901760, %v9919_v24  ;;  %v14442_v35 = vand.u32 4294901760, %v9490_v51  ;;  %v14444_v60 = vand.u32 4294901760, %v9520_v32  ;;  %v10027_v46 = vsub.f32 %v204_v14, %v9978_v2  ;;  %v179_v51 = vld [vmem:[#allocation5 + $0x378] sm:$0xff] }
 0x153   :  { %14435 = vst [vmem:[#allocation66_spill] sm:$0xff] %v9994_v8  ;;  %14437 = vst [vmem:[#allocation68_spill] sm:$0xff] %v9998_v49  ;;  %2595 = vmatpush1.msra.mxu1 %v9761_v62  ;;  %2628 = vmatprep.mubr.f32.mxu1 %v14173_v34  ;;  %v10032_v28 = vsub.f32 %v218_v10, %v9976_v59  ;;  %v14447_v62 = vand.u32 4294901760, %v9505_v11  ;;  %v13693_v14 = vand.u32 4294901760, %v9994_v8  ;;  %v448_v10 = vpop.f32.mrf.mxu0  ;;  %v14455_v11 = vand.u32 4294901760, %v9581_v20 }
 0x154   :  { %14438 = vst [vmem:[#allocation69_spill] sm:$0xff] %v10003_v38  ;;  %14439 = vst [vmem:[#allocation70_spill] sm:$0xff] %v10005_v18  ;;  %v10015_v22 = vsub.f32 %v9919_v24, %v14441_v63  ;;  %2669 = vmatpush1.msra.mxu0 %v14442_v35  ;;  %2632 = vmatmul.mubr.f32.vlgmr.msra.gmra.mxu1 %v14443_v37  ;;  %v13692_v35 = vand.u32 4294901760, %v9986_v31  ;;  %v178_v37 = vld [vmem:[#allocation5 + $0x370] sm:$0xff]  ;;  %v10042_v32 = vsub.f32 %v205_v15, %v9996_v52  ;;  %v113_v24 = vld [vmem:[#allocation5 + $0x168] sm:$0xff] }
 0x155   :  { %2673 = vmatprep.subr.mxu0 %v14444_v60  ;;  %2807 = vmatprep.subr.mxu1 %v9411_v36  ;;  %14445 = vst [vmem:[#allocation71_spill] sm:$0xff] %v10027_v46  ;;  %14446 = vst [vmem:[#allocation72_spill] sm:$0xff] %v10032_v28  ;;  %v10038_v36 = vsub.f32 %v191_v9, %v9998_v49  ;;  %v14450_v60 = vand.u32 4294901760, %v9546_v39  ;;  %v14452_v9 = vand.u32 4294901760, %v9540_v0  ;;  %v10056_v15 = vand.u32 4294901760, %v179_v51 }
 0x156   :  { %2677 = vmatpush1.msra.mxu0 %v14447_v62  ;;  %2809 = vmatpush1.msra.mxu1 %v9413_v27  ;;  %14449 = vst [vmem:[#allocation74_spill] sm:$0xff] %v10042_v32  ;;  %v10051_v27 = vsub.f32 %v192_v25, %v10005_v18  ;;  %v10058_v39 = vand.u32 4294901760, %v178_v37  ;;  %v10068_v0 = vsub.f32 %v9986_v31, %v13692_v35  ;;  %v153_v25 = vld [vmem:[#allocation5 + $0x2a8] sm:$0xff]  ;;  %v14456_v62 = vand.u32 4294901760, %v9561_v41  ;;  %v126_v31 = vld [vmem:[#allocation5 + $0x1d0] sm:$0xff] }
 0x157   :  { %14448 = vst [vmem:[#allocation73_spill] sm:$0xff] %v10038_v36  ;;  %2681 = vmatprep.subr.mxu0 %v14450_v60  ;;  %2811 = vmatprep.subr.mxu1 %v9421_v13  ;;  %v166_v60 = vld [vmem:[#allocation5 + $0x310] sm:$0xff]  ;;  %v10060_v13 = vand.u32 4294901760, %v165_v5  ;;  %v14457_v35 = vand.u32 4294901760, %v9617_v16  ;;  %v14459_v41 = vand.u32 4294901760, %v10003_v38  ;;  %v14461_v20 = vand.u32 4294901760, %v14386_v6 }
 0x158   :  { %14451 = vst [vmem:[#allocation75_spill] sm:$0xff] %v10051_v27  ;;  %2685 = vmatpush1.msra.mxu0 %v14452_v9  ;;  %2813 = vmatpush1.msra.mxu1 %v9423_v40  ;;  %14453 = vst [vmem:[#allocation76_spill] sm:$0xff] %v10058_v39  ;;  %v152_v9 = vld [vmem:[#allocation5 + $0x2a0] sm:$0xff]  ;;  %v10085_v63 = vand.u32 4294901760, %v166_v60  ;;  %v10099_v16 = vsub.f32 %v178_v37, %v10058_v39  ;;  %v680_v40 = vpop.f32.mrf.mxu1 }
 0x159   :  { %14454 = vst [vmem:[#allocation77_spill] sm:$0xff] %v10060_v13  ;;  %2689 = vmatprep.subr.mxu0 %v14455_v11  ;;  %2815 = vmatprep.subr.mxu1 %v9434_v12  ;;  %v10078_v12 = vsub.f32 %v9994_v8, %v13693_v14  ;;  %v10106_v11 = vand.u32 4294901760, %v152_v9  ;;  %v139_v14 = vld [vmem:[#allocation5 + $0x238] sm:$0xff]  ;;  %v10123_v8 = vsub.f32 %v179_v51, %v10056_v15 }
 0x15a   :  { %2693 = vmatpush1.msra.mxu0 %v14456_v62  ;;  %2817 = vmatpush1.msra.mxu1 %v14384_v30  ;;  %14458 = vst [vmem:[#allocation78_spill] sm:$0xff] %v10085_v63  ;;  %v10090_v30 = vsub.f32 %v10003_v38, %v14459_v41  ;;  %v10092_v62 = vld [vmem:[#allocation5 + $0x240] sm:$0xff]  ;;  %14462 = vst [vmem:[#allocation80_spill] sm:$0xff] %v10099_v16  ;;  %v450_v41 = vpop.f32.mrf.mxu0  ;;  %v14466_v38 = vand.u32 4294901760, %v9649_v42  ;;  %v14471_v42 = vand.u32 4294901760, %v9643_v50 }
 0x15b   :  { %2697 = vmatprep.subr.mxu0 %v14457_v35  ;;  %2819 = vmatprep.subr.mxu1 %v14385_v55  ;;  %v10102_v55 = vsub.f32 %v165_v5, %v10060_v13  ;;  %v10104_v35 = vand.u32 4294901760, %v153_v25  ;;  %14465 = vst [vmem:[#allocation83_spill] sm:$0xff] %v10106_v11  ;;  %v14468_v5 = vand.u32 4294901760, %v10027_v46  ;;  %14470 = vst [vmem:[#allocation85_spill] sm:$0xff] %v10123_v8  ;;  %v10135_v6 = vand.u32 4294901760, %v10092_v62 }
 0x15c   :  { %14460 = vst [vmem:[#allocation79_spill] sm:$0xff] %v10090_v30  ;;  %2701 = vmatpush1.msra.mxu0 %v14461_v20  ;;  %2821 = vmatpush1.msra.mxu1 %v14387_v44  ;;  %v14467_v44 = vand.u32 4294901760, %v10032_v28  ;;  %v14477_v50 = vrot.slane %v9924_v21, %v9914_v1  ;;  %v14496_v30 = vld [vmem:[#allocation44_spill] sm:$0xff] }
 0x15d   :  { %14463 = vst [vmem:[#allocation81_spill] sm:$0xff] %v10102_v55  ;;  %14464 = vst [vmem:[#allocation82_spill] sm:$0xff] %v10104_v35  ;;  %2705 = vmatprep.subr.mxu0 %v14466_v38  ;;  %2823 = vmatprep.subr.mxu1 %v14388_v48  ;;  %v10120_v20 = vsub.f32 %v10027_v46, %v14468_v5  ;;  %v14472_v38 = vand.u32 4294901760, %v10042_v32  ;;  %v14475_v5 = vand.u32 4294901760, %v10038_v36  ;;  %v14478_v48 = vand.u32 4294901760, %v14390_v17  ;;  %v14479_v46 = vld [vmem:[#allocation19_spill] sm:$0xff] }
 0x15e   :  { %v10115_v37 = vsub.f32 %v10032_v28, %v14467_v44  ;;  %2709 = vmatpush1.msra.mxu0 %v14471_v42  ;;  %2825 = vmatpush1.msra.mxu1 %v14389_v7  ;;  %14474 = vst [vmem:[#allocation87_spill] sm:$0xff] %v10135_v6  ;;  %v449_v42 = vadd.f32 %v448_v10, %v14477_v50  ;;  %v817_v7 = vpop.f32.mrf.mxu0  ;;  %v14485_v10 = vld [vmem:[#allocation18_spill] sm:$0xff]  ;;  %v14497_v13 = vand.u32 4294901760, %v14496_v30 }
 0x15f   :  { %14469 = vst [vmem:[#allocation84_spill] sm:$0xff] %v10120_v20  ;;  %v10132_v44 = vsub.f32 %v10042_v32, %v14472_v38  ;;  %v10140_v51 = vsub.f32 %v10038_v36, %v14475_v5  ;;  %2713 = vmatprep.subr.mxu0 %v14478_v48  ;;  %2827 = vmatprep.subr.mxu1 %v14479_v46  ;;  %v14480_v32 = vand.u32 4294901760, %v10051_v27  ;;  %v14483_v36 = vld [vmem:[#allocation40_spill] sm:$0xff]  ;;  %v10163_v46 = vand.u32 4294901760, %v139_v14  ;;  %v10165_v48 = vld [vmem:[#allocation5 + $0x1d8] sm:$0xff]  ;;  %v682_v38 = vpop.f32.mrf.mxu1 }
 0x160   :  { %v10155_v5 = vsub.f32 %v166_v60, %v10085_v63  ;;  %v14484_v1 = vand.u32 4294901760, %v14483_v36  ;;  %2829 = vmatpush1.msra.mxu1 %v14485_v10  ;;  %v10161_v17 = vsub.f32 %v152_v9, %v10106_v11  ;;  %v14489_v60 = vld [vmem:[#allocation28_spill] sm:$0xff]  ;;  %v14492_v50 = vrot.slane %v9924_v21, %v9939_v26  ;;  %v14493_v11 = vld [vmem:[#allocation42_spill] sm:$0xff]  ;;  %v819_v20 = vpop.f32.mrf.mxu0  ;;  %2798 = vmatprep.mubr.f32.mxu0 %v14173_v34 }
 0x161   :  { %14473 = vst [vmem:[#allocation86_spill] sm:$0xff] %v10132_v44  ;;  %14476 = vst [vmem:[#allocation88_spill] sm:$0xff] %v10140_v51  ;;  %v10152_v28 = vsub.f32 %v10051_v27, %v14480_v32  ;;  %v10169_v32 = vsub.f32 %v153_v25, %v10104_v35  ;;  %v14490_v27 = vand.u32 4294901760, %v14489_v60  ;;  %v14491_v36 = vld [vmem:[#allocation20_spill] sm:$0xff]  ;;  %v14494_v35 = vand.u32 4294901760, %v14493_v11  ;;  %v14495_v60 = vld [vmem:[#allocation21_spill] sm:$0xff]  ;;  %v923_v43 = vpop.f32.mrf.mxu1  ;;  %2902 = vmatprep.mubr.f32.mxu1 %v14173_v34 }
 0x162   :  { %14482 = vst [vmem:[#allocation89_spill] sm:$0xff] %v10155_v5  ;;  %2717 = vmatpush1.msra.mxu0 %v14484_v1  ;;  %14486 = vst [vmem:[#allocation40_spill] sm:$0xff] %v10161_v17  ;;  %2831 = vmatprep.subr.mxu1 %v14491_v36  ;;  %v451_v25 = vadd.f32 %v450_v41, %v14492_v50  ;;  %v10186_v1 = vand.u32 4294901760, %v126_v31  ;;  %v10188_v9 = vld [vmem:[#allocation5 + $0x170] sm:$0xff]  ;;  %v681_v10 = vadd.f32 %v680_v40, %v449_v42  ;;  %v14498_v21 = vld [vmem:[#allocation22_spill] sm:$0xff] }
 0x163   :  { %14481 = vst [vmem:[#allocation19_spill] sm:$0xff] %v10152_v28  ;;  %14487 = vst [vmem:[#allocation18_spill] sm:$0xff] %v10163_v46  ;;  %2721 = vmatprep.subr.mxu0 %v14490_v27  ;;  %2833 = vmatpush1.msra.mxu1 %v14495_v60  ;;  %v10198_v50 = vld [vmem:[#allocation5 + $0x108] sm:$0xff]  ;;  %v100_v60 = vld [vmem:[#allocation5 + $0x100] sm:$0xff]  ;;  %v10204_v30 = vsub.f32 %v139_v14, %v10163_v46  ;;  %v10223_v46 = vand.u32 4294901760, %v10188_v9  ;;  %v925_v28 = vpop.f32.mrf.mxu1  ;;  %v14513_v44 = vand.u32 4294901760, %v9755_v23 }
 0x164   :  { %14488 = vst [vmem:[#allocation90_spill] sm:$0xff] %v10169_v32  ;;  %2725 = vmatpush1.msra.mxu0 %v14494_v35  ;;  %2835 = vmatprep.subr.mxu1 %v14498_v21  ;;  %v10195_v35 = vand.u32 4294901760, %v10165_v48  ;;  %v14499_v36 = vld [vmem:[#allocation45_spill] sm:$0xff]  ;;  %v14501_v40 = vld [vmem:[#allocation23_spill] sm:$0xff]  ;;  %v10211_v21 = vand.u32 4294901760, %v113_v24  ;;  %v818_v41 = vadd.f32 %v817_v7, %v681_v10  ;;  %v14504_v26 = vld [vmem:[#allocation48_spill] sm:$0xff]  ;;  %v683_v7 = vadd.f32 %v682_v38, %v451_v25 }
 0x165   :  { %2729 = vmatprep.subr.mxu0 %v14497_v13  ;;  %v14500_v27 = vand.u32 4294901760, %v14499_v36  ;;  %2837 = vmatpush1.msra.mxu1 %v14501_v40  ;;  %14502 = vst [vmem:[#allocation28_spill] sm:$0xff] %v10204_v30  ;;  %v14503_v13 = vand.u32 4294901760, %v10099_v16  ;;  %v14505_v51 = vand.u32 4294901760, %v14504_v26  ;;  %v14506_v36 = vld [vmem:[#allocation29_spill] sm:$0xff]  ;;  %v14507_v40 = vand.u32 4294901760, %v10123_v8 }
 0x166   :  { %2839 = vmatprep.subr.mxu1 %v14506_v36  ;;  %v14509_v10 = vld [vmem:[#allocation47_spill] sm:$0xff]  ;;  %v10234_v36 = vsub.f32 %v126_v31, %v10186_v1  ;;  %v10239_v11 = vand.u32 4294901760, %v100_v60  ;;  %v14515_v38 = vand.u32 4294901760, %v10155_v5  ;;  %v14521_v31 = vand.u32 4294901760, %v9769_v45 }
 0x167   :  { %2733 = vmatpush1.msra.mxu0 %v14500_v27  ;;  %v10209_v42 = vsub.f32 %v10099_v16, %v14503_v13  ;;  %v1091_v27 = vpop.f32.mrf.mxu0  ;;  %v10220_v14 = vsub.f32 %v10123_v8, %v14507_v40  ;;  %v14508_v13 = vand.u32 4294901760, %v10102_v55  ;;  %v14510_v26 = vand.u32 4294901760, %v14509_v10  ;;  %v10250_v10 = vld [vmem:[#allocation5 + $0xa0] sm:$0xff] }
 0x168   :  { %2737 = vmatprep.subr.mxu0 %v14505_v51  ;;  %v14511_v51 = vld [vmem:[#allocation32_spill] sm:$0xff]  ;;  %14512 = vst [vmem:[#allocation20_spill] sm:$0xff] %v10234_v36  ;;  %v10237_v40 = vand.u32 4294901760, %v10198_v50  ;;  %v924_v8 = vadd.f32 %v923_v43, %v818_v41  ;;  %v10247_v25 = vsub.f32 %v10155_v5, %v14515_v38  ;;  %v820_v43 = vadd.f32 %v819_v20, %v683_v7  ;;  %v14517_v41 = vld [vmem:[#allocation49_spill] sm:$0xff] }
 0x169   :  { %v10228_v16 = vsub.f32 %v10102_v55, %v14508_v13  ;;  %2741 = vmatpush1.msra.mxu0 %v14510_v26  ;;  %2841 = vmatpush1.msra.mxu1 %v14511_v51  ;;  %v14514_v13 = vld [vmem:[#allocation30_spill] sm:$0xff]  ;;  %v10254_v26 = vsub.f32 %v10092_v62, %v10135_v6  ;;  %v14518_v51 = vand.u32 4294901760, %v14517_v41  ;;  %v14522_v62 = vld [vmem:[#allocation31_spill] sm:$0xff]  ;;  %v1093_v7 = vpop.f32.mrf.mxu0  ;;  %v14538_v55 = vld [vmem:[#allocation36_spill] sm:$0xff] }
 0x16a   :  { %2745 = vmatprep.subr.mxu0 %v14513_v44  ;;  %2843 = vmatprep.subr.mxu1 %v14514_v13  ;;  %v10261_v44 = vsub.f32 %v113_v24, %v10211_v21  ;;  %v14520_v13 = vand.u32 4294901760, %v10169_v32  ;;  %v1092_v20 = vadd.f32 %v1091_v27, %v924_v8  ;;  %v10275_v24 = vsub.f32 %v10165_v48, %v10195_v35  ;;  %v1195_v45 = vpop.f32.mrf.mxu1 }
 0x16b   :  { %14516 = vst [vmem:[#allocation42_spill] sm:$0xff] %v10254_v26  ;;  %2749 = vmatpush1.msra.mxu0 %v14518_v51  ;;  %2845 = vmatpush1.msra.mxu1 %v14404_v29  ;;  %v87_v51 = vld [vmem:[#allocation5 + $0x98] sm:$0xff]  ;;  %v926_v23 = vadd.f32 %v925_v28, %v820_v43  ;;  %v10284_v8 = vand.u32 4294901760, %v10250_v10  ;;  %v13743_v27 = vand.u32 4294901760, %v10204_v30  ;;  %v14527_v48 = vand.u32 4294901760, %v9785_v19  ;;  %v14530_v29 = vld [vmem:[#allocation52_spill] sm:$0xff] }
 0x16c   :  { %14519 = vst [vmem:[#allocation21_spill] sm:$0xff] %v10261_v44  ;;  %v10266_v38 = vsub.f32 %v10169_v32, %v14520_v13  ;;  %2753 = vmatprep.subr.mxu0 %v14521_v31  ;;  %2847 = vmatprep.subr.mxu1 %v14522_v62  ;;  %14523 = vst [vmem:[#allocation44_spill] sm:$0xff] %v10275_v24  ;;  %v14524_v13 = vand.u32 4294901760, %v9773_v4  ;;  %v14525_v32 = vld [vmem:[#allocation39_spill] sm:$0xff]  ;;  %v10281_v31 = vsub.f32 %v100_v60, %v10239_v11  ;;  %v10287_v62 = vld [vmem:[#allocation5 + $0x38] sm:$0xff] }
 0x16d   :  { %2849 = vmatpush1.msra.mxu1 %v14525_v32  ;;  %v10292_v4 = vadd.f32 %v1195_v45, %v1092_v20  ;;  %v14529_v32 = vand.u32 4294901760, %v10161_v17  ;;  %v14531_v41 = vand.u32 4294901760, %v14530_v29  ;;  %v1094_v19 = vadd.f32 %v1093_v7, %v926_v23  ;;  %v14534_v28 = vld [vmem:[#allocation33_spill] sm:$0xff]  ;;  %v14535_v7 = vld [vmem:[#allocation15_spill] sm:$0xff] }
 0x16e   :  { %2757 = vmatpush1.msra.mxu0 %v14524_v13  ;;  %14526 = vst [vmem:[#allocation22_spill] sm:$0xff] %v10281_v31  ;;  %2851 = vmatprep.subr.mxu1 %v9670_v47  ;;  %v74_v13 = vld [vmem:[#allocation5 + $0x30] sm:$0xff]  ;;  %v10305_v20 = vand.u32 4294901760, %v87_v51  ;;  %v10309_v45 = vsub.f32 %v10188_v9, %v10223_v46  ;;  %v10316_v29 = vand.u32 4294901760, %v10287_v62  ;;  %v10326_v9 = vsub.f32 %v10204_v30, %v13743_v27  ;;  %v14541_v27 = vld [vmem:[#allocation46_spill] sm:$0xff] }
 0x16f   :  { %2761 = vmatprep.subr.mxu0 %v14527_v48  ;;  %14528 = vst [vmem:[#allocation45_spill] sm:$0xff] %v10292_v4  ;;  %v10298_v60 = vsub.f32 %v10161_v17, %v14529_v32  ;;  %v1197_v48 = vpop.f32.mrf.mxu1  ;;  %v14533_v32 = vld [vmem:[#allocation27_spill] sm:$0xff]  ;;  %v14537_v17 = vld [vmem:[#allocation41_spill] sm:$0xff]  ;;  %v14539_v5 = vand.u32 4294901760, %v10254_v26  ;;  %v14542_v30 = vld [vmem:[#allocation24_spill] sm:$0xff] }
 0x170   :  { %2765 = vmatpush1.msra.mxu0 %v14531_v41  ;;  %14532 = vst [vmem:[#allocation23_spill] sm:$0xff] %v10309_v45  ;;  %2853 = vmatpush1.msra.mxu1 %v14533_v32  ;;  %v6119_v41 = vand.u32 2139095040, %v10292_v4  ;;  %v10321_v47 = vadd.f32 %v1197_v48, %v1094_v19  ;;  %v10328_v32 = vand.u32 4294901760, %v74_v13  ;;  %v10341_v48 = vsub.f32 %v10198_v50, %v10237_v40 }
 0x171   :  { %2800 = vmatmul.mubr.f32.vlgmr.msra.gmra.mxu0 %v14534_v28  ;;  %2855 = vmatprep.subr.mxu1 %v9686_v61  ;;  %v10337_v19 = vsub.f32 %v10254_v26, %v14539_v5  ;;  %v10349_v61 = vsub.f32 %v87_v51, %v10305_v20  ;;  %v14544_v5 = vld [vmem:[#allocation43_spill] sm:$0xff]  ;;  %v14545_v26 = vld [vmem:[#allocation17_spill] sm:$0xff] }
 0x172   :  { %2911 = vmatprep.subr.mxu0 %v14535_v7  ;;  %14536 = vst [vmem:[#allocation48_spill] sm:$0xff] %v10321_v47  ;;  %2857 = vmatpush1.msra.mxu1 %v14537_v17  ;;  %v6120_v23 = vshrl.u32 %v6119_v41, 23  ;;  %14540 = vst [vmem:[#allocation29_spill] sm:$0xff] %v10341_v48  ;;  %v14543_v17 = vand.u32 2147483647, %v10292_v4  ;;  %v6223_v41 = vand.u32 2139095040, %v10321_v47 }
 0x173   :  { %2913 = vmatpush1.msra.mxu0 %v14538_v55  ;;  %2859 = vmatprep.subr.mxu1 %v14541_v27  ;;  %v14546_v27 = vand.u32 4294901760, %v10275_v24  ;;  %v14547_v51 = vld [vmem:[#allocation25_spill] sm:$0xff] }
 0x174   :  { %2915 = vmatprep.subr.mxu0 %v14542_v30  ;;  %v6123_v43 = vand.u32 8388607, %v14543_v17  ;;  %2861 = vmatpush1.msra.mxu1 %v14544_v5  ;;  %v7675_v50 = vadd.s32 4294967169, %v6120_v23  ;;  %v6224_v4 = vshrl.u32 %v6223_v41, 23  ;;  %v10365_v5 = vsub.f32 %v74_v13, %v10328_v32  ;;  %v14551_v13 = vld [vmem:[#allocation59_spill] sm:$0xff]  ;;  %v14557_v41 = vld [vmem:[#allocation61_spill] sm:$0xff] }
 0x175   :  { %2917 = vmatpush1.msra.mxu0 %v14545_v26  ;;  %v10358_v30 = vsub.f32 %v10275_v24, %v14546_v27  ;;  %2863 = vmatprep.subr.mxu1 %v9734_v56  ;;  %v14548_v23 = vand.u32 4294901760, %v10234_v36  ;;  %v14549_v26 = vld [vmem:[#allocation50_spill] sm:$0xff]  ;;  %v14550_v27 = vld [vmem:[#allocation37_spill] sm:$0xff] }
 0x176   :  { %2919 = vmatprep.subr.mxu0 %v14547_v51  ;;  %2865 = vmatpush1.msra.mxu1 %v14549_v26  ;;  %v6126_v17 = vadd.s32 1, %v7675_v50  ;;  %v6124_v55 = vor.u32 8388608, %v6123_v43  ;;  %v7679_v51 = vadd.s32 4294967169, %v6224_v4  ;;  %v10386_v26 = vsub.f32 %v10250_v10, %v10284_v8  ;;  %v14554_v50 = vld [vmem:[#allocation51_spill] sm:$0xff] }
 0x177   :  { %v10370_v7 = vsub.f32 %v10234_v36, %v14548_v23  ;;  %2921 = vmatpush1.msra.mxu0 %v14550_v27  ;;  %2867 = vmatprep.subr.mxu1 %v9751_v3  ;;  %v14552_v23 = vand.u32 4294901760, %v10309_v45  ;;  %v14555_v3 = vand.u32 2147483647, %v10321_v47  ;;  %v14556_v43 = vand.u32 4294901760, %v10261_v44 }
 0x178   :  { %2923 = vmatprep.subr.mxu0 %v14551_v13  ;;  %2869 = vmatpush1.msra.mxu1 %v14554_v50  ;;  %vm6127_vm0 = vcmp.gt.s32.totalorder %v6126_v17, 0  ;;  %v6230_v50 = vadd.s32 1, %v7679_v51  ;;  %v14558_v4 = vand.u32 4294901760, %v9961_v54  ;;  %v10419_v24 = vshll.u32 %v6124_v55, 8 }
 0x179   :  { %v10382_v36 = vsub.f32 %v10309_v45, %v14552_v23  ;;  %v10392_v56 = vand.u32 8388607, %v14555_v3  ;;  %v10398_v23 = vsub.f32 %v10261_v44, %v14556_v43  ;;  %2925 = vmatpush1.msra.mxu0 %v14557_v41  ;;  %v6128_v10 = vsel %vm6127_vm0, %v6126_v17, 0  ;;  %2904 = vmatmul.mubr.f32.vlgmr.msra.gmra.mxu1 %v14534_v28  ;;  %v14561_v45 = vld [vmem:[#allocation62_spill] sm:$0xff] }
 0x17a   :  { %v10404_v47 = vshrl.u32 %v6128_v10, 5  ;;  %v6130_v3 = vand.u32 31, %v6128_v10  ;;  %2927 = vmatprep.subr.mxu0 %v9976_v59  ;;  %3023 = vmatprep.subr.mxu1 %v14558_v4  ;;  %v14559_v43 = vand.u32 4294901760, %v10341_v48  ;;  %v14560_v17 = vand.u32 4294901760, %v10281_v31 }
 0x17b   :  { %14553 = vst [vmem:[#allocation47_spill] sm:$0xff] %v10382_v36  ;;  %2929 = vmatpush1.msra.mxu0 %v14561_v45  ;;  %v14562_v10 = vand.u32 4294901760, %v9966_v57  ;;  %v13766_v59 = vmov 683565275   ;;  %v14563_v57 = vand.u32 4294901760, %v9971_v58  ;;  %vm6231_vm1 = vcmp.gt.s32.totalorder %v6230_v50, 0  ;;  %3006 = vmatprep.mubr.f32.mxu0 %v14173_v34 }
 0x17c   :  { %v10412_v44 = vsub.f32 %v10341_v48, %v14559_v43  ;;  %v10417_v51 = vsub.f32 %v10281_v31, %v14560_v17  ;;  %v10428_v43 = vsub.f32 %v10287_v62, %v10316_v29  ;;  %v6131_v48 = vsub.s32 32, %v6130_v3  ;;  %2931 = vmatprep.subr.mxu0 %v9996_v52  ;;  %3242 = vmatprep.mubr.f32.mxu1 %v14173_v34 }
 0x17d   :  { %3029 = vmatpush1.msra.mxu1 %v14562_v10  ;;  %v6133_v17 = vshll.u32 %v13766_v59, %v6130_v3  ;;  %v13777_v31 = vmov 2475754826   ;;  %v13775_v10 = vmov 2131351028   ;;  %v13773_v4 = vmov 2102212464   ;;  %2933 = vmatpush1.msra.mxu0 %v9978_v2 }
 0x17e   :  { %v6136_v55 = vshll.u32 %v13777_v31, %v6130_v3  ;;  %3035 = vmatprep.subr.mxu1 %v14563_v57  ;;  %v6139_v54 = vshll.u32 %v13775_v10, %v6130_v3  ;;  %v6142_v62 = vshll.u32 %v13773_v4, %v6130_v3  ;;  %v13781_v41 = vmov 920167782   ;;  %2935 = vmatprep.subr.mxu0 %v10005_v18 }
 0x17f   :  { %v6145_v13 = vshll.u32 %v13781_v41, %v6130_v3  ;;  %v14564_v59 = vand.u32 4294901760, %v9983_v33  ;;  %v6134_v45 = vshrl.u32 %v13777_v31, %v6131_v48  ;;  %v6137_v58 = vshrl.u32 %v13775_v10, %v6131_v48  ;;  %2937 = vmatpush1.msra.mxu0 %v9998_v49 }
 0x180   :  { %v6140_v57 = vshrl.u32 %v13773_v4, %v6131_v48  ;;  %vm6148_vm2 = vcmp.lt.s32.totalorder %v10404_v47, 1  ;;  %v14565_v52 = vmov 683565275   ;;  %v6143_v3 = vshrl.u32 %v13781_v41, %v6131_v48  ;;  %2939 = vmatprep.subr.mxu0 %v10056_v15 }
 0x181   :  { %3041 = vmatpush1.msra.mxu1 %v14564_v59  ;;  %v6132_v27 = vshrl.u32 %v14565_v52, %v6131_v48  ;;  %v13787_v28 = vmov 1326507024   ;;  %vm6150_vm3 = vcmp.lt.s32.totalorder %v10404_v47, 3  ;;  %v14566_v59 = vand.u32 4294901760, %v10010_v53  ;;  %2941 = vmatpush1.msra.mxu0 %v10058_v39 }
 0x182   :  { %v6146_v2 = vshrl.u32 %v13787_v28, %v6131_v48  ;;  %v6135_v33 = vor.u32 %v6134_v45, %v6133_v17  ;;  %v6138_v4 = vor.u32 %v6137_v58, %v6136_v55  ;;  %v6141_v10 = vor.u32 %v6140_v57, %v6139_v54  ;;  %2943 = vmatprep.subr.mxu0 %v10085_v63  ;;  %v14571_v55 = vld [vmem:[#allocation77_spill] sm:$0xff]  ;;  %v14572_v57 = vld [vmem:[#allocation79_spill] sm:$0xff] }
 0x183   :  { %3047 = vmatprep.subr.mxu1 %v14566_v59  ;;  %v6232_v31 = vsel %vm6231_vm1, %v6230_v50, 0  ;;  %v14567_v18 = vand.u32 4294901760, %v10015_v22  ;;  %v6144_v41 = vor.u32 %v6143_v3, %v6142_v62  ;;  %vm6151_vm4 = vcmp.lt.s32.totalorder %v10404_v47, 4  ;;  %2945 = vmatpush1.msra.mxu0 %v14571_v55 }
 0x184   :  { %v6147_v36 = vor.u32 %v6146_v2, %v6145_v13  ;;  %v6234_v48 = vand.u32 31, %v6232_v31  ;;  %v14568_v53 = vand.u32 4294901760, %v10068_v0  ;;  %v6152_v45 = vsel %vm6148_vm2, %v6132_v27, %v6135_v33 }
 0x185   :  { %3053 = vmatpush1.msra.mxu1 %v14567_v18  ;;  %v6153_v54 = vsel %vm6151_vm4, %v6141_v10, 2102212464  ;;  %v6156_v22 = vsel %vm6148_vm2, %v6135_v33, %v6138_v4  ;;  %v6160_v18 = vsel %vm6148_vm2, %v6138_v4, %v6141_v10  ;;  %v14569_v2 = vand.u32 4294901760, %v10078_v12  ;;  %v14574_v33 = vld [vmem:[#allocation82_spill] sm:$0xff] }
 0x186   :  { %3059 = vmatprep.subr.mxu1 %v14568_v53  ;;  %v6154_v0 = vsel %vm6150_vm3, %v6138_v4, %v6153_v54  ;;  %v6157_v13 = vsel %vm6151_vm4, %v6144_v41, 920167782  ;;  %v6161_v50 = vsel %vm6151_vm4, %v6147_v36, 1326507024  ;;  %v6235_v17 = vsub.s32 32, %v6234_v48  ;;  %2947 = vmatprep.subr.mxu0 %v14574_v33  ;;  %v14587_v33 = vld [vmem:[#allocation18_spill] sm:$0xff] }
 0x187   :  { %3065 = vmatpush1.msra.mxu1 %v14569_v2  ;;  %v14570_v27 = vand.u32 4294901760, %v10115_v37  ;;  %vm6149_vm5 = vcmp.lt.s32.totalorder %v10404_v47, 2  ;;  %v6158_v62 = vsel %vm6150_vm3, %v6141_v10, %v6157_v13  ;;  %v6162_v12 = vsel %vm6150_vm3, %v6144_v41, %v6161_v50  ;;  %v14577_v2 = vld [vmem:[#allocation83_spill] sm:$0xff] }
 0x188   :  { %v10481_v58 = vshrl.u32 %v6232_v31, 5  ;;  %v14573_v4 = vand.u32 4294901760, %v14572_v57  ;;  %v6155_v36 = vsel %vm6149_vm5, %v6152_v45, %v6154_v0  ;;  %v6159_v3 = vsel %vm6149_vm5, %v6156_v22, %v6158_v62  ;;  %v14575_v31 = vld [vmem:[#allocation86_spill] sm:$0xff]  ;;  %2949 = vmatpush1.msra.mxu0 %v14577_v2 }
 0x189   :  { %3071 = vmatprep.subr.mxu1 %v14570_v27  ;;  %v6163_v59 = vsel %vm6149_vm5, %v6160_v18, %v6162_v12  ;;  %v6237_v37 = vshll.u32 %v14565_v52, %v6234_v48  ;;  %v10492_v10 = vmul.u32.u64.low %v10419_v24, %v6159_v3  ;;  %v10493_v47 = vmul.u32.u64.high %v10419_v24, %v6159_v3, %v10492_v10  ;;  %v14580_v27 = vld [vmem:[#allocation84_spill] sm:$0xff]  ;;  %2951 = vmatprep.subr.mxu0 %v10135_v6 }
 0x18a   :  { %3077 = vmatpush1.msra.mxu1 %v14573_v4  ;;  %v10488_v53 = vmul.u32.u64.low %v10419_v24, %v6163_v59  ;;  %v10489_v54 = vmul.u32.u64.high %v10419_v24, %v6163_v59, %v10488_v53  ;;  %v14576_v41 = vand.u32 4294901760, %v14575_v31  ;;  %v14578_v45 = vmov 2475754826   ;;  %2953 = vmatpush1.msra.mxu0 %v14587_v33 }
 0x18b   :  { %v6238_v22 = vshrl.u32 %v14578_v45, %v6235_v17  ;;  %v6240_v18 = vshll.u32 %v14578_v45, %v6234_v48  ;;  %v14579_v0 = vmov 2131351028   ;;  %v14581_v62 = vand.u32 4294901760, %v14580_v27  ;;  %v14585_v27 = vld [vmem:[#allocation19_spill] sm:$0xff]  ;;  %2955 = vmatprep.subr.mxu0 %v10195_v35 }
 0x18c   :  { %3083 = vmatprep.subr.mxu1 %v14576_v41  ;;  %v6241_v13 = vshrl.u32 %v14579_v0, %v6235_v17  ;;  %v6243_v50 = vshll.u32 %v14579_v0, %v6234_v48  ;;  %v14582_v12 = vmov 2102212464   ;;  %v14583_v3 = vmov 920167782   ;;  %2957 = vmatpush1.msra.mxu0 %v10186_v1 }
 0x18d   :  { %3089 = vmatpush1.msra.mxu1 %v14581_v62  ;;  %v6244_v57 = vshrl.u32 %v14582_v12, %v6235_v17  ;;  %v6246_v4 = vshll.u32 %v14582_v12, %v6234_v48  ;;  %v6247_v59 = vshrl.u32 %v14583_v3, %v6235_v17  ;;  %v6249_v53 = vshll.u32 %v14583_v3, %v6234_v48  ;;  %v14627_v3 = vld [vmem:[#allocation25_spill] sm:$0xff] }
 0x18e   :  { %v6239_v31 = vor.u32 %v6238_v22, %v6237_v37  ;;  %v6242_v41 = vor.u32 %v6241_v13, %v6240_v18  ;;  %v6250_v45 = vshrl.u32 %v13787_v28, %v6235_v17  ;;  %v14584_v2 = vor.u32 8388608, %v10392_v56  ;;  %v14588_v22 = vld [vmem:[#allocation88_spill] sm:$0xff]  ;;  %2959 = vmatprep.subr.mxu0 %v10223_v46 }
 0x18f   :  { %v14586_v62 = vand.u32 4294901760, %v14585_v27  ;;  %v6171_v12 = vmul.u32 %v10419_v24, %v6155_v36  ;;  %vm6173_vm6 = vc.u32 %v10489_v54, %v10492_v10  ;;  %v6174_v48 = vadd.s32 1, %v10493_v47  ;;  %2961 = vmatpush1.msra.mxu0 %v10211_v21  ;;  %v258_v28 = vld [vmem:[#allocation5 + $0x5f0] sm:$0xff] }
 0x190   :  { %v10513_v0 = vshll.u32 %v14584_v2, 8  ;;  %v6245_v37 = vor.u32 %v6244_v57, %v6243_v50  ;;  %v14589_v18 = vand.u32 4294901760, %v14588_v22  ;;  %v6236_v56 = vshrl.u32 %v14565_v52, %v6235_v17  ;;  %2963 = vmatprep.subr.mxu0 %v10237_v40 }
 0x191   :  { %3095 = vmatprep.subr.mxu1 %v14586_v62  ;;  %v6248_v2 = vor.u32 %v6247_v59, %v6246_v4  ;;  %v6251_v13 = vor.u32 %v6250_v45, %v6249_v53  ;;  %vm6252_vm7 = vcmp.lt.s32.totalorder %v10481_v58, 1  ;;  %v14590_v27 = vand.u32 4294901760, %v10220_v14  ;;  %2965 = vmatpush1.msra.mxu0 %v10239_v11 }
 0x192   :  { %3101 = vmatpush1.msra.mxu1 %v14589_v18  ;;  %v6175_v24 = vsel %vm6173_vm6, %v6174_v48, %v10493_v47  ;;  %vm6254_vm8 = vcmp.lt.s32.totalorder %v10481_v58, 3  ;;  %vm6255_vm9 = vcmp.lt.s32.totalorder %v10481_v58, 4  ;;  %v6260_v36 = vsel %vm6252_vm7, %v6239_v31, %v6242_v41  ;;  %2967 = vmatprep.subr.mxu0 %v10284_v8 }
 0x193   :  { %3107 = vmatprep.subr.mxu1 %v14590_v27  ;;  %v14591_v17 = vand.u32 4294901760, %v10209_v42  ;;  %v6176_v45 = vadd.s32 %v6175_v24, %v6171_v12  ;;  %v6257_v50 = vsel %vm6255_vm9, %v6245_v37, 2102212464  ;;  %v6261_v14 = vsel %vm6255_vm9, %v6248_v2, 920167782  ;;  %2969 = vmatpush1.msra.mxu0 %v10305_v20 }
 0x194   :  { %v6264_v57 = vsel %vm6252_vm7, %v6242_v41, %v6245_v37  ;;  %v14592_v47 = vand.u32 4294901760, %v10247_v25  ;;  %vm6253_vm10 = vcmp.lt.s32.totalorder %v10481_v58, 2  ;;  %v6256_v4 = vsel %vm6252_vm7, %v6236_v56, %v6239_v31  ;;  %2971 = vmatprep.subr.mxu0 %v10316_v29 }
 0x195   :  { %3113 = vmatpush1.msra.mxu1 %v14591_v17  ;;  %v6262_v42 = vsel %vm6254_vm8, %v6245_v37, %v6261_v14  ;;  %v6265_v59 = vsel %vm6255_vm9, %v6251_v13, 1326507024  ;;  %v14593_v12 = vand.u32 4294901760, %v10228_v16  ;;  %v6177_v53 = vadd.s32 536870912, %v6176_v45  ;;  %2973 = vmatpush1.msra.mxu0 %v10328_v32 }
 0x196   :  { %3119 = vmatprep.subr.mxu1 %v14592_v47  ;;  %v6258_v25 = vsel %vm6254_vm8, %v6242_v41, %v6257_v50  ;;  %v6263_v62 = vsel %vm6253_vm10, %v6260_v36, %v6262_v42  ;;  %v6266_v48 = vsel %vm6254_vm8, %v6248_v2, %v6265_v59  ;;  %v14594_v31 = vand.u32 4294901760, %v10266_v38 }
 0x197   :  { %3125 = vmatpush1.msra.mxu1 %v14593_v12  ;;  %v6267_v16 = vsel %vm6253_vm10, %v6264_v57, %v6266_v48  ;;  %v10563_v37 = vmul.u32.u64.low %v10513_v0, %v6263_v62  ;;  %v10564_v22 = vmul.u32.u64.high %v10513_v0, %v6263_v62, %v10563_v37  ;;  %v14595_v41 = vand.u32 4294901760, %v10298_v60  ;;  %v14602_v12 = vld [vmem:[#allocation47_spill] sm:$0xff]  ;;  %v14606_v48 = vld [vmem:[#allocation26_spill] sm:$0xff] }
 0x198   :  { %3131 = vmatprep.subr.mxu1 %v14594_v31  ;;  %v13790_v18 = vand.u32 4294901760, %v10428_v43  ;;  %v10571_v56 = vshrl.u32 %v6177_v53, 30  ;;  %v10574_v38 = vmul.u32.u64.low %v10513_v0, %v6267_v16  ;;  %v10575_v2 = vmul.u32.u64.high %v10513_v0, %v6267_v16, %v10574_v38  ;;  %v14604_v53 = vld [vmem:[#allocation53_spill] sm:$0xff]  ;;  %v14607_v16 = vld [vmem:[#allocation54_spill] sm:$0xff] }
 0x199   :  { %3137 = vmatpush1.msra.mxu1 %v14595_v41  ;;  %v14596_v13 = vand.u32 4294901760, %v10337_v19  ;;  %v13789_v27 = vand.u32 4294901760, %v10365_v5  ;;  %v6259_v60 = vsel %vm6253_vm10, %v6256_v4, %v6258_v25  ;;  %v14597_v24 = vand.u32 4294901760, %v10326_v9  ;;  %3252 = vmatprep.subr.mxu0 %v14604_v53  ;;  %v14605_v25 = vld [vmem:[#allocation38_spill] sm:$0xff] }
 0x19a   :  { %v14598_v36 = vand.u32 4294901760, %v10386_v26  ;;  %v6179_v50 = vshll.u32 %v10571_v56, 30  ;;  %v14599_v19 = vand.u32 4294901760, %v10358_v30  ;;  %v3172_v14 = vand.u32 4294901760, %v10398_v23  ;;  %3012 = vmatmul.mubr.f32.vlgmr.msra.gmra.mxu0 %v14605_v25  ;;  %v14626_v25 = vld [vmem:[#allocation75_spill] sm:$0xff] }
 0x19b   :  { %3143 = vmatprep.subr.mxu1 %v14596_v13  ;;  %v14600_v58 = vand.u32 4294901760, %v10349_v61  ;;  %v6278_v57 = vadd.s32 1, %v10564_v22  ;;  %v14601_v47 = vand.u32 4294901760, %v10370_v7  ;;  %v3178_v4 = vand.u32 4294901760, %v10412_v44  ;;  %3255 = vmatpush1.msra.mxu0 %v14606_v48 }
 0x19c   :  { %3149 = vmatpush1.msra.mxu1 %v14597_v24  ;;  %v3189_v17 = vsub.f32 %v10386_v26, %v14598_v36  ;;  %v3184_v30 = vand.u32 4294901760, %v10417_v51  ;;  %v3201_v42 = vsub.f32 %v10428_v43, %v13790_v18  ;;  %v10606_v23 = vsub.s32 %v6176_v45, %v6179_v50  ;;  %3258 = vmatprep.subr.mxu0 %v14607_v16  ;;  %v14609_v24 = vld [vmem:[#allocation58_spill] sm:$0xff]  ;;  %v10652_v18 = vld [vmem:[#allocation8] sm:$0xff] }
 0x19d   :  { %3155 = vmatprep.subr.mxu1 %v14599_v19  ;;  %v3195_v9 = vsub.f32 %v10349_v61, %v14600_v58  ;;  %v6275_v59 = vmul.u32 %v10513_v0, %v6259_v60  ;;  %vm6277_vm11 = vc.u32 %v10575_v2, %v10563_v37  ;;  %v14603_v7 = vand.u32 4294901760, %v14602_v12  ;;  %v14611_v19 = vld [vmem:[#allocation65_spill] sm:$0xff]  ;;  %14625 = vst [vmem:[#allocation49_spill] sm:$0xff] %v10652_v18 }
 0x19e   :  { %3161 = vmatpush1.msra.mxu1 %v14601_v47  ;;  %v3207_v44 = vsub.f32 %v10365_v5, %v13789_v27  ;;  %v6279_v51 = vsel %vm6277_vm11, %v6278_v57, %v10564_v22  ;;  %v3190_v45 = vand.u32 4294901760, %v3189_v17  ;;  %v6182_v62 = vsub.s32 0, %v10606_v23  ;;  %v14608_v22 = vld [vmem:[#allocation55_spill] sm:$0xff]  ;;  %v14610_v17 = vld [vmem:[#allocation57_spill] sm:$0xff]  ;;  %v14614_v47 = vld [vmem:[#allocation72_spill] sm:$0xff]  ;;  %3378 = vmatprep.mubr.f32.mxu0 %v14173_v34 }
 0x19f   :  { %3167 = vmatprep.subr.mxu1 %v14603_v7  ;;  %v6280_v0 = vadd.s32 %v6279_v51, %v6275_v59  ;;  %v3196_v31 = vand.u32 4294901760, %v3195_v9  ;;  %v3202_v41 = vand.u32 4294901760, %v3201_v42  ;;  %3261 = vmatpush1.msra.mxu0 %v14608_v22  ;;  %v14612_v9 = vld [vmem:[#allocation66_spill] sm:$0xff]  ;;  %v14613_v57 = vld [vmem:[#allocation33_spill] sm:$0xff]  ;;  %v14617_v7 = vld [vmem:[#allocation36_spill] sm:$0xff]  ;;  %v6172_v51 = vadd.s32 %v10492_v10, %v10489_v54 }
 0x1a0   :  { %3173 = vmatpush1.msra.mxu1 %v3172_v14  ;;  %v7676_v38 = vmin.u32 %v6182_v62, %v10606_v23  ;;  %v3208_v60 = vand.u32 4294901760, %v3207_v44  ;;  %3264 = vmatprep.subr.mxu0 %v14609_v24  ;;  %v14616_v12 = vld [vmem:[#allocation69_spill] sm:$0xff] }
 0x1a1   :  { %3179 = vmatprep.subr.mxu1 %v3178_v4  ;;  %v6281_v13 = vadd.s32 536870912, %v6280_v0  ;;  %3267 = vmatpush1.msra.mxu0 %v14610_v17  ;;  %v14615_v4 = vld [vmem:[#allocation15_spill] sm:$0xff]  ;;  %v271_v44 = vld [vmem:[#allocation5 + $0x658] sm:$0xff] }
 0x1a2   :  { %3185 = vmatpush1.msra.mxu1 %v3184_v30  ;;  %v6184_v36 = vclz %v7676_v38  ;;  %3270 = vmatprep.subr.mxu0 %v14611_v19  ;;  %v272_v30 = vld [vmem:[#allocation5 + $0x660] sm:$0xff]  ;;  %v10656_v52 = vand.u32 4294901760, %v271_v44 }
 0x1a3   :  { %3191 = vmatprep.subr.mxu1 %v3190_v45  ;;  %v10626_v50 = vshrl.u32 %v6281_v13, 30  ;;  %3273 = vmatpush1.msra.mxu0 %v14612_v9  ;;  %v14620_v13 = vld [vmem:[#allocation16_spill] sm:$0xff] }
 0x1a4   :  { %3197 = vmatpush1.msra.mxu1 %v3196_v31  ;;  %v7677_v14 = vadd.s32 4294967294, %v6184_v36  ;;  %3276 = vmatprep.subr.mxu0 %v14614_v47  ;;  %v14618_v31 = vld [vmem:[#allocation74_spill] sm:$0xff]  ;;  %v14623_v36 = vld [vmem:[#allocation17_spill] sm:$0xff]  ;;  %14628 = vst [vmem:[#allocation31_spill] sm:$0xff] %v10656_v52 }
 0x1a5   :  { %3203 = vmatprep.subr.mxu1 %v3202_v41  ;;  %v6283_v58 = vshll.u32 %v10626_v50, 30  ;;  %3279 = vmatpush1.msra.mxu0 %v14616_v12  ;;  %v14619_v41 = vld [vmem:[#allocation24_spill] sm:$0xff] }
 0x1a6   :  { %3209 = vmatpush1.msra.mxu1 %v3208_v60  ;;  %vm7678_vm12 = vcmp.lt.s32.totalorder %v7677_v14, 0  ;;  %3282 = vmatprep.subr.mxu0 %v14618_v31  ;;  %v10645_v60 = vsub.s32 2, %v14620_v13  ;;  %v10671_v31 = vand.u32 4294901760, %v258_v28  ;;  %v14638_v12 = vld [vmem:[#allocation60_spill] sm:$0xff] }
 0x1a7   :  { %3244 = vmatmul.mubr.f32.vlgmr.msra.gmra.mxu1 %v14613_v57  ;;  %3388 = vmatprep.subr.mxu1 %v14615_v4  ;;  %v6187_v42 = vsel %vm7678_vm12, 0, %v7677_v14  ;;  %v10635_v59 = vsub.s32 %v6280_v0, %v6283_v58  ;;  %v14622_v0 = vld [vmem:[#allocation71_spill] sm:$0xff]  ;;  %v10649_v14 = vand.u32 4294901760, %v272_v30  ;;  %v259_v58 = vld [vmem:[#allocation5 + $0x5f8] sm:$0xff]  ;;  %v10659_v57 = vsub.f32 1.0, %v10652_v18  ;;  %v14639_v4 = vld [vmem:[#allocation80_spill] sm:$0xff] }
 0x1a8   :  { %3390 = vmatpush1.msra.mxu1 %v14617_v7  ;;  %v6188_v45 = vsub.s32 32, %v6187_v42  ;;  %v6192_v62 = vsub.s32 4294967266, %v6187_v42  ;;  %14621 = vst [vmem:[#allocation32_spill] sm:$0xff] %v10645_v60  ;;  %3285 = vmatpush1.msra.mxu0 %v14622_v0  ;;  %v6189_v54 = vshll.u32 %v10606_v23, %v6187_v42  ;;  %v10663_v0 = vsub.s32 3, %v14620_v13  ;;  %v14632_v23 = vld [vmem:[#allocation37_spill] sm:$0xff]  ;;  %v245_v42 = vld [vmem:[#allocation5 + $0x588] sm:$0xff] }
 0x1a9   :  { %3392 = vmatprep.subr.mxu1 %v14619_v41  ;;  %v6286_v38 = vsub.s32 0, %v10635_v59  ;;  %14624 = vst [vmem:[#allocation30_spill] sm:$0xff] %v10649_v14  ;;  %3288 = vmatprep.subr.mxu0 %v14626_v25  ;;  %14629 = vst [vmem:[#allocation39_spill] sm:$0xff] %v10659_v57  ;;  %v14631_v41 = vld [vmem:[#allocation73_spill] sm:$0xff]  ;;  %v10669_v25 = vand.u32 4294901760, %v259_v58  ;;  %v14637_v7 = vld [vmem:[#allocation56_spill] sm:$0xff]  ;;  %v10706_v47 = vsub.f32 %v258_v28, %v10671_v31 }
 0x1aa   :  { %3394 = vmatpush1.msra.mxu1 %v14623_v36  ;;  %v6190_v10 = vshrl.u32 %v6172_v51, %v6188_v45  ;;  %v6193_v27 = vadd.s32 127, %v6192_v62  ;;  %14630 = vst [vmem:[#allocation52_spill] sm:$0xff] %v10663_v0  ;;  %3291 = vmatpush1.msra.mxu0 %v14631_v41  ;;  %v14633_v62 = vld [vmem:[#allocation85_spill] sm:$0xff]  ;;  %14636 = vst [vmem:[#allocation41_spill] sm:$0xff] %v10671_v31  ;;  %v14648_v60 = vld [vmem:[#allocation90_spill] sm:$0xff] }
 0x1ab   :  { %3396 = vmatprep.subr.mxu1 %v14627_v3  ;;  %v7680_v36 = vmin.u32 %v6286_v38, %v10635_v59  ;;  %3294 = vmatprep.subr.mxu0 %v14633_v62  ;;  %v14634_v3 = vld [vmem:[#allocation59_spill] sm:$0xff]  ;;  %14635 = vst [vmem:[#allocation27_spill] sm:$0xff] %v10669_v25  ;;  %v14642_v62 = vld [vmem:[#allocation89_spill] sm:$0xff]  ;;  %14650 = vst [vmem:[#allocation51_spill] sm:$0xff] %v10706_v47 }
 0x1ac   :  { %3398 = vmatpush1.msra.mxu1 %v14632_v23  ;;  %v6191_v51 = vor.u32 %v6190_v10, %v6189_v54  ;;  %v6194_v45 = vshll.u32 %v6193_v27, 23  ;;  %3297 = vmatpush1.msra.mxu0 %v14639_v4  ;;  %v14640_v23 = vld [vmem:[#allocation61_spill] sm:$0xff]  ;;  %v10680_v27 = vsub.f32 %v272_v30, %v10649_v14  ;;  %v10682_v10 = vld [vmem:[#allocation7] sm:$0xff]  ;;  %v10691_v4 = vand.u32 4294901760, %v245_v42  ;;  %v14652_v14 = vld [vmem:[#allocation40_spill] sm:$0xff] }
 0x1ad   :  { %3400 = vmatprep.subr.mxu1 %v14634_v3  ;;  %v6288_v13 = vclz %v7680_v36  ;;  %3300 = vmatprep.subr.mxu0 %v14642_v62  ;;  %v14643_v38 = vld [vmem:[#allocation63_spill] sm:$0xff]  ;;  %v10689_v36 = vsub.f32 %v271_v44, %v10656_v52  ;;  %v246_v41 = vld [vmem:[#allocation5 + $0x590] sm:$0xff]  ;;  %v10709_v30 = vsub.f32 %v259_v58, %v10669_v25  ;;  %v14656_v28 = vld [vmem:[#allocation42_spill] sm:$0xff] }
 0x1ae   :  { %3402 = vmatpush1.msra.mxu1 %v14640_v23  ;;  %14641 = vst [vmem:[#allocation46_spill] sm:$0xff] %v10680_v27  ;;  %v6195_v54 = vor.u32 4788187, %v6194_v45  ;;  %14645 = vst [vmem:[#allocation50_spill] sm:$0xff] %v10691_v4  ;;  %v10693_v23 = vld [vmem:[#allocation5 + $0x528] sm:$0xff]  ;;  %v14646_v62 = vld [vmem:[#allocation81_spill] sm:$0xff]  ;;  %v6198_v52 = vcvt.s32.f32 %v6191_v51  ;;  %v10722_v58 = vsub.f32 %v245_v42, %v10691_v4  ;;  %3483 = vmatprep.mubr.f32.mxu1 %v14173_v34 }
 0x1af   :  { %3404 = vmatprep.subr.mxu1 %v14643_v38  ;;  %14644 = vst [vmem:[#allocation43_spill] sm:$0xff] %v10689_v36  ;;  %v7681_v45 = vadd.s32 4294967294, %v6288_v13  ;;  %3303 = vmatpush1.msra.mxu0 %v14646_v62  ;;  %v14647_v38 = vld [vmem:[#allocation62_spill] sm:$0xff]  ;;  %v14649_v18 = vld [vmem:[#allocation67_spill] sm:$0xff]  ;;  %14651 = vst [vmem:[#allocation77_spill] sm:$0xff] %v10709_v30  ;;  %v10713_v62 = vand.u32 4294901760, %v246_v41 }
 0x1b0   :  { %3406 = vmatpush1.msra.mxu1 %v14647_v38  ;;  %v6196_v44 = vand.u32 2147483647, %v6195_v54  ;;  %3306 = vmatprep.subr.mxu0 %v14648_v60  ;;  %v232_v13 = vld [vmem:[#allocation5 + $0x520] sm:$0xff]  ;;  %v14653_v3 = vld [vmem:[#allocation64_spill] sm:$0xff]  ;;  %v10716_v51 = vand.u32 4294901760, %v10693_v23  ;;  %14658 = vst [vmem:[#allocation84_spill] sm:$0xff] %v10722_v58 }
 0x1b1   :  { %3408 = vmatprep.subr.mxu1 %v14649_v18  ;;  %vm7682_vm13 = vcmp.lt.s32.totalorder %v7681_v45, 0  ;;  %3309 = vmatpush1.msra.mxu0 %v14652_v14  ;;  %14654 = vst [vmem:[#allocation79_spill] sm:$0xff] %v10713_v62  ;;  %v14657_v31 = vld [vmem:[#allocation70_spill] sm:$0xff]  ;;  %v14659_v0 = vld [vmem:[#allocation28_spill] sm:$0xff]  ;;  %v14667_v42 = vld [vmem:[#allocation23_spill] sm:$0xff] }
 0x1b2   :  { %3410 = vmatpush1.msra.mxu1 %v14653_v3  ;;  %14655 = vst [vmem:[#allocation86_spill] sm:$0xff] %v10716_v51  ;;  %v6199_v18 = vmul.f32 %v6198_v52, %v6196_v44  ;;  %v6291_v60 = vsel %vm7682_vm13, 0, %v7681_v45  ;;  %3312 = vmatprep.subr.mxu0 %v14656_v28  ;;  %v6276_v3 = vadd.s32 %v10563_v37, %v10575_v2  ;;  %v10729_v52 = vand.u32 4294901760, %v232_v13  ;;  %v14661_v45 = vld [vmem:[#allocation45_spill] sm:$0xff]  ;;  %v14662_v54 = vld [vmem:[#allocation44_spill] sm:$0xff] }
 0x1b3   :  { %3412 = vmatprep.subr.mxu1 %v14657_v31  ;;  %v6292_v14 = vsub.s32 32, %v6291_v60  ;;  %v6296_v38 = vsub.s32 4294967266, %v6291_v60  ;;  %3315 = vmatpush1.msra.mxu0 %v14659_v0  ;;  %vm6118_vm14 = vcmp.lt.s32.totalorder %v14661_v45, 0  ;;  %v6202_v37 = vsub.s32 4, %v10571_v56  ;;  %v219_v31 = vld [vmem:[#allocation5 + $0x4b8] sm:$0xff] }
 0x1b4   :  { %3414 = vmatpush1.msra.mxu1 %v9998_v49  ;;  %14660 = vst [vmem:[#allocation19_spill] sm:$0xff] %v10729_v52  ;;  %v6200_v44 = vxor.u32 2147483648, %v6199_v18  ;;  %3318 = vmatprep.subr.mxu0 %v14662_v54  ;;  %v6293_v2 = vshll.u32 %v10635_v59, %v6291_v60  ;;  %v14663_v49 = vld [vmem:[#allocation20_spill] sm:$0xff]  ;;  %v14664_v28 = vand.u32 2147483647, %v14661_v45  ;;  %v10756_v60 = vsub.f32 %v246_v41, %v10713_v62  ;;  %v14675_v41 = vld [vmem:[#allocation82_spill] sm:$0xff] }
 0x1b5   :  { %3416 = vmatprep.subr.mxu1 %v10056_v15  ;;  %v6294_v4 = vshrl.u32 %v6276_v3, %v6292_v14  ;;  %v6297_v0 = vadd.s32 127, %v6296_v38  ;;  %3321 = vmatpush1.msra.mxu0 %v14663_v49  ;;  %v14668_v3 = vand.u32 4294901760, %v10680_v27  ;;  %v14680_v62 = vld [vmem:[#allocation22_spill] sm:$0xff]  ;;  %vm6208_vm5 = vweird.f32 %v14661_v45 }
 0x1b6   :  { %3418 = vmatpush1.msra.mxu1 %v10058_v39  ;;  %vm10742_vm15 = vcmp.le.f32.partialorder %v14664_v28, 0.7853982  ;;  %v6201_v25 = vsel %vm6118_vm14, %v6200_v44, %v6199_v18  ;;  %3324 = vmatprep.subr.mxu0 %v14667_v42  ;;  %14670 = vst [vmem:[#allocation88_spill] sm:$0xff] %v10756_v60  ;;  %v14671_v39 = vld [vmem:[#allocation21_spill] sm:$0xff]  ;;  %v220_v18 = vld [vmem:[#allocation5 + $0x4c0] sm:$0xff]  ;;  %v14672_v44 = vand.u32 4294901760, %v10689_v36 }
 0x1b7   :  { %3420 = vmatprep.subr.mxu1 %v10085_v63  ;;  %v10753_v59 = vsub.f32 %v10680_v27, %v14668_v3  ;;  %v6204_v14 = vsel %vm10742_vm15, %v14661_v45, %v6201_v25  ;;  %v6295_v38 = vor.u32 %v6294_v4, %v6293_v2  ;;  %v6298_v28 = vshll.u32 %v6297_v0, 23  ;;  %3327 = vmatpush1.msra.mxu0 %v14671_v39  ;;  %v14674_v3 = vld [vmem:[#allocation29_spill] sm:$0xff]  ;;  %v180_v54 = vld [vmem:[#allocation5 + $0x380] sm:$0xff] }
 0x1b8   :  { %3422 = vmatpush1.msra.mxu1 %v14571_v55  ;;  %v10766_v63 = vsub.f32 %v10689_v36, %v14672_v44  ;;  %8106 = vcosq.f32 %v6204_v14  ;;  %3330 = vmatprep.subr.mxu0 %v14674_v3  ;;  %v10770_v27 = vand.u32 4294901760, %v219_v31  ;;  %v14677_v25 = vand.u32 4294901760, %v10709_v30  ;;  %v206_v0 = vld [vmem:[#allocation5 + $0x450] sm:$0xff] }
 0x1b9   :  { %14669 = vst [vmem:[#allocation18_spill] sm:$0xff] %v10753_v59  ;;  %3424 = vmatprep.subr.mxu1 %v14675_v41  ;;  %v10779_v2 = vsub.f32 %v10693_v23, %v10716_v51  ;;  %v6203_v44 = vsel %vm6118_vm14, %v6202_v37, %v10571_v56  ;;  %8108 = vsinq.f32 %v6204_v14  ;;  %v6299_v36 = vor.u32 4788187, %v6298_v28  ;;  %3333 = vmatpush1.msra.mxu0 %v14680_v62  ;;  %v14681_v41 = vld [vmem:[#allocation83_spill] sm:$0xff]  ;;  %v207_v56 = vld [vmem:[#allocation5 + $0x458] sm:$0xff] }
 0x1ba   :  { %14673 = vst [vmem:[#allocation47_spill] sm:$0xff] %v10766_v63  ;;  %14676 = vst [vmem:[#allocation53_spill] sm:$0xff] %v10770_v27  ;;  %v10775_v4 = vsub.f32 %v10709_v30, %v14677_v25  ;;  %3426 = vmatpush1.msra.mxu1 %v14681_v41  ;;  %v14682_v3 = vand.u32 4294901760, %v10706_v47  ;;  %3336 = vmatprep.subr.mxu0 %v10386_v26  ;;  %v10794_v23 = vsub.f32 %v232_v13, %v10729_v52  ;;  %v193_v14 = vld [vmem:[#allocation5 + $0x3e8] sm:$0xff] }
 0x1bb   :  { %14679 = vst [vmem:[#allocation54_spill] sm:$0xff] %v10779_v2  ;;  %3428 = vmatprep.subr.mxu1 %v10135_v6  ;;  %v10796_v30 = vand.u32 4294901760, %v220_v18  ;;  %v6300_v28 = vand.u32 2147483647, %v6299_v36  ;;  %v6302_v51 = vcvt.s32.f32 %v6295_v38  ;;  %3339 = vmatpush1.msra.mxu0 %v10349_v61  ;;  %v10805_v6 = vld [vmem:[#allocation5 + $0x3f0] sm:$0xff]  ;;  %v6205_v13 = vsel %vm10742_vm15, 0, %v6203_v44 }
 0x1bc   :  { %14678 = vst [vmem:[#allocation26_spill] sm:$0xff] %v10775_v4  ;;  %v10789_v25 = vsub.f32 %v10706_v47, %v14682_v3  ;;  %14684 = vst [vmem:[#allocation58_spill] sm:$0xff] %v10794_v23  ;;  %3430 = vmatpush1.msra.mxu1 %v14587_v33  ;;  %v10803_v47 = vand.u32 4294901760, %v206_v0  ;;  %3342 = vmatprep.subr.mxu0 %v10428_v43  ;;  %v10812_v36 = vsub.f32 %v219_v31, %v10770_v27  ;;  %v14689_v31 = vld [vmem:[#allocation34_spill] sm:$0xff] }
 0x1bd   :  { %14685 = vst [vmem:[#allocation57_spill] sm:$0xff] %v10796_v30  ;;  %3432 = vmatprep.subr.mxu1 %v10195_v35  ;;  %v6303_v3 = vmul.f32 %v6302_v51, %v6300_v28  ;;  %3345 = vmatpush1.msra.mxu0 %v10365_v5  ;;  %v10818_v59 = vand.u32 4294901760, %v207_v56  ;;  %v10825_v38 = vand.u32 4294901760, %v10805_v6  ;;  %v14691_v37 = vand.u32 4294901760, %v10756_v60 }
 0x1be   :  { %14683 = vst [vmem:[#allocation55_spill] sm:$0xff] %v10789_v25  ;;  %14686 = vst [vmem:[#allocation65_spill] sm:$0xff] %v10803_v47  ;;  %3434 = vmatpush1.msra.mxu1 %v10186_v1  ;;  %3381 = vmatmul.mubr.f32.vlgmr.msra.gmra.mxu0 %v14689_v31  ;;  %v14693_v28 = vand.u32 4294901760, %v10722_v58  ;;  %v6209_v25 = vadd.s32 3, %v6205_v13  ;;  %v14695_v31 = vand.u32 4294901760, %v14604_v53  ;;  %v10842_v27 = vsub.f32 %v206_v0, %v10803_v47  ;;  %v10851_v13 = vld [vmem:[#allocation5 + $0x388] sm:$0xff] }
 0x1bf   :  { %14687 = vst [vmem:[#allocation66_spill] sm:$0xff] %v10812_v36  ;;  %14688 = vst [vmem:[#allocation45_spill] sm:$0xff] %v10818_v59  ;;  %v10830_v51 = vsub.f32 %v10756_v60, %v14691_v37  ;;  %v6304_v4 = vxor.u32 2147483648, %v6303_v3  ;;  %3436 = vmatprep.subr.mxu1 %v10223_v46  ;;  %v10844_v37 = vand.u32 4294901760, %v193_v14  ;;  %v14698_v60 = vld [vmem:[#allocation48_spill] sm:$0xff]  ;;  %v14699_v44 = vand.u32 4294901760, %v14606_v48  ;;  %3653 = vmatprep.mubr.f32.mxu0 %v14173_v34 }
 0x1c0   :  { %14690 = vst [vmem:[#allocation20_spill] sm:$0xff] %v10825_v38  ;;  %v10835_v63 = vsub.f32 %v10722_v58, %v14693_v28  ;;  %3496 = vmatprep.subr.mxu0 %v14695_v31  ;;  %14696 = vst [vmem:[#allocation22_spill] sm:$0xff] %v10842_v27  ;;  %vm6222_vm0 = vcmp.lt.s32.totalorder %v14698_v60, 0  ;;  %v6306_v28 = vsub.s32 4, %v10626_v50  ;;  %3438 = vmatpush1.msra.mxu1 %v10211_v21  ;;  %v14700_v58 = vand.u32 4294901760, %v10779_v2 }
 0x1c1   :  { %14692 = vst [vmem:[#allocation23_spill] sm:$0xff] %v10830_v51  ;;  %14697 = vst [vmem:[#allocation83_spill] sm:$0xff] %v10844_v37  ;;  %3500 = vmatpush1.msra.mxu0 %v14699_v44  ;;  %v10859_v0 = vsub.f32 %v220_v18, %v10796_v30  ;;  %v14703_v31 = vand.u32 2147483647, %v14698_v60  ;;  %v6305_v48 = vsel %vm6222_vm0, %v6304_v4, %v6303_v3  ;;  %3440 = vmatprep.subr.mxu1 %v10237_v40  ;;  %v14752_v51 = vld [vmem:[#allocation73_spill] sm:$0xff] }
 0x1c2   :  { %14694 = vst [vmem:[#allocation21_spill] sm:$0xff] %v10835_v63  ;;  %v10856_v53 = vsub.f32 %v10779_v2, %v14700_v58  ;;  %v14706_v44 = vand.u32 4294901760, %v14607_v16  ;;  %v10872_v52 = vand.u32 4294901760, %v180_v54  ;;  %v10875_v58 = vsub.f32 %v207_v56, %v10818_v59  ;;  %3442 = vmatpush1.msra.mxu1 %v10239_v11 }
 0x1c3   :  { %14702 = vst [vmem:[#allocation91_spill] sm:$0xff] %v10859_v0  ;;  %vm10863_vm1 = vcmp.le.f32.partialorder %v14703_v31, 0.7853982  ;;  %v14709_v31 = vand.u32 4294901760, %v14608_v22  ;;  %v14710_v16 = vand.u32 4294901760, %v10794_v23  ;;  %v6210_v56 = vand.u32 3, %v6209_v25  ;;  %3444 = vmatprep.subr.mxu1 %v10284_v8 }
 0x1c4   :  { %14701 = vst [vmem:[#allocation48_spill] sm:$0xff] %v10856_v53  ;;  %3504 = vmatprep.subr.mxu0 %v14706_v44  ;;  %14707 = vst [vmem:[#allocation92_spill] sm:$0xff] %v10872_v52  ;;  %v6308_v18 = vsel %vm10863_vm1, %v14698_v60, %v6305_v48  ;;  %v14712_v48 = vand.u32 4294901760, %v14609_v24  ;;  %v10894_v2 = vand.u32 4294901760, %v10851_v13  ;;  %v10896_v22 = vld [vmem:[#allocation5 + $0x320] sm:$0xff]  ;;  %3446 = vmatpush1.msra.mxu1 %v10305_v20  ;;  %v14714_v25 = vand.u32 4294901760, %v14610_v17 }
 0x1c5   :  { %14708 = vst [vmem:[#allocation93_spill] sm:$0xff] %v10875_v58  ;;  %3508 = vmatpush1.msra.mxu0 %v14709_v31  ;;  %v10888_v44 = vsub.f32 %v10794_v23, %v14710_v16  ;;  %8110 = vcosq.f32 %v6308_v18  ;;  %v167_v31 = vld [vmem:[#allocation5 + $0x318] sm:$0xff]  ;;  %v6307_v16 = vsel %vm6222_vm0, %v6306_v28, %v10626_v50  ;;  %v10906_v24 = vsub.f32 %v193_v14, %v10844_v37  ;;  %v8107_v4 = vpop.eup %8106  ;;  %v14722_v28 = vld [vmem:[#allocation35_spill] sm:$0xff] }
 0x1c6   :  { %3512 = vmatprep.subr.mxu0 %v14712_v48  ;;  %14713 = vst [vmem:[#allocation95_spill] sm:$0xff] %v10894_v2  ;;  %8112 = vsinq.f32 %v6308_v18  ;;  %3448 = vmatprep.subr.mxu1 %v10316_v29  ;;  %v14716_v3 = vand.u32 4294901760, %v14611_v19  ;;  %v10914_v50 = vsub.f32 %v180_v54, %v10872_v52  ;;  %v10919_v17 = vsub.f32 %v10805_v6, %v10825_v38  ;;  %v8109_v14 = vpop.eup %8108  ;;  %v14723_v19 = vld [vmem:[#allocation72_spill] sm:$0xff]  ;;  %v14725_v53 = vld [vmem:[#allocation15_spill] sm:$0xff]  ;;  %v1303_v48 = vpop.f32.mrf.mxu0 }
 0x1c7   :  { %14711 = vst [vmem:[#allocation94_spill] sm:$0xff] %v10888_v44  ;;  %3516 = vmatpush1.msra.mxu0 %v14714_v25  ;;  %14715 = vst [vmem:[#allocation96_spill] sm:$0xff] %v10906_v24  ;;  %v6216_v18 = vxor.u32 2147483648, %v8107_v4  ;;  %3450 = vmatpush1.msra.mxu1 %v10328_v32  ;;  %v10927_v25 = vand.u32 4294901760, %v167_v31  ;;  %v6213_v54 = vxor.u32 2147483648, %v8109_v14  ;;  %vm6215_vm2 = vcmp.eq.s32.totalorder %v6210_v56, 2 }
 0x1c8   :  { %3520 = vmatprep.subr.mxu0 %v14716_v3  ;;  %14717 = vst [vmem:[#allocation97_spill] sm:$0xff] %v10914_v50  ;;  %14718 = vst [vmem:[#allocation98_spill] sm:$0xff] %v10919_v17  ;;  %v10925_v3 = vand.u32 4294901760, %v10896_v22  ;;  %v6309_v23 = vsel %vm10863_vm1, 0, %v6307_v16  ;;  %v14721_v6 = vand.u32 4294901760, %v14612_v9  ;;  %3487 = vmatmul.mubr.f32.vlgmr.msra.gmra.mxu1 %v14722_v28  ;;  %vm6212_vm3 = vcmp.eq.s32.totalorder %v6210_v56, 0 }
 0x1c9   :  { %14720 = vst [vmem:[#allocation100_spill] sm:$0xff] %v10927_v25  ;;  %v6217_v52 = vsel %vm6215_vm2, %v6216_v18, %v8109_v14  ;;  %v14724_v44 = vand.u32 4294901760, %v14723_v19  ;;  %3662 = vmatprep.subr.mxu1 %v14725_v53  ;;  %v14726_v63 = vand.u32 4294901760, %v10859_v0  ;;  %v14728_v47 = vand.u32 4294901760, %v10812_v36  ;;  %v154_v16 = vld [vmem:[#allocation5 + $0x2b0] sm:$0xff]  ;;  %3757 = vmatprep.mubr.f32.mxu1 %v14173_v34 }
 0x1ca   :  { %14719 = vst [vmem:[#allocation99_spill] sm:$0xff] %v10925_v3  ;;  %3524 = vmatpush1.msra.mxu0 %v14721_v6  ;;  %vm6211_vm4 = vcmp.lt.s32.totalorder %v6210_v56, 2  ;;  %v6214_v6 = vsel %vm6212_vm3, %v8107_v4, %v6213_v54  ;;  %v14730_v14 = vld [vmem:[#allocation69_spill] sm:$0xff]  ;;  %v14733_v53 = vand.u32 4294901760, %v10875_v58  ;;  %v6313_v28 = vadd.s32 3, %v6309_v23  ;;  %v14737_v4 = vld [vmem:[#allocation24_spill] sm:$0xff] }
 0x1cb   :  { %3528 = vmatprep.subr.mxu0 %v14724_v44  ;;  %v10941_v37 = vsub.f32 %v10859_v0, %v14726_v63  ;;  %v10946_v9 = vsub.f32 %v10812_v36, %v14728_v47  ;;  %v14731_v18 = vand.u32 4294901760, %v14730_v14  ;;  %v14732_v44 = vld [vmem:[#allocation36_spill] sm:$0xff]  ;;  %v6218_v47 = vsel %vm6211_vm4, %v6214_v6, %v6217_v52  ;;  %v14735_v36 = vld [vmem:[#allocation74_spill] sm:$0xff] }
 0x1cc   :  { %3664 = vmatpush1.msra.mxu1 %v14732_v44  ;;  %v10954_v19 = vsub.f32 %v10875_v58, %v14733_v53  ;;  %v14736_v56 = vand.u32 4294901760, %v14735_v36  ;;  %v10961_v54 = vld [vmem:[#allocation5 + $0x2b8] sm:$0xff]  ;;  %v14738_v44 = vld [vmem:[#allocation71_spill] sm:$0xff]  ;;  %v10967_v63 = vand.u32 4294901760, %v154_v16  ;;  %v14742_v52 = vand.u32 4294901760, %v10842_v27 }
 0x1cd   :  { %14727 = vst [vmem:[#allocation72_spill] sm:$0xff] %v10941_v37  ;;  %14729 = vst [vmem:[#allocation15_spill] sm:$0xff] %v10946_v9  ;;  %3532 = vmatpush1.msra.mxu0 %v14731_v18  ;;  %3666 = vmatprep.subr.mxu1 %v14737_v4  ;;  %v6219_v18 = vsel %vm6208_vm5, nan, %v6218_v47  ;;  %v14739_v0 = vand.u32 4294901760, %v14738_v44  ;;  %v14740_v53 = vld [vmem:[#allocation17_spill] sm:$0xff]  ;;  %v141_v36 = vld [vmem:[#allocation5 + $0x248] sm:$0xff]  ;;  %v10976_v6 = vsub.f32 %v10851_v13, %v10894_v2  ;;  %v1535_v2 = vpop.f32.mrf.mxu1  ;;  %vm6312_vm6 = vweird.f32 %v14698_v60 }
 0x1ce   :  { %14734 = vst [vmem:[#allocation69_spill] sm:$0xff] %v10954_v19  ;;  %3536 = vmatprep.subr.mxu0 %v14736_v56  ;;  %3668 = vmatpush1.msra.mxu1 %v14740_v53  ;;  %14741 = vst [vmem:[#allocation36_spill] sm:$0xff] %v10967_v63  ;;  %v10972_v23 = vsub.f32 %v10842_v27, %v14742_v52  ;;  %v14745_v56 = vld [vmem:[#allocation49_spill] sm:$0xff]  ;;  %v14748_v53 = vld [vmem:[#allocation75_spill] sm:$0xff]  ;;  %v10989_v52 = vsub.f32 %v167_v31, %v10927_v25  ;;  %v1305_v27 = vpop.f32.mrf.mxu0  ;;  %v14753_v38 = vand.u32 4294901760, %v14752_v51 }
 0x1cf   :  { %3540 = vmatpush1.msra.mxu0 %v14739_v0  ;;  %14744 = vst [vmem:[#allocation24_spill] sm:$0xff] %v10976_v6  ;;  %v14746_v47 = vrot.slane %v14745_v56, %v14637_v7  ;;  %v14747_v0 = vrot.slane %v10659_v57, %v14637_v7  ;;  %v14749_v14 = vand.u32 4294901760, %v14748_v53  ;;  %v14750_v58 = vld [vmem:[#allocation25_spill] sm:$0xff]  ;;  %v14756_v31 = vand.u32 4294901760, %v10919_v17 }
 0x1d0   :  { %14743 = vst [vmem:[#allocation74_spill] sm:$0xff] %v10972_v23  ;;  %3670 = vmatprep.subr.mxu1 %v14750_v58  ;;  %14751 = vst [vmem:[#allocation71_spill] sm:$0xff] %v10989_v52  ;;  %v11000_v58 = vld [vmem:[#allocation5 + $0x250] sm:$0xff]  ;;  %v6314_v13 = vand.u32 3, %v6313_v28  ;;  %v11014_v7 = vsub.f32 %v10896_v22, %v10925_v3  ;;  %v14769_v22 = vrot.slane %v14745_v56, %v14638_v12  ;;  %v14778_v37 = vand.u32 4294901760, %v10906_v24  ;;  %v14779_v3 = vld [vmem:[#allocation90_spill] sm:$0xff] }
 0x1d1   :  { %v7537_v4 = vmul.f32 %v14746_v47, %v14661_v45  ;;  %v7619_v44 = vmul.f32 %v14747_v0, %v6219_v18  ;;  %3544 = vmatprep.subr.mxu0 %v14749_v14  ;;  %v14754_v45 = vld [vmem:[#allocation37_spill] sm:$0xff]  ;;  %v10997_v18 = vand.u32 4294901760, %v10961_v54  ;;  %v11005_v0 = vsub.f32 %v10919_v17, %v14756_v31  ;;  %v14763_v14 = vld [vmem:[#allocation32_spill] sm:$0xff]  ;;  %v1672_v17 = vpop.f32.mrf.mxu0 }
 0x1d2   :  { %3548 = vmatpush1.msra.mxu0 %v14753_v38  ;;  %3672 = vmatpush1.msra.mxu1 %v14754_v45  ;;  %v14758_v51 = vld [vmem:[#allocation85_spill] sm:$0xff]  ;;  %v14760_v45 = vld [vmem:[#allocation59_spill] sm:$0xff]  ;;  %v11010_v47 = vand.u32 4294901760, %v141_v36  ;;  %14762 = vst [vmem:[#allocation25_spill] sm:$0xff] %v11014_v7  ;;  %v14764_v19 = vrot.slane %v10682_v10, %v14763_v14  ;;  %v11031_v9 = vmul.f32 %v14769_v22, %v14698_v60  ;;  %v14773_v23 = vld [vmem:[#allocation52_spill] sm:$0xff]  ;;  %vm6319_vm7 = vcmp.eq.s32.totalorder %v6314_v13, 2 }
 0x1d3   :  { %14755 = vst [vmem:[#allocation17_spill] sm:$0xff] %v10997_v18  ;;  %14757 = vst [vmem:[#allocation49_spill] sm:$0xff] %v11005_v0  ;;  %v7632_v53 = vadd.f32 %v7619_v44, %v7537_v4  ;;  %v14759_v38 = vand.u32 4294901760, %v14758_v51  ;;  %3674 = vmatprep.subr.mxu1 %v14760_v45  ;;  %v14765_v4 = vld [vmem:[#allocation80_spill] sm:$0xff]  ;;  %v14767_v44 = vld [vmem:[#allocation61_spill] sm:$0xff]  ;;  %v11024_v51 = vsub.f32 %v154_v16, %v10967_v63  ;;  %v8111_v45 = vpop.eup %8110  ;;  %v1537_v63 = vpop.f32.mrf.mxu1  ;;  %v14780_v59 = vand.u32 4294901760, %v14779_v3 }
 0x1d4   :  { %14761 = vst [vmem:[#allocation75_spill] sm:$0xff] %v11010_v47  ;;  %v1304_v31 = vadd.f32 %v1303_v48, %v14764_v19  ;;  %v14766_v28 = vand.u32 4294901760, %v14765_v4  ;;  %3676 = vmatpush1.msra.mxu1 %v14767_v44  ;;  %v14770_v48 = vld [vmem:[#allocation89_spill] sm:$0xff]  ;;  %v14772_v4 = vld [vmem:[#allocation63_spill] sm:$0xff]  ;;  %v6320_v14 = vxor.u32 2147483648, %v8111_v45  ;;  %v14774_v56 = vrot.slane %v10682_v10, %v14773_v23  ;;  %v14783_v23 = vld [vmem:[#allocation40_spill] sm:$0xff] }
 0x1d5   :  { %3552 = vmatprep.subr.mxu0 %v14759_v38  ;;  %14768 = vst [vmem:[#allocation73_spill] sm:$0xff] %v11024_v51  ;;  %7645 = vst [vmem:[#allocation10] sm:$0xff] %v7632_v53  ;;  %v14771_v19 = vand.u32 4294901760, %v14770_v48  ;;  %3678 = vmatprep.subr.mxu1 %v14772_v4  ;;  %v128_v44 = vld [vmem:[#allocation5 + $0x1e0] sm:$0xff]  ;;  %v8113_v53 = vpop.eup %8112  ;;  %v14775_v25 = vld [vmem:[#allocation81_spill] sm:$0xff]  ;;  %v11051_v16 = vsub.f32 %v10906_v24, %v14778_v37  ;;  %vm6316_vm8 = vcmp.eq.s32.totalorder %v6314_v13, 0  ;;  %v1674_v4 = vpop.f32.mrf.mxu0 }
 0x1d6   :  { %3556 = vmatpush1.msra.mxu0 %v14766_v28  ;;  %v11037_v28 = vand.u32 4294901760, %v11000_v58  ;;  %v1306_v22 = vadd.f32 %v1305_v27, %v14774_v56  ;;  %v14776_v48 = vand.u32 4294901760, %v14775_v25  ;;  %v6317_v38 = vxor.u32 2147483648, %v8113_v53  ;;  %v14781_v10 = vld [vmem:[#allocation67_spill] sm:$0xff]  ;;  %v1778_v37 = vpop.f32.mrf.mxu1  ;;  %v14785_v0 = vld [vmem:[#allocation64_spill] sm:$0xff] }
 0x1d7   :  { %3560 = vmatprep.subr.mxu0 %v14771_v19  ;;  %v14777_v19 = vld [vmem:[#allocation62_spill] sm:$0xff]  ;;  %v11057_v27 = vsub.f32 %v141_v36, %v11010_v47  ;;  %v11059_v25 = vld [vmem:[#allocation5 + $0x1e8] sm:$0xff]  ;;  %v14784_v24 = vand.u32 4294901760, %v14783_v23  ;;  %vm6315_vm9 = vcmp.lt.s32.totalorder %v6314_v13, 2  ;;  %v14789_v56 = vand.u32 4294901760, %v10976_v6 }
 0x1d8   :  { %3564 = vmatpush1.msra.mxu0 %v14776_v48  ;;  %3680 = vmatpush1.msra.mxu1 %v14777_v19  ;;  %v6321_v48 = vsel %vm6319_vm7, %v6320_v14, %v8113_v53  ;;  %v1536_v19 = vadd.f32 %v1535_v2, %v1304_v31  ;;  %v6318_v3 = vsel %vm6316_vm8, %v8111_v45, %v6317_v38  ;;  %v14786_v36 = vld [vmem:[#allocation42_spill] sm:$0xff]  ;;  %v14790_v14 = vand.u32 4294901760, %v10914_v50  ;;  %v14791_v13 = vld [vmem:[#allocation28_spill] sm:$0xff]  ;;  %v1946_v53 = vpop.f32.mrf.mxu0 }
 0x1d9   :  { %3568 = vmatprep.subr.mxu0 %v14780_v59  ;;  %3682 = vmatprep.subr.mxu1 %v14781_v10  ;;  %14782 = vst [vmem:[#allocation37_spill] sm:$0xff] %v11057_v27  ;;  %v11065_v59 = vand.u32 4294901760, %v128_v44  ;;  %v14787_v10 = vand.u32 4294901760, %v14786_v36  ;;  %v14788_v47 = vld [vmem:[#allocation70_spill] sm:$0xff]  ;;  %v11073_v2 = vsub.f32 %v10976_v6, %v14789_v56  ;;  %v6322_v23 = vsel %vm6315_vm9, %v6318_v3, %v6321_v48  ;;  %v14793_v45 = vld [vmem:[#allocation68_spill] sm:$0xff] }
 0x1da   :  { %3572 = vmatpush1.msra.mxu0 %v14784_v24  ;;  %3684 = vmatpush1.msra.mxu1 %v14785_v0  ;;  %v11078_v24 = vsub.f32 %v10914_v50, %v14790_v14  ;;  %v1538_v0 = vadd.f32 %v1537_v63, %v1306_v22  ;;  %v1673_v31 = vadd.f32 %v1672_v17, %v1536_v19  ;;  %v14792_v38 = vand.u32 4294901760, %v14791_v13  ;;  %v115_v36 = vld [vmem:[#allocation5 + $0x178] sm:$0xff]  ;;  %v11091_v63 = vld [vmem:[#allocation5 + $0x180] sm:$0xff]  ;;  %v1780_v14 = vpop.f32.mrf.mxu1 }
 0x1db   :  { %3576 = vmatprep.subr.mxu0 %v14787_v10  ;;  %3686 = vmatprep.subr.mxu1 %v14788_v47  ;;  %v11084_v47 = vand.u32 4294901760, %v11059_v25  ;;  %v6323_v56 = vsel %vm6312_vm6, nan, %v6322_v23  ;;  %v14795_v10 = vld [vmem:[#allocation44_spill] sm:$0xff]  ;;  %v14797_v17 = vand.u32 4294901760, %v11014_v7  ;;  %v13886_v48 = vand.u32 4294901760, %v10989_v52 }
 0x1dc   :  { %3580 = vmatpush1.msra.mxu0 %v14792_v38  ;;  %3688 = vmatpush1.msra.mxu1 %v14793_v45  ;;  %v14796_v6 = vand.u32 4294901760, %v14795_v10  ;;  %v11101_v19 = vsub.f32 %v10961_v54, %v10997_v18  ;;  %v14799_v60 = vrot.slane %v10659_v57, %v14638_v12  ;;  %v14801_v23 = vld [vmem:[#allocation76_spill] sm:$0xff]  ;;  %v11112_v45 = vsub.f32 %v11000_v58, %v11037_v28 }
 0x1dd   :  { %14794 = vst [vmem:[#allocation85_spill] sm:$0xff] %v11084_v47  ;;  %3690 = vmatprep.subr.mxu1 %v10056_v15  ;;  %v11096_v22 = vsub.f32 %v11014_v7, %v14797_v17  ;;  %v14800_v15 = vand.u32 4294901760, %v14663_v49  ;;  %v102_v38 = vld [vmem:[#allocation5 + $0x110] sm:$0xff]  ;;  %v1675_v54 = vadd.f32 %v1674_v4, %v1538_v0  ;;  %v14803_v10 = vand.u32 4294901760, %v14667_v42  ;;  %v14804_v17 = vld [vmem:[#allocation78_spill] sm:$0xff]  ;;  %v1948_v4 = vpop.f32.mrf.mxu0 }
 0x1de   :  { %3584 = vmatprep.subr.mxu0 %v14796_v6  ;;  %14798 = vst [vmem:[#allocation59_spill] sm:$0xff] %v11101_v19  ;;  %v7620_v3 = vmul.f32 %v14799_v60, %v6323_v56  ;;  %v1779_v6 = vadd.f32 %v1778_v37, %v1673_v31  ;;  %3692 = vmatpush1.msra.mxu1 %v14801_v23  ;;  %14802 = vst [vmem:[#allocation80_spill] sm:$0xff] %v11112_v45  ;;  %v11120_v49 = vand.u32 4294901760, %v115_v36  ;;  %v14845_v57 = vmov 1326507024  }
 0x1df   :  { %3588 = vmatpush1.msra.mxu0 %v14800_v15  ;;  %3694 = vmatprep.subr.mxu1 %v14804_v17  ;;  %v11118_v37 = vsub.f32 %v128_v44, %v11065_v59  ;;  %v13887_v31 = vand.u32 4294901760, %v11024_v51  ;;  %v14806_v60 = vand.u32 4294901760, %v14671_v39  ;;  %v11129_v0 = vand.u32 4294901760, %v11091_v63  ;;  %v14807_v15 = vld [vmem:[#allocation29_spill] sm:$0xff]  ;;  %v2050_v17 = vpop.f32.mrf.mxu1 }
 0x1e0   :  { %3592 = vmatprep.subr.mxu0 %v14803_v10  ;;  %v7633_v56 = vadd.f32 %v7620_v3, %v11031_v9  ;;  %3696 = vmatpush1.msra.mxu1 %v14571_v55  ;;  %v1947_v58 = vadd.f32 %v1946_v53, %v1779_v6  ;;  %v1781_v44 = vadd.f32 %v1780_v14, %v1675_v54  ;;  %v14808_v23 = vand.u32 4294901760, %v14807_v15  ;;  %v14809_v10 = vld [vmem:[#allocation82_spill] sm:$0xff] }
 0x1e1   :  { %14805 = vst [vmem:[#allocation61_spill] sm:$0xff] %v11118_v37  ;;  %3596 = vmatpush1.msra.mxu0 %v14806_v60  ;;  %3698 = vmatprep.subr.mxu1 %v14809_v10  ;;  %v11138_v39 = vsub.f32 %v10989_v52, %v13886_v48  ;;  %v11140_v55 = vld [vmem:[#allocation5 + $0x118] sm:$0xff]  ;;  %v11142_v53 = vand.u32 4294901760, %v102_v38  ;;  %v14810_v3 = vand.u32 4294901760, %v14680_v62  ;;  %v13889_v54 = vand.u32 4294901760, %v11101_v19  ;;  %v11151_v60 = vld [vmem:[#allocation5 + $0xb0] sm:$0xff]  ;;  %v2052_v62 = vpop.f32.mrf.mxu1 }
 0x1e2   :  { %3600 = vmatprep.subr.mxu0 %v14808_v23  ;;  %7646 = vst [vmem:[#allocation10 + $0x8] sm:$0xff] %v7633_v56  ;;  %3700 = vmatpush1.msra.mxu1 %v14681_v41  ;;  %v11147_v6 = vadd.f32 %v2050_v17, %v1947_v58  ;;  %v13888_v15 = vand.u32 4294901760, %v11112_v45  ;;  %v14812_v23 = vand.u32 4294901760, %v10386_v26  ;;  %v14813_v10 = vld [vmem:[#allocation87_spill] sm:$0xff]  ;;  %v1949_v56 = vadd.f32 %v1948_v4, %v1781_v44 }
 0x1e3   :  { %3604 = vmatpush1.msra.mxu0 %v14810_v3  ;;  %3702 = vmatprep.subr.mxu1 %v14813_v10  ;;  %v11158_v3 = vsub.f32 %v115_v36, %v11120_v49  ;;  %v11163_v41 = vsub.f32 %v11024_v51, %v13887_v31  ;;  %v89_v58 = vld [vmem:[#allocation5 + $0xa8] sm:$0xff]  ;;  %v13891_v17 = vand.u32 4294901760, %v11057_v27  ;;  %v14814_v48 = vand.u32 4294901760, %v10349_v61  ;;  %v76_v31 = vld [vmem:[#allocation5 + $0x40] sm:$0xff] }
 0x1e4   :  { %14811 = vst [vmem:[#allocation89_spill] sm:$0xff] %v11147_v6  ;;  %3608 = vmatprep.subr.mxu0 %v14812_v23  ;;  %3704 = vmatpush1.msra.mxu1 %v14587_v33  ;;  %v13890_v26 = vand.u32 2147483647, %v11147_v6  ;;  %v6327_v4 = vand.u32 2139095040, %v11147_v6  ;;  %v11172_v36 = vand.u32 4294901760, %v11140_v55  ;;  %v11176_v44 = vsub.f32 %v11059_v25, %v11084_v47 }
 0x1e5   :  { %3612 = vmatpush1.msra.mxu0 %v14814_v48  ;;  %v14816_v23 = vand.u32 4294901760, %v10428_v43  ;;  %3706 = vmatprep.subr.mxu1 %v10195_v35  ;;  %v11181_v61 = vadd.f32 %v2052_v62, %v1949_v56  ;;  %v11185_v48 = vsub.f32 %v102_v38, %v11142_v53  ;;  %v11188_v10 = vand.u32 4294901760, %v11151_v60  ;;  %v77_v56 = vld [vmem:[#allocation5 + $0x48] sm:$0xff] }
 0x1e6   :  { %14815 = vst [vmem:[#allocation63_spill] sm:$0xff] %v11176_v44  ;;  %v14819_v14 = vand.u32 4294901760, %v10365_v5  ;;  %v6328_v43 = vshrl.u32 %v6327_v4, 23  ;;  %v11196_v35 = vsub.f32 %v11101_v19, %v13889_v54  ;;  %v11201_v25 = vsub.f32 %v11112_v45, %v13888_v15  ;;  %3708 = vmatpush1.msra.mxu1 %v10186_v1  ;;  %v14821_v5 = vld [vmem:[#allocation33_spill] sm:$0xff]  ;;  %v14823_v15 = vld [vmem:[#allocation30_spill] sm:$0xff] }
 0x1e7   :  { %3616 = vmatprep.subr.mxu0 %v14816_v23  ;;  %14817 = vst [vmem:[#allocation81_spill] sm:$0xff] %v11181_v61  ;;  %14818 = vst [vmem:[#allocation62_spill] sm:$0xff] %v11188_v10  ;;  %v11203_v38 = vand.u32 4294901760, %v89_v58  ;;  %v6431_v62 = vand.u32 2139095040, %v11181_v61  ;;  %v11214_v23 = vsub.f32 %v11057_v27, %v13891_v17  ;;  %3710 = vmatprep.subr.mxu1 %v10223_v46  ;;  %v11220_v9 = vand.u32 4294901760, %v76_v31 }
 0x1e8   :  { %3620 = vmatpush1.msra.mxu0 %v14819_v14  ;;  %v6331_v14 = vand.u32 8388607, %v13890_v26  ;;  %v7683_v54 = vadd.s32 4294967169, %v6328_v43  ;;  %3712 = vmatpush1.msra.mxu1 %v10211_v21  ;;  %v14825_v26 = vld [vmem:[#allocation31_spill] sm:$0xff]  ;;  %v11224_v42 = vand.u32 4294901760, %v77_v56  ;;  %v11229_v46 = vsub.f32 %v11091_v63, %v11129_v0 }
 0x1e9   :  { %14820 = vst [vmem:[#allocation90_spill] sm:$0xff] %v11203_v38  ;;  %3655 = vmatmul.mubr.f32.vlgmr.msra.gmra.mxu0 %v14821_v5  ;;  %14822 = vst [vmem:[#allocation67_spill] sm:$0xff] %v11214_v23  ;;  %3766 = vmatprep.subr.mxu0 %v14823_v15  ;;  %v6432_v4 = vshrl.u32 %v6431_v62, 23  ;;  %v14827_v43 = vld [vmem:[#allocation27_spill] sm:$0xff]  ;;  %v11236_v1 = vsub.f32 %v89_v58, %v11203_v38  ;;  %v14828_v62 = vld [vmem:[#allocation41_spill] sm:$0xff]  ;;  %v14834_v33 = vand.u32 4294901760, %v11118_v37 }
 0x1ea   :  { %14824 = vst [vmem:[#allocation40_spill] sm:$0xff] %v11220_v9  ;;  %3768 = vmatpush1.msra.mxu0 %v14825_v26  ;;  %14826 = vst [vmem:[#allocation64_spill] sm:$0xff] %v11224_v42  ;;  %3714 = vmatprep.subr.mxu1 %v10237_v40  ;;  %v6334_v13 = vadd.s32 1, %v7683_v54  ;;  %v6332_v17 = vor.u32 8388608, %v6331_v14  ;;  %v11243_v40 = vsub.f32 %v11140_v55, %v11172_v36  ;;  %v14829_v54 = vld [vmem:[#allocation79_spill] sm:$0xff]  ;;  %v14833_v55 = vld [vmem:[#allocation50_spill] sm:$0xff] }
 0x1eb   :  { %3770 = vmatprep.subr.mxu0 %v14827_v43  ;;  %3716 = vmatpush1.msra.mxu1 %v10239_v11  ;;  %v7687_v12 = vadd.s32 4294967169, %v6432_v4  ;;  %v14830_v58 = vand.u32 2147483647, %v11181_v61  ;;  %v14831_v11 = vand.u32 4294901760, %v11176_v44  ;;  %v11257_v4 = vsub.f32 %v76_v31, %v11220_v9  ;;  %v14849_v15 = vld [vmem:[#allocation26_spill] sm:$0xff] }
 0x1ec   :  { %3772 = vmatpush1.msra.mxu0 %v14828_v62  ;;  %3718 = vmatprep.subr.mxu1 %v10284_v8  ;;  %vm6335_vm10 = vcmp.gt.s32.totalorder %v6334_v13, 0  ;;  %v11264_v61 = vsub.f32 %v11118_v37, %v14834_v33  ;;  %v11283_v33 = vsub.f32 %v77_v56, %v11224_v42  ;;  %v14838_v37 = vmov 2475754826   ;;  %v14842_v56 = vld [vmem:[#allocation18_spill] sm:$0xff]  ;;  %v14852_v42 = vld [vmem:[#allocation55_spill] sm:$0xff] }
 0x1ed   :  { %3774 = vmatprep.subr.mxu0 %v14829_v54  ;;  %v11249_v21 = vand.u32 8388607, %v14830_v58  ;;  %v11254_v14 = vsub.f32 %v11176_v44, %v14831_v11  ;;  %14832 = vst [vmem:[#allocation42_spill] sm:$0xff] %v11257_v4  ;;  %3720 = vmatpush1.msra.mxu1 %v10305_v20  ;;  %v6336_v8 = vsel %vm6335_vm10, %v6334_v13, 0  ;;  %v6438_v63 = vadd.s32 1, %v7687_v12  ;;  %v14835_v11 = vld [vmem:[#allocation86_spill] sm:$0xff] }
 0x1ee   :  { %3776 = vmatpush1.msra.mxu0 %v14833_v55  ;;  %3722 = vmatprep.subr.mxu1 %v10316_v29  ;;  %v11269_v44 = vshrl.u32 %v6336_v8, 5  ;;  %v6338_v31 = vand.u32 31, %v6336_v8  ;;  %v11275_v12 = vshll.u32 %v6332_v17, 8  ;;  %v11280_v29 = vsub.f32 %v11151_v60, %v11188_v10  ;;  %v14836_v8 = vld [vmem:[#allocation19_spill] sm:$0xff]  ;;  %v14844_v17 = vld [vmem:[#allocation53_spill] sm:$0xff] }
 0x1ef   :  { %3778 = vmatprep.subr.mxu0 %v14835_v11  ;;  %3724 = vmatpush1.msra.mxu1 %v10328_v32  ;;  %v14837_v58 = vmov 683565275   ;;  %v14839_v45 = vmov 2131351028   ;;  %v14840_v51 = vmov 2102212464  }
 0x1f0   :  { %3780 = vmatpush1.msra.mxu0 %v14836_v8  ;;  %v6339_v20 = vsub.s32 32, %v6338_v31  ;;  %v6341_v27 = vshll.u32 %v14837_v58, %v6338_v31  ;;  %v6344_v32 = vshll.u32 %v14838_v37, %v6338_v31  ;;  %3759 = vmatmul.mubr.f32.vlgmr.msra.gmra.mxu1 %v14821_v5  ;;  %v6347_v13 = vshll.u32 %v14839_v45, %v6338_v31  ;;  %v14848_v55 = vld [vmem:[#allocation45_spill] sm:$0xff] }
 0x1f1   :  { %v6350_v6 = vshll.u32 %v14840_v51, %v6338_v31  ;;  %v14841_v60 = vmov 920167782   ;;  %3782 = vmatprep.subr.mxu0 %v10796_v30  ;;  %v14843_v52 = vand.u32 4294901760, %v14842_v56  ;;  %vm6439_vm11 = vcmp.gt.s32.totalorder %v6438_v63, 0 }
 0x1f2   :  { %v6353_v19 = vshll.u32 %v14841_v60, %v6338_v31  ;;  %v6342_v7 = vshrl.u32 %v14838_v37, %v6339_v20  ;;  %v6345_v8 = vshrl.u32 %v14839_v45, %v6339_v20  ;;  %v6348_v50 = vshrl.u32 %v14840_v51, %v6339_v20  ;;  %3784 = vmatpush1.msra.mxu0 %v14844_v17  ;;  %v14851_v17 = vld [vmem:[#allocation65_spill] sm:$0xff] }
 0x1f3   :  { %3878 = vmatprep.subr.mxu1 %v14843_v52  ;;  %vm6356_vm12 = vcmp.lt.s32.totalorder %v11269_v44, 1  ;;  %v6340_v11 = vshrl.u32 %v14837_v58, %v6339_v20  ;;  %v6351_v31 = vshrl.u32 %v14841_v60, %v6339_v20  ;;  %v6354_v30 = vshrl.u32 %v14845_v57, %v6339_v20  ;;  %v14846_v52 = vld [vmem:[#allocation47_spill] sm:$0xff]  ;;  %3786 = vmatprep.subr.mxu0 %v14848_v55 }
 0x1f4   :  { %vm6358_vm13 = vcmp.lt.s32.totalorder %v11269_v44, 3  ;;  %v14847_v56 = vand.u32 4294901760, %v14846_v52  ;;  %v6343_v54 = vor.u32 %v6342_v7, %v6341_v27  ;;  %v6346_v62 = vor.u32 %v6345_v8, %v6344_v32  ;;  %3788 = vmatpush1.msra.mxu0 %v14851_v17  ;;  %v14854_v52 = vld [vmem:[#allocation20_spill] sm:$0xff]  ;;  %v14860_v8 = vld [vmem:[#allocation95_spill] sm:$0xff] }
 0x1f5   :  { %v6349_v43 = vor.u32 %v6348_v50, %v6347_v13  ;;  %v6440_v26 = vsel %vm6439_vm11, %v6438_v63, 0  ;;  %v14850_v5 = vand.u32 4294901760, %v14849_v15  ;;  %v6352_v34 = vor.u32 %v6351_v31, %v6350_v6  ;;  %3790 = vmatprep.subr.mxu0 %v14854_v52  ;;  %v14855_v6 = vld [vmem:[#allocation23_spill] sm:$0xff]  ;;  %v14858_v13 = vld [vmem:[#allocation21_spill] sm:$0xff] }
 0x1f6   :  { %3884 = vmatpush1.msra.mxu1 %v14847_v56  ;;  %v6355_v9 = vor.u32 %v6354_v30, %v6353_v19  ;;  %vm6359_vm14 = vcmp.lt.s32.totalorder %v11269_v44, 4  ;;  %v6442_v20 = vand.u32 31, %v6440_v26  ;;  %v14853_v23 = vand.u32 4294901760, %v14852_v42  ;;  %v14857_v19 = vld [vmem:[#allocation83_spill] sm:$0xff]  ;;  %v14861_v56 = vld [vmem:[#allocation48_spill] sm:$0xff] }
 0x1f7   :  { %3890 = vmatprep.subr.mxu1 %v14850_v5  ;;  %v6360_v7 = vsel %vm6356_vm12, %v6340_v11, %v6343_v54  ;;  %v6361_v50 = vsel %vm6359_vm14, %v6349_v43, 2102212464  ;;  %v6364_v27 = vsel %vm6356_vm12, %v6343_v54, %v6346_v62  ;;  %v6368_v15 = vsel %vm6356_vm12, %v6346_v62, %v6349_v43  ;;  %3792 = vmatpush1.msra.mxu0 %v14857_v19 }
 0x1f8   :  { %3896 = vmatpush1.msra.mxu1 %v14853_v23  ;;  %v14856_v30 = vand.u32 4294901760, %v14855_v6  ;;  %v6362_v42 = vsel %vm6358_vm13, %v6346_v62, %v6361_v50  ;;  %v6365_v5 = vsel %vm6359_vm14, %v6352_v34, 920167782  ;;  %v6369_v23 = vsel %vm6359_vm14, %v6355_v9, 1326507024  ;;  %3794 = vmatprep.subr.mxu0 %v14860_v8 }
 0x1f9   :  { %v6443_v63 = vsub.s32 32, %v6442_v20  ;;  %v14859_v11 = vand.u32 4294901760, %v14858_v13  ;;  %vm6357_vm15 = vcmp.lt.s32.totalorder %v11269_v44, 2  ;;  %v6366_v54 = vsel %vm6358_vm13, %v6349_v43, %v6365_v5  ;;  %v14863_v13 = vld [vmem:[#allocation92_spill] sm:$0xff]  ;;  %v14866_v5 = vld [vmem:[#allocation99_spill] sm:$0xff] }
 0x1fa   :  { %3902 = vmatprep.subr.mxu1 %v14856_v30  ;;  %v6370_v32 = vsel %vm6358_vm13, %v6352_v34, %v6369_v23  ;;  %v11334_v31 = vshrl.u32 %v6440_v26, 5  ;;  %v14862_v62 = vand.u32 4294901760, %v14861_v56  ;;  %v6363_v9 = vsel %vm6357_vm15, %v6360_v7, %v6362_v42  ;;  %3796 = vmatpush1.msra.mxu0 %v14863_v13  ;;  %v14864_v34 = vld [vmem:[#allocation94_spill] sm:$0xff]  ;;  %v14867_v23 = vld [vmem:[#allocation72_spill] sm:$0xff] }
 0x1fb   :  { %3908 = vmatpush1.msra.mxu1 %v14859_v11  ;;  %v6367_v50 = vsel %vm6357_vm15, %v6364_v27, %v6366_v54  ;;  %v6371_v6 = vsel %vm6357_vm15, %v6368_v15, %v6370_v32  ;;  %v6445_v30 = vshll.u32 %v14837_v58, %v6442_v20  ;;  %v14865_v26 = vand.u32 4294901760, %v14864_v34  ;;  %3798 = vmatprep.subr.mxu0 %v14866_v5 }
 0x1fc   :  { %3914 = vmatprep.subr.mxu1 %v14862_v62  ;;  %v11341_v11 = vmul.u32.u64.low %v11275_v12, %v6371_v6  ;;  %v11342_v8 = vmul.u32.u64.high %v11275_v12, %v6371_v6, %v11341_v11  ;;  %v11345_v43 = vmul.u32.u64.low %v11275_v12, %v6367_v50  ;;  %v11346_v44 = vmul.u32.u64.high %v11275_v12, %v6367_v50, %v11345_v43  ;;  %v14869_v6 = vld [vmem:[#allocation100_spill] sm:$0xff] }
 0x1fd   :  { %3920 = vmatpush1.msra.mxu1 %v14865_v26  ;;  %v6446_v7 = vshrl.u32 %v14838_v37, %v6443_v63  ;;  %v6448_v27 = vshll.u32 %v14838_v37, %v6442_v20  ;;  %v6449_v15 = vshrl.u32 %v14839_v45, %v6443_v63  ;;  %v6451_v42 = vshll.u32 %v14839_v45, %v6442_v20 }
 0x1fe   :  { %v14868_v54 = vand.u32 4294901760, %v14867_v23  ;;  %v6452_v32 = vshrl.u32 %v14840_v51, %v6443_v63  ;;  %v6454_v56 = vshll.u32 %v14840_v51, %v6442_v20  ;;  %v6455_v62 = vshrl.u32 %v14841_v60, %v6443_v63  ;;  %3800 = vmatpush1.msra.mxu0 %v14869_v6  ;;  %v14871_v23 = vld [vmem:[#allocation15_spill] sm:$0xff] }
 0x1ff   :  { %v6457_v50 = vshll.u32 %v14841_v60, %v6442_v20  ;;  %v6447_v11 = vor.u32 %v6446_v7, %v6445_v30  ;;  %v6450_v34 = vor.u32 %v6449_v15, %v6448_v27  ;;  %v6458_v26 = vshrl.u32 %v14845_v57, %v6443_v63  ;;  %3802 = vmatprep.subr.mxu0 %v10997_v18  ;;  %v14873_v7 = vld [vmem:[#allocation69_spill] sm:$0xff]  ;;  %v14875_v15 = vld [vmem:[#allocation36_spill] sm:$0xff] }
 0x200   :  { %3926 = vmatprep.subr.mxu1 %v14868_v54  ;;  %v14870_v37 = vor.u32 8388608, %v11249_v21  ;;  %v14872_v54 = vand.u32 4294901760, %v14871_v23  ;;  %v6379_v51 = vmul.u32 %v11275_v12, %v6363_v9  ;;  %vm6381_vm0 = vc.u32 %v11342_v8, %v11345_v43  ;;  %3804 = vmatpush1.msra.mxu0 %v14875_v15  ;;  %v261_v60 = vld [vmem:[#allocation5 + $0x608] sm:$0xff] }
 0x201   :  { %v6382_v20 = vadd.s32 1, %v11346_v44  ;;  %v6453_v30 = vor.u32 %v6452_v32, %v6451_v42  ;;  %v14874_v27 = vand.u32 4294901760, %v14873_v7  ;;  %v6456_v21 = vor.u32 %v6455_v62, %v6454_v56  ;;  %3806 = vmatprep.subr.mxu0 %v11037_v28  ;;  %v14878_v42 = vld [vmem:[#allocation49_spill] sm:$0xff]  ;;  %v14880_v32 = vld [vmem:[#allocation75_spill] sm:$0xff] }
 0x202   :  { %v11366_v45 = vshll.u32 %v14870_v37, 8  ;;  %3932 = vmatpush1.msra.mxu1 %v14872_v54  ;;  %v6444_v37 = vshrl.u32 %v14837_v58, %v6443_v63  ;;  %v6459_v23 = vor.u32 %v6458_v26, %v6457_v50  ;;  %vm6460_vm1 = vcmp.lt.s32.totalorder %v11334_v31, 1  ;;  %v14876_v54 = vld [vmem:[#allocation74_spill] sm:$0xff]  ;;  %3808 = vmatpush1.msra.mxu0 %v14880_v32 }
 0x203   :  { %3938 = vmatprep.subr.mxu1 %v14874_v27  ;;  %v14877_v57 = vand.u32 4294901760, %v14876_v54  ;;  %v6383_v12 = vsel %vm6381_vm0, %v6382_v20, %v11346_v44  ;;  %vm6462_vm2 = vcmp.lt.s32.totalorder %v11334_v31, 3  ;;  %vm6463_vm3 = vcmp.lt.s32.totalorder %v11334_v31, 4  ;;  %3810 = vmatprep.subr.mxu0 %v11084_v47 }
 0x204   :  { %v6468_v9 = vsel %vm6460_vm1, %v6447_v11, %v6450_v34  ;;  %v14879_v63 = vand.u32 4294901760, %v14878_v42  ;;  %v6384_v56 = vadd.s32 %v6383_v12, %v6379_v51  ;;  %v6465_v62 = vsel %vm6463_vm3, %v6453_v30, 2102212464  ;;  %3812 = vmatpush1.msra.mxu0 %v11065_v59 }
 0x205   :  { %3944 = vmatpush1.msra.mxu1 %v14877_v57  ;;  %v6469_v50 = vsel %vm6463_vm3, %v6456_v21, 920167782  ;;  %v6472_v57 = vsel %vm6460_vm1, %v6450_v34, %v6453_v30  ;;  %v14881_v44 = vand.u32 4294901760, %v11051_v16  ;;  %vm6461_vm4 = vcmp.lt.s32.totalorder %v11334_v31, 2  ;;  %3814 = vmatprep.subr.mxu0 %v11129_v0 }
 0x206   :  { %3950 = vmatprep.subr.mxu1 %v14879_v63  ;;  %v6464_v26 = vsel %vm6460_vm1, %v6444_v37, %v6447_v11  ;;  %v6470_v20 = vsel %vm6462_vm2, %v6453_v30, %v6469_v50  ;;  %v6473_v7 = vsel %vm6463_vm3, %v6459_v23, 1326507024  ;;  %v14882_v51 = vand.u32 4294901760, %v11073_v2  ;;  %3816 = vmatpush1.msra.mxu0 %v11120_v49 }
 0x207   :  { %3956 = vmatpush1.msra.mxu1 %v14881_v44  ;;  %v6385_v27 = vadd.s32 536870912, %v6384_v56  ;;  %v6466_v16 = vsel %vm6462_vm2, %v6450_v34, %v6465_v62  ;;  %v6471_v54 = vsel %vm6461_vm4, %v6468_v9, %v6470_v20  ;;  %v6474_v12 = vsel %vm6462_vm2, %v6456_v21, %v6473_v7  ;;  %3818 = vmatprep.subr.mxu0 %v11172_v36 }
 0x208   :  { %3962 = vmatprep.subr.mxu1 %v14882_v51  ;;  %v14883_v11 = vand.u32 4294901760, %v11078_v24  ;;  %v6475_v2 = vsel %vm6461_vm4, %v6472_v57, %v6474_v12  ;;  %v11416_v30 = vmul.u32.u64.low %v11366_v45, %v6471_v54  ;;  %v11417_v37 = vmul.u32.u64.high %v11366_v45, %v6471_v54, %v11416_v30  ;;  %3820 = vmatpush1.msra.mxu0 %v11142_v53 }
 0x209   :  { %v14884_v34 = vand.u32 4294901760, %v11096_v22  ;;  %v14885_v21 = vand.u32 4294901760, %v11229_v46  ;;  %v11426_v23 = vshrl.u32 %v6385_v27, 30  ;;  %v14886_v63 = vand.u32 4294901760, %v11138_v39  ;;  %3822 = vmatprep.subr.mxu0 %v11188_v10 }
 0x20a   :  { %3968 = vmatpush1.msra.mxu1 %v14883_v11  ;;  %v11429_v9 = vmul.u32.u64.low %v11366_v45, %v6475_v2  ;;  %v11430_v42 = vmul.u32.u64.high %v11366_v45, %v6475_v2, %v11429_v9  ;;  %v13933_v22 = vand.u32 4294901760, %v11280_v29  ;;  %v6467_v62 = vsel %vm6461_vm4, %v6464_v26, %v6466_v16  ;;  %3824 = vmatpush1.msra.mxu0 %v11203_v38  ;;  %v248_v38 = vld [vmem:[#allocation5 + $0x5a0] sm:$0xff] }
 0x20b   :  { %3974 = vmatprep.subr.mxu1 %v14884_v34  ;;  %v4020_v24 = vsub.f32 %v11229_v46, %v14885_v21  ;;  %v14887_v50 = vand.u32 4294901760, %v11196_v35  ;;  %v4009_v57 = vand.u32 4294901760, %v11254_v14  ;;  %v14888_v44 = vand.u32 4294901760, %v11158_v3  ;;  %v14893_v34 = vld [vmem:[#allocation67_spill] sm:$0xff]  ;;  %v14895_v9 = vld [vmem:[#allocation64_spill] sm:$0xff] }
 0x20c   :  { %3980 = vmatpush1.msra.mxu1 %v14886_v63  ;;  %v13932_v39 = vand.u32 4294901760, %v11236_v1  ;;  %v6387_v7 = vshll.u32 %v11426_v23, 30  ;;  %v14889_v51 = vand.u32 4294901760, %v11163_v41  ;;  %v4015_v35 = vand.u32 4294901760, %v11264_v61  ;;  %3826 = vmatprep.subr.mxu0 %v14895_v9  ;;  %v14931_v9 = vld [vmem:[#allocation97_spill] sm:$0xff] }
 0x20d   :  { %3986 = vmatprep.subr.mxu1 %v14887_v50  ;;  %v4026_v20 = vsub.f32 %v11158_v3, %v14888_v44  ;;  %v14890_v31 = vand.u32 4294901760, %v11243_v40  ;;  %v13931_v14 = vand.u32 4294901760, %v11283_v33  ;;  %v6486_v27 = vadd.s32 1, %v11417_v37  ;;  %v14896_v50 = vld [vmem:[#allocation40_spill] sm:$0xff] }
 0x20e   :  { %3992 = vmatpush1.msra.mxu1 %v14889_v51  ;;  %v14891_v16 = vand.u32 4294901760, %v11201_v25  ;;  %v4021_v54 = vand.u32 4294901760, %v4020_v24  ;;  %v14892_v41 = vand.u32 4294901760, %v11185_v48  ;;  %v13930_v61 = vand.u32 4294901760, %v11257_v4  ;;  %3828 = vmatpush1.msra.mxu0 %v14896_v50  ;;  %v14941_v50 = vld [vmem:[#allocation59_spill] sm:$0xff] }
 0x20f   :  { %v4032_v26 = vsub.f32 %v11243_v40, %v14890_v31  ;;  %v11463_v11 = vsub.s32 %v6384_v56, %v6387_v7  ;;  %v6483_v2 = vmul.u32 %v11366_v45, %v6467_v62  ;;  %vm6485_vm5 = vc.u32 %v11430_v42, %v11416_v30 }
 0x210   :  { %3998 = vmatprep.subr.mxu1 %v14891_v16  ;;  %v4038_v12 = vsub.f32 %v11185_v48, %v14892_v41  ;;  %v14894_v21 = vand.u32 4294901760, %v14893_v34  ;;  %v4044_v25 = vsub.f32 %v11280_v29, %v13933_v22  ;;  %v6487_v24 = vsel %vm6485_vm5, %v6486_v27, %v11417_v37  ;;  %v14898_v27 = vld [vmem:[#allocation46_spill] sm:$0xff]  ;;  %v14912_v22 = vld [vmem:[#allocation93_spill] sm:$0xff] }
 0x211   :  { %v4027_v63 = vand.u32 4294901760, %v4026_v20  ;;  %v4050_v45 = vsub.f32 %v11236_v1, %v13932_v39  ;;  %v6390_v56 = vsub.s32 0, %v11463_v11  ;;  %v6488_v62 = vadd.s32 %v6487_v24, %v6483_v2  ;;  %4107 = vmatprep.subr.mxu0 %v14898_v27  ;;  %v14899_v16 = vld [vmem:[#allocation38_spill] sm:$0xff] }
 0x212   :  { %4004 = vmatpush1.msra.mxu1 %v14894_v21  ;;  %v4033_v44 = vand.u32 4294901760, %v4032_v26  ;;  %v4056_v7 = vsub.f32 %v11283_v33, %v13931_v14  ;;  %v14897_v37 = vmov 0.0   ;;  %v4062_v20 = vsub.f32 %v11257_v4, %v13930_v61  ;;  %v14900_v26 = vld [vmem:[#allocation43_spill] sm:$0xff]  ;;  %v14903_v61 = vld [vmem:[#allocation88_spill] sm:$0xff]  ;;  %v14910_v39 = vld [vmem:[#allocation66_spill] sm:$0xff] }
 0x213   :  { %4010 = vmatprep.subr.mxu1 %v4009_v57  ;;  %3861 = vmatprep.mubr.f32.mxu0 %v14897_v37  ;;  %v4039_v57 = vand.u32 4294901760, %v4038_v12  ;;  %v7684_v51 = vmin.u32 %v6390_v56, %v11463_v11  ;;  %v6489_v31 = vadd.s32 536870912, %v6488_v62  ;;  %v4051_v41 = vand.u32 4294901760, %v4050_v45  ;;  %v14902_v21 = vld [vmem:[#allocation51_spill] sm:$0xff]  ;;  %v14905_v45 = vld [vmem:[#allocation54_spill] sm:$0xff] }
 0x214   :  { %4016 = vmatpush1.msra.mxu1 %v4015_v35  ;;  %3867 = vmatmul.mubr.f32.vlgmr.msra.gmra.mxu0 %v14899_v16  ;;  %v4045_v35 = vand.u32 4294901760, %v4044_v25  ;;  %v4057_v12 = vand.u32 4294901760, %v4056_v7  ;;  %v4063_v24 = vand.u32 4294901760, %v4062_v20  ;;  %v14913_v16 = vld [vmem:[#allocation27_spill] sm:$0xff] }
 0x215   :  { %4022 = vmatprep.subr.mxu1 %v4021_v54  ;;  %4110 = vmatpush1.msra.mxu0 %v14900_v26  ;;  %v6392_v2 = vclz %v7684_v51  ;;  %v14901_v54 = vld [vmem:[#allocation77_spill] sm:$0xff]  ;;  %v11492_v34 = vshrl.u32 %v6489_v31, 30  ;;  %v14906_v31 = vld [vmem:[#allocation58_spill] sm:$0xff] }
 0x216   :  { %4028 = vmatpush1.msra.mxu1 %v4027_v63  ;;  %4113 = vmatprep.subr.mxu0 %v14901_v54  ;;  %v14904_v63 = vld [vmem:[#allocation84_spill] sm:$0xff] }
 0x217   :  { %4034 = vmatprep.subr.mxu1 %v4033_v44  ;;  %4116 = vmatpush1.msra.mxu0 %v14902_v21  ;;  %v7685_v56 = vadd.s32 4294967294, %v6392_v2  ;;  %v6491_v25 = vshll.u32 %v11492_v34, 30  ;;  %v14908_v2 = vld [vmem:[#allocation91_spill] sm:$0xff] }
 0x218   :  { %4040 = vmatpush1.msra.mxu1 %v4039_v57  ;;  %4119 = vmatprep.subr.mxu0 %v14903_v61  ;;  %v6380_v57 = vadd.s32 %v11345_v43, %v11342_v8  ;;  %v14911_v8 = vld [vmem:[#allocation31_spill] sm:$0xff] }
 0x219   :  { %4046 = vmatprep.subr.mxu1 %v4045_v35  ;;  %4122 = vmatpush1.msra.mxu0 %v14904_v63  ;;  %vm7686_vm6 = vcmp.lt.s32.totalorder %v7685_v56, 0  ;;  %v11499_v7 = vsub.s32 %v6488_v62, %v6491_v25  ;;  %v14907_v35 = vld [vmem:[#allocation33_spill] sm:$0xff]  ;;  %v14932_v63 = vld [vmem:[#allocation19_spill] sm:$0xff] }
 0x21a   :  { %4052 = vmatpush1.msra.mxu1 %v4051_v41  ;;  %4125 = vmatprep.subr.mxu0 %v14905_v45  ;;  %v6395_v44 = vsel %vm7686_vm6, 0, %v7685_v56  ;;  %v274_v62 = vld [vmem:[#allocation5 + $0x670] sm:$0xff]  ;;  %v273_v56 = vld [vmem:[#allocation5 + $0x668] sm:$0xff] }
 0x21b   :  { %4058 = vmatprep.subr.mxu1 %v4057_v12  ;;  %4097 = vmatprep.mubr.f32.mxu1 %v14897_v37  ;;  %v6396_v20 = vsub.s32 32, %v6395_v44  ;;  %v6400_v51 = vsub.s32 4294967266, %v6395_v44  ;;  %v6494_v41 = vsub.s32 0, %v11499_v7  ;;  %v14909_v12 = vld [vmem:[#allocation30_spill] sm:$0xff] }
 0x21c   :  { %4064 = vmatpush1.msra.mxu1 %v4063_v24  ;;  %4128 = vmatpush1.msra.mxu0 %v14906_v31  ;;  %v6397_v24 = vshll.u32 %v11463_v11, %v6395_v44  ;;  %v11517_v11 = vand.u32 4294901760, %v274_v62  ;;  %v11519_v44 = vand.u32 4294901760, %v273_v56 }
 0x21d   :  { %4099 = vmatmul.mubr.f32.vlgmr.msra.gmra.mxu1 %v14907_v35  ;;  %4131 = vmatprep.subr.mxu0 %v14908_v2  ;;  %v6398_v25 = vshrl.u32 %v6380_v57, %v6396_v20  ;;  %v6401_v14 = vadd.s32 127, %v6400_v51  ;;  %v7688_v43 = vmin.u32 %v6494_v41, %v11499_v7  ;;  %v14915_v2 = vld [vmem:[#allocation41_spill] sm:$0xff]  ;;  %v14918_v20 = vld [vmem:[#allocation16_spill] sm:$0xff] }
 0x21e   :  { %4243 = vmatprep.subr.mxu1 %v14909_v12  ;;  %4134 = vmatpush1.msra.mxu0 %v14910_v39  ;;  %v14914_v12 = vld [vmem:[#allocation22_spill] sm:$0xff]  ;;  %14916 = vst [vmem:[#allocation70_spill] sm:$0xff] %v11517_v11  ;;  %14917 = vst [vmem:[#allocation28_spill] sm:$0xff] %v11519_v44  ;;  %v11522_v51 = vsub.s32 4, %v14918_v20  ;;  %v11525_v41 = vsub.s32 5, %v14918_v20  ;;  %v14927_v39 = vld [vmem:[#allocation39_spill] sm:$0xff] }
 0x21f   :  { %4245 = vmatpush1.msra.mxu1 %v14911_v8  ;;  %4137 = vmatprep.subr.mxu0 %v14912_v22  ;;  %v6399_v58 = vor.u32 %v6398_v25, %v6397_v24  ;;  %v6402_v35 = vshll.u32 %v6401_v14, 23  ;;  %v6496_v57 = vclz %v7688_v43  ;;  %v14921_v22 = vld [vmem:[#allocation98_spill] sm:$0xff]  ;;  %v14923_v24 = vld [vmem:[#allocation96_spill] sm:$0xff]  ;;  %v11546_v8 = vsub.f32 %v273_v56, %v11519_v44  ;;  %v14936_v56 = vld [vmem:[#allocation57_spill] sm:$0xff] }
 0x220   :  { %4247 = vmatprep.subr.mxu1 %v14913_v16  ;;  %4140 = vmatpush1.msra.mxu0 %v14914_v12  ;;  %14919 = vst [vmem:[#allocation68_spill] sm:$0xff] %v11522_v51  ;;  %14920 = vst [vmem:[#allocation44_spill] sm:$0xff] %v11525_v41  ;;  %v14922_v16 = vld [vmem:[#allocation79_spill] sm:$0xff]  ;;  %v14924_v25 = vld [vmem:[#allocation50_spill] sm:$0xff] }
 0x221   :  { %4249 = vmatpush1.msra.mxu1 %v14915_v2  ;;  %4143 = vmatprep.subr.mxu0 %v14921_v22  ;;  %v6403_v14 = vor.u32 4788187, %v6402_v35  ;;  %v11531_v2 = vand.u32 4294901760, %v261_v60  ;;  %v11533_v12 = vld [vmem:[#allocation8] sm:$0xff]  ;;  %v7689_v31 = vadd.s32 4294967294, %v6496_v57  ;;  %v14930_v35 = vld [vmem:[#allocation86_spill] sm:$0xff]  ;;  %v6406_v45 = vcvt.s32.f32 %v6399_v58 }
 0x222   :  { %4251 = vmatprep.subr.mxu1 %v14922_v16  ;;  %4146 = vmatpush1.msra.mxu0 %v14923_v24  ;;  %v14926_v43 = vld [vmem:[#allocation32_spill] sm:$0xff]  ;;  %v260_v24 = vld [vmem:[#allocation5 + $0x600] sm:$0xff]  ;;  %14933 = vst [vmem:[#allocation78_spill] sm:$0xff] %v11546_v8  ;;  %v11549_v57 = vsub.f32 %v274_v62, %v11517_v11  ;;  %v14938_v11 = vld [vmem:[#allocation53_spill] sm:$0xff]  ;;  %v6484_v58 = vadd.s32 %v11416_v30, %v11430_v42  ;;  %v6410_v42 = vsub.s32 4, %v11426_v23 }
 0x223   :  { %4253 = vmatpush1.msra.mxu1 %v14924_v25  ;;  %14925 = vst [vmem:[#allocation76_spill] sm:$0xff] %v11531_v2  ;;  %v14929_v16 = vld [vmem:[#allocation24_spill] sm:$0xff]  ;;  %v6404_v25 = vand.u32 2147483647, %v6403_v14  ;;  %vm7690_vm7 = vcmp.lt.s32.totalorder %v7689_v31, 0  ;;  %v11553_v20 = vld [vmem:[#allocation7] sm:$0xff]  ;;  %v11566_v22 = vsub.f32 %v261_v60, %v11531_v2  ;;  %4233 = vmatprep.mubr.f32.mxu0 %v14897_v37 }
 0x224   :  { %4149 = vmatprep.subr.mxu0 %v14929_v16  ;;  %4255 = vmatprep.subr.mxu1 %v14930_v35  ;;  %14934 = vst [vmem:[#allocation29_spill] sm:$0xff] %v11549_v57  ;;  %v14937_v62 = vld [vmem:[#allocation71_spill] sm:$0xff]  ;;  %v11563_v35 = vand.u32 4294901760, %v260_v24  ;;  %v14949_v60 = vld [vmem:[#allocation37_spill] sm:$0xff] }
 0x225   :  { %4152 = vmatpush1.msra.mxu0 %v14931_v9  ;;  %4257 = vmatpush1.msra.mxu1 %v14932_v63  ;;  %v14935_v63 = vld [vmem:[#allocation25_spill] sm:$0xff]  ;;  %v6407_v44 = vmul.f32 %v6406_v45, %v6404_v25  ;;  %v6499_v9 = vsel %vm7690_vm7, 0, %v7689_v31  ;;  %14940 = vst [vmem:[#allocation87_spill] sm:$0xff] %v11566_v22  ;;  %v11572_v45 = vand.u32 4294901760, %v248_v38 }
 0x226   :  { %4155 = vmatprep.subr.mxu0 %v14935_v63  ;;  %4259 = vmatprep.subr.mxu1 %v14936_v56  ;;  %14939 = vst [vmem:[#allocation82_spill] sm:$0xff] %v11563_v35  ;;  %v6500_v16 = vsub.s32 32, %v6499_v9  ;;  %v6504_v14 = vsub.s32 4294967266, %v6499_v9  ;;  %v247_v31 = vld [vmem:[#allocation5 + $0x598] sm:$0xff]  ;;  %v6501_v2 = vshll.u32 %v11499_v7, %v6499_v9  ;;  %v14945_v56 = vld [vmem:[#allocation80_spill] sm:$0xff] }
 0x227   :  { %4158 = vmatpush1.msra.mxu0 %v14937_v62  ;;  %4261 = vmatpush1.msra.mxu1 %v14938_v11  ;;  %14942 = vst [vmem:[#allocation18_spill] sm:$0xff] %v11572_v45  ;;  %v14943_v25 = vld [vmem:[#allocation89_spill] sm:$0xff]  ;;  %v6408_v11 = vxor.u32 2147483648, %v6407_v44  ;;  %v11593_v9 = vand.u32 4294901760, %v247_v31 }
 0x228   :  { %4161 = vmatprep.subr.mxu0 %v14941_v50  ;;  %4263 = vmatprep.subr.mxu1 %v14848_v55  ;;  %vm6326_vm8 = vcmp.lt.s32.totalorder %v14943_v25, 0  ;;  %v14944_v62 = vld [vmem:[#allocation73_spill] sm:$0xff]  ;;  %v6502_v50 = vshrl.u32 %v6484_v58, %v6500_v16  ;;  %v6505_v55 = vadd.s32 127, %v6504_v14  ;;  %v14946_v41 = vand.u32 2147483647, %v14943_v25  ;;  %v14951_v14 = vld [vmem:[#allocation63_spill] sm:$0xff] }
 0x229   :  { %4164 = vmatpush1.msra.mxu0 %v14944_v62  ;;  %4265 = vmatpush1.msra.mxu1 %v14851_v17  ;;  %v234_v63 = vld [vmem:[#allocation5 + $0x530] sm:$0xff]  ;;  %v6409_v30 = vsel %vm6326_vm8, %v6408_v11, %v6407_v44  ;;  %14950 = vst [vmem:[#allocation47_spill] sm:$0xff] %v11593_v9  ;;  %v11602_v11 = vsub.f32 %v260_v24, %v11563_v35  ;;  %v235_v44 = vld [vmem:[#allocation5 + $0x538] sm:$0xff]  ;;  %vm6416_vm15 = vweird.f32 %v14943_v25 }
 0x22a   :  { %4167 = vmatprep.subr.mxu0 %v14945_v56  ;;  %4267 = vmatprep.subr.mxu1 %v14854_v52  ;;  %vm11585_vm9 = vcmp.le.f32.partialorder %v14946_v41, 0.7853982  ;;  %v6503_v58 = vor.u32 %v6502_v50, %v6501_v2  ;;  %v6506_v41 = vshll.u32 %v6505_v55, 23  ;;  %v14952_v52 = vld [vmem:[#allocation95_spill] sm:$0xff]  ;;  %v11606_v16 = vand.u32 4294901760, %v234_v63  ;;  %v11608_v56 = vld [vmem:[#allocation5 + $0x4d0] sm:$0xff] }
 0x22b   :  { %4170 = vmatpush1.msra.mxu0 %v14949_v60  ;;  %4269 = vmatpush1.msra.mxu1 %v14857_v19  ;;  %v6412_v7 = vsel %vm11585_vm9, %v14943_v25, %v6409_v30  ;;  %14953 = vst [vmem:[#allocation26_spill] sm:$0xff] %v11602_v11  ;;  %v221_v60 = vld [vmem:[#allocation5 + $0x4c8] sm:$0xff]  ;;  %v14954_v19 = vld [vmem:[#allocation61_spill] sm:$0xff]  ;;  %v14956_v55 = vand.u32 4294901760, %v11549_v57  ;;  %v14958_v2 = vand.u32 4294901760, %v11546_v8  ;;  %v6411_v30 = vsel %vm6326_vm8, %v6410_v42, %v11426_v23 }
 0x22c   :  { %4173 = vmatprep.subr.mxu0 %v14951_v14  ;;  %4271 = vmatprep.subr.mxu1 %v14952_v52  ;;  %8114 = vcosq.f32 %v6412_v7  ;;  %14955 = vst [vmem:[#allocation65_spill] sm:$0xff] %v11606_v16  ;;  %v6507_v35 = vor.u32 4788187, %v6506_v41  ;;  %v11637_v23 = vld [vmem:[#allocation5 + $0x468] sm:$0xff]  ;;  %v14964_v42 = vand.u32 4294901760, %v11566_v22 }
 0x22d   :  { %4176 = vmatpush1.msra.mxu0 %v14954_v19  ;;  %4273 = vmatpush1.msra.mxu1 %v14863_v13  ;;  %v11613_v50 = vsub.f32 %v11549_v57, %v14956_v55  ;;  %v11618_v24 = vsub.f32 %v11546_v8, %v14958_v2  ;;  %8116 = vsinq.f32 %v6412_v7  ;;  %v11626_v13 = vsub.f32 %v248_v38, %v11572_v45  ;;  %v208_v38 = vld [vmem:[#allocation5 + $0x460] sm:$0xff] }
 0x22e   :  { %4179 = vmatprep.subr.mxu0 %v11229_v46  ;;  %4275 = vmatprep.subr.mxu1 %v14866_v5  ;;  %v11631_v55 = vsub.f32 %v247_v31, %v11593_v9  ;;  %v11633_v2 = vand.u32 4294901760, %v235_v44  ;;  %v11635_v8 = vand.u32 4294901760, %v221_v60  ;;  %v11642_v7 = vsub.f32 %v11566_v22, %v14964_v42  ;;  %v11659_v22 = vld [vmem:[#allocation5 + $0x400] sm:$0xff] }
 0x22f   :  { %14957 = vst [vmem:[#allocation55_spill] sm:$0xff] %v11613_v50  ;;  %14959 = vst [vmem:[#allocation23_spill] sm:$0xff] %v11618_v24  ;;  %4182 = vmatpush1.msra.mxu0 %v11158_v3  ;;  %4277 = vmatpush1.msra.mxu1 %v14869_v6  ;;  %v6508_v41 = vand.u32 2147483647, %v6507_v35  ;;  %v6510_v57 = vcvt.s32.f32 %v6503_v58  ;;  %v11647_v31 = vand.u32 4294901760, %v11608_v56  ;;  %v6413_v45 = vsel %vm11585_vm9, 0, %v6411_v30 }
 0x230   :  { %14960 = vst [vmem:[#allocation21_spill] sm:$0xff] %v11626_v13  ;;  %14961 = vst [vmem:[#allocation48_spill] sm:$0xff] %v11631_v55  ;;  %4185 = vmatprep.subr.mxu0 %v11243_v40  ;;  %4279 = vmatprep.subr.mxu1 %v10997_v18  ;;  %v11655_v42 = vsub.f32 %v234_v63, %v11606_v16  ;;  %v11664_v62 = vand.u32 4294901760, %v11637_v23  ;;  %v11666_v30 = vand.u32 4294901760, %v208_v38  ;;  %v195_v63 = vld [vmem:[#allocation5 + $0x3f8] sm:$0xff]  ;;  %v6417_v24 = vadd.s32 3, %v6413_v45 }
 0x231   :  { %14962 = vst [vmem:[#allocation94_spill] sm:$0xff] %v11633_v2  ;;  %14963 = vst [vmem:[#allocation99_spill] sm:$0xff] %v11635_v8  ;;  %4188 = vmatpush1.msra.mxu0 %v11185_v48  ;;  %4281 = vmatpush1.msra.mxu1 %v14875_v15  ;;  %v6511_v18 = vmul.f32 %v6510_v57, %v6508_v41  ;;  %v11672_v58 = vsub.f32 %v221_v60, %v11635_v8  ;;  %v14972_v9 = vand.u32 4294901760, %v11602_v11  ;;  %v182_v57 = vld [vmem:[#allocation5 + $0x390] sm:$0xff] }
 0x232   :  { %14965 = vst [vmem:[#allocation72_spill] sm:$0xff] %v11642_v7  ;;  %14966 = vst [vmem:[#allocation100_spill] sm:$0xff] %v11647_v31  ;;  %4191 = vmatprep.subr.mxu0 %v11280_v29  ;;  %4283 = vmatprep.subr.mxu1 %v11037_v28  ;;  %v11677_v35 = vsub.f32 %v235_v44, %v11633_v2  ;;  %v11687_v60 = vand.u32 4294901760, %v11659_v22  ;;  %v14975_v7 = vld [vmem:[#allocation81_spill] sm:$0xff]  ;;  %v6514_v44 = vsub.s32 4, %v11492_v34  ;;  %v11693_v45 = vand.u32 4294901760, %v195_v63 }
 0x233   :  { %14967 = vst [vmem:[#allocation15_spill] sm:$0xff] %v11655_v42  ;;  %14968 = vst [vmem:[#allocation69_spill] sm:$0xff] %v11664_v62  ;;  %4194 = vmatpush1.msra.mxu0 %v11236_v1  ;;  %4285 = vmatpush1.msra.mxu1 %v14880_v32  ;;  %v6512_v50 = vxor.u32 2147483648, %v6511_v18  ;;  %v11684_v16 = vsub.f32 %v11602_v11, %v14972_v9  ;;  %vm6430_vm10 = vcmp.lt.s32.totalorder %v14975_v7, 0  ;;  %v14977_v8 = vand.u32 2147483647, %v14975_v7 }
 0x234   :  { %14969 = vst [vmem:[#allocation36_spill] sm:$0xff] %v11666_v30  ;;  %14970 = vst [vmem:[#allocation74_spill] sm:$0xff] %v11672_v58  ;;  %4197 = vmatprep.subr.mxu0 %v11283_v33  ;;  %4287 = vmatprep.subr.mxu1 %v11084_v47  ;;  %v14980_v2 = vld [vmem:[#allocation34_spill] sm:$0xff]  ;;  %v14982_v47 = vand.u32 4294901760, %v11626_v13  ;;  %vm6520_vm0 = vweird.f32 %v14975_v7 }
 0x235   :  { %14971 = vst [vmem:[#allocation49_spill] sm:$0xff] %v11677_v35  ;;  %14973 = vst [vmem:[#allocation75_spill] sm:$0xff] %v11684_v16  ;;  %4200 = vmatpush1.msra.mxu0 %v11257_v4  ;;  %vm11698_vm11 = vcmp.le.f32.partialorder %v14977_v8, 0.7853982  ;;  %v6513_v11 = vsel %vm6430_vm10, %v6512_v50, %v6511_v18  ;;  %4289 = vmatpush1.msra.mxu1 %v11065_v59  ;;  %v11707_v4 = vsub.f32 %v208_v38, %v11666_v30  ;;  %v11725_v38 = vld [vmem:[#allocation5 + $0x398] sm:$0xff] }
 0x236   :  { %14974 = vst [vmem:[#allocation67_spill] sm:$0xff] %v11687_v60  ;;  %14976 = vst [vmem:[#allocation46_spill] sm:$0xff] %v11693_v45  ;;  %4236 = vmatmul.mubr.f32.vlgmr.msra.gmra.mxu0 %v14980_v2  ;;  %v11712_v41 = vsub.f32 %v11626_v13, %v14982_v47  ;;  %v6516_v8 = vsel %vm11698_vm11, %v14975_v7, %v6513_v11  ;;  %4291 = vmatprep.subr.mxu1 %v11129_v0  ;;  %v14984_v18 = vand.u32 4294901760, %v14898_v27  ;;  %v15001_v16 = vld [vmem:[#allocation90_spill] sm:$0xff] }
 0x237   :  { %14981 = vst [vmem:[#allocation43_spill] sm:$0xff] %v11707_v4  ;;  %v14985_v50 = vand.u32 4294901760, %v11631_v55  ;;  %v11728_v47 = vand.u32 4294901760, %v182_v57  ;;  %v6418_v13 = vand.u32 3, %v6417_v24  ;;  %8118 = vcosq.f32 %v6516_v8  ;;  %4293 = vmatpush1.msra.mxu1 %v11120_v49  ;;  %4338 = vmatprep.mubr.f32.mxu1 %v14897_v37 }
 0x238   :  { %14983 = vst [vmem:[#allocation77_spill] sm:$0xff] %v11712_v41  ;;  %4351 = vmatprep.subr.mxu0 %v14984_v18  ;;  %v14988_v11 = vand.u32 4294901760, %v14900_v26  ;;  %v11736_v18 = vsub.f32 %v11608_v56, %v11647_v31  ;;  %8120 = vsinq.f32 %v6516_v8  ;;  %4295 = vmatprep.subr.mxu1 %v11172_v36  ;;  %v14990_v24 = vand.u32 4294901760, %v14901_v54  ;;  %v11759_v54 = vld [vmem:[#allocation5 + $0x330] sm:$0xff]  ;;  %v2158_v41 = vpop.f32.mrf.mxu0  ;;  %v2390_v31 = vpop.f32.mrf.mxu1 }
 0x239   :  { %v11723_v2 = vsub.f32 %v11631_v55, %v14985_v50  ;;  %14987 = vst [vmem:[#allocation88_spill] sm:$0xff] %v11728_v47  ;;  %v6515_v50 = vsel %vm6430_vm10, %v6514_v44, %v11492_v34  ;;  %v11745_v30 = vsub.f32 %v195_v63, %v11693_v45  ;;  %v14992_v26 = vand.u32 4294901760, %v11655_v42  ;;  %v8115_v56 = vpop.eup %8114  ;;  %4297 = vmatpush1.msra.mxu1 %v11142_v53  ;;  %v169_v55 = vld [vmem:[#allocation5 + $0x328] sm:$0xff] }
 0x23a   :  { %4355 = vmatpush1.msra.mxu0 %v14988_v11  ;;  %14989 = vst [vmem:[#allocation89_spill] sm:$0xff] %v11736_v18  ;;  %v14994_v27 = vand.u32 4294901760, %v14902_v21  ;;  %v11757_v44 = vand.u32 4294901760, %v11725_v38  ;;  %v11764_v8 = vsub.f32 %v11637_v23, %v11664_v62  ;;  %4299 = vmatprep.subr.mxu1 %v11188_v10  ;;  %v14997_v21 = vand.u32 4294901760, %v14903_v61  ;;  %v15002_v61 = vld [vmem:[#allocation84_spill] sm:$0xff] }
 0x23b   :  { %14986 = vst [vmem:[#allocation51_spill] sm:$0xff] %v11723_v2  ;;  %4359 = vmatprep.subr.mxu0 %v14990_v24  ;;  %14991 = vst [vmem:[#allocation63_spill] sm:$0xff] %v11745_v30  ;;  %v11750_v11 = vsub.f32 %v11655_v42, %v14992_v26  ;;  %v8117_v24 = vpop.eup %8116  ;;  %v6424_v26 = vxor.u32 2147483648, %v8115_v56  ;;  %v14998_v34 = vand.u32 4294901760, %v11677_v35  ;;  %v11776_v63 = vsub.f32 %v182_v57, %v11728_v47  ;;  %v15005_v57 = vld [vmem:[#allocation54_spill] sm:$0xff]  ;;  %v15007_v62 = vld [vmem:[#allocation40_spill] sm:$0xff] }
 0x23c   :  { %4363 = vmatpush1.msra.mxu0 %v14994_v27  ;;  %14995 = vst [vmem:[#allocation61_spill] sm:$0xff] %v11757_v44  ;;  %14996 = vst [vmem:[#allocation81_spill] sm:$0xff] %v11764_v8  ;;  %v6421_v23 = vxor.u32 2147483648, %v8117_v24  ;;  %vm6423_vm12 = vcmp.eq.s32.totalorder %v6418_v13, 2  ;;  %v6517_v45 = vsel %vm11698_vm11, 0, %v6515_v50  ;;  %4301 = vmatpush1.msra.mxu1 %v15001_v16  ;;  %vm6420_vm13 = vcmp.eq.s32.totalorder %v6418_v13, 0 }
 0x23d   :  { %14993 = vst [vmem:[#allocation95_spill] sm:$0xff] %v11750_v11  ;;  %4367 = vmatprep.subr.mxu0 %v14997_v21  ;;  %v11773_v42 = vsub.f32 %v11677_v35, %v14998_v34  ;;  %15000 = vst [vmem:[#allocation102_spill] sm:$0xff] %v11776_v63  ;;  %v15003_v21 = vand.u32 4294901760, %v15002_v61  ;;  %v6425_v34 = vsel %vm6423_vm12, %v6424_v26, %v8117_v24  ;;  %v15004_v35 = vld [vmem:[#allocation64_spill] sm:$0xff]  ;;  %v15006_v47 = vand.u32 4294901760, %v15005_v57  ;;  %v156_v26 = vld [vmem:[#allocation5 + $0x2c0] sm:$0xff]  ;;  %v2160_v11 = vpop.f32.mrf.mxu0 }
 0x23e   :  { %4303 = vmatprep.subr.mxu1 %v15004_v35  ;;  %v11789_v9 = vand.u32 4294901760, %v11759_v54  ;;  %vm6419_vm14 = vcmp.lt.s32.totalorder %v6418_v13, 2  ;;  %v6422_v50 = vsel %vm6420_vm13, %v8115_v56, %v6421_v23  ;;  %v11793_v61 = vand.u32 4294901760, %v169_v55  ;;  %v15009_v57 = vld [vmem:[#allocation58_spill] sm:$0xff]  ;;  %v15011_v27 = vld [vmem:[#allocation35_spill] sm:$0xff]  ;;  %v2392_v35 = vpop.f32.mrf.mxu1  ;;  %4508 = vmatprep.mubr.f32.mxu0 %v14897_v37 }
 0x23f   :  { %14999 = vst [vmem:[#allocation101_spill] sm:$0xff] %v11773_v42  ;;  %4371 = vmatpush1.msra.mxu0 %v15003_v21  ;;  %4305 = vmatpush1.msra.mxu1 %v15007_v62  ;;  %v6426_v21 = vsel %vm6419_vm14, %v6422_v50, %v6425_v34  ;;  %v15010_v2 = vand.u32 4294901760, %v15009_v57  ;;  %v11802_v13 = vsub.f32 %v11659_v22, %v11687_v60  ;;  %v15014_v62 = vld [vmem:[#allocation91_spill] sm:$0xff]  ;;  %v15017_v50 = vand.u32 4294901760, %v11736_v18 }
 0x240   :  { %4375 = vmatprep.subr.mxu0 %v15006_v47  ;;  %15008 = vst [vmem:[#allocation84_spill] sm:$0xff] %v11793_v61  ;;  %v6521_v47 = vadd.s32 3, %v6517_v45  ;;  %4342 = vmatmul.mubr.f32.vlgmr.msra.gmra.mxu1 %v15011_v27  ;;  %v6427_v56 = vsel %vm6416_vm15, nan, %v6426_v21  ;;  %v15013_v23 = vrot.slane %v11533_v12, %v14926_v43  ;;  %v15015_v34 = vand.u32 4294901760, %v15014_v62  ;;  %v15016_v45 = vld [vmem:[#allocation30_spill] sm:$0xff]  ;;  %v15053_v16 = vld [vmem:[#allocation19_spill] sm:$0xff] }
 0x241   :  { %4379 = vmatpush1.msra.mxu0 %v15010_v2  ;;  %15012 = vst [vmem:[#allocation54_spill] sm:$0xff] %v11802_v13  ;;  %4517 = vmatprep.subr.mxu1 %v15016_v45  ;;  %v11815_v22 = vsub.f32 %v11736_v18, %v15017_v50  ;;  %v15019_v21 = vrot.slane %v14927_v39, %v14926_v43  ;;  %v15020_v27 = vld [vmem:[#allocation66_spill] sm:$0xff]  ;;  %v15023_v62 = vand.u32 4294901760, %v11672_v58  ;;  %v11828_v45 = vld [vmem:[#allocation5 + $0x2c8] sm:$0xff]  ;;  %v11830_v2 = vand.u32 4294901760, %v156_v26 }
 0x242   :  { %v7539_v24 = vmul.f32 %v15013_v23, %v14943_v25  ;;  %4383 = vmatprep.subr.mxu0 %v15015_v34  ;;  %v15021_v25 = vand.u32 4294901760, %v15020_v27  ;;  %v15022_v23 = vld [vmem:[#allocation31_spill] sm:$0xff]  ;;  %v143_v18 = vld [vmem:[#allocation5 + $0x258] sm:$0xff]  ;;  %v15026_v27 = vrot.slane %v11553_v20, %v11522_v51  ;;  %v15031_v43 = vand.u32 4294901760, %v11764_v8  ;;  %v15032_v51 = vld [vmem:[#allocation44_spill] sm:$0xff]  ;;  %4612 = vmatprep.mubr.f32.mxu1 %v14897_v37 }
 0x243   :  { %15018 = vst [vmem:[#allocation58_spill] sm:$0xff] %v11815_v22  ;;  %v7621_v57 = vmul.f32 %v15019_v21, %v6427_v56  ;;  %4519 = vmatpush1.msra.mxu1 %v15022_v23  ;;  %v11826_v34 = vsub.f32 %v11672_v58, %v15023_v62  ;;  %15025 = vst [vmem:[#allocation30_spill] sm:$0xff] %v11830_v2  ;;  %v15027_v21 = vld [vmem:[#allocation93_spill] sm:$0xff]  ;;  %v15029_v23 = vld [vmem:[#allocation27_spill] sm:$0xff]  ;;  %v11841_v62 = vsub.f32 %v169_v55, %v11793_v61 }
 0x244   :  { %4387 = vmatpush1.msra.mxu0 %v15021_v25  ;;  %v2159_v56 = vadd.f32 %v2158_v41, %v15026_v27  ;;  %v15028_v25 = vand.u32 4294901760, %v15027_v21  ;;  %4521 = vmatprep.subr.mxu1 %v15029_v23  ;;  %v11846_v58 = vsub.f32 %v11764_v8, %v15031_v43  ;;  %v11848_v50 = vld [vmem:[#allocation5 + $0x260] sm:$0xff]  ;;  %v6522_v60 = vand.u32 3, %v6521_v47  ;;  %v15036_v23 = vld [vmem:[#allocation41_spill] sm:$0xff]  ;;  %v15037_v61 = vld [vmem:[#allocation52_spill] sm:$0xff] }
 0x245   :  { %15024 = vst [vmem:[#allocation91_spill] sm:$0xff] %v11826_v34  ;;  %15030 = vst [vmem:[#allocation66_spill] sm:$0xff] %v11841_v62  ;;  %v7634_v42 = vadd.f32 %v7621_v57, %v7539_v24  ;;  %v15033_v41 = vrot.slane %v11553_v20, %v15032_v51  ;;  %v15034_v21 = vld [vmem:[#allocation22_spill] sm:$0xff]  ;;  %4523 = vmatpush1.msra.mxu1 %v15036_v23  ;;  %v15038_v43 = vrot.slane %v11533_v12, %v15037_v61  ;;  %v2527_v24 = vpop.f32.mrf.mxu0  ;;  %v15041_v20 = vld [vmem:[#allocation79_spill] sm:$0xff] }
 0x246   :  { %4391 = vmatprep.subr.mxu0 %v15028_v25  ;;  %v15035_v25 = vand.u32 4294901760, %v15034_v21  ;;  %v15039_v47 = vld [vmem:[#allocation98_spill] sm:$0xff]  ;;  %4525 = vmatprep.subr.mxu1 %v15041_v20  ;;  %v11870_v21 = vand.u32 4294901760, %v143_v18  ;;  %v15043_v23 = vld [vmem:[#allocation96_spill] sm:$0xff]  ;;  %v2391_v22 = vadd.f32 %v2390_v31, %v2159_v56  ;;  %vm6527_vm1 = vcmp.eq.s32.totalorder %v6522_v60, 2 }
 0x247   :  { %v2161_v27 = vadd.f32 %v2160_v11, %v15033_v41  ;;  %v11861_v8 = vmul.f32 %v15038_v43, %v14975_v7  ;;  %v15040_v57 = vand.u32 4294901760, %v15039_v47  ;;  %v11868_v41 = vand.u32 4294901760, %v11828_v45  ;;  %7647 = vst [vmem:[#allocation10 + $0x10] sm:$0xff] %v7634_v42  ;;  %v15045_v43 = vld [vmem:[#allocation50_spill] sm:$0xff]  ;;  %v15072_v7 = vld [vmem:[#allocation80_spill] sm:$0xff] }
 0x248   :  { %4395 = vmatpush1.msra.mxu0 %v15035_v25  ;;  %15042 = vst [vmem:[#allocation31_spill] sm:$0xff] %v11870_v21  ;;  %v8119_v25 = vpop.eup %8118  ;;  %v15044_v12 = vand.u32 4294901760, %v15043_v23  ;;  %4527 = vmatpush1.msra.mxu1 %v15045_v43  ;;  %v11877_v47 = vsub.f32 %v156_v26, %v11830_v2  ;;  %v11885_v11 = vand.u32 4294901760, %v11848_v50  ;;  %v15048_v23 = vld [vmem:[#allocation24_spill] sm:$0xff]  ;;  %v15050_v43 = vld [vmem:[#allocation86_spill] sm:$0xff]  ;;  %v15054_v10 = vand.u32 4294901760, %v11802_v13 }
 0x249   :  { %4399 = vmatprep.subr.mxu0 %v15040_v57  ;;  %v15047_v57 = vand.u32 4294901760, %v11707_v4  ;;  %v8121_v51 = vpop.eup %8120  ;;  %v6528_v42 = vxor.u32 2147483648, %v8119_v25  ;;  %4529 = vmatprep.subr.mxu1 %v15050_v43  ;;  %v2393_v34 = vadd.f32 %v2392_v35, %v2161_v27  ;;  %vm6524_vm2 = vcmp.eq.s32.totalorder %v6522_v60, 0  ;;  %v15055_v43 = vld [vmem:[#allocation25_spill] sm:$0xff]  ;;  %v15129_v37 = vld [vmem:[#allocation100_spill] sm:$0xff] }
 0x24a   :  { %4403 = vmatpush1.msra.mxu0 %v15044_v12  ;;  %15046 = vst [vmem:[#allocation93_spill] sm:$0xff] %v11877_v47  ;;  %v15049_v12 = vand.u32 4294901760, %v15048_v23  ;;  %v6525_v2 = vxor.u32 2147483648, %v8121_v51  ;;  %4531 = vmatpush1.msra.mxu1 %v15053_v16  ;;  %v11898_v31 = vsub.f32 %v11802_v13, %v15054_v10  ;;  %v2529_v23 = vpop.f32.mrf.mxu0  ;;  %v15056_v55 = vand.u32 4294901760, %v15055_v43  ;;  %v15057_v26 = vld [vmem:[#allocation57_spill] sm:$0xff]  ;;  %v15064_v13 = vld [vmem:[#allocation59_spill] sm:$0xff] }
 0x24b   :  { %v11882_v20 = vsub.f32 %v11707_v4, %v15047_v57  ;;  %v15051_v57 = vld [vmem:[#allocation97_spill] sm:$0xff]  ;;  %v6529_v56 = vsel %vm6527_vm1, %v6528_v42, %v8121_v51  ;;  %4533 = vmatprep.subr.mxu1 %v15057_v26  ;;  %v11904_v35 = vsub.f32 %v143_v18, %v11870_v21  ;;  %v11910_v16 = vsub.f32 %v11725_v38, %v11757_v44  ;;  %v15060_v51 = vld [vmem:[#allocation71_spill] sm:$0xff] }
 0x24c   :  { %4407 = vmatprep.subr.mxu0 %v15049_v12  ;;  %v15052_v4 = vand.u32 4294901760, %v15051_v57  ;;  %v2633_v12 = vpop.f32.mrf.mxu1  ;;  %v130_v10 = vld [vmem:[#allocation5 + $0x1f0] sm:$0xff]  ;;  %vm6523_vm3 = vcmp.lt.s32.totalorder %v6522_v60, 2  ;;  %v6526_v27 = vsel %vm6524_vm2, %v8119_v25, %v6525_v2  ;;  %v15061_v42 = vand.u32 4294901760, %v15060_v51  ;;  %v2801_v60 = vpop.f32.mrf.mxu0 }
 0x24d   :  { %15058 = vst [vmem:[#allocation27_spill] sm:$0xff] %v11904_v35  ;;  %15059 = vst [vmem:[#allocation22_spill] sm:$0xff] %v11910_v16  ;;  %v15062_v57 = vld [vmem:[#allocation53_spill] sm:$0xff]  ;;  %v11918_v18 = vsub.f32 %v11759_v54, %v11789_v9  ;;  %v6530_v26 = vsel %vm6523_vm3, %v6526_v27, %v6529_v56  ;;  %v2528_v43 = vadd.f32 %v2527_v24, %v2391_v22  ;;  %v15065_v21 = vand.u32 4294901760, %v15064_v13 }
 0x24e   :  { %4411 = vmatpush1.msra.mxu0 %v15052_v4  ;;  %v11906_v4 = vld [vmem:[#allocation5 + $0x1f8] sm:$0xff]  ;;  %4535 = vmatpush1.msra.mxu1 %v15062_v57  ;;  %v15067_v25 = vand.u32 4294901760, %v11745_v30  ;;  %v6531_v54 = vsel %vm6520_vm0, nan, %v6530_v26  ;;  %v11938_v24 = vand.u32 4294901760, %v130_v10  ;;  %v15073_v26 = vand.u32 4294901760, %v15072_v7 }
 0x24f   :  { %4415 = vmatprep.subr.mxu0 %v15056_v55  ;;  %15063 = vst [vmem:[#allocation41_spill] sm:$0xff] %v11918_v18  ;;  %v15066_v38 = vld [vmem:[#allocation45_spill] sm:$0xff]  ;;  %v11936_v22 = vand.u32 4294901760, %v11906_v4  ;;  %v11951_v13 = vsub.f32 %v11828_v45, %v11868_v41  ;;  %v2530_v2 = vadd.f32 %v2529_v23, %v2393_v34  ;;  %v15081_v45 = vand.u32 4294901760, %v14951_v14 }
 0x250   :  { %4419 = vmatpush1.msra.mxu0 %v15061_v42  ;;  %4537 = vmatprep.subr.mxu1 %v15066_v38  ;;  %v11927_v51 = vsub.f32 %v11745_v30, %v15067_v25  ;;  %v117_v42 = vld [vmem:[#allocation5 + $0x188] sm:$0xff]  ;;  %v15068_v57 = vld [vmem:[#allocation73_spill] sm:$0xff]  ;;  %15070 = vst [vmem:[#allocation98_spill] sm:$0xff] %v11938_v24  ;;  %v2634_v38 = vadd.f32 %v2633_v12, %v2528_v43  ;;  %v2635_v25 = vpop.f32.mrf.mxu1  ;;  %v15079_v12 = vand.u32 4294901760, %v11776_v63  ;;  %v14027_v23 = vand.u32 4294901760, %v11841_v62 }
 0x251   :  { %4423 = vmatprep.subr.mxu0 %v15065_v21  ;;  %v15069_v56 = vand.u32 4294901760, %v15068_v57  ;;  %4539 = vmatpush1.msra.mxu1 %v14851_v17  ;;  %v15071_v21 = vrot.slane %v14927_v39, %v15037_v61  ;;  %v15074_v57 = vld [vmem:[#allocation20_spill] sm:$0xff]  ;;  %v14031_v17 = vand.u32 4294901760, %v11910_v16  ;;  %15075 = vst [vmem:[#allocation79_spill] sm:$0xff] %v11951_v13  ;;  %v15076_v55 = vld [vmem:[#allocation37_spill] sm:$0xff]  ;;  %v11962_v7 = vand.u32 4294901760, %v117_v42 }
 0x252   :  { %4541 = vmatprep.subr.mxu1 %v15074_v57  ;;  %v15077_v30 = vand.u32 4294901760, %v15076_v55  ;;  %v11959_v43 = vsub.f32 %v11776_v63, %v15079_v12  ;;  %v2802_v34 = vadd.f32 %v2801_v60, %v2634_v38  ;;  %v11971_v55 = vsub.f32 %v11848_v50, %v11885_v11  ;;  %v15084_v12 = vld [vmem:[#allocation92_spill] sm:$0xff] }
 0x253   :  { %4427 = vmatpush1.msra.mxu0 %v15069_v56  ;;  %v7622_v27 = vmul.f32 %v15071_v21, %v6531_v54  ;;  %v11947_v56 = vld [vmem:[#allocation5 + $0x190] sm:$0xff]  ;;  %v15078_v54 = vld [vmem:[#allocation83_spill] sm:$0xff]  ;;  %v14030_v21 = vand.u32 4294901760, %v11918_v18  ;;  %15080 = vst [vmem:[#allocation96_spill] sm:$0xff] %v11962_v7  ;;  %v2636_v57 = vadd.f32 %v2635_v25, %v2530_v2  ;;  %v15086_v60 = vand.u32 4294901760, %v11229_v46 }
 0x254   :  { %4431 = vmatprep.subr.mxu0 %v15073_v26  ;;  %4543 = vmatpush1.msra.mxu1 %v15078_v54  ;;  %15082 = vst [vmem:[#allocation50_spill] sm:$0xff] %v11971_v55  ;;  %v15083_v54 = vand.u32 4294901760, %v14954_v19  ;;  %v11989_v19 = vsub.f32 %v11910_v16, %v14031_v17  ;;  %v11992_v2 = vsub.f32 %v130_v10, %v11938_v24  ;;  %v11994_v38 = vld [vmem:[#allocation5 + $0x128] sm:$0xff]  ;;  %v14029_v25 = vand.u32 4294901760, %v11951_v13  ;;  %v15100_v17 = vld [vmem:[#allocation85_spill] sm:$0xff] }
 0x255   :  { %4435 = vmatpush1.msra.mxu0 %v15077_v30  ;;  %v7635_v26 = vadd.f32 %v7622_v27, %v11861_v8  ;;  %4545 = vmatprep.subr.mxu1 %v14952_v52  ;;  %v2803_v30 = vpop.f32.mrf.mxu0  ;;  %v2905_v8 = vpop.f32.mrf.mxu1  ;;  %v11978_v27 = vand.u32 4294901760, %v11947_v56  ;;  %v14028_v52 = vand.u32 4294901760, %v11877_v47  ;;  %v15088_v46 = vand.u32 4294901760, %v11158_v3  ;;  %v15125_v16 = vld [vmem:[#allocation40_spill] sm:$0xff] }
 0x256   :  { %4439 = vmatprep.subr.mxu0 %v15081_v45  ;;  %4547 = vmatpush1.msra.mxu1 %v15084_v12  ;;  %v11984_v50 = vadd.f32 %v2905_v8, %v2802_v34  ;;  %v12007_v10 = vsub.f32 %v117_v42, %v11962_v7  ;;  %v15089_v12 = vand.u32 4294901760, %v11243_v40  ;;  %v15090_v8 = vld [vmem:[#allocation17_spill] sm:$0xff]  ;;  %v15091_v42 = vand.u32 4294901760, %v11185_v48  ;;  %v15102_v34 = vld [vmem:[#allocation42_spill] sm:$0xff] }
 0x257   :  { %4443 = vmatpush1.msra.mxu0 %v15083_v54  ;;  %15085 = vst [vmem:[#allocation24_spill] sm:$0xff] %v11978_v27  ;;  %7648 = vst [vmem:[#allocation10 + $0x18] sm:$0xff] %v7635_v26  ;;  %4549 = vmatprep.subr.mxu1 %v14866_v5  ;;  %v104_v26 = vld [vmem:[#allocation5 + $0x120] sm:$0xff]  ;;  %v2804_v5 = vadd.f32 %v2803_v30, %v2636_v57  ;;  %v2907_v45 = vpop.f32.mrf.mxu1  ;;  %v12004_v54 = vsub.f32 %v11918_v18, %v14030_v21  ;;  %v14033_v57 = vand.u32 4294901760, %v11971_v55 }
 0x258   :  { %4447 = vmatprep.subr.mxu0 %v15086_v60  ;;  %15087 = vst [vmem:[#allocation86_spill] sm:$0xff] %v11984_v50  ;;  %4551 = vmatpush1.msra.mxu1 %v14869_v6  ;;  %v14032_v3 = vand.u32 2147483647, %v11984_v50  ;;  %v6535_v6 = vand.u32 2139095040, %v11984_v50  ;;  %v12017_v30 = vsub.f32 %v11841_v62, %v14027_v23  ;;  %v91_v60 = vld [vmem:[#allocation5 + $0xb8] sm:$0xff]  ;;  %v15095_v23 = vand.u32 4294901760, %v11280_v29 }
 0x259   :  { %4451 = vmatpush1.msra.mxu0 %v15088_v46  ;;  %4553 = vmatprep.subr.mxu1 %v15090_v8  ;;  %v12023_v40 = vadd.f32 %v2907_v45, %v2804_v5  ;;  %v12026_v46 = vand.u32 4294901760, %v11994_v38  ;;  %v12033_v8 = vsub.f32 %v11877_v47, %v14028_v52  ;;  %v12042_v5 = vsub.f32 %v11951_v13, %v14029_v25  ;;  %v92_v45 = vld [vmem:[#allocation5 + $0xc0] sm:$0xff]  ;;  %v78_v25 = vld [vmem:[#allocation5 + $0x50] sm:$0xff]  ;;  %v79_v29 = vld [vmem:[#allocation5 + $0x58] sm:$0xff] }
 0x25a   :  { %4455 = vmatprep.subr.mxu0 %v15089_v12  ;;  %4555 = vmatpush1.msra.mxu1 %v14875_v15  ;;  %v12028_v12 = vand.u32 4294901760, %v104_v26  ;;  %v6536_v48 = vshrl.u32 %v6535_v6, 23  ;;  %v15097_v52 = vand.u32 4294901760, %v11236_v1  ;;  %v14035_v6 = vand.u32 4294901760, %v11904_v35 }
 0x25b   :  { %4459 = vmatpush1.msra.mxu0 %v15091_v42  ;;  %15092 = vst [vmem:[#allocation97_spill] sm:$0xff] %v12023_v40  ;;  %15093 = vst [vmem:[#allocation19_spill] sm:$0xff] %v12026_v46  ;;  %4557 = vmatprep.subr.mxu1 %v11037_v28  ;;  %v12046_v42 = vsub.f32 %v11906_v4, %v11936_v22  ;;  %v6639_v28 = vand.u32 2139095040, %v12023_v40  ;;  %v15099_v21 = vand.u32 4294901760, %v11283_v33  ;;  %v6539_v1 = vand.u32 8388607, %v14032_v3 }
 0x25c   :  { %15094 = vst [vmem:[#allocation25_spill] sm:$0xff] %v12028_v12  ;;  %4463 = vmatprep.subr.mxu0 %v15095_v23  ;;  %4559 = vmatpush1.msra.mxu1 %v14880_v32  ;;  %v12053_v23 = vand.u32 4294901760, %v91_v60  ;;  %v7691_v4 = vadd.s32 4294967169, %v6536_v48  ;;  %v15103_v15 = vand.u32 4294901760, %v15102_v34  ;;  %v12074_v48 = vand.u32 4294901760, %v92_v45  ;;  %v15105_v3 = vld [vmem:[#allocation33_spill] sm:$0xff] }
 0x25d   :  { %15096 = vst [vmem:[#allocation57_spill] sm:$0xff] %v12046_v42  ;;  %4467 = vmatpush1.msra.mxu0 %v15097_v52  ;;  %4561 = vmatprep.subr.mxu1 %v15100_v17  ;;  %v12065_v52 = vsub.f32 %v11971_v55, %v14033_v57  ;;  %v6640_v33 = vshrl.u32 %v6639_v28, 23  ;;  %v12071_v17 = vsub.f32 %v104_v26, %v12028_v12  ;;  %v15107_v28 = vld [vmem:[#allocation70_spill] sm:$0xff]  ;;  %v15109_v32 = vld [vmem:[#allocation28_spill] sm:$0xff]  ;;  %v6540_v14 = vor.u32 8388608, %v6539_v1 }
 0x25e   :  { %15098 = vst [vmem:[#allocation71_spill] sm:$0xff] %v12053_v23  ;;  %4471 = vmatprep.subr.mxu0 %v15099_v21  ;;  %15104 = vst [vmem:[#allocation59_spill] sm:$0xff] %v12074_v48  ;;  %4563 = vmatpush1.msra.mxu1 %v11065_v59  ;;  %v6542_v57 = vadd.s32 1, %v7691_v4  ;;  %v12085_v21 = vsub.f32 %v91_v60, %v12053_v23  ;;  %v12090_v59 = vsub.f32 %v11904_v35, %v14035_v6  ;;  %v15110_v60 = vld [vmem:[#allocation76_spill] sm:$0xff]  ;;  %v15115_v6 = vld [vmem:[#allocation18_spill] sm:$0xff] }
 0x25f   :  { %15101 = vst [vmem:[#allocation53_spill] sm:$0xff] %v12065_v52  ;;  %4475 = vmatpush1.msra.mxu0 %v15103_v15  ;;  %v12080_v15 = vand.u32 4294901760, %v78_v25  ;;  %4565 = vmatprep.subr.mxu1 %v11129_v0  ;;  %v7695_v26 = vadd.s32 4294967169, %v6640_v33  ;;  %v12092_v4 = vand.u32 4294901760, %v79_v29  ;;  %v12103_v39 = vsub.f32 %v11947_v56, %v11978_v27 }
 0x260   :  { %4510 = vmatmul.mubr.f32.vlgmr.msra.gmra.mxu0 %v15105_v3  ;;  %4621 = vmatprep.subr.mxu0 %v15107_v28  ;;  %vm6543_vm4 = vcmp.gt.s32.totalorder %v6542_v57, 0  ;;  %v15112_v33 = vand.u32 4294901760, %v12046_v42  ;;  %v12133_v47 = vshll.u32 %v6540_v14, 8  ;;  %v15119_v56 = vand.u32 2147483647, %v12023_v40 }
 0x261   :  { %15106 = vst [vmem:[#allocation45_spill] sm:$0xff] %v12080_v15  ;;  %15108 = vst [vmem:[#allocation73_spill] sm:$0xff] %v12092_v4  ;;  %4567 = vmatpush1.msra.mxu1 %v11120_v49  ;;  %4623 = vmatpush1.msra.mxu0 %v15109_v32  ;;  %v6544_v34 = vsel %vm6543_vm4, %v6542_v57, 0  ;;  %v6646_v61 = vadd.s32 1, %v7695_v26  ;;  %v15111_v49 = vld [vmem:[#allocation82_spill] sm:$0xff]  ;;  %v12115_v57 = vsub.f32 %v78_v25, %v12080_v15  ;;  %v15117_v25 = vld [vmem:[#allocation47_spill] sm:$0xff] }
 0x262   :  { %4569 = vmatprep.subr.mxu1 %v11172_v36  ;;  %4625 = vmatprep.subr.mxu0 %v15110_v60  ;;  %v12107_v1 = vshrl.u32 %v6544_v34, 5  ;;  %v6546_v0 = vand.u32 31, %v6544_v34  ;;  %v12112_v36 = vsub.f32 %v12046_v42, %v15112_v33  ;;  %v15114_v26 = vld [vmem:[#allocation62_spill] sm:$0xff]  ;;  %v12125_v34 = vsub.f32 %v92_v45, %v12074_v48  ;;  %v15133_v48 = vld [vmem:[#allocation23_spill] sm:$0xff] }
 0x263   :  { %4571 = vmatpush1.msra.mxu1 %v11142_v53  ;;  %4627 = vmatpush1.msra.mxu0 %v15111_v49  ;;  %15113 = vst [vmem:[#allocation80_spill] sm:$0xff] %v12115_v57  ;;  %v12122_v53 = vsub.f32 %v11994_v38, %v12026_v46  ;;  %v12128_v35 = vsub.f32 %v79_v29, %v12092_v4  ;;  %v15116_v33 = vld [vmem:[#allocation90_spill] sm:$0xff]  ;;  %v12137_v13 = vand.u32 8388607, %v15119_v56  ;;  %v15120_v38 = vld [vmem:[#allocation64_spill] sm:$0xff]  ;;  %vm6647_vm5 = vcmp.gt.s32.totalorder %v6646_v61, 0 }
 0x264   :  { %4573 = vmatprep.subr.mxu1 %v15114_v26  ;;  %4629 = vmatprep.subr.mxu0 %v15115_v6  ;;  %v6547_v42 = vsub.s32 32, %v6546_v0  ;;  %v15118_v26 = vmov 683565275   ;;  %v15121_v45 = vld [vmem:[#allocation94_spill] sm:$0xff]  ;;  %v15122_v62 = vmov 2475754826  }
 0x265   :  { %4575 = vmatpush1.msra.mxu1 %v15116_v33  ;;  %4631 = vmatpush1.msra.mxu0 %v15117_v25  ;;  %v6549_v55 = vshll.u32 %v15118_v26, %v6546_v0  ;;  %v6552_v29 = vshll.u32 %v15122_v62, %v6546_v0  ;;  %v15123_v50 = vmov 2131351028   ;;  %v15124_v33 = vmov 2102212464   ;;  %v15132_v57 = vld [vmem:[#allocation99_spill] sm:$0xff] }
 0x266   :  { %4577 = vmatprep.subr.mxu1 %v15120_v38  ;;  %4633 = vmatprep.subr.mxu0 %v15121_v45  ;;  %v6555_v18 = vshll.u32 %v15123_v50, %v6546_v0  ;;  %v6558_v63 = vshll.u32 %v15124_v33, %v6546_v0  ;;  %v6550_v14 = vshrl.u32 %v15122_v62, %v6547_v42  ;;  %v15126_v40 = vmov 920167782   ;;  %v15127_v38 = vld [vmem:[#allocation65_spill] sm:$0xff] }
 0x267   :  { %4579 = vmatpush1.msra.mxu1 %v15125_v16  ;;  %v6553_v56 = vshrl.u32 %v15123_v50, %v6547_v42  ;;  %v6561_v25 = vshll.u32 %v15126_v40, %v6546_v0  ;;  %vm6564_vm6 = vcmp.lt.s32.totalorder %v12107_v1, 1  ;;  %4635 = vmatpush1.msra.mxu0 %v15127_v38  ;;  %v6556_v45 = vshrl.u32 %v15124_v33, %v6547_v42  ;;  %v15130_v0 = vld [vmem:[#allocation55_spill] sm:$0xff] }
 0x268   :  { %v6559_v6 = vshrl.u32 %v15126_v40, %v6547_v42  ;;  %v15128_v49 = vmov 1326507024   ;;  %vm6565_vm7 = vcmp.lt.s32.totalorder %v12107_v1, 2  ;;  %4614 = vmatmul.mubr.f32.vlgmr.msra.gmra.mxu1 %v15105_v3  ;;  %v6548_v16 = vshrl.u32 %v15118_v26, %v6547_v42  ;;  %4637 = vmatprep.subr.mxu0 %v15129_v37 }
 0x269   :  { %v6562_v60 = vshrl.u32 %v15128_v49, %v6547_v42  ;;  %v6551_v32 = vor.u32 %v6550_v14, %v6549_v55  ;;  %v6554_v28 = vor.u32 %v6553_v56, %v6552_v29  ;;  %v15131_v15 = vand.u32 4294901760, %v15130_v0  ;;  %4639 = vmatpush1.msra.mxu0 %v15132_v57  ;;  %v15141_v0 = vld [vmem:[#allocation67_spill] sm:$0xff] }
 0x26a   :  { %v6648_v38 = vsel %vm6647_vm5, %v6646_v61, 0  ;;  %v6557_v4 = vor.u32 %v6556_v45, %v6555_v18  ;;  %v6560_v23 = vor.u32 %v6559_v6, %v6558_v63  ;;  %vm6566_vm8 = vcmp.lt.s32.totalorder %v12107_v1, 3  ;;  %v15135_v61 = vld [vmem:[#allocation69_spill] sm:$0xff]  ;;  %v15136_v63 = vld [vmem:[#allocation72_spill] sm:$0xff]  ;;  %v15139_v45 = vld [vmem:[#allocation75_spill] sm:$0xff] }
 0x26b   :  { %4733 = vmatprep.subr.mxu1 %v15131_v15  ;;  %v6563_v52 = vor.u32 %v6562_v60, %v6561_v25  ;;  %v15134_v3 = vand.u32 4294901760, %v15133_v48  ;;  %vm6567_vm9 = vcmp.lt.s32.totalorder %v12107_v1, 4  ;;  %v6568_v55 = vsel %vm6564_vm6, %v6548_v16, %v6551_v32  ;;  %4641 = vmatprep.subr.mxu0 %v15135_v61  ;;  %v15138_v25 = vld [vmem:[#allocation36_spill] sm:$0xff] }
 0x26c   :  { %v6572_v42 = vsel %vm6564_vm6, %v6551_v32, %v6554_v28  ;;  %v6650_v15 = vand.u32 31, %v6648_v38  ;;  %v15137_v18 = vand.u32 4294901760, %v15136_v63  ;;  %v6569_v6 = vsel %vm6567_vm9, %v6557_v4, 2102212464  ;;  %4643 = vmatpush1.msra.mxu0 %v15138_v25  ;;  %v15142_v63 = vld [vmem:[#allocation77_spill] sm:$0xff] }
 0x26d   :  { %4739 = vmatpush1.msra.mxu1 %v15134_v3  ;;  %v6573_v60 = vsel %vm6567_vm9, %v6560_v23, 920167782  ;;  %v6576_v48 = vsel %vm6564_vm6, %v6554_v28, %v6557_v4  ;;  %v6577_v3 = vsel %vm6567_vm9, %v6563_v52, 1326507024  ;;  %v15140_v29 = vand.u32 4294901760, %v15139_v45  ;;  %4645 = vmatprep.subr.mxu0 %v15141_v0 }
 0x26e   :  { %4745 = vmatprep.subr.mxu1 %v15137_v18  ;;  %v6570_v32 = vsel %vm6566_vm8, %v6554_v28, %v6569_v6  ;;  %v6574_v14 = vsel %vm6566_vm8, %v6557_v4, %v6573_v60  ;;  %v6578_v56 = vsel %vm6566_vm8, %v6560_v23, %v6577_v3  ;;  %v6651_v16 = vsub.s32 32, %v6650_v15  ;;  %v15144_v4 = vld [vmem:[#allocation46_spill] sm:$0xff] }
 0x26f   :  { %4751 = vmatpush1.msra.mxu1 %v15140_v29  ;;  %v15143_v18 = vand.u32 4294901760, %v15142_v63  ;;  %v6575_v52 = vsel %vm6565_vm7, %v6572_v42, %v6574_v14  ;;  %v6579_v45 = vsel %vm6565_vm7, %v6576_v48, %v6578_v56  ;;  %v6644_v28 = vor.u32 8388608, %v12137_v13  ;;  %4647 = vmatpush1.msra.mxu0 %v15144_v4  ;;  %v15145_v63 = vld [vmem:[#allocation51_spill] sm:$0xff]  ;;  %v15147_v56 = vld [vmem:[#allocation101_spill] sm:$0xff] }
 0x270   :  { %v12192_v6 = vshrl.u32 %v6648_v38, 5  ;;  %v12196_v23 = vmul.u32.u64.low %v12133_v47, %v6579_v45  ;;  %v12197_v60 = vmul.u32.u64.high %v12133_v47, %v6579_v45, %v12196_v23  ;;  %v15146_v42 = vand.u32 4294901760, %v15145_v63  ;;  %4649 = vmatprep.subr.mxu0 %v11757_v44  ;;  %v15150_v44 = vld [vmem:[#allocation95_spill] sm:$0xff] }
 0x271   :  { %4757 = vmatprep.subr.mxu1 %v15143_v18  ;;  %v12200_v3 = vmul.u32.u64.low %v12133_v47, %v6575_v52  ;;  %v12201_v29 = vmul.u32.u64.high %v12133_v47, %v6575_v52, %v12200_v3  ;;  %v6571_v13 = vsel %vm6565_vm7, %v6568_v55, %v6570_v32  ;;  %v6653_v38 = vshll.u32 %v15118_v26, %v6650_v15 }
 0x272   :  { %4763 = vmatpush1.msra.mxu1 %v15146_v42  ;;  %v6654_v48 = vshrl.u32 %v15122_v62, %v6651_v16  ;;  %v6656_v14 = vshll.u32 %v15122_v62, %v6650_v15  ;;  %v15148_v18 = vand.u32 4294901760, %v15147_v56  ;;  %v6657_v52 = vshrl.u32 %v15123_v50, %v6651_v16  ;;  %v15149_v42 = vld [vmem:[#allocation88_spill] sm:$0xff] }
 0x273   :  { %v6659_v45 = vshll.u32 %v15123_v50, %v6650_v15  ;;  %v6660_v23 = vshrl.u32 %v15124_v33, %v6651_v16  ;;  %v6662_v63 = vshll.u32 %v15124_v33, %v6650_v15  ;;  %4651 = vmatpush1.msra.mxu0 %v15149_v42  ;;  %v6663_v55 = vshrl.u32 %v15126_v40, %v6651_v16 }
 0x274   :  { %4769 = vmatprep.subr.mxu1 %v15148_v18  ;;  %v6655_v1 = vor.u32 %v6654_v48, %v6653_v38  ;;  %v6665_v32 = vshll.u32 %v15126_v40, %v6650_v15  ;;  %v6666_v62 = vshrl.u32 %v15128_v49, %v6651_v16  ;;  %v15151_v56 = vand.u32 4294901760, %v15150_v44  ;;  %4653 = vmatprep.subr.mxu0 %v11789_v9  ;;  %v15152_v38 = vld [vmem:[#allocation58_spill] sm:$0xff]  ;;  %v15154_v49 = vld [vmem:[#allocation84_spill] sm:$0xff]  ;;  %v15155_v44 = vld [vmem:[#allocation91_spill] sm:$0xff] }
 0x275   :  { %v6587_v18 = vmul.u32 %v12133_v47, %v6571_v13  ;;  %vm6589_vm10 = vc.u32 %v12197_v60, %v12200_v3  ;;  %v6590_v50 = vadd.s32 1, %v12201_v29  ;;  %v6658_v33 = vor.u32 %v6657_v52, %v6656_v14  ;;  %4655 = vmatpush1.msra.mxu0 %v15154_v49 }
 0x276   :  { %4775 = vmatpush1.msra.mxu1 %v15151_v56  ;;  %v15153_v48 = vand.u32 4294901760, %v15152_v38  ;;  %v6661_v42 = vor.u32 %v6660_v23, %v6659_v45  ;;  %v6664_v15 = vor.u32 %v6663_v55, %v6662_v63  ;;  %v6667_v40 = vor.u32 %v6666_v62, %v6665_v32  ;;  %4657 = vmatprep.subr.mxu0 %v11868_v41 }
 0x277   :  { %v15156_v56 = vand.u32 4294901760, %v15155_v44  ;;  %v14084_v47 = vand.u32 4294901760, %v12103_v39  ;;  %v6591_v13 = vsel %vm6589_vm10, %v6590_v50, %v12201_v29  ;;  %v6652_v4 = vshrl.u32 %v15118_v26, %v6651_v16  ;;  %v15158_v50 = vld [vmem:[#allocation30_spill] sm:$0xff]  ;;  %v15199_v26 = vld [vmem:[#allocation63_spill] sm:$0xff] }
 0x278   :  { %4781 = vmatprep.subr.mxu1 %v15153_v48  ;;  %vm6668_vm11 = vcmp.lt.s32.totalorder %v12192_v6, 1  ;;  %v12238_v14 = vshll.u32 %v6644_v28, 8  ;;  %v15157_v52 = vand.u32 4294901760, %v11846_v58  ;;  %v6592_v62 = vadd.s32 %v6591_v13, %v6587_v18  ;;  %4659 = vmatpush1.msra.mxu0 %v15158_v50  ;;  %v15161_v18 = vld [vmem:[#allocation31_spill] sm:$0xff] }
 0x279   :  { %4787 = vmatpush1.msra.mxu1 %v15156_v56  ;;  %vm6670_vm12 = vcmp.lt.s32.totalorder %v12192_v6, 3  ;;  %vm6671_vm13 = vcmp.lt.s32.totalorder %v12192_v6, 4  ;;  %v6676_v45 = vsel %vm6668_vm11, %v6655_v1, %v6658_v33  ;;  %v15159_v16 = vand.u32 4294901760, %v11882_v20  ;;  %4661 = vmatprep.subr.mxu0 %v11885_v11 }
 0x27a   :  { %4793 = vmatprep.subr.mxu1 %v15157_v52  ;;  %v6673_v28 = vsel %vm6671_vm13, %v6661_v42, 2102212464  ;;  %v6677_v29 = vsel %vm6671_vm13, %v6664_v15, 920167782  ;;  %v6680_v23 = vsel %vm6668_vm11, %v6658_v33, %v6661_v42  ;;  %v6681_v58 = vsel %vm6671_vm13, %v6667_v40, 1326507024  ;;  %4663 = vmatpush1.msra.mxu0 %v15161_v18 }
 0x27b   :  { %4799 = vmatpush1.msra.mxu1 %v15159_v16  ;;  %v15160_v63 = vand.u32 4294901760, %v11898_v31  ;;  %v6593_v55 = vadd.s32 536870912, %v6592_v62  ;;  %vm6669_vm14 = vcmp.lt.s32.totalorder %v12192_v6, 2  ;;  %v6678_v32 = vsel %vm6670_vm12, %v6661_v42, %v6677_v29  ;;  %4665 = vmatprep.subr.mxu0 %v11936_v22 }
 0x27c   :  { %v6682_v20 = vsel %vm6670_vm12, %v6664_v15, %v6681_v58  ;;  %v15162_v38 = vand.u32 4294901760, %v11927_v51  ;;  %v6672_v40 = vsel %vm6668_vm11, %v6652_v4, %v6655_v1  ;;  %v6679_v31 = vsel %vm6669_vm14, %v6676_v45, %v6678_v32  ;;  %4667 = vmatpush1.msra.mxu0 %v11938_v24 }
 0x27d   :  { %4805 = vmatprep.subr.mxu1 %v15160_v63  ;;  %v6683_v48 = vsel %vm6669_vm14, %v6680_v23, %v6682_v20  ;;  %v15163_v42 = vand.u32 4294901760, %v11989_v19  ;;  %v14083_v15 = vand.u32 4294901760, %v12122_v53  ;;  %v12273_v44 = vshrl.u32 %v6593_v55, 30  ;;  %4669 = vmatprep.subr.mxu0 %v11978_v27 }
 0x27e   :  { %4811 = vmatpush1.msra.mxu1 %v15162_v38  ;;  %v6674_v51 = vsel %vm6670_vm12, %v6658_v33, %v6673_v28  ;;  %v12278_v4 = vmul.u32.u64.low %v12238_v14, %v6683_v48  ;;  %v12279_v1 = vmul.u32.u64.high %v12238_v14, %v6683_v48, %v12278_v4  ;;  %v15164_v56 = vand.u32 4294901760, %v11959_v43  ;;  %4671 = vmatpush1.msra.mxu0 %v11962_v7  ;;  %v15172_v48 = vld [vmem:[#allocation80_spill] sm:$0xff] }
 0x27f   :  { %4817 = vmatprep.subr.mxu1 %v15163_v42  ;;  %v12285_v13 = vmul.u32.u64.low %v12238_v14, %v6679_v31  ;;  %v12286_v19 = vmul.u32.u64.high %v12238_v14, %v6679_v31, %v12285_v13  ;;  %v15165_v52 = vand.u32 4294901760, %v12004_v54  ;;  %v15166_v33 = vand.u32 4294901760, %v11992_v2  ;;  %4673 = vmatprep.subr.mxu0 %v12026_v46 }
 0x280   :  { %4823 = vmatpush1.msra.mxu1 %v15164_v56  ;;  %v14082_v16 = vand.u32 4294901760, %v12071_v17  ;;  %v6595_v28 = vshll.u32 %v12273_v44, 30  ;;  %v15167_v43 = vand.u32 4294901760, %v12017_v30  ;;  %v4858_v29 = vand.u32 4294901760, %v12090_v59  ;;  %4675 = vmatpush1.msra.mxu0 %v12028_v12  ;;  %v15173_v56 = vld [vmem:[#allocation53_spill] sm:$0xff] }
 0x281   :  { %4829 = vmatprep.subr.mxu1 %v15165_v52  ;;  %v4869_v45 = vsub.f32 %v11992_v2, %v15166_v33  ;;  %v4875_v54 = vsub.f32 %v12103_v39, %v14084_v47  ;;  %v14081_v23 = vand.u32 4294901760, %v12125_v34  ;;  %v6675_v58 = vsel %vm6669_vm14, %v6672_v40, %v6674_v51  ;;  %v15171_v40 = vld [vmem:[#allocation59_spill] sm:$0xff]  ;;  %v15196_v47 = vld [vmem:[#allocation82_spill] sm:$0xff] }
 0x282   :  { %4835 = vmatpush1.msra.mxu1 %v15167_v43  ;;  %v15168_v63 = vand.u32 4294901760, %v12042_v5  ;;  %v4864_v55 = vand.u32 4294901760, %v12112_v36  ;;  %v15169_v30 = vand.u32 4294901760, %v12007_v10  ;;  %v14079_v32 = vand.u32 4294901760, %v12085_v21  ;;  %4677 = vmatprep.subr.mxu0 %v15171_v40  ;;  %v15175_v33 = vld [vmem:[#allocation71_spill] sm:$0xff]  ;;  %v15176_v43 = vld [vmem:[#allocation73_spill] sm:$0xff] }
 0x283   :  { %v12315_v20 = vsub.s32 %v6592_v62, %v6595_v28  ;;  %vm6693_vm15 = vc.u32 %v12279_v1, %v12285_v13  ;;  %v4887_v5 = vsub.f32 %v12122_v53, %v14083_v15  ;;  %v14078_v6 = vand.u32 4294901760, %v12128_v35  ;;  %4679 = vmatpush1.msra.mxu0 %v15175_v33 }
 0x284   :  { %4841 = vmatprep.subr.mxu1 %v15168_v63  ;;  %v4881_v59 = vsub.f32 %v12007_v10, %v15169_v30  ;;  %v6694_v36 = vadd.s32 1, %v12286_v19  ;;  %v15170_v38 = vand.u32 4294901760, %v12033_v8  ;;  %v4870_v62 = vand.u32 4294901760, %v4869_v45  ;;  %4681 = vmatprep.subr.mxu0 %v15176_v43  ;;  %v15177_v30 = vld [vmem:[#allocation45_spill] sm:$0xff] }
 0x285   :  { %v4893_v31 = vsub.f32 %v12071_v17, %v14082_v16  ;;  %v14080_v42 = vand.u32 4294901760, %v15172_v48  ;;  %v6598_v51 = vsub.s32 0, %v12315_v20  ;;  %v6691_v4 = vmul.u32 %v12238_v14, %v6675_v58  ;;  %4683 = vmatpush1.msra.mxu0 %v15177_v30  ;;  %v15191_v16 = vld [vmem:[#allocation74_spill] sm:$0xff] }
 0x286   :  { %4847 = vmatpush1.msra.mxu1 %v15170_v38  ;;  %v15174_v52 = vand.u32 4294901760, %v15173_v56  ;;  %v4876_v8 = vand.u32 4294901760, %v4875_v54  ;;  %v4899_v45 = vsub.f32 %v12125_v34, %v14081_v23  ;;  %v6695_v28 = vsel %vm6693_vm15, %v6694_v36, %v12286_v19  ;;  %v15189_v23 = vld [vmem:[#allocation89_spill] sm:$0xff] }
 0x287   :  { %v4882_v63 = vand.u32 4294901760, %v4881_v59  ;;  %v4905_v14 = vsub.f32 %v12085_v21, %v14079_v32  ;;  %v7692_v58 = vmin.u32 %v6598_v51, %v12315_v20  ;;  %v6696_v54 = vadd.s32 %v6695_v28, %v6691_v4  ;;  %v15179_v51 = vld [vmem:[#allocation29_spill] sm:$0xff]  ;;  %v15182_v32 = vld [vmem:[#allocation87_spill] sm:$0xff] }
 0x288   :  { %4853 = vmatprep.subr.mxu1 %v15174_v52  ;;  %v4888_v38 = vand.u32 4294901760, %v4887_v5  ;;  %v4911_v56 = vsub.f32 %v12128_v35, %v14078_v6  ;;  %v15178_v19 = vmov 0.0   ;;  %v4917_v59 = vsub.f32 %v15172_v48, %v14080_v42  ;;  %4962 = vmatprep.subr.mxu0 %v15179_v51  ;;  %v15180_v52 = vld [vmem:[#allocation38_spill] sm:$0xff] }
 0x289   :  { %4859 = vmatpush1.msra.mxu1 %v4858_v29  ;;  %4716 = vmatprep.mubr.f32.mxu0 %v15178_v19  ;;  %v4894_v29 = vand.u32 4294901760, %v4893_v31  ;;  %v6600_v36 = vclz %v7692_v58  ;;  %v6697_v4 = vadd.s32 536870912, %v6696_v54  ;;  %v4906_v5 = vand.u32 4294901760, %v4905_v14  ;;  %v15181_v6 = vld [vmem:[#allocation78_spill] sm:$0xff] }
 0x28a   :  { %4865 = vmatprep.subr.mxu1 %v4864_v55  ;;  %v4900_v55 = vand.u32 4294901760, %v4899_v45  ;;  %4722 = vmatmul.mubr.f32.vlgmr.msra.gmra.mxu0 %v15180_v52  ;;  %v4918_v58 = vand.u32 4294901760, %v4917_v59  ;;  %v6588_v14 = vadd.s32 %v12200_v3, %v12197_v60  ;;  %v15186_v59 = vld [vmem:[#allocation49_spill] sm:$0xff]  ;;  %v15198_v52 = vld [vmem:[#allocation18_spill] sm:$0xff] }
 0x28b   :  { %4871 = vmatpush1.msra.mxu1 %v4870_v62  ;;  %v7693_v28 = vadd.s32 4294967294, %v6600_v36  ;;  %4965 = vmatpush1.msra.mxu0 %v15181_v6  ;;  %v4912_v62 = vand.u32 4294901760, %v4911_v56  ;;  %v12360_v31 = vshrl.u32 %v6697_v4, 30  ;;  %v15185_v36 = vld [vmem:[#allocation48_spill] sm:$0xff]  ;;  %v15188_v3 = vld [vmem:[#allocation33_spill] sm:$0xff] }
 0x28c   :  { %4877 = vmatprep.subr.mxu1 %v4876_v8  ;;  %4968 = vmatprep.subr.mxu0 %v15182_v32  ;;  %v15183_v8 = vld [vmem:[#allocation26_spill] sm:$0xff] }
 0x28d   :  { %4883 = vmatpush1.msra.mxu1 %v4882_v63  ;;  %vm7694_vm0 = vcmp.lt.s32.totalorder %v7693_v28, 0  ;;  %4971 = vmatpush1.msra.mxu0 %v15183_v8  ;;  %v6699_v42 = vshll.u32 %v12360_v31, 30  ;;  %v15184_v63 = vld [vmem:[#allocation21_spill] sm:$0xff] }
 0x28e   :  { %4889 = vmatprep.subr.mxu1 %v4888_v38  ;;  %v6603_v45 = vsel %vm7694_vm0, 0, %v7693_v28  ;;  %4974 = vmatprep.subr.mxu0 %v15184_v63 }
 0x28f   :  { %4895 = vmatpush1.msra.mxu1 %v4894_v29  ;;  %v6604_v38 = vsub.s32 32, %v6603_v45  ;;  %v6608_v56 = vsub.s32 4294967266, %v6603_v45  ;;  %4977 = vmatpush1.msra.mxu0 %v15185_v36  ;;  %v12369_v29 = vsub.s32 %v6696_v54, %v6699_v42  ;;  %v15190_v54 = vld [vmem:[#allocation70_spill] sm:$0xff] }
 0x290   :  { %4901 = vmatprep.subr.mxu1 %v4900_v55  ;;  %4980 = vmatprep.subr.mxu0 %v15186_v59  ;;  %v6605_v55 = vshll.u32 %v12315_v20, %v6603_v45  ;;  %v15193_v45 = vld [vmem:[#allocation81_spill] sm:$0xff] }
 0x291   :  { %4907 = vmatpush1.msra.mxu1 %v4906_v5  ;;  %v6606_v4 = vshrl.u32 %v6588_v14, %v6604_v38  ;;  %v6609_v28 = vadd.s32 127, %v6608_v56  ;;  %4952 = vmatprep.mubr.f32.mxu1 %v15178_v19  ;;  %v15187_v5 = vld [vmem:[#allocation15_spill] sm:$0xff]  ;;  %v6702_v60 = vsub.s32 0, %v12369_v29  ;;  %v15194_v38 = vld [vmem:[#allocation76_spill] sm:$0xff] }
 0x292   :  { %4913 = vmatprep.subr.mxu1 %v4912_v62  ;;  %4983 = vmatpush1.msra.mxu0 %v15187_v5  ;;  %v15195_v56 = vld [vmem:[#allocation43_spill] sm:$0xff] }
 0x293   :  { %4919 = vmatpush1.msra.mxu1 %v4918_v58  ;;  %4986 = vmatprep.subr.mxu0 %v15189_v23  ;;  %v6607_v62 = vor.u32 %v6606_v4, %v6605_v55  ;;  %v6610_v42 = vshll.u32 %v6609_v28, 23  ;;  %v7696_v20 = vmin.u32 %v6702_v60, %v12369_v29  ;;  %v15192_v58 = vld [vmem:[#allocation28_spill] sm:$0xff]  ;;  %v15197_v55 = vld [vmem:[#allocation54_spill] sm:$0xff] }
 0x294   :  { %4954 = vmatmul.mubr.f32.vlgmr.msra.gmra.mxu1 %v15188_v3  ;;  %5098 = vmatprep.subr.mxu1 %v15190_v54  ;;  %v15200_v3 = vld [vmem:[#allocation47_spill] sm:$0xff] }
 0x295   :  { %4989 = vmatpush1.msra.mxu0 %v15191_v16  ;;  %5100 = vmatpush1.msra.mxu1 %v15192_v58  ;;  %v6611_v14 = vor.u32 4788187, %v6610_v42  ;;  %v6704_v15 = vclz %v7696_v20  ;;  %v6614_v28 = vcvt.s32.f32 %v6607_v62  ;;  %v15204_v20 = vld [vmem:[#allocation65_spill] sm:$0xff]  ;;  %v15206_v62 = vld [vmem:[#allocation86_spill] sm:$0xff] }
 0x296   :  { %4992 = vmatprep.subr.mxu0 %v15193_v45  ;;  %5102 = vmatprep.subr.mxu1 %v15194_v38  ;;  %v15201_v45 = vld [vmem:[#allocation22_spill] sm:$0xff]  ;;  %vm6534_vm2 = vcmp.lt.s32.totalorder %v15206_v62, 0  ;;  %vm6624_vm9 = vweird.f32 %v15206_v62 }
 0x297   :  { %4995 = vmatpush1.msra.mxu0 %v15195_v56  ;;  %5104 = vmatpush1.msra.mxu1 %v15196_v47  ;;  %v6612_v4 = vand.u32 2147483647, %v6611_v14  ;;  %v7697_v60 = vadd.s32 4294967294, %v6704_v15  ;;  %v15202_v38 = vld [vmem:[#allocation94_spill] sm:$0xff] }
 0x298   :  { %4998 = vmatprep.subr.mxu0 %v15197_v55  ;;  %5106 = vmatprep.subr.mxu1 %v15198_v52  ;;  %v15203_v56 = vld [vmem:[#allocation102_spill] sm:$0xff]  ;;  %v15205_v55 = vld [vmem:[#allocation41_spill] sm:$0xff] }
 0x299   :  { %5001 = vmatpush1.msra.mxu0 %v15199_v26  ;;  %5108 = vmatpush1.msra.mxu1 %v15200_v3  ;;  %v6615_v42 = vmul.f32 %v6614_v28, %v6612_v4  ;;  %vm7698_vm1 = vcmp.lt.s32.totalorder %v7697_v60, 0  ;;  %v15207_v15 = vld [vmem:[#allocation66_spill] sm:$0xff]  ;;  %v6692_v4 = vadd.s32 %v12285_v13, %v12279_v1 }
 0x29a   :  { %5004 = vmatprep.subr.mxu0 %v15201_v45  ;;  %5110 = vmatprep.subr.mxu1 %v15202_v38  ;;  %v6707_v52 = vsel %vm7698_vm1, 0, %v7697_v60  ;;  %v6618_v45 = vsub.s32 4, %v12273_v44 }
 0x29b   :  { %5007 = vmatpush1.msra.mxu0 %v15203_v56  ;;  %5112 = vmatpush1.msra.mxu1 %v15204_v20  ;;  %v6616_v14 = vxor.u32 2147483648, %v6615_v42  ;;  %v6708_v28 = vsub.s32 32, %v6707_v52  ;;  %v6712_v56 = vsub.s32 4294967266, %v6707_v52  ;;  %v15208_v20 = vld [vmem:[#allocation79_spill] sm:$0xff]  ;;  %v6709_v13 = vshll.u32 %v12369_v29, %v6707_v52  ;;  %v15216_v52 = vld [vmem:[#allocation57_spill] sm:$0xff] }
 0x29c   :  { %5010 = vmatprep.subr.mxu0 %v15205_v55  ;;  %5114 = vmatprep.subr.mxu1 %v15129_v37  ;;  %v15209_v55 = vand.u32 2147483647, %v15206_v62  ;;  %v15217_v29 = vld [vmem:[#allocation61_spill] sm:$0xff] }
 0x29d   :  { %5013 = vmatpush1.msra.mxu0 %v15207_v15  ;;  %5116 = vmatpush1.msra.mxu1 %v15132_v57  ;;  %v6617_v60 = vsel %vm6534_vm2, %v6616_v14, %v6615_v42  ;;  %v15212_v15 = vld [vmem:[#allocation93_spill] sm:$0xff]  ;;  %v6713_v57 = vadd.s32 127, %v6712_v56  ;;  %v15214_v42 = vld [vmem:[#allocation27_spill] sm:$0xff]  ;;  %v6619_v14 = vsel %vm6534_vm2, %v6618_v45, %v12273_v44 }
 0x29e   :  { %5016 = vmatprep.subr.mxu0 %v15208_v20  ;;  %vm12405_vm3 = vcmp.le.f32.partialorder %v15209_v55, 0.7853982  ;;  %5118 = vmatprep.subr.mxu1 %v15135_v61  ;;  %v6710_v20 = vshrl.u32 %v6692_v4, %v6708_v28  ;;  %v15213_v55 = vld [vmem:[#allocation50_spill] sm:$0xff]  ;;  %v15218_v4 = vld [vmem:[#allocation88_spill] sm:$0xff] }
 0x29f   :  { %5019 = vmatpush1.msra.mxu0 %v15212_v15  ;;  %v6620_v1 = vsel %vm12405_vm3, %v15206_v62, %v6617_v60  ;;  %5120 = vmatpush1.msra.mxu1 %v15138_v25  ;;  %v6714_v60 = vshll.u32 %v6713_v57, 23  ;;  %v15215_v61 = vld [vmem:[#allocation46_spill] sm:$0xff]  ;;  %v6621_v28 = vsel %vm12405_vm3, 0, %v6619_v14 }
 0x2a0   :  { %5022 = vmatprep.subr.mxu0 %v15213_v55  ;;  %8122 = vcosq.f32 %v6620_v1  ;;  %5122 = vmatprep.subr.mxu1 %v15141_v0  ;;  %v6711_v15 = vor.u32 %v6710_v20, %v6709_v13  ;;  %v6625_v45 = vadd.s32 3, %v6621_v28 }
 0x2a1   :  { %5025 = vmatpush1.msra.mxu0 %v15214_v42  ;;  %8124 = vsinq.f32 %v6620_v1  ;;  %5124 = vmatpush1.msra.mxu1 %v15215_v61  ;;  %v6715_v56 = vor.u32 4788187, %v6714_v60  ;;  %v6722_v1 = vsub.s32 4, %v12360_v31  ;;  %v15235_v60 = vand.u32 4294901760, %v15186_v59 }
 0x2a2   :  { %5028 = vmatprep.subr.mxu0 %v15216_v52  ;;  %5126 = vmatprep.subr.mxu1 %v15217_v29  ;;  %v6718_v44 = vcvt.s32.f32 %v6711_v15  ;;  %v15219_v15 = vld [vmem:[#allocation97_spill] sm:$0xff]  ;;  %v6626_v13 = vand.u32 3, %v6625_v45 }
 0x2a3   :  { %5031 = vmatpush1.msra.mxu0 %v11992_v2  ;;  %5128 = vmatpush1.msra.mxu1 %v15218_v4  ;;  %v6716_v57 = vand.u32 2147483647, %v6715_v56  ;;  %vm6638_vm4 = vcmp.lt.s32.totalorder %v15219_v15, 0  ;;  %v15220_v14 = vand.u32 2147483647, %v15219_v15  ;;  %vm6728_vm13 = vweird.f32 %v15219_v15 }
 0x2a4   :  { %5034 = vmatprep.subr.mxu0 %v12103_v39  ;;  %5130 = vmatprep.subr.mxu1 %v11789_v9  ;;  %vm6631_vm6 = vcmp.eq.s32.totalorder %v6626_v13, 2  ;;  %vm6628_vm7 = vcmp.eq.s32.totalorder %v6626_v13, 0  ;;  %vm6627_vm8 = vcmp.lt.s32.totalorder %v6626_v13, 2 }
 0x2a5   :  { %5037 = vmatpush1.msra.mxu0 %v12007_v10  ;;  %5132 = vmatpush1.msra.mxu1 %v15154_v49  ;;  %v6719_v20 = vmul.f32 %v6718_v44, %v6716_v57  ;;  %vm12450_vm5 = vcmp.le.f32.partialorder %v15220_v14, 0.7853982  ;;  %v15223_v57 = vld [vmem:[#allocation34_spill] sm:$0xff]  ;;  %v15224_v14 = vand.u32 4294901760, %v15179_v51 }
 0x2a6   :  { %5040 = vmatprep.subr.mxu0 %v12122_v53  ;;  %5134 = vmatprep.subr.mxu1 %v11868_v41  ;;  %v275_v44 = vld [vmem:[#allocation5 + $0x678] sm:$0xff] }
 0x2a7   :  { %5043 = vmatpush1.msra.mxu0 %v12071_v17  ;;  %5136 = vmatpush1.msra.mxu1 %v15158_v50  ;;  %v6720_v38 = vxor.u32 2147483648, %v6719_v20  ;;  %v12475_v51 = vand.u32 4294901760, %v275_v44 }
 0x2a8   :  { %5046 = vmatprep.subr.mxu0 %v12125_v34  ;;  %5138 = vmatprep.subr.mxu1 %v11885_v11 }
 0x2a9   :  { %5049 = vmatpush1.msra.mxu0 %v12085_v21  ;;  %5140 = vmatpush1.msra.mxu1 %v15161_v18  ;;  %v6721_v56 = vsel %vm6638_vm4, %v6720_v38, %v6719_v20  ;;  %15227 = vst [vmem:[#allocation20_spill] sm:$0xff] %v12475_v51 }
 0x2aa   :  { %5052 = vmatprep.subr.mxu0 %v12128_v35  ;;  %5142 = vmatprep.subr.mxu1 %v11936_v22  ;;  %v6724_v28 = vsel %vm12450_vm5, %v15219_v15, %v6721_v56  ;;  %v15225_v56 = vand.u32 4294901760, %v15181_v6  ;;  %v15229_v6 = vld [vmem:[#allocation39_spill] sm:$0xff] }
 0x2ab   :  { %5055 = vmatpush1.msra.mxu0 %v15172_v48  ;;  %5088 = vmatprep.mubr.f32.mxu0 %v15178_v19  ;;  %8126 = vcosq.f32 %v6724_v28 }
 0x2ac   :  { %5144 = vmatpush1.msra.mxu1 %v11938_v24  ;;  %5091 = vmatmul.mubr.f32.vlgmr.msra.gmra.mxu0 %v15223_v57  ;;  %v6723_v24 = vsel %vm6638_vm4, %v6722_v1, %v12360_v31  ;;  %8128 = vsinq.f32 %v6724_v28  ;;  %v15228_v31 = vld [vmem:[#allocation68_spill] sm:$0xff] }
 0x2ad   :  { %5146 = vmatprep.subr.mxu1 %v11978_v27  ;;  %v8123_v45 = vpop.eup %8122  ;;  %5206 = vmatprep.subr.mxu0 %v15224_v14  ;;  %v15226_v27 = vand.u32 4294901760, %v15182_v32  ;;  %v7573_v28 = vrot.slane %v15229_v6, %v15228_v31 }
 0x2ae   :  { %5148 = vmatpush1.msra.mxu1 %v11962_v7  ;;  %v8125_v20 = vpop.eup %8124  ;;  %v6632_v38 = vxor.u32 2147483648, %v8123_v45  ;;  %5210 = vmatpush1.msra.mxu0 %v15225_v56  ;;  %v12477_v7 = vld [vmem:[#allocation8] sm:$0xff]  ;;  %v15230_v56 = vand.u32 4294901760, %v15183_v8  ;;  %v15234_v8 = vand.u32 4294901760, %v15185_v36  ;;  %v15238_v36 = vand.u32 4294901760, %v15187_v5  ;;  %v236_v5 = vld [vmem:[#allocation5 + $0x540] sm:$0xff] }
 0x2af   :  { %5150 = vmatprep.subr.mxu1 %v12026_v46  ;;  %v6629_v57 = vxor.u32 2147483648, %v8125_v20  ;;  %5214 = vmatprep.subr.mxu0 %v15226_v27  ;;  %v7491_v1 = vrot.slane %v12477_v7, %v15228_v31  ;;  %v262_v27 = vld [vmem:[#allocation5 + $0x610] sm:$0xff] }
 0x2b0   :  { %5152 = vmatpush1.msra.mxu1 %v12028_v12  ;;  %v6633_v14 = vsel %vm6631_vm6, %v6632_v38, %v8125_v20  ;;  %5218 = vmatpush1.msra.mxu0 %v15230_v56  ;;  %v6725_v12 = vsel %vm12450_vm5, 0, %v6723_v24  ;;  %v15231_v20 = vand.u32 4294901760, %v15184_v63  ;;  %v15232_v31 = vld [vmem:[#allocation16_spill] sm:$0xff]  ;;  %v12502_v24 = vsub.f32 %v275_v44, %v12475_v51  ;;  %v3013_v56 = vpop.f32.mrf.mxu0 }
 0x2b1   :  { %5154 = vmatprep.subr.mxu1 %v15171_v40  ;;  %v6630_v32 = vsel %vm6628_vm7, %v8123_v45, %v6629_v57  ;;  %v12493_v46 = vsub.s32 6, %v15232_v31  ;;  %v12504_v63 = vand.u32 4294901760, %v262_v27  ;;  %v7541_v57 = vmul.f32 %v7491_v1, %v15206_v62  ;;  %5193 = vmatprep.mubr.f32.mxu1 %v15178_v19  ;;  %v15243_v1 = vld [vmem:[#allocation81_spill] sm:$0xff] }
 0x2b2   :  { %5222 = vmatprep.subr.mxu0 %v15231_v20  ;;  %5156 = vmatpush1.msra.mxu1 %v15175_v33  ;;  %v6634_v38 = vsel %vm6627_vm8, %v6630_v32, %v6633_v14  ;;  %15236 = vst [vmem:[#allocation83_spill] sm:$0xff] %v12502_v24  ;;  %v6729_v14 = vadd.s32 3, %v6725_v12  ;;  %v249_v32 = vld [vmem:[#allocation5 + $0x5a8] sm:$0xff]  ;;  %v12511_v59 = vsub.s32 7, %v15232_v31  ;;  %v15241_v44 = vand.u32 4294901760, %v15189_v23 }
 0x2b3   :  { %15233 = vst [vmem:[#allocation37_spill] sm:$0xff] %v12493_v46  ;;  %5226 = vmatpush1.msra.mxu0 %v15234_v8  ;;  %5158 = vmatprep.subr.mxu1 %v15176_v43  ;;  %v6635_v13 = vsel %vm6624_vm9, nan, %v6634_v38  ;;  %15237 = vst [vmem:[#allocation92_spill] sm:$0xff] %v12504_v63  ;;  %v15240_v20 = vld [vmem:[#allocation35_spill] sm:$0xff]  ;;  %v15242_v12 = vand.u32 4294901760, %v15191_v16  ;;  %v15244_v31 = vand.u32 4294901760, %v15243_v1 }
 0x2b4   :  { %5230 = vmatprep.subr.mxu0 %v15235_v60  ;;  %5160 = vmatpush1.msra.mxu1 %v15177_v30  ;;  %v7623_v45 = vmul.f32 %v7573_v28, %v6635_v13  ;;  %15239 = vst [vmem:[#allocation17_spill] sm:$0xff] %v12511_v59  ;;  %v8162_v8 = vld [vmem:[#allocation7] sm:$0xff]  ;;  %v12524_v28 = vsub.f32 %v262_v27, %v12504_v63  ;;  %v12526_v23 = vand.u32 4294901760, %v249_v32  ;;  %v6730_v60 = vand.u32 3, %v6729_v14  ;;  %v223_v1 = vld [vmem:[#allocation5 + $0x4d8] sm:$0xff]  ;;  %v15252_v14 = vld [vmem:[#allocation44_spill] sm:$0xff] }
 0x2b5   :  { %5234 = vmatpush1.msra.mxu0 %v15238_v36  ;;  %5197 = vmatmul.mubr.f32.vlgmr.msra.gmra.mxu1 %v15240_v20  ;;  %v307_v62 = vrot.slane %v8162_v8, %v12493_v46  ;;  %v15247_v16 = vld [vmem:[#allocation43_spill] sm:$0xff]  ;;  %v7495_v13 = vrot.slane %v12477_v7, %v15252_v14  ;;  %v15253_v20 = vld [vmem:[#allocation18_spill] sm:$0xff]  ;;  %v15257_v43 = vand.u32 4294901760, %v12502_v24 }
 0x2b6   :  { %5238 = vmatprep.subr.mxu0 %v15241_v44  ;;  %v7636_v38 = vadd.f32 %v7623_v45, %v7541_v57  ;;  %5372 = vmatprep.subr.mxu1 %v15190_v54  ;;  %15245 = vst [vmem:[#allocation85_spill] sm:$0xff] %v12526_v23  ;;  %v3015_v57 = vpop.f32.mrf.mxu0  ;;  %v3245_v54 = vpop.f32.mrf.mxu1  ;;  %v15246_v45 = vld [vmem:[#allocation76_spill] sm:$0xff]  ;;  %v15248_v36 = vand.u32 4294901760, %v15247_v16  ;;  %v15249_v44 = vld [vmem:[#allocation54_spill] sm:$0xff]  ;;  %v12549_v30 = vsub.f32 %v249_v32, %v12526_v23  ;;  %vm6735_vm10 = vcmp.eq.s32.totalorder %v6730_v60, 2 }
 0x2b7   :  { %5242 = vmatpush1.msra.mxu0 %v15242_v12  ;;  %5374 = vmatpush1.msra.mxu1 %v15192_v58  ;;  %v311_v58 = vrot.slane %v8162_v8, %v12511_v59  ;;  %v15250_v27 = vand.u32 4294901760, %v15249_v44  ;;  %v12536_v12 = vand.u32 4294901760, %v236_v5  ;;  %v3014_v16 = vadd.f32 %v3013_v56, %v307_v62  ;;  %v197_v62 = vld [vmem:[#allocation5 + $0x408] sm:$0xff]  ;;  %v15264_v63 = vld [vmem:[#allocation66_spill] sm:$0xff] }
 0x2b8   :  { %5246 = vmatprep.subr.mxu0 %v15244_v31  ;;  %7649 = vst [vmem:[#allocation10 + $0x20] sm:$0xff] %v7636_v38  ;;  %5376 = vmatprep.subr.mxu1 %v15246_v45  ;;  %v210_v31 = vld [vmem:[#allocation5 + $0x470] sm:$0xff]  ;;  %v8127_v38 = vpop.eup %8126  ;;  %v7577_v45 = vrot.slane %v15229_v6, %v15252_v14  ;;  %v12554_v56 = vsub.f32 %v12502_v24, %v15257_v43  ;;  %v3247_v14 = vpop.f32.mrf.mxu1  ;;  %vm6732_vm11 = vcmp.eq.s32.totalorder %v6730_v60, 0  ;;  %vm6731_vm12 = vcmp.lt.s32.totalorder %v6730_v60, 2 }
 0x2b9   :  { %5250 = vmatpush1.msra.mxu0 %v15248_v36  ;;  %5378 = vmatpush1.msra.mxu1 %v15196_v47  ;;  %15251 = vst [vmem:[#allocation42_spill] sm:$0xff] %v12536_v12  ;;  %v3382_v36 = vpop.f32.mrf.mxu0  ;;  %v15254_v47 = vand.u32 4294901760, %v15199_v26  ;;  %v8129_v8 = vpop.eup %8128  ;;  %v6736_v44 = vxor.u32 2147483648, %v8127_v38  ;;  %v12562_v32 = vand.u32 4294901760, %v210_v31  ;;  %v3016_v23 = vadd.f32 %v3015_v57, %v311_v58  ;;  %v15261_v43 = vld [vmem:[#allocation65_spill] sm:$0xff]  ;;  %v184_v57 = vld [vmem:[#allocation5 + $0x3a0] sm:$0xff] }
 0x2ba   :  { %5254 = vmatprep.subr.mxu0 %v15250_v27  ;;  %5380 = vmatprep.subr.mxu1 %v15253_v20  ;;  %v15255_v27 = vld [vmem:[#allocation22_spill] sm:$0xff]  ;;  %v6733_v26 = vxor.u32 2147483648, %v8129_v8  ;;  %v15262_v24 = vld [vmem:[#allocation41_spill] sm:$0xff]  ;;  %v12568_v33 = vsub.f32 %v236_v5, %v12536_v12  ;;  %v3246_v40 = vadd.f32 %v3245_v54, %v3014_v16  ;;  %v15265_v51 = vand.u32 4294901760, %v15264_v63  ;;  %v15266_v58 = vld [vmem:[#allocation99_spill] sm:$0xff] }
 0x2bb   :  { %5258 = vmatpush1.msra.mxu0 %v15254_v47  ;;  %5382 = vmatpush1.msra.mxu1 %v15200_v3  ;;  %v15256_v59 = vand.u32 4294901760, %v15255_v27  ;;  %v15258_v47 = vld [vmem:[#allocation94_spill] sm:$0xff]  ;;  %v6737_v27 = vsel %vm6735_vm10, %v6736_v44, %v8129_v8  ;;  %v15263_v20 = vand.u32 4294901760, %v15262_v24  ;;  %v12573_v8 = vand.u32 4294901760, %v197_v62  ;;  %v15267_v5 = vld [vmem:[#allocation79_spill] sm:$0xff]  ;;  %v15270_v16 = vld [vmem:[#allocation69_spill] sm:$0xff] }
 0x2bc   :  { %5384 = vmatprep.subr.mxu1 %v15258_v47  ;;  %v15259_v3 = vld [vmem:[#allocation102_spill] sm:$0xff]  ;;  %v6734_v47 = vsel %vm6732_vm11, %v8127_v38, %v6733_v26  ;;  %v15268_v44 = vand.u32 4294901760, %v15267_v5  ;;  %v15269_v60 = vand.u32 4294901760, %v12524_v28  ;;  %v3383_v38 = vadd.f32 %v3382_v36, %v3246_v40  ;;  %5363 = vmatprep.mubr.f32.mxu0 %v15178_v19 }
 0x2bd   :  { %5262 = vmatprep.subr.mxu0 %v15256_v59  ;;  %v15260_v6 = vand.u32 4294901760, %v15259_v3  ;;  %v12560_v59 = vand.u32 4294901760, %v223_v1  ;;  %5386 = vmatpush1.msra.mxu1 %v15261_v43  ;;  %v3384_v3 = vpop.f32.mrf.mxu0  ;;  %v6738_v24 = vsel %vm6731_vm12, %v6734_v47, %v6737_v27  ;;  %v171_v63 = vld [vmem:[#allocation5 + $0x338] sm:$0xff]  ;;  %v12592_v47 = vsub.f32 %v210_v31, %v12562_v32 }
 0x2be   :  { %5388 = vmatprep.subr.mxu1 %v15129_v37  ;;  %v12582_v54 = vsub.f32 %v12524_v28, %v15269_v60  ;;  %v14115_v37 = vand.u32 4294901760, %v12549_v30  ;;  %v15274_v40 = vand.u32 4294901760, %v15213_v55  ;;  %v12598_v36 = vand.u32 4294901760, %v184_v57  ;;  %5467 = vmatprep.mubr.f32.mxu1 %v15178_v19 }
 0x2bf   :  { %5266 = vmatpush1.msra.mxu0 %v15260_v6  ;;  %v3488_v6 = vpop.f32.mrf.mxu1  ;;  %5390 = vmatpush1.msra.mxu1 %v15266_v58  ;;  %v3656_v27 = vpop.f32.mrf.mxu0  ;;  %v12589_v43 = vsub.f32 %v223_v1, %v12560_v59  ;;  %15273 = vst [vmem:[#allocation62_spill] sm:$0xff] %v12592_v47  ;;  %v7542_v58 = vmul.f32 %v7495_v13, %v15219_v15  ;;  %v15275_v1 = vand.u32 4294901760, %v15214_v42  ;;  %v12606_v15 = vand.u32 4294901760, %v171_v63 }
 0x2c0   :  { %5270 = vmatprep.subr.mxu0 %v15263_v20  ;;  %5392 = vmatprep.subr.mxu1 %v15270_v16  ;;  %v15271_v20 = vld [vmem:[#allocation93_spill] sm:$0xff]  ;;  %v12604_v31 = vsub.f32 %v197_v62, %v12573_v8  ;;  %v15277_v13 = vand.u32 4294901760, %v15216_v52  ;;  %v15278_v42 = vand.u32 4294901760, %v11992_v2  ;;  %v145_v52 = vld [vmem:[#allocation5 + $0x268] sm:$0xff]  ;;  %v15279_v2 = vand.u32 4294901760, %v12103_v39 }
 0x2c1   :  { %5274 = vmatpush1.msra.mxu0 %v15265_v51  ;;  %v6739_v51 = vsel %vm6728_vm13, nan, %v6738_v24  ;;  %v15272_v26 = vand.u32 4294901760, %v15271_v20  ;;  %5394 = vmatpush1.msra.mxu1 %v15138_v25  ;;  %v3489_v24 = vadd.f32 %v3488_v6, %v3383_v38  ;;  %v3490_v60 = vpop.f32.mrf.mxu1  ;;  %v7499_v25 = vrot.slane %v12477_v7, %v12493_v46 }
 0x2c2   :  { %5278 = vmatprep.subr.mxu0 %v15268_v44  ;;  %v7624_v5 = vmul.f32 %v7577_v45, %v6739_v51  ;;  %v3248_v44 = vadd.f32 %v3247_v14, %v3016_v23  ;;  %5396 = vmatprep.subr.mxu1 %v15141_v0  ;;  %15276 = vst [vmem:[#allocation90_spill] sm:$0xff] %v12604_v31  ;;  %v14114_v0 = vand.u32 4294901760, %v12568_v33  ;;  %v158_v45 = vld [vmem:[#allocation5 + $0x2d0] sm:$0xff]  ;;  %v3658_v14 = vpop.f32.mrf.mxu0  ;;  %v14111_v20 = vand.u32 4294901760, %v12592_v47 }
 0x2c3   :  { %5282 = vmatpush1.msra.mxu0 %v15272_v26  ;;  %5398 = vmatpush1.msra.mxu1 %v15215_v61  ;;  %v3657_v62 = vadd.f32 %v3656_v27, %v3489_v24  ;;  %v12621_v7 = vsub.f32 %v12549_v30, %v14115_v37  ;;  %v14113_v61 = vand.u32 4294901760, %v12589_v43  ;;  %v12629_v16 = vsub.f32 %v184_v57, %v12598_v36  ;;  %v15308_v24 = vld [vmem:[#allocation45_spill] sm:$0xff] }
 0x2c4   :  { %5286 = vmatprep.subr.mxu0 %v15274_v40  ;;  %v7637_v23 = vadd.f32 %v7624_v5, %v7542_v58  ;;  %v3385_v55 = vadd.f32 %v3384_v3, %v3248_v44  ;;  %5400 = vmatprep.subr.mxu1 %v15217_v29  ;;  %v132_v3 = vld [vmem:[#allocation5 + $0x200] sm:$0xff]  ;;  %v3760_v29 = vpop.f32.mrf.mxu1  ;;  %v15281_v26 = vand.u32 4294901760, %v12007_v10  ;;  %v12640_v39 = vand.u32 4294901760, %v158_v45 }
 0x2c5   :  { %5290 = vmatpush1.msra.mxu0 %v15275_v1  ;;  %5402 = vmatpush1.msra.mxu1 %v15218_v4  ;;  %15280 = vst [vmem:[#allocation64_spill] sm:$0xff] %v12629_v16  ;;  %v12635_v27 = vadd.f32 %v3760_v29, %v3657_v62  ;;  %v12638_v4 = vsub.f32 %v171_v63, %v12606_v15  ;;  %v14110_v58 = vand.u32 4294901760, %v12604_v31  ;;  %v15284_v57 = vand.u32 4294901760, %v12122_v53 }
 0x2c6   :  { %5294 = vmatprep.subr.mxu0 %v15277_v13  ;;  %7650 = vst [vmem:[#allocation10 + $0x28] sm:$0xff] %v7637_v23  ;;  %v3491_v51 = vadd.f32 %v3490_v60, %v3385_v55  ;;  %5404 = vmatprep.subr.mxu1 %v11789_v9  ;;  %v3762_v44 = vpop.f32.mrf.mxu1  ;;  %v12649_v9 = vsub.f32 %v12568_v33, %v14114_v0  ;;  %v12651_v10 = vand.u32 4294901760, %v145_v52  ;;  %v12653_v63 = vand.u32 4294901760, %v132_v3  ;;  %v119_v13 = vld [vmem:[#allocation5 + $0x198] sm:$0xff]  ;;  %v12742_v0 = vld [vmem:[#allocation5 + $0x60] sm:$0xff] }
 0x2c7   :  { %5298 = vmatpush1.msra.mxu0 %v15278_v42  ;;  %15282 = vst [vmem:[#allocation40_spill] sm:$0xff] %v12635_v27  ;;  %15283 = vst [vmem:[#allocation100_spill] sm:$0xff] %v12638_v4  ;;  %5406 = vmatpush1.msra.mxu1 %v15154_v49  ;;  %v15285_v40 = vand.u32 4294901760, %v12071_v17  ;;  %v14116_v49 = vand.u32 2147483647, %v12635_v27  ;;  %v6743_v53 = vand.u32 2139095040, %v12635_v27  ;;  %v12664_v60 = vsub.f32 %v12589_v43, %v14113_v61 }
 0x2c8   :  { %5302 = vmatprep.subr.mxu0 %v15279_v2  ;;  %v3659_v5 = vadd.f32 %v3658_v14, %v3491_v51  ;;  %5408 = vmatprep.subr.mxu1 %v11868_v41  ;;  %v15286_v1 = vand.u32 4294901760, %v12125_v34  ;;  %v12670_v41 = vmul.f32 %v7499_v25, %v12635_v27  ;;  %v12677_v23 = vsub.f32 %v12592_v47, %v14111_v20  ;;  %v106_v14 = vld [vmem:[#allocation5 + $0x130] sm:$0xff] }
 0x2c9   :  { %5306 = vmatpush1.msra.mxu0 %v15281_v26  ;;  %5410 = vmatpush1.msra.mxu1 %v15158_v50  ;;  %v14109_v55 = vand.u32 4294901760, %v12629_v16  ;;  %v15289_v50 = vand.u32 4294901760, %v12085_v21  ;;  %v6744_v34 = vshrl.u32 %v6743_v53, 23  ;;  %v12684_v42 = vsub.f32 %v158_v45, %v12640_v39  ;;  %v15297_v53 = vld [vmem:[#allocation24_spill] sm:$0xff] }
 0x2ca   :  { %5310 = vmatprep.subr.mxu0 %v15284_v57  ;;  %15287 = vst [vmem:[#allocation55_spill] sm:$0xff] %v12670_v41  ;;  %v12672_v17 = vadd.f32 %v3762_v44, %v3659_v5  ;;  %5412 = vmatprep.subr.mxu1 %v11885_v11  ;;  %v12689_v25 = vsub.f32 %v12604_v31, %v14110_v58  ;;  %v14112_v62 = vand.u32 4294901760, %v12638_v4  ;;  %v15291_v51 = vand.u32 4294901760, %v12128_v35  ;;  %v93_v5 = vld [vmem:[#allocation5 + $0xc8] sm:$0xff] }
 0x2cb   :  { %5314 = vmatpush1.msra.mxu0 %v15285_v40  ;;  %15290 = vst [vmem:[#allocation72_spill] sm:$0xff] %v12684_v42  ;;  %5414 = vmatpush1.msra.mxu1 %v15161_v18  ;;  %v12698_v45 = vsub.f32 %v145_v52, %v12651_v10  ;;  %v12701_v2 = vsub.f32 %v132_v3, %v12653_v63  ;;  %v15294_v29 = vand.u32 4294901760, %v15172_v48  ;;  %v7699_v26 = vadd.s32 4294967169, %v6744_v34  ;;  %v15295_v52 = vld [vmem:[#allocation98_spill] sm:$0xff]  ;;  %v15296_v40 = vld [vmem:[#allocation33_spill] sm:$0xff]  ;;  %v15300_v58 = vld [vmem:[#allocation19_spill] sm:$0xff] }
 0x2cc   :  { %5318 = vmatprep.subr.mxu0 %v15286_v1  ;;  %15288 = vst [vmem:[#allocation23_spill] sm:$0xff] %v12672_v17  ;;  %v6847_v11 = vand.u32 2139095040, %v12672_v17  ;;  %5416 = vmatprep.subr.mxu1 %v11936_v22  ;;  %v6747_v35 = vand.u32 8388607, %v14116_v49  ;;  %v12709_v57 = vand.u32 4294901760, %v119_v13  ;;  %v12717_v22 = vsub.f32 %v12629_v16, %v14109_v55  ;;  %v15306_v18 = vld [vmem:[#allocation73_spill] sm:$0xff] }
 0x2cd   :  { %5322 = vmatpush1.msra.mxu0 %v15289_v50  ;;  %15292 = vst [vmem:[#allocation36_spill] sm:$0xff] %v12698_v45  ;;  %15293 = vst [vmem:[#allocation75_spill] sm:$0xff] %v12701_v2  ;;  %5418 = vmatpush1.msra.mxu1 %v15295_v52  ;;  %v12719_v48 = vand.u32 4294901760, %v106_v14  ;;  %v6750_v1 = vadd.s32 1, %v7699_v26  ;;  %v12727_v34 = vsub.f32 %v12638_v4, %v14112_v62  ;;  %v12732_v52 = vand.u32 4294901760, %v93_v5 }
 0x2ce   :  { %5326 = vmatprep.subr.mxu0 %v15291_v51  ;;  %v6848_v3 = vshrl.u32 %v6847_v11, 23  ;;  %5420 = vmatprep.subr.mxu1 %v15297_v53  ;;  %v14117_v51 = vand.u32 4294901760, %v12684_v42  ;;  %v15298_v11 = vld [vmem:[#allocation96_spill] sm:$0xff]  ;;  %v14118_v55 = vand.u32 4294901760, %v12698_v45  ;;  %v14119_v26 = vand.u32 4294901760, %v12701_v2 }
 0x2cf   :  { %5330 = vmatpush1.msra.mxu0 %v15294_v29  ;;  %5422 = vmatpush1.msra.mxu1 %v15298_v11  ;;  %v15299_v53 = vld [vmem:[#allocation20_spill] sm:$0xff]  ;;  %v6748_v20 = vor.u32 8388608, %v6747_v35  ;;  %vm6751_vm14 = vcmp.gt.s32.totalorder %v6750_v1, 0  ;;  %v14123_v62 = vand.u32 2147483647, %v12672_v17  ;;  %v12740_v61 = vsub.f32 %v119_v13, %v12709_v57  ;;  %v15303_v35 = vld [vmem:[#allocation59_spill] sm:$0xff] }
 0x2d0   :  { %5365 = vmatmul.mubr.f32.vlgmr.msra.gmra.mxu0 %v15296_v40  ;;  %7829 = vmatprep.subr.mxu0 %v15178_v19  ;;  %v7703_v29 = vadd.s32 4294967169, %v6848_v3  ;;  %v15301_v3 = vld [vmem:[#allocation25_spill] sm:$0xff]  ;;  %v6752_v11 = vsel %vm6751_vm14, %v6750_v1, 0  ;;  %v12748_v50 = vsub.f32 %v106_v14, %v12719_v48  ;;  %v15304_v1 = vld [vmem:[#allocation71_spill] sm:$0xff]  ;;  %v12763_v14 = vsub.f32 %v93_v5, %v12732_v52 }
 0x2d1   :  { %7830 = vmatpush3.msra.mxu0 %v15299_v53  ;;  %5424 = vmatprep.subr.mxu1 %v15300_v58  ;;  %v15302_v58 = vld [vmem:[#allocation92_spill] sm:$0xff]  ;;  %v12752_v44 = vshrl.u32 %v6752_v11, 5  ;;  %v6754_v13 = vand.u32 31, %v6752_v11  ;;  %v12771_v11 = vand.u32 4294901760, %v12742_v0  ;;  %v15307_v5 = vmov 683565275  }
 0x2d2   :  { %7831 = vmatprep.subr.mxu0 %v15178_v19  ;;  %5426 = vmatpush1.msra.mxu1 %v15301_v3  ;;  %v6854_v37 = vadd.s32 1, %v7703_v29  ;;  %v12758_v3 = vsub.f32 %v12684_v42, %v14117_v51  ;;  %v12768_v29 = vsub.f32 %v12698_v45, %v14118_v55  ;;  %v15305_v51 = vld [vmem:[#allocation85_spill] sm:$0xff]  ;;  %v12781_v21 = vshll.u32 %v6748_v20, 8 }
 0x2d3   :  { %7832 = vmatpush3.msra.mxu0 %v15302_v58  ;;  %5428 = vmatprep.subr.mxu1 %v15303_v35  ;;  %v12776_v35 = vsub.f32 %v12701_v2, %v14119_v26  ;;  %v6757_v49 = vshll.u32 %v15307_v5, %v6754_v13  ;;  %v12785_v55 = vand.u32 8388607, %v14123_v62  ;;  %v15309_v38 = vmov 2475754826  }
 0x2d4   :  { %7833 = vmatprep.subr.mxu0 %v15178_v19  ;;  %5430 = vmatpush1.msra.mxu1 %v15304_v1  ;;  %v6755_v1 = vsub.s32 32, %v6754_v13  ;;  %v6760_v26 = vshll.u32 %v15309_v38, %v6754_v13  ;;  %v15310_v6 = vmov 2131351028   ;;  %v15311_v46 = vmov 2102212464  }
 0x2d5   :  { %7834 = vmatpush3.msra.mxu0 %v15305_v51  ;;  %5432 = vmatprep.subr.mxu1 %v15306_v18  ;;  %v6763_v41 = vshll.u32 %v15310_v6, %v6754_v13  ;;  %v6766_v2 = vshll.u32 %v15311_v46, %v6754_v13  ;;  %vm6855_vm15 = vcmp.gt.s32.totalorder %v6854_v37, 0  ;;  %v15312_v62 = vmov 920167782  }
 0x2d6   :  { %7835 = vmatprep.subr.mxu0 %v15178_v19  ;;  %5434 = vmatpush1.msra.mxu1 %v15308_v24  ;;  %v6758_v20 = vshrl.u32 %v15309_v38, %v6755_v1  ;;  %v6761_v18 = vshrl.u32 %v15310_v6, %v6755_v1  ;;  %v6769_v17 = vshll.u32 %v15312_v62, %v6754_v13  ;;  %vm6772_vm0 = vcmp.lt.s32.totalorder %v12752_v44, 1 }
 0x2d7   :  { %7836 = vmatpush3.msra.mxu0 %v12536_v12  ;;  %v6764_v24 = vshrl.u32 %v15311_v46, %v6755_v1  ;;  %v6767_v45 = vshrl.u32 %v15312_v62, %v6755_v1  ;;  %v15313_v42 = vmov 1326507024   ;;  %vm6773_vm1 = vcmp.lt.s32.totalorder %v12752_v44, 2  ;;  %5469 = vmatmul.mubr.f32.vlgmr.msra.gmra.mxu1 %v15296_v40 }
 0x2d8   :  { %v6770_v4 = vshrl.u32 %v15313_v42, %v6755_v1  ;;  %7837 = vmatprep.subr.mxu0 %v15178_v19  ;;  %v6756_v27 = vshrl.u32 %v15307_v5, %v6755_v1  ;;  %v6759_v12 = vor.u32 %v6758_v20, %v6757_v49  ;;  %v6762_v16 = vor.u32 %v6761_v18, %v6760_v26 }
 0x2d9   :  { %7864 = vmatprep.subr.mxu1 %v15178_v19  ;;  %7838 = vmatpush3.msra.mxu0 %v12560_v59  ;;  %v6856_v13 = vsel %vm6855_vm15, %v6854_v37, 0  ;;  %v6765_v51 = vor.u32 %v6764_v24, %v6763_v41  ;;  %v6768_v31 = vor.u32 %v6767_v45, %v6766_v2  ;;  %vm6774_vm2 = vcmp.lt.s32.totalorder %v12752_v44, 3 }
 0x2da   :  { %v6771_v58 = vor.u32 %v6770_v4, %v6769_v17  ;;  %v15314_v47 = vand.u32 4294901760, %v12554_v56  ;;  %7839 = vmatprep.subr.mxu0 %v15178_v19  ;;  %vm6775_vm3 = vcmp.lt.s32.totalorder %v12752_v44, 4  ;;  %v6776_v49 = vsel %vm6772_vm0, %v6756_v27, %v6759_v12 }
 0x2db   :  { %v6780_v26 = vsel %vm6772_vm0, %v6759_v12, %v6762_v16  ;;  %v6858_v1 = vand.u32 31, %v6856_v13  ;;  %7840 = vmatpush3.msra.mxu0 %v12562_v32  ;;  %v6777_v37 = vsel %vm6775_vm3, %v6765_v51, 2102212464  ;;  %v6781_v4 = vsel %vm6775_vm3, %v6768_v31, 920167782 }
 0x2dc   :  { %7865 = vmatpush3.msra.mxu1 %v15314_v47  ;;  %v6784_v56 = vsel %vm6772_vm0, %v6762_v16, %v6765_v51  ;;  %v6785_v47 = vsel %vm6775_vm3, %v6771_v58, 1326507024  ;;  %v15315_v41 = vand.u32 4294901760, %v12582_v54  ;;  %7841 = vmatprep.subr.mxu0 %v15178_v19  ;;  %v6778_v27 = vsel %vm6774_vm2, %v6762_v16, %v6777_v37 }
 0x2dd   :  { %7866 = vmatprep.subr.mxu1 %v15178_v19  ;;  %v6782_v12 = vsel %vm6774_vm2, %v6765_v51, %v6781_v4  ;;  %v6786_v17 = vsel %vm6774_vm2, %v6768_v31, %v6785_v47  ;;  %v6859_v45 = vsub.s32 32, %v6858_v1  ;;  %7842 = vmatpush3.msra.mxu0 %v12573_v8  ;;  %v6852_v58 = vor.u32 8388608, %v12785_v55 }
 0x2de   :  { %7867 = vmatpush3.msra.mxu1 %v15315_v41  ;;  %v6783_v54 = vsel %vm6773_vm1, %v6780_v26, %v6782_v12  ;;  %v6787_v2 = vsel %vm6773_vm1, %v6784_v56, %v6786_v17  ;;  %v12837_v16 = vshrl.u32 %v6856_v13, 5  ;;  %v15316_v51 = vand.u32 4294901760, %v12621_v7  ;;  %7843 = vmatprep.subr.mxu0 %v15178_v19 }
 0x2df   :  { %7868 = vmatprep.subr.mxu1 %v15178_v19  ;;  %v12842_v31 = vmul.u32.u64.low %v12781_v21, %v6787_v2  ;;  %v12843_v20 = vmul.u32.u64.high %v12781_v21, %v6787_v2, %v12842_v31  ;;  %v12846_v18 = vmul.u32.u64.low %v12781_v21, %v6783_v54  ;;  %v12847_v24 = vmul.u32.u64.high %v12781_v21, %v6783_v54, %v12846_v18  ;;  %7844 = vmatpush3.msra.mxu0 %v12598_v36 }
 0x2e0   :  { %7869 = vmatpush3.msra.mxu1 %v15316_v51  ;;  %v6779_v55 = vsel %vm6773_vm1, %v6776_v49, %v6778_v27  ;;  %v6861_v13 = vshll.u32 %v15307_v5, %v6858_v1  ;;  %v6862_v7 = vshrl.u32 %v15309_v38, %v6859_v45  ;;  %v6864_v26 = vshll.u32 %v15309_v38, %v6858_v1 }
 0x2e1   :  { %7870 = vmatprep.subr.mxu1 %v15178_v19  ;;  %v6865_v37 = vshrl.u32 %v15310_v6, %v6859_v45  ;;  %v6867_v4 = vshll.u32 %v15310_v6, %v6858_v1  ;;  %v6868_v56 = vshrl.u32 %v15311_v46, %v6859_v45  ;;  %v6870_v47 = vshll.u32 %v15311_v46, %v6858_v1 }
 0x2e2   :  { %v15317_v41 = vand.u32 4294901760, %v12649_v9  ;;  %v6863_v44 = vor.u32 %v6862_v7, %v6861_v13  ;;  %v6871_v49 = vshrl.u32 %v15312_v62, %v6859_v45  ;;  %v6873_v27 = vshll.u32 %v15312_v62, %v6858_v1  ;;  %7845 = vmatprep.subr.mxu0 %v15178_v19 }
 0x2e3   :  { %v6874_v12 = vshrl.u32 %v15313_v42, %v6859_v45  ;;  %v6795_v17 = vmul.u32 %v12781_v21, %v6779_v55  ;;  %vm6797_vm4 = vc.u32 %v12843_v20, %v12846_v18  ;;  %v6798_v54 = vadd.s32 1, %v12847_v24  ;;  %7846 = vmatpush3.msra.mxu0 %v12606_v15 }
 0x2e4   :  { %7871 = vmatpush3.msra.mxu1 %v15317_v41  ;;  %v6866_v2 = vor.u32 %v6865_v37, %v6864_v26  ;;  %v6869_v9 = vor.u32 %v6868_v56, %v6867_v4  ;;  %v6872_v51 = vor.u32 %v6871_v49, %v6870_v47  ;;  %v15318_v1 = vand.u32 4294901760, %v12664_v60  ;;  %7847 = vmatprep.subr.mxu0 %v15178_v19 }
 0x2e5   :  { %7872 = vmatprep.subr.mxu1 %v15178_v19  ;;  %v6875_v31 = vor.u32 %v6874_v12, %v6873_v27  ;;  %v5634_v21 = vand.u32 4294901760, %v12758_v3  ;;  %v6799_v55 = vsel %vm6797_vm4, %v6798_v54, %v12847_v24  ;;  %v6860_v13 = vshrl.u32 %v15307_v5, %v6859_v45  ;;  %7848 = vmatpush3.msra.mxu0 %v12640_v39 }
 0x2e6   :  { %7873 = vmatpush3.msra.mxu1 %v15318_v1  ;;  %vm6876_vm5 = vcmp.lt.s32.totalorder %v12837_v16, 1  ;;  %v12881_v7 = vshll.u32 %v6852_v58, 8  ;;  %v6800_v26 = vadd.s32 %v6799_v55, %v6795_v17  ;;  %vm6878_vm6 = vcmp.lt.s32.totalorder %v12837_v16, 3  ;;  %7849 = vmatprep.subr.mxu0 %v15178_v19 }
 0x2e7   :  { %7874 = vmatprep.subr.mxu1 %v15178_v19  ;;  %vm6879_vm7 = vcmp.lt.s32.totalorder %v12837_v16, 4  ;;  %v6884_v60 = vsel %vm6876_vm5, %v6863_v44, %v6866_v2  ;;  %v15319_v3 = vand.u32 4294901760, %v12677_v23  ;;  %v6888_v24 = vsel %vm6876_vm5, %v6866_v2, %v6869_v9  ;;  %7850 = vmatpush3.msra.mxu0 %v12651_v10 }
 0x2e8   :  { %v6881_v45 = vsel %vm6879_vm7, %v6869_v9, 2102212464  ;;  %v6885_v58 = vsel %vm6879_vm7, %v6872_v51, 920167782  ;;  %v6889_v37 = vsel %vm6879_vm7, %v6875_v31, 1326507024  ;;  %7851 = vmatprep.subr.mxu0 %v15178_v19  ;;  %v6880_v41 = vsel %vm6876_vm5, %v6860_v13, %v6863_v44 }
 0x2e9   :  { %7875 = vmatpush3.msra.mxu1 %v15319_v3  ;;  %v6801_v4 = vadd.s32 536870912, %v6800_v26  ;;  %vm6877_vm8 = vcmp.lt.s32.totalorder %v12837_v16, 2  ;;  %v6886_v56 = vsel %vm6878_vm6, %v6869_v9, %v6885_v58  ;;  %v6890_v23 = vsel %vm6878_vm6, %v6872_v51, %v6889_v37  ;;  %7852 = vmatpush3.msra.mxu0 %v12653_v63 }
 0x2ea   :  { %7876 = vmatprep.subr.mxu1 %v15178_v19  ;;  %v15320_v47 = vand.u32 4294901760, %v12689_v25  ;;  %v6887_v49 = vsel %vm6877_vm8, %v6884_v60, %v6886_v56  ;;  %v6891_v27 = vsel %vm6877_vm8, %v6888_v24, %v6890_v23  ;;  %v5653_v12 = vand.u32 4294901760, %v12740_v61  ;;  %7853 = vmatprep.subr.mxu0 %v15178_v19 }
 0x2eb   :  { %v12913_v17 = vshrl.u32 %v6801_v4, 30  ;;  %v6882_v25 = vsel %vm6878_vm6, %v6866_v2, %v6881_v45  ;;  %v12918_v54 = vmul.u32.u64.low %v12881_v7, %v6891_v27  ;;  %v12919_v44 = vmul.u32.u64.high %v12881_v7, %v6891_v27, %v12918_v54  ;;  %7854 = vmatpush3.msra.mxu0 %v12709_v57  ;;  %v15324_v27 = vld [vmem:[#allocation83_spill] sm:$0xff] }
 0x2ec   :  { %7877 = vmatpush3.msra.mxu1 %v15320_v47  ;;  %v15321_v9 = vand.u32 4294901760, %v12717_v22  ;;  %v12925_v51 = vmul.u32.u64.low %v12881_v7, %v6887_v49  ;;  %v12926_v31 = vmul.u32.u64.high %v12881_v7, %v6887_v49, %v12925_v51  ;;  %v12933_v2 = vsub.f32 %v12742_v0, %v12771_v11  ;;  %7855 = vmatprep.subr.mxu0 %v15178_v19 }
 0x2ed   :  { %7878 = vmatprep.subr.mxu1 %v15178_v19  ;;  %v5660_v1 = vand.u32 4294901760, %v12748_v50  ;;  %v6803_v22 = vshll.u32 %v12913_v17, 30  ;;  %v15322_v55 = vand.u32 4294901760, %v12727_v34  ;;  %v5641_v13 = vand.u32 4294901760, %v12768_v29  ;;  %7856 = vmatpush3.msra.mxu0 %v12719_v48 }
 0x2ee   :  { %7879 = vmatpush3.msra.mxu1 %v15321_v9  ;;  %v6883_v60 = vsel %vm6877_vm8, %v6880_v41, %v6882_v25  ;;  %v5654_v0 = vsub.f32 %v12740_v61, %v5653_v12  ;;  %v5667_v3 = vand.u32 4294901760, %v12763_v14  ;;  %vm6901_vm9 = vc.u32 %v12919_v44, %v12925_v51  ;;  %7857 = vmatprep.subr.mxu0 %v15178_v19  ;;  %v15323_v41 = vld [vmem:[#allocation38_spill] sm:$0xff] }
 0x2ef   :  { %7880 = vmatprep.subr.mxu1 %v15178_v19  ;;  %v12949_v45 = vsub.s32 %v6800_v26, %v6803_v22  ;;  %v5648_v34 = vand.u32 4294901760, %v12776_v35  ;;  %v6902_v29 = vadd.s32 1, %v12926_v31  ;;  %v5661_v16 = vsub.f32 %v12748_v50, %v5660_v1  ;;  %7858 = vmatpush3.msra.mxu0 %v12732_v52 }
 0x2f0   :  { %7881 = vmatpush3.msra.mxu1 %v15322_v55  ;;  %v5674_v58 = vand.u32 4294901760, %v12933_v2  ;;  %v6899_v24 = vmul.u32 %v12881_v7, %v6883_v60  ;;  %7859 = vmatprep.subr.mxu0 %v15178_v19  ;;  %v5668_v37 = vsub.f32 %v12763_v14, %v5667_v3  ;;  %vm8286_vm10 = vmmov 0  }
 0x2f1   :  { %7882 = vmatprep.subr.mxu1 %v15178_v19  ;;  %v6806_v26 = vsub.s32 0, %v12949_v45  ;;  %v6903_v35 = vsel %vm6901_vm9, %v6902_v29, %v12926_v31  ;;  %7860 = vmatpush3.msra.mxu0 %v12771_v11  ;;  %v5662_v7 = vand.u32 4294901760, %v5661_v16 }
 0x2f2   :  { %7883 = vmatpush3.msra.mxu1 %v5634_v21  ;;  %v5655_v21 = vand.u32 4294901760, %v5654_v0  ;;  %v6904_v56 = vadd.s32 %v6903_v35, %v6899_v24  ;;  %7861 = vmatprep.mubr.msk.f32.mxu0 %vm8286_vm10, %v15178_v19  ;;  %v5675_v23 = vsub.f32 %v12933_v2, %v5674_v58  ;;  %v5669_v25 = vand.u32 4294901760, %v5668_v37  ;;  %v15326_v37 = vld [vmem:[#allocation92_spill] sm:$0xff] }
 0x2f3   :  { %7884 = vmatprep.subr.mxu1 %v15178_v19  ;;  %v7700_v4 = vmin.u32 %v6806_v26, %v12949_v45  ;;  %7899 = vmatprep.subr.mxu0 %v15178_v19 }
 0x2f4   :  { %7885 = vmatpush3.msra.mxu1 %v5641_v13  ;;  %7862 = vmatmul.mubr.f32.vlgmr.msra.gmra.mxu0 %v15323_v41  ;;  %v6905_v49 = vadd.s32 536870912, %v6904_v56  ;;  %v5676_v31 = vand.u32 4294901760, %v5675_v23  ;;  %v6796_v13 = vadd.s32 %v12846_v18, %v12843_v20  ;;  %v15327_v23 = vld [vmem:[#allocation90_spill] sm:$0xff] }
 0x2f5   :  { %7886 = vmatprep.subr.mxu1 %v15178_v19  ;;  %v6808_v47 = vclz %v7700_v4  ;;  %7900 = vmatpush3.msra.mxu0 %v15324_v27 }
 0x2f6   :  { %7887 = vmatpush3.msra.mxu1 %v5648_v34  ;;  %7901 = vmatprep.subr.mxu0 %v15178_v19  ;;  %v12983_v9 = vshrl.u32 %v6905_v49, 30 }
 0x2f7   :  { %7888 = vmatprep.subr.mxu1 %v15178_v19  ;;  %v7701_v54 = vadd.s32 4294967294, %v6808_v47  ;;  %7902 = vmatpush3.msra.mxu0 %v12524_v28  ;;  %v15328_v47 = vld [vmem:[#allocation85_spill] sm:$0xff] }
 0x2f8   :  { %7889 = vmatpush3.msra.mxu1 %v5655_v21  ;;  %7903 = vmatprep.subr.mxu0 %v15178_v19  ;;  %v6907_v55 = vshll.u32 %v12983_v9, 30  ;;  %v15325_v21 = vld [vmem:[#allocation62_spill] sm:$0xff] }
 0x2f9   :  { %7890 = vmatprep.subr.mxu1 %v15178_v19  ;;  %vm7702_vm11 = vcmp.lt.s32.totalorder %v7701_v54, 0  ;;  %7904 = vmatpush3.msra.mxu0 %v12549_v30 }
 0x2fa   :  { %7891 = vmatpush3.msra.mxu1 %v5662_v7  ;;  %v6811_v22 = vsel %vm7702_vm11, 0, %v7701_v54  ;;  %7905 = vmatprep.subr.mxu0 %v15178_v19  ;;  %v12994_v34 = vsub.s32 %v6904_v56, %v6907_v55  ;;  %v15330_v54 = vld [vmem:[#allocation42_spill] sm:$0xff] }
 0x2fb   :  { %7892 = vmatprep.subr.mxu1 %v15178_v19  ;;  %v6812_v60 = vsub.s32 32, %v6811_v22  ;;  %v6816_v0 = vsub.s32 4294967266, %v6811_v22  ;;  %7896 = vmatprep.mubr.msk.f32.mxu1 %vm8286_vm10, %v15178_v19  ;;  %v6813_v29 = vshll.u32 %v12949_v45, %v6811_v22 }
 0x2fc   :  { %7893 = vmatpush3.msra.mxu1 %v5669_v25  ;;  %7906 = vmatpush3.msra.mxu0 %v12568_v33  ;;  %v6910_v20 = vsub.s32 0, %v12994_v34  ;;  %v15329_v25 = vld [vmem:[#allocation64_spill] sm:$0xff] }
 0x2fd   :  { %7894 = vmatprep.subr.mxu1 %v15178_v19  ;;  %v6814_v16 = vshrl.u32 %v6796_v13, %v6812_v60  ;;  %v6817_v26 = vadd.s32 127, %v6816_v0  ;;  %7907 = vmatprep.subr.mxu0 %v15178_v19  ;;  %v15332_v13 = vld [vmem:[#allocation100_spill] sm:$0xff]  ;;  %v6826_v60 = vsub.s32 4, %v12913_v17  ;;  %v6900_v0 = vadd.s32 %v12925_v51, %v12919_v44 }
 0x2fe   :  { %7895 = vmatpush3.msra.mxu1 %v5676_v31  ;;  %7908 = vmatpush3.msra.mxu0 %v12589_v43  ;;  %v7704_v45 = vmin.u32 %v6910_v20, %v12994_v34  ;;  %v15331_v31 = vld [vmem:[#allocation40_spill] sm:$0xff] }
 0x2ff   :  { %7897 = vmatmul.mubr.f32.vlgmr.msra.gmra.mxu1 %v15296_v40  ;;  %7934 = vmatprep.subr.mxu1 %v15178_v19  ;;  %v6815_v18 = vor.u32 %v6814_v16, %v6813_v29  ;;  %v6818_v24 = vshll.u32 %v6817_v26, 23  ;;  %vm6742_vm13 = vcmp.lt.s32.totalorder %v15331_v31, 0  ;;  %v15333_v26 = vand.u32 2147483647, %v15331_v31 }
 0x300   :  { %7935 = vmatpush3.msra.mxu1 %v15299_v53  ;;  %7909 = vmatprep.subr.mxu0 %v15178_v19  ;;  %v6912_v4 = vclz %v7704_v45  ;;  %vm6832_vm4 = vweird.f32 %v15331_v31 }
 0x301   :  { %7936 = vmatprep.subr.mxu1 %v15178_v19  ;;  %v6819_v35 = vor.u32 4788187, %v6818_v24  ;;  %7910 = vmatpush3.msra.mxu0 %v15325_v21  ;;  %v6822_v7 = vcvt.s32.f32 %v6815_v18  ;;  %vm13031_vm14 = vcmp.le.f32.partialorder %v15333_v26, 0.7853982  ;;  %v15336_v24 = vld [vmem:[#allocation72_spill] sm:$0xff]  ;;  %v6930_v26 = vsub.s32 4, %v12983_v9 }
 0x302   :  { %7937 = vmatpush3.msra.mxu1 %v15326_v37  ;;  %7911 = vmatprep.subr.mxu0 %v15178_v19  ;;  %v7705_v41 = vadd.s32 4294967294, %v6912_v4  ;;  %v15337_v4 = vld [vmem:[#allocation36_spill] sm:$0xff] }
 0x303   :  { %7938 = vmatprep.subr.mxu1 %v15178_v19  ;;  %v6820_v56 = vand.u32 2147483647, %v6819_v35  ;;  %7912 = vmatpush3.msra.mxu0 %v15327_v23 }
 0x304   :  { %7939 = vmatpush3.msra.mxu1 %v15328_v47  ;;  %7913 = vmatprep.subr.mxu0 %v15178_v19  ;;  %vm7706_vm12 = vcmp.lt.s32.totalorder %v7705_v41, 0 }
 0x305   :  { %7940 = vmatprep.subr.mxu1 %v15178_v19  ;;  %v6823_v49 = vmul.f32 %v6822_v7, %v6820_v56  ;;  %7914 = vmatpush3.msra.mxu0 %v15329_v25  ;;  %v6915_v55 = vsel %vm7706_vm12, 0, %v7705_v41  ;;  %v6827_v56 = vsel %vm6742_vm13, %v6826_v60, %v12913_v17 }
 0x306   :  { %7941 = vmatpush3.msra.mxu1 %v15330_v54  ;;  %7915 = vmatprep.subr.mxu0 %v15178_v19  ;;  %v6916_v29 = vsub.s32 32, %v6915_v55  ;;  %v6920_v16 = vsub.s32 4294967266, %v6915_v55  ;;  %v6917_v51 = vshll.u32 %v12994_v34, %v6915_v55  ;;  %v15338_v34 = vld [vmem:[#allocation75_spill] sm:$0xff] }
 0x307   :  { %7942 = vmatprep.subr.mxu1 %v15178_v19  ;;  %v6824_v22 = vxor.u32 2147483648, %v6823_v49  ;;  %7916 = vmatpush3.msra.mxu0 %v15332_v13 }
 0x308   :  { %7943 = vmatpush3.msra.mxu1 %v12560_v59  ;;  %7917 = vmatprep.subr.mxu0 %v15178_v19  ;;  %v6918_v45 = vshrl.u32 %v6900_v0, %v6916_v29  ;;  %v6921_v35 = vadd.s32 127, %v6920_v16  ;;  %v15339_v16 = vld [vmem:[#allocation23_spill] sm:$0xff] }
 0x309   :  { %7944 = vmatprep.subr.mxu1 %v15178_v19  ;;  %v6825_v18 = vsel %vm6742_vm13, %v6824_v22, %v6823_v49  ;;  %7918 = vmatpush3.msra.mxu0 %v15336_v24  ;;  %v6829_v22 = vsel %vm13031_vm14, 0, %v6827_v56  ;;  %vm6846_vm15 = vcmp.lt.s32.totalorder %v15339_v16, 0  ;;  %vm6936_vm8 = vweird.f32 %v15339_v16 }
 0x30a   :  { %7945 = vmatpush3.msra.mxu1 %v12562_v32  ;;  %v6828_v44 = vsel %vm13031_vm14, %v15331_v31, %v6825_v18  ;;  %7919 = vmatprep.subr.mxu0 %v15178_v19  ;;  %v6919_v7 = vor.u32 %v6918_v45, %v6917_v51  ;;  %v6922_v41 = vshll.u32 %v6921_v35, 23  ;;  %v6833_v60 = vadd.s32 3, %v6829_v22  ;;  %v15343_v45 = vld [vmem:[#allocation34_spill] sm:$0xff]  ;;  %v15350_v31 = vld [vmem:[#allocation35_spill] sm:$0xff] }
 0x30b   :  { %7946 = vmatprep.subr.mxu1 %v15178_v19  ;;  %8130 = vcosq.f32 %v6828_v44  ;;  %7920 = vmatpush3.msra.mxu0 %v15337_v4  ;;  %v15340_v18 = vand.u32 2147483647, %v15339_v16  ;;  %v6931_v22 = vsel %vm6846_vm15, %v6930_v26, %v12983_v9 }
 0x30c   :  { %7947 = vmatpush3.msra.mxu1 %v12573_v8  ;;  %8132 = vsinq.f32 %v6828_v44  ;;  %7921 = vmatprep.subr.mxu0 %v15178_v19  ;;  %v6923_v49 = vor.u32 4788187, %v6922_v41  ;;  %v6926_v55 = vcvt.s32.f32 %v6919_v7  ;;  %v6834_v20 = vand.u32 3, %v6833_v60  ;;  %v15347_v60 = vld [vmem:[#allocation39_spill] sm:$0xff] }
 0x30d   :  { %7948 = vmatprep.subr.mxu1 %v15178_v19  ;;  %7922 = vmatpush3.msra.mxu0 %v15338_v34  ;;  %vm13077_vm0 = vcmp.le.f32.partialorder %v15340_v18, 0.7853982  ;;  %v15344_v7 = vand.u32 4294901760, %v15324_v27  ;;  %v15346_v27 = vld [vmem:[#allocation37_spill] sm:$0xff]  ;;  %v15348_v18 = vand.u32 4294901760, %v12549_v30  ;;  %v15349_v30 = vand.u32 4294901760, %v12568_v33 }
 0x30e   :  { %7949 = vmatpush3.msra.mxu1 %v12598_v36  ;;  %7923 = vmatprep.subr.mxu0 %v15178_v19  ;;  %v6924_v17 = vand.u32 2147483647, %v6923_v49  ;;  %vm6839_vm1 = vcmp.eq.s32.totalorder %v6834_v20, 2  ;;  %vm6836_vm2 = vcmp.eq.s32.totalorder %v6834_v20, 0  ;;  %vm6835_vm3 = vcmp.lt.s32.totalorder %v6834_v20, 2 }
 0x30f   :  { %7950 = vmatprep.subr.mxu1 %v15178_v19  ;;  %7924 = vmatpush3.msra.mxu0 %v12740_v61  ;;  %v6933_v26 = vsel %vm13077_vm0, 0, %v6931_v22  ;;  %v15353_v22 = vand.u32 4294901760, %v12589_v43 }
 0x310   :  { %7951 = vmatpush3.msra.mxu1 %v12606_v15  ;;  %7925 = vmatprep.subr.mxu0 %v15178_v19  ;;  %v6927_v0 = vmul.f32 %v6926_v55, %v6924_v17  ;;  %v15345_v55 = vand.u32 4294901760, %v12524_v28  ;;  %v6937_v44 = vadd.s32 3, %v6933_v26  ;;  %v15356_v26 = vand.u32 4294901760, %v15327_v23 }
 0x311   :  { %7952 = vmatprep.subr.mxu1 %v15178_v19  ;;  %7926 = vmatpush3.msra.mxu0 %v12748_v50 }
 0x312   :  { %7953 = vmatpush3.msra.mxu1 %v12640_v39  ;;  %7927 = vmatprep.subr.mxu0 %v15178_v19  ;;  %v6928_v29 = vxor.u32 2147483648, %v6927_v0  ;;  %v6938_v33 = vand.u32 3, %v6937_v44 }
 0x313   :  { %7954 = vmatprep.subr.mxu1 %v15178_v19  ;;  %7928 = vmatpush3.msra.mxu0 %v12763_v14 }
 0x314   :  { %7955 = vmatpush3.msra.mxu1 %v12651_v10  ;;  %7929 = vmatprep.subr.mxu0 %v15178_v19  ;;  %v6929_v51 = vsel %vm6846_vm15, %v6928_v29, %v6927_v0  ;;  %v7581_v0 = vrot.slane %v15347_v60, %v15346_v27  ;;  %v15354_v27 = vand.u32 4294901760, %v15325_v21  ;;  %vm6943_vm5 = vcmp.eq.s32.totalorder %v6938_v33, 2 }
 0x315   :  { %7956 = vmatprep.subr.mxu1 %v15178_v19  ;;  %7930 = vmatpush3.msra.mxu0 %v12933_v2  ;;  %v6932_v35 = vsel %vm13077_vm0, %v15339_v16, %v6929_v51  ;;  %vm6940_vm6 = vcmp.eq.s32.totalorder %v6938_v33, 0  ;;  %vm6939_vm7 = vcmp.lt.s32.totalorder %v6938_v33, 2  ;;  %v15360_v33 = vand.u32 4294901760, %v15336_v24 }
 0x316   :  { %7931 = vmatprep.mubr.msk.f32.mxu0 %vm8286_vm10, %v15178_v19  ;;  %7957 = vmatpush3.msra.mxu1 %v12653_v63  ;;  %8134 = vcosq.f32 %v6932_v35 }
 0x317   :  { %7932 = vmatmul.mubr.f32.vlgmr.msra.gmra.mxu0 %v15343_v45  ;;  %7958 = vmatprep.subr.mxu1 %v15178_v19  ;;  %8136 = vsinq.f32 %v6932_v35  ;;  %v13113_v45 = vld [vmem:[#allocation7 + $0x8] sm:$0x1f]  ;;  %v3868_v35 = vpop.f32.mrf.mxu0 }
 0x318   :  { %7969 = vmatprep.subr.mxu0 %v15178_v19  ;;  %v8131_v56 = vpop.eup %8130  ;;  %7959 = vmatpush3.msra.mxu1 %v12709_v57 }
 0x319   :  { %7970 = vmatpush3.msra.mxu0 %v15344_v7  ;;  %v8133_v41 = vpop.eup %8132  ;;  %v6840_v49 = vxor.u32 2147483648, %v8131_v56  ;;  %7960 = vmatprep.subr.mxu1 %v15178_v19 }
 0x31a   :  { %7971 = vmatprep.subr.mxu0 %v15178_v19  ;;  %v6837_v17 = vxor.u32 2147483648, %v8133_v41  ;;  %7961 = vmatpush3.msra.mxu1 %v12719_v48 }
 0x31b   :  { %7972 = vmatpush3.msra.mxu0 %v15345_v55  ;;  %v6841_v29 = vsel %vm6839_vm1, %v6840_v49, %v8133_v41  ;;  %7962 = vmatprep.subr.mxu1 %v15178_v19  ;;  %v15352_v41 = vld [vmem:[#allocation56_spill] sm:$0xff]  ;;  %v4100_v55 = vpop.f32.mrf.mxu1 }
 0x31c   :  { %7973 = vmatprep.subr.mxu0 %v15178_v19  ;;  %v6838_v9 = vsel %vm6836_vm2, %v8131_v56, %v6837_v17  ;;  %7963 = vmatpush3.msra.mxu1 %v12732_v52  ;;  %v15351_v56 = vld [vmem:[#allocation55_spill] sm:$0xff]  ;;  %v315_v49 = vrot.slane %v13113_v45, %v15352_v41  ;;  %v3870_v17 = vpop.f32.mrf.mxu0 }
 0x31d   :  { %7974 = vmatpush3.msra.mxu0 %v15348_v18  ;;  %v6842_v28 = vsel %vm6835_vm3, %v6838_v9, %v6841_v29  ;;  %7964 = vmatprep.subr.mxu1 %v15178_v19  ;;  %v4102_v44 = vpop.f32.mrf.mxu1 }
 0x31e   :  { %7975 = vmatprep.subr.mxu0 %v15178_v19  ;;  %v6843_v51 = vsel %vm6832_vm4, nan, %v6842_v28  ;;  %7965 = vmatpush3.msra.mxu1 %v12771_v11  ;;  %v4237_v9 = vpop.f32.mrf.mxu0  ;;  %v15357_v28 = vld [vmem:[#allocation17_spill] sm:$0xff] }
 0x31f   :  { %7966 = vmatprep.mubr.msk.f32.mxu1 %vm8286_vm10, %v15178_v19  ;;  %v7625_v20 = vmul.f32 %v7581_v0, %v6843_v51  ;;  %7976 = vmatpush3.msra.mxu0 %v15349_v30  ;;  %v15355_v0 = vld [vmem:[#allocation60_spill] sm:$0xff]  ;;  %v7585_v23 = vrot.slane %v15347_v60, %v15357_v28 }
 0x320   :  { %7967 = vmatmul.mubr.f32.vlgmr.msra.gmra.mxu1 %v15350_v31  ;;  %7977 = vmatprep.subr.mxu0 %v15178_v19  ;;  %v319_v29 = vrot.slane %v13113_v45, %v15355_v0 }
 0x321   :  { %8004 = vmatprep.subr.mxu1 %v15178_v19  ;;  %v7638_v7 = vadd.f32 %v7625_v20, %v15351_v56  ;;  %7978 = vmatpush3.msra.mxu0 %v15353_v22 }
 0x322   :  { %8005 = vmatpush3.msra.mxu1 %v15299_v53  ;;  %7979 = vmatprep.subr.mxu0 %v15178_v19  ;;  %v3869_v53 = vadd.f32 %v3868_v35, %v315_v49  ;;  %v15358_v35 = vand.u32 4294901760, %v15329_v25  ;;  %v3871_v30 = vadd.f32 %v3870_v17, %v319_v29  ;;  %v4343_v49 = vpop.f32.mrf.mxu1  ;;  %v15359_v25 = vand.u32 4294901760, %v15332_v13 }
 0x323   :  { %8006 = vmatprep.subr.mxu1 %v15178_v19  ;;  %7651 = vst [vmem:[#allocation10 + $0x30] sm:$0xff] %v7638_v7  ;;  %7980 = vmatpush3.msra.mxu0 %v15354_v27  ;;  %v8135_v43 = vpop.eup %8134  ;;  %v4239_v7 = vpop.f32.mrf.mxu0 }
 0x324   :  { %8007 = vmatpush3.msra.mxu1 %v15326_v37  ;;  %7981 = vmatprep.subr.mxu0 %v15178_v19  ;;  %v8137_v18 = vpop.eup %8136  ;;  %v6944_v21 = vxor.u32 2147483648, %v8135_v43  ;;  %v8163_v37 = vld [vmem:[#allocation8] sm:$0xff]  ;;  %v4101_v56 = vadd.f32 %v4100_v55, %v3869_v53  ;;  %v4103_v27 = vadd.f32 %v4102_v44, %v3871_v30  ;;  %v4345_v29 = vpop.f32.mrf.mxu1 }
 0x325   :  { %8008 = vmatprep.subr.mxu1 %v15178_v19  ;;  %7982 = vmatpush3.msra.mxu0 %v15356_v26  ;;  %v7503_v51 = vrot.slane %v8163_v37, %v15357_v28  ;;  %v6941_v20 = vxor.u32 2147483648, %v8137_v18  ;;  %v4511_v17 = vpop.f32.mrf.mxu0 }
 0x326   :  { %8009 = vmatpush3.msra.mxu1 %v15328_v47  ;;  %7983 = vmatprep.subr.mxu0 %v15178_v19  ;;  %v6945_v47 = vsel %vm6943_vm5, %v6944_v21, %v8137_v18  ;;  %v4238_v22 = vadd.f32 %v4237_v9, %v4101_v56  ;;  %v4240_v53 = vadd.f32 %v4239_v7, %v4103_v27 }
 0x327   :  { %8010 = vmatprep.subr.mxu1 %v15178_v19  ;;  %7984 = vmatpush3.msra.mxu0 %v15358_v35  ;;  %v6942_v31 = vsel %vm6940_vm6, %v8135_v43, %v6941_v20  ;;  %v7544_v13 = vmul.f32 %v7503_v51, %v15339_v16  ;;  %v15361_v43 = vand.u32 4294901760, %v15337_v4  ;;  %v4513_v9 = vpop.f32.mrf.mxu0 }
 0x328   :  { %8011 = vmatpush3.msra.mxu1 %v15330_v54  ;;  %7985 = vmatprep.subr.mxu0 %v15178_v19  ;;  %v6946_v54 = vsel %vm6939_vm7, %v6942_v31, %v6945_v47  ;;  %v4346_v26 = vadd.f32 %v4345_v29, %v4240_v53 }
 0x329   :  { %8012 = vmatprep.subr.mxu1 %v15178_v19  ;;  %7986 = vmatpush3.msra.mxu0 %v15359_v25  ;;  %v6947_v60 = vsel %vm6936_vm8, nan, %v6946_v54 }
 0x32a   :  { %8013 = vmatpush3.msra.mxu1 %v12560_v59  ;;  %7987 = vmatprep.subr.mxu0 %v15178_v19  ;;  %v7626_v55 = vmul.f32 %v7585_v23, %v6947_v60  ;;  %v4344_v59 = vadd.f32 %v4343_v49, %v4238_v22 }
 0x32b   :  { %8014 = vmatprep.subr.mxu1 %v15178_v19  ;;  %7988 = vmatpush3.msra.mxu0 %v15360_v33 }
 0x32c   :  { %8015 = vmatpush3.msra.mxu1 %v12562_v32  ;;  %7989 = vmatprep.subr.mxu0 %v15178_v19  ;;  %v7639_v24 = vadd.f32 %v7626_v55, %v7544_v13  ;;  %v15362_v32 = vand.u32 4294901760, %v15338_v34  ;;  %v4512_v16 = vadd.f32 %v4511_v17, %v4344_v59 }
 0x32d   :  { %8016 = vmatprep.subr.mxu1 %v15178_v19  ;;  %7990 = vmatpush3.msra.mxu0 %v15361_v43 }
 0x32e   :  { %8017 = vmatpush3.msra.mxu1 %v12573_v8  ;;  %7991 = vmatprep.subr.mxu0 %v15178_v19  ;;  %7652 = vst [vmem:[#allocation10 + $0x38] sm:$0xff] %v7639_v24  ;;  %v4615_v8 = vpop.f32.mrf.mxu1 }
 0x32f   :  { %8018 = vmatprep.subr.mxu1 %v15178_v19  ;;  %7992 = vmatpush3.msra.mxu0 %v15362_v32  ;;  %v13176_v4 = vadd.f32 %v4615_v8, %v4512_v16 }
 0x330   :  { %8019 = vmatpush3.msra.mxu1 %v12598_v36  ;;  %7993 = vmatprep.subr.mxu0 %v15178_v19  ;;  %v4514_v36 = vadd.f32 %v4513_v9, %v4346_v26  ;;  %v4617_v34 = vpop.f32.mrf.mxu1 }
 0x331   :  { %8020 = vmatprep.subr.mxu1 %v15178_v19  ;;  %7994 = vmatpush3.msra.mxu0 %v5653_v12  ;;  %v6948_v18 = vand.u32 2147483647, %v13176_v4  ;;  %v6951_v61 = vand.u32 2139095040, %v13176_v4  ;;  %vm6950_vm7 = vcmp.lt.s32.totalorder %v13176_v4, 0 }
 0x332   :  { %8021 = vmatpush3.msra.mxu1 %v12606_v15  ;;  %7995 = vmatprep.subr.mxu0 %v15178_v19  ;;  %v13187_v15 = vadd.f32 %v4617_v34, %v4514_v36 }
 0x333   :  { %8022 = vmatprep.subr.mxu1 %v15178_v19  ;;  %7996 = vmatpush3.msra.mxu0 %v5660_v1  ;;  %v6952_v12 = vshrl.u32 %v6951_v61, 23  ;;  %vm6949_vm8 = vcmp.le.f32.partialorder %v6948_v18, 0.7853982 }
 0x334   :  { %8023 = vmatpush3.msra.mxu1 %v12640_v39  ;;  %7997 = vmatprep.subr.mxu0 %v15178_v19  ;;  %v6955_v39 = vand.u32 8388607, %v6948_v18  ;;  %v7055_v50 = vand.u32 2139095040, %v13187_v15  ;;  %v7052_v1 = vand.u32 2147483647, %v13187_v15 }
 0x335   :  { %8024 = vmatprep.subr.mxu1 %v15178_v19  ;;  %7998 = vmatpush3.msra.mxu0 %v5667_v3  ;;  %v7707_v14 = vadd.s32 4294967169, %v6952_v12 }
 0x336   :  { %8025 = vmatpush3.msra.mxu1 %v12651_v10  ;;  %7999 = vmatprep.subr.mxu0 %v15178_v19  ;;  %v7056_v10 = vshrl.u32 %v7055_v50, 23  ;;  %v6956_v2 = vor.u32 8388608, %v6955_v39  ;;  %v7059_v21 = vand.u32 8388607, %v7052_v1 }
 0x337   :  { %8026 = vmatprep.subr.mxu1 %v15178_v19  ;;  %8000 = vmatpush3.msra.mxu0 %v5674_v58  ;;  %v6958_v3 = vadd.s32 1, %v7707_v14 }
 0x338   :  { %8001 = vmatprep.mubr.msk.f32.mxu0 %vm8286_vm10, %v15178_v19  ;;  %8027 = vmatpush3.msra.mxu1 %v12653_v63  ;;  %v7711_v58 = vadd.s32 4294967169, %v7056_v10  ;;  %v13214_v20 = vshll.u32 %v6956_v2, 8  ;;  %v7060_v35 = vor.u32 8388608, %v7059_v21 }
 0x339   :  { %8002 = vmatmul.mubr.f32.vlgmr.msra.gmra.mxu0 %v15296_v40  ;;  %8028 = vmatprep.subr.mxu1 %v15178_v19  ;;  %vm6959_vm9 = vcmp.gt.s32.totalorder %v6958_v3, 0 }
 0x33a   :  { %8036 = vmatprep.mubr.msk.f32.mxu1 %vm8286_vm10, %v15178_v19  ;;  %8029 = vmatpush3.msra.mxu1 %v12709_v57  ;;  %v6960_v63 = vsel %vm6959_vm9, %v6958_v3, 0  ;;  %v7062_v37 = vadd.s32 1, %v7711_v58  ;;  %v7100_v16 = vshll.u32 %v7060_v35, 8  ;;  %vm7054_vm9 = vcmp.lt.s32.totalorder %v13187_v15, 0 }
 0x33b   :  { %8030 = vmatprep.subr.mxu1 %v15178_v19  ;;  %v6961_v28 = vshrl.u32 %v6960_v63, 5  ;;  %v6962_v51 = vand.u32 31, %v6960_v63 }
 0x33c   :  { %8031 = vmatpush3.msra.mxu1 %v12719_v48  ;;  %vm7063_vm10 = vcmp.gt.s32.totalorder %v7062_v37, 0 }
 0x33d   :  { %8032 = vmatprep.subr.mxu1 %v15178_v19  ;;  %v6963_v57 = vsub.s32 32, %v6962_v51  ;;  %v6965_v44 = vshll.u32 %v15307_v5, %v6962_v51  ;;  %v6968_v48 = vshll.u32 %v15309_v38, %v6962_v51  ;;  %v6971_v23 = vshll.u32 %v15310_v6, %v6962_v51 }
 0x33e   :  { %8033 = vmatpush3.msra.mxu1 %v12732_v52  ;;  %v6974_v47 = vshll.u32 %v15311_v46, %v6962_v51  ;;  %v6977_v30 = vshll.u32 %v15312_v62, %v6962_v51  ;;  %vm6980_vm11 = vcmp.lt.s32.totalorder %v6961_v28, 1  ;;  %vm6982_vm12 = vcmp.lt.s32.totalorder %v6961_v28, 3 }
 0x33f   :  { %8034 = vmatprep.subr.mxu1 %v15178_v19  ;;  %v6966_v52 = vshrl.u32 %v15309_v38, %v6963_v57  ;;  %v6969_v31 = vshrl.u32 %v15310_v6, %v6963_v57  ;;  %v6972_v19 = vshrl.u32 %v15311_v46, %v6963_v57  ;;  %v6964_v56 = vshrl.u32 %v15307_v5, %v6963_v57 }
 0x340   :  { %8035 = vmatpush3.msra.mxu1 %v12771_v11  ;;  %v6975_v11 = vshrl.u32 %v15312_v62, %v6963_v57  ;;  %v6978_v7 = vshrl.u32 %v15313_v42, %v6963_v57  ;;  %v7064_v60 = vsel %vm7063_vm10, %v7062_v37, 0  ;;  %vm6983_vm13 = vcmp.lt.s32.totalorder %v6961_v28, 4 }
 0x341   :  { %8037 = vmatmul.mubr.f32.vlgmr.msra.gmra.mxu1 %v15296_v40  ;;  %v6967_v49 = vor.u32 %v6966_v52, %v6965_v44  ;;  %v6970_v25 = vor.u32 %v6969_v31, %v6968_v48  ;;  %v6973_v54 = vor.u32 %v6972_v19, %v6971_v23  ;;  %v7066_v17 = vand.u32 31, %v7064_v60 }
 0x342   :  { %v6976_v22 = vor.u32 %v6975_v11, %v6974_v47  ;;  %v6979_v33 = vor.u32 %v6978_v7, %v6977_v30  ;;  %vm6981_vm14 = vcmp.lt.s32.totalorder %v6961_v28, 2  ;;  %v7065_v36 = vshrl.u32 %v7064_v60, 5 }
 0x343   :  { %v6984_v13 = vsel %vm6980_vm11, %v6964_v56, %v6967_v49  ;;  %v6985_v55 = vsel %vm6983_vm13, %v6973_v54, 2102212464  ;;  %v6988_v40 = vsel %vm6980_vm11, %v6967_v49, %v6970_v25  ;;  %v6992_v27 = vsel %vm6980_vm11, %v6970_v25, %v6973_v54 }
 0x344   :  { %v6986_v59 = vsel %vm6982_vm12, %v6970_v25, %v6985_v55  ;;  %v6989_v29 = vsel %vm6983_vm13, %v6976_v22, 920167782  ;;  %v6993_v43 = vsel %vm6983_vm13, %v6979_v33, 1326507024  ;;  %v7067_v24 = vsub.s32 32, %v7066_v17 }
 0x345   :  { %v6990_v53 = vsel %vm6982_vm12, %v6973_v54, %v6989_v29  ;;  %v6994_v32 = vsel %vm6982_vm12, %v6976_v22, %v6993_v43  ;;  %v6987_v9 = vsel %vm6981_vm14, %v6984_v13, %v6986_v59  ;;  %v7069_v50 = vshll.u32 %v15307_v5, %v7066_v17 }
 0x346   :  { %v6991_v26 = vsel %vm6981_vm14, %v6988_v40, %v6990_v53  ;;  %v6995_v8 = vsel %vm6981_vm14, %v6992_v27, %v6994_v32  ;;  %v7070_v14 = vshrl.u32 %v15309_v38, %v7067_v24  ;;  %v7072_v10 = vshll.u32 %v15309_v38, %v7066_v17 }
 0x347   :  { %v13238_v34 = vmul.u32.u64.low %v13214_v20, %v6995_v8  ;;  %v13239_v61 = vmul.u32.u64.high %v13214_v20, %v6995_v8, %v13238_v34  ;;  %v13242_v12 = vmul.u32.u64.low %v13214_v20, %v6991_v26  ;;  %v13243_v39 = vmul.u32.u64.high %v13214_v20, %v6991_v26, %v13242_v12 }
 0x348   :  { %v7073_v3 = vshrl.u32 %v15310_v6, %v7067_v24  ;;  %v7075_v2 = vshll.u32 %v15310_v6, %v7066_v17  ;;  %v7076_v58 = vshrl.u32 %v15311_v46, %v7067_v24  ;;  %v7078_v21 = vshll.u32 %v15311_v46, %v7066_v17 }
 0x349   :  { %v7079_v63 = vshrl.u32 %v15312_v62, %v7067_v24  ;;  %v7071_v37 = vor.u32 %v7070_v14, %v7069_v50  ;;  %v7081_v51 = vshll.u32 %v15312_v62, %v7066_v17  ;;  %v7082_v57 = vshrl.u32 %v15313_v42, %v7067_v24 }
 0x34a   :  { %v7074_v28 = vor.u32 %v7073_v3, %v7072_v10  ;;  %v7003_v44 = vmul.u32 %v13214_v20, %v6987_v9  ;;  %vm7005_vm15 = vc.u32 %v13239_v61, %v13242_v12  ;;  %v7006_v35 = vadd.s32 1, %v13243_v39 }
 0x34b   :  { %v7077_v48 = vor.u32 %v7076_v58, %v7075_v2  ;;  %v7068_v23 = vshrl.u32 %v15307_v5, %v7067_v24  ;;  %v7080_v47 = vor.u32 %v7079_v63, %v7078_v21  ;;  %v7083_v30 = vor.u32 %v7082_v57, %v7081_v51 }
 0x34c   :  { %vm7084_vm0 = vcmp.lt.s32.totalorder %v7065_v36, 1  ;;  %v7007_v52 = vsel %vm7005_vm15, %v7006_v35, %v13243_v39  ;;  %vm7086_vm1 = vcmp.lt.s32.totalorder %v7065_v36, 3  ;;  %vm7087_vm2 = vcmp.lt.s32.totalorder %v7065_v36, 4 }
 0x34d   :  { %v7092_v31 = vsel %vm7084_vm0, %v7071_v37, %v7074_v28  ;;  %v7008_v19 = vadd.s32 %v7007_v52, %v7003_v44  ;;  %v7089_v56 = vsel %vm7087_vm2, %v7077_v48, 2102212464  ;;  %v7093_v11 = vsel %vm7087_vm2, %v7080_v47, 920167782 }
 0x34e   :  { %v7096_v20 = vsel %vm7084_vm0, %v7074_v28, %v7077_v48  ;;  %vm7085_vm3 = vcmp.lt.s32.totalorder %v7065_v36, 2  ;;  %v7088_v7 = vsel %vm7084_vm0, %v7068_v23, %v7071_v37  ;;  %v7094_v49 = vsel %vm7086_vm1, %v7077_v48, %v7093_v11 }
 0x34f   :  { %v7097_v25 = vsel %vm7087_vm2, %v7083_v30, 1326507024  ;;  %v7009_v54 = vadd.s32 536870912, %v7008_v19  ;;  %v7090_v60 = vsel %vm7086_vm1, %v7074_v28, %v7089_v56  ;;  %v7095_v22 = vsel %vm7085_vm3, %v7092_v31, %v7094_v49 }
 0x350   :  { %v7098_v33 = vsel %vm7086_vm1, %v7080_v47, %v7097_v25  ;;  %v13262_v13 = vmul.u32.u64.low %v7100_v16, %v7095_v22  ;;  %v13263_v55 = vmul.u32.u64.high %v7100_v16, %v7095_v22, %v13262_v13  ;;  %v7091_v29 = vsel %vm7085_vm3, %v7088_v7, %v7090_v60 }
 0x351   :  { %v7099_v17 = vsel %vm7085_vm3, %v7096_v20, %v7098_v33  ;;  %v7010_v40 = vshrl.u32 %v7009_v54, 30  ;;  %v7107_v32 = vmul.u32 %v7100_v16, %v7091_v29  ;;  %v7004_v58 = vadd.s32 %v13242_v12, %v13239_v61 }
 0x352   :  { %v13265_v27 = vmul.u32.u64.low %v7100_v16, %v7099_v17  ;;  %v13266_v59 = vmul.u32.u64.high %v7100_v16, %v7099_v17, %v13265_v27  ;;  %v7110_v24 = vadd.s32 1, %v13263_v55  ;;  %vm13281_vm10 = vcmp.le.f32.partialorder %v7052_v1, 0.7853982 }
 0x353   :  { %v7011_v43 = vshll.u32 %v7010_v40, 30  ;;  %v7034_v20 = vsub.s32 4, %v7010_v40  ;;  %vm7040_vm14 = vweird.f32 %v13176_v4  ;;  %vm7144_vm2 = vweird.f32 %v13187_v15 }
 0x354   :  { %vm7109_vm4 = vc.u32 %v13266_v59, %v13262_v13  ;;  %v7108_v56 = vadd.s32 %v13262_v13, %v13266_v59 }
 0x355   :  { %v7012_v53 = vsub.s32 %v7008_v19, %v7011_v43  ;;  %v7111_v9 = vsel %vm7109_vm4, %v7110_v24, %v13263_v55  ;;  %v7035_v17 = vsel %vm6950_vm7, %v7034_v20, %v7010_v40 }
 0x356   :  { %v7112_v8 = vadd.s32 %v7111_v9, %v7107_v32  ;;  %v7037_v59 = vsel %vm6949_vm8, 0, %v7035_v17 }
 0x357   :  { %v7014_v26 = vsub.s32 0, %v7012_v53  ;;  %v7041_v43 = vadd.s32 3, %v7037_v59 }
 0x358   :  { %v7113_v34 = vadd.s32 536870912, %v7112_v8 }
 0x359   :  { %v7708_v36 = vmin.u32 %v7014_v26, %v7012_v53  ;;  %v7042_v9 = vand.u32 3, %v7041_v43  ;;  %v13288_v26 = vld [vmem:[#allocation8 + $0x8] sm:$0x1f] }
 0x35a   :  { %v7114_v50 = vshrl.u32 %v7113_v34, 30 }
 0x35b   :  { %v7016_v39 = vclz %v7708_v36  ;;  %vm7047_vm11 = vcmp.eq.s32.totalorder %v7042_v9, 2  ;;  %vm7044_vm12 = vcmp.eq.s32.totalorder %v7042_v9, 0  ;;  %vm7043_vm13 = vcmp.lt.s32.totalorder %v7042_v9, 2 }
 0x35c   :  { %v7115_v10 = vshll.u32 %v7114_v50, 30 }
 0x35d   :  { %v7709_v14 = vadd.s32 4294967294, %v7016_v39 }
 0x35e   :  { %v7116_v2 = vsub.s32 %v7112_v8, %v7115_v10  ;;  %v13291_v8 = vsub.f32 1.0, %v13288_v26 }
 0x35f   :  { %vm7710_vm5 = vcmp.lt.s32.totalorder %v7709_v14, 0 }
 0x360   :  { %v7019_v3 = vsel %vm7710_vm5, 0, %v7709_v14  ;;  %v7118_v63 = vsub.s32 0, %v7116_v2  ;;  %v7593_v20 = vrot.slane %v13291_v8, %v15355_v0 }
 0x361   :  { %v7020_v21 = vsub.s32 32, %v7019_v3  ;;  %v7024_v16 = vsub.s32 4294967266, %v7019_v3  ;;  %v7021_v37 = vshll.u32 %v7012_v53, %v7019_v3  ;;  %v7138_v53 = vsub.s32 4, %v7114_v50 }
 0x362   :  { %v7712_v57 = vmin.u32 %v7118_v63, %v7116_v2 }
 0x363   :  { %v7022_v28 = vshrl.u32 %v7004_v58, %v7020_v21  ;;  %v7025_v51 = vadd.s32 127, %v7024_v16  ;;  %v7139_v36 = vsel %vm7054_vm9, %v7138_v53, %v7114_v50  ;;  %v7589_v58 = vrot.slane %v13291_v8, %v15352_v41 }
 0x364   :  { %v7120_v48 = vclz %v7712_v57  ;;  %v7141_v10 = vsel %vm13281_vm10, 0, %v7139_v36 }
 0x365   :  { %v7023_v44 = vor.u32 %v7022_v28, %v7021_v37  ;;  %v7026_v35 = vshll.u32 %v7025_v51, 23  ;;  %v7145_v16 = vadd.s32 3, %v7141_v10  ;;  %v4723_v51 = vpop.f32.mrf.mxu0 }
 0x366   :  { %v7713_v47 = vadd.s32 4294967294, %v7120_v48 }
 0x367   :  { %v7027_v23 = vor.u32 4788187, %v7026_v35  ;;  %v7030_v52 = vcvt.s32.f32 %v7023_v44  ;;  %v7146_v44 = vand.u32 3, %v7145_v16  ;;  %v15365_v35 = vld [vmem:[#allocation32_spill] sm:$0xff] }
 0x368   :  { %vm7714_vm6 = vcmp.lt.s32.totalorder %v7713_v47, 0  ;;  %v323_v48 = vrot.slane %v13113_v45, %v15365_v35 }
 0x369   :  { %v7028_v30 = vand.u32 2147483647, %v7027_v23  ;;  %v7123_v19 = vsel %vm7714_vm6, 0, %v7713_v47  ;;  %v4725_v47 = vpop.f32.mrf.mxu0  ;;  %vm7151_vm15 = vcmp.eq.s32.totalorder %v7146_v44, 2  ;;  %vm7148_vm0 = vcmp.eq.s32.totalorder %v7146_v44, 0 }
 0x36a   :  { %v7124_v61 = vsub.s32 32, %v7123_v19  ;;  %v7128_v12 = vsub.s32 4294967266, %v7123_v19  ;;  %v7125_v7 = vshll.u32 %v7116_v2, %v7123_v19  ;;  %v7507_v2 = vrot.slane %v13288_v26, %v15352_v41  ;;  %v4955_v41 = vpop.f32.mrf.mxu1 }
 0x36b   :  { %v7031_v31 = vmul.f32 %v7030_v52, %v7028_v30  ;;  %vm7147_vm1 = vcmp.lt.s32.totalorder %v7146_v44, 2 }
 0x36c   :  { %v7126_v49 = vshrl.u32 %v7108_v56, %v7124_v61  ;;  %v7129_v25 = vadd.s32 127, %v7128_v12  ;;  %v7545_v37 = vmul.f32 %v7507_v2, %v13176_v4  ;;  %v4724_v61 = vadd.f32 %v4723_v51, %v323_v48 }
 0x36d   :  { %v7032_v11 = vxor.u32 2147483648, %v7031_v31 }
 0x36e   :  { %v7127_v22 = vor.u32 %v7126_v49, %v7125_v7  ;;  %v7130_v33 = vshll.u32 %v7129_v25, 23  ;;  %v4957_v49 = vpop.f32.mrf.mxu1 }
 0x36f   :  { %v7033_v54 = vsel %vm6950_vm7, %v7032_v11, %v7031_v31  ;;  %v15366_v31 = vld [vmem:[#allocation52_spill] sm:$0xff]  ;;  %v7511_v11 = vrot.slane %v13288_v26, %v15355_v0 }
 0x370   :  { %v7036_v60 = vsel %vm6949_vm8, %v13176_v4, %v7033_v54  ;;  %v7131_v13 = vor.u32 4788187, %v7130_v33  ;;  %v7134_v27 = vcvt.s32.f32 %v7127_v22  ;;  %v327_v19 = vrot.slane %v13113_v45, %v15366_v31  ;;  %v5092_v4 = vpop.f32.mrf.mxu0 }
 0x371   :  { %8138 = vcosq.f32 %v7036_v60  ;;  %v7546_v17 = vmul.f32 %v7511_v11, %v13187_v15 }
 0x372   :  { %8140 = vsinq.f32 %v7036_v60  ;;  %v7132_v55 = vand.u32 2147483647, %v7131_v13  ;;  %v4726_v54 = vadd.f32 %v4725_v47, %v327_v19  ;;  %v4956_v60 = vadd.f32 %v4955_v41, %v4724_v61  ;;  %v5094_v22 = vpop.f32.mrf.mxu0 }
 0x374   :  { %v7135_v29 = vmul.f32 %v7134_v27, %v7132_v55  ;;  %v5093_v55 = vadd.f32 %v5092_v4, %v4956_v60 }
 0x375   :  { %v5198_v33 = vpop.f32.mrf.mxu1 }
 0x376   :  { %v7136_v24 = vxor.u32 2147483648, %v7135_v29  ;;  %v5199_v43 = vadd.f32 %v5198_v33, %v5093_v55 }
 0x377   :  { %v5200_v0 = vpop.f32.mrf.mxu1 }
 0x378   :  { %v7137_v32 = vsel %vm7054_vm9, %v7136_v24, %v7135_v29  ;;  %v4958_v29 = vadd.f32 %v4957_v49, %v4726_v54 }
 0x379   :  { %v7140_v40 = vsel %vm13281_vm10, %v13187_v15, %v7137_v32 }
 0x37a   :  { %8142 = vcosq.f32 %v7140_v40  ;;  %v5095_v24 = vadd.f32 %v5094_v22, %v4958_v29 }
 0x37b   :  { %8144 = vsinq.f32 %v7140_v40 }
 0x37c   :  { %v5201_v32 = vadd.f32 %v5200_v0, %v5095_v24 }
 0x37e   :  { %v8139_v34 = vpop.eup %8138 }
 0x37f   :  { %v8141_v39 = vpop.eup %8140  ;;  %v7048_v1 = vxor.u32 2147483648, %v8139_v34 }
 0x380   :  { %v7045_v14 = vxor.u32 2147483648, %v8141_v39 }
 0x381   :  { %v7049_v3 = vsel %vm7047_vm11, %v7048_v1, %v8141_v39 }
 0x382   :  { %v7046_v21 = vsel %vm7044_vm12, %v8139_v34, %v7045_v14 }
 0x383   :  { %v7050_v50 = vsel %vm7043_vm13, %v7046_v21, %v7049_v3 }
 0x384   :  { %v7051_v63 = vsel %vm7040_vm14, nan, %v7050_v50 }
 0x385   :  { %v7627_v28 = vmul.f32 %v7589_v58, %v7051_v63 }
 0x387   :  { %v7640_v57 = vadd.f32 %v7627_v28, %v7545_v37  ;;  %v8143_v23 = vpop.eup %8142 }
 0x388   :  { %v8145_v30 = vpop.eup %8144  ;;  %v7152_v52 = vxor.u32 2147483648, %v8143_v23 }
 0x389   :  { %7653 = vst [vmem:[#allocation10 + $0x40] sm:$0xff] %v7640_v57  ;;  %v7149_v56 = vxor.u32 2147483648, %v8145_v30 }
 0x38a   :  { %v7153_v12 = vsel %vm7151_vm15, %v7152_v52, %v8145_v30 }
 0x38b   :  { %v7150_v7 = vsel %vm7148_vm0, %v8143_v23, %v7149_v56 }
 0x38c   :  { %v7154_v25 = vsel %vm7147_vm1, %v7150_v7, %v7153_v12 }
 0x38d   :  { %v7155_v45 = vsel %vm7144_vm2, nan, %v7154_v25 }
 0x38e   :  { %v7628_v13 = vmul.f32 %v7593_v20, %v7155_v45 }
 0x390   :  { %v5366_v27 = vpop.f32.mrf.mxu0  ;;  %v7641_v59 = vadd.f32 %v7628_v13, %v7546_v17 }
 0x391   :  { %v5367_v53 = vadd.f32 %v5366_v27, %v5199_v43 }
 0x392   :  { %7654 = vst [vmem:[#allocation10 + $0x48] sm:$0xff] %v7641_v59  ;;  %v5368_v18 = vpop.f32.mrf.mxu0 }
 0x393   :  { %v5369_v36 = vadd.f32 %v5368_v18, %v5201_v32 }
 0x397   :  { %v5470_v40 = vpop.f32.mrf.mxu1 }
 0x398   :  { %v13311_v9 = vadd.f32 %v5470_v40, %v5367_v53 }
 0x399   :  { %v5472_v34 = vpop.f32.mrf.mxu1 }
 0x39a   :  { %v7156_v39 = vand.u32 2147483647, %v13311_v9  ;;  %v7159_v15 = vand.u32 2139095040, %v13311_v9  ;;  %v13315_v1 = vadd.f32 %v5472_v34, %v5369_v36  ;;  %vm7158_vm1 = vcmp.lt.s32.totalorder %v13311_v9, 0 }
 0x39c   :  { %v7160_v14 = vshrl.u32 %v7159_v15, 23  ;;  %v7163_v10 = vand.u32 8388607, %v7156_v39  ;;  %v7263_v3 = vand.u32 2139095040, %v13315_v1  ;;  %v7260_v58 = vand.u32 2147483647, %v13315_v1 }
 0x39d   :  { %vm7157_vm2 = vcmp.le.f32.partialorder %v7156_v39, 0.7853982 }
 0x39e   :  { %v7715_v2 = vadd.s32 4294967169, %v7160_v14  ;;  %v7264_v21 = vshrl.u32 %v7263_v3, 23  ;;  %v7164_v16 = vor.u32 8388608, %v7163_v10  ;;  %v7267_v37 = vand.u32 8388607, %v7260_v58 }
 0x3a0   :  { %v7166_v50 = vadd.s32 1, %v7715_v2  ;;  %v7719_v63 = vadd.s32 4294967169, %v7264_v21  ;;  %v13323_v48 = vshll.u32 %v7164_v16, 8  ;;  %v7268_v41 = vor.u32 8388608, %v7267_v37 }
 0x3a2   :  { %vm7167_vm3 = vcmp.gt.s32.totalorder %v7166_v50, 0  ;;  %v7270_v51 = vadd.s32 1, %v7719_v63  ;;  %v13343_v18 = vshll.u32 %v7268_v41, 8 }
 0x3a3   :  { %v7168_v28 = vsel %vm7167_vm3, %v7166_v50, 0  ;;  %vm7262_vm3 = vcmp.lt.s32.totalorder %v13315_v1, 0 }
 0x3a4   :  { %v7169_v57 = vshrl.u32 %v7168_v28, 5  ;;  %v7170_v44 = vand.u32 31, %v7168_v28  ;;  %vm7271_vm4 = vcmp.gt.s32.totalorder %v7270_v51, 0 }
 0x3a5   :  { %v7272_v45 = vsel %vm7271_vm4, %v7270_v51, 0  ;;  %vm13398_vm4 = vcmp.le.f32.partialorder %v7260_v58, 0.7853982 }
 0x3a6   :  { %v7171_v23 = vsub.s32 32, %v7170_v44  ;;  %v7173_v47 = vshll.u32 %v15307_v5, %v7170_v44  ;;  %v7176_v30 = vshll.u32 %v15309_v38, %v7170_v44  ;;  %v7179_v52 = vshll.u32 %v15310_v6, %v7170_v44 }
 0x3a7   :  { %v7182_v19 = vshll.u32 %v15311_v46, %v7170_v44  ;;  %v7185_v56 = vshll.u32 %v15312_v62, %v7170_v44  ;;  %vm7188_vm5 = vcmp.lt.s32.totalorder %v7169_v57, 1  ;;  %vm7190_vm6 = vcmp.lt.s32.totalorder %v7169_v57, 3 }
 0x3a8   :  { %v7174_v61 = vshrl.u32 %v15309_v38, %v7171_v23  ;;  %v7177_v4 = vshrl.u32 %v15310_v6, %v7171_v23  ;;  %v7180_v12 = vshrl.u32 %v15311_v46, %v7171_v23  ;;  %v7172_v11 = vshrl.u32 %v15307_v5, %v7171_v23 }
 0x3a9   :  { %v7183_v20 = vshrl.u32 %v15312_v62, %v7171_v23  ;;  %v7186_v7 = vshrl.u32 %v15313_v42, %v7171_v23  ;;  %vm7191_vm7 = vcmp.lt.s32.totalorder %v7169_v57, 4  ;;  %v7274_v33 = vand.u32 31, %v7272_v45 }
 0x3aa   :  { %v7175_v49 = vor.u32 %v7174_v61, %v7173_v47  ;;  %v7178_v25 = vor.u32 %v7177_v4, %v7176_v30  ;;  %v7181_v54 = vor.u32 %v7180_v12, %v7179_v52  ;;  %vm7189_vm8 = vcmp.lt.s32.totalorder %v7169_v57, 2 }
 0x3ab   :  { %v7184_v60 = vor.u32 %v7183_v20, %v7182_v19  ;;  %v7187_v22 = vor.u32 %v7186_v7, %v7185_v56  ;;  %v7275_v0 = vsub.s32 32, %v7274_v33  ;;  %v7273_v34 = vshrl.u32 %v7272_v45, 5 }
 0x3ac   :  { %v7192_v17 = vsel %vm7188_vm5, %v7172_v11, %v7175_v49  ;;  %v7193_v13 = vsel %vm7191_vm7, %v7181_v54, 2102212464  ;;  %v7196_v55 = vsel %vm7188_vm5, %v7175_v49, %v7178_v25  ;;  %v7200_v27 = vsel %vm7188_vm5, %v7178_v25, %v7181_v54 }
 0x3ad   :  { %v7194_v59 = vsel %vm7190_vm6, %v7178_v25, %v7193_v13  ;;  %v7197_v29 = vsel %vm7191_vm7, %v7184_v60, 920167782  ;;  %v7201_v43 = vsel %vm7191_vm7, %v7187_v22, 1326507024  ;;  %v7277_v2 = vshll.u32 %v15307_v5, %v7274_v33 }
 0x3ae   :  { %v7198_v24 = vsel %vm7190_vm6, %v7181_v54, %v7197_v29  ;;  %v7202_v53 = vsel %vm7190_vm6, %v7184_v60, %v7201_v43  ;;  %v7195_v32 = vsel %vm7189_vm8, %v7192_v17, %v7194_v59  ;;  %v7278_v21 = vshrl.u32 %v15309_v38, %v7275_v0 }
 0x3af   :  { %v7199_v40 = vsel %vm7189_vm8, %v7196_v55, %v7198_v24  ;;  %v7203_v36 = vsel %vm7189_vm8, %v7200_v27, %v7202_v53  ;;  %v7280_v50 = vshll.u32 %v15309_v38, %v7274_v33  ;;  %v7281_v16 = vshrl.u32 %v15310_v6, %v7275_v0 }
 0x3b0   :  { %v13346_v15 = vmul.u32.u64.low %v13323_v48, %v7203_v36  ;;  %v13347_v14 = vmul.u32.u64.high %v13323_v48, %v7203_v36, %v13346_v15  ;;  %v13350_v10 = vmul.u32.u64.low %v13323_v48, %v7199_v40  ;;  %v13351_v3 = vmul.u32.u64.high %v13323_v48, %v7199_v40, %v13350_v10 }
 0x3b1   :  { %v7283_v63 = vshll.u32 %v15310_v6, %v7274_v33  ;;  %v7284_v37 = vshrl.u32 %v15311_v46, %v7275_v0  ;;  %v7286_v28 = vshll.u32 %v15311_v46, %v7274_v33  ;;  %v7287_v51 = vshrl.u32 %v15312_v62, %v7275_v0 }
 0x3b2   :  { %v7279_v57 = vor.u32 %v7278_v21, %v7277_v2  ;;  %v7282_v44 = vor.u32 %v7281_v16, %v7280_v50  ;;  %v7289_v23 = vshll.u32 %v15312_v62, %v7274_v33  ;;  %v7290_v47 = vshrl.u32 %v15313_v42, %v7275_v0 }
 0x3b3   :  { %v7211_v30 = vmul.u32 %v13323_v48, %v7195_v32  ;;  %vm7213_vm9 = vc.u32 %v13347_v14, %v13350_v10  ;;  %v7214_v52 = vadd.s32 1, %v13351_v3  ;;  %v7285_v19 = vor.u32 %v7284_v37, %v7283_v63 }
 0x3b4   :  { %v13364_v41 = vpop.f32.mrf.mxu0  ;;  %v7276_v56 = vshrl.u32 %v15307_v5, %v7275_v0  ;;  %v7288_v61 = vor.u32 %v7287_v51, %v7286_v28  ;;  %v7291_v4 = vor.u32 %v7290_v47, %v7289_v23  ;;  %vm7292_vm10 = vcmp.lt.s32.totalorder %v7273_v34, 1 }
 0x3b5   :  { %v7215_v11 = vsel %vm7213_vm9, %v7214_v52, %v13351_v3  ;;  %vm7294_vm11 = vcmp.lt.s32.totalorder %v7273_v34, 3  ;;  %vm7295_vm12 = vcmp.lt.s32.totalorder %v7273_v34, 4  ;;  %v7300_v20 = vsel %vm7292_vm10, %v7279_v57, %v7282_v44 }
 0x3b6   :  { %v7863_v12 = vpop.f32.mrf.mxu0  ;;  %v7216_v7 = vadd.s32 %v7215_v11, %v7211_v30  ;;  %v7297_v49 = vsel %vm7295_vm12, %v7285_v19, 2102212464  ;;  %v7301_v48 = vsel %vm7295_vm12, %v7288_v61, 920167782  ;;  %v7304_v25 = vsel %vm7292_vm10, %v7282_v44, %v7285_v19 }
 0x3b7   :  { %vm7293_vm13 = vcmp.lt.s32.totalorder %v7273_v34, 2  ;;  %v7296_v54 = vsel %vm7292_vm10, %v7276_v56, %v7279_v57  ;;  %v7302_v45 = vsel %vm7294_vm11, %v7285_v19, %v7301_v48  ;;  %v7305_v60 = vsel %vm7295_vm12, %v7291_v4, 1326507024 }
 0x3b8   :  { %v7217_v22 = vadd.s32 536870912, %v7216_v7  ;;  %v7298_v33 = vsel %vm7294_vm11, %v7282_v44, %v7297_v49  ;;  %v7303_v17 = vsel %vm7293_vm13, %v7300_v20, %v7302_v45  ;;  %v7306_v13 = vsel %vm7294_vm11, %v7288_v61, %v7305_v60 }
 0x3b9   :  { %v7307_v55 = vsel %vm7293_vm13, %v7304_v25, %v7306_v13  ;;  %v13373_v27 = vmul.u32.u64.low %v13343_v18, %v7303_v17  ;;  %v13374_v59 = vmul.u32.u64.high %v13343_v18, %v7303_v17, %v13373_v27  ;;  %v7299_v53 = vsel %vm7293_vm13, %v7296_v54, %v7298_v33 }
 0x3ba   :  { %v7218_v29 = vshrl.u32 %v7217_v22, 30  ;;  %v13377_v43 = vmul.u32.u64.low %v13343_v18, %v7307_v55  ;;  %v13378_v0 = vmul.u32.u64.high %v13343_v18, %v7307_v55, %v13377_v43  ;;  %v7315_v15 = vmul.u32 %v13343_v18, %v7299_v53 }
 0x3bb   :  { %v7318_v36 = vadd.s32 1, %v13374_v59  ;;  %v7212_v23 = vadd.s32 %v13350_v10, %v13347_v14  ;;  %vm7248_vm8 = vweird.f32 %v13311_v9  ;;  %vm7352_vm12 = vweird.f32 %v13315_v1 }
 0x3bc   :  { %v7219_v32 = vshll.u32 %v7218_v29, 30  ;;  %vm7317_vm14 = vc.u32 %v13378_v0, %v13373_v27  ;;  %v7316_v14 = vadd.s32 %v13373_v27, %v13378_v0  ;;  %v7242_v17 = vsub.s32 4, %v7218_v29 }
 0x3bd   :  { %v7319_v3 = vsel %vm7317_vm14, %v7318_v36, %v13374_v59 }
 0x3be   :  { %v7220_v34 = vsub.s32 %v7216_v7, %v7219_v32  ;;  %v7320_v21 = vadd.s32 %v7319_v3, %v7315_v15  ;;  %v7243_v27 = vsel %vm7158_vm1, %v7242_v17, %v7218_v29 }
 0x3bf   :  { %v13380_v24 = vpop.f32.mrf.mxu1  ;;  %v7245_v3 = vsel %vm7157_vm2, 0, %v7243_v27 }
 0x3c0   :  { %v7222_v2 = vsub.s32 0, %v7220_v34  ;;  %v7321_v16 = vadd.s32 536870912, %v7320_v21 }
 0x3c1   :  { %v7898_v40 = vpop.f32.mrf.mxu1 }
 0x3c2   :  { %v7716_v50 = vmin.u32 %v7222_v2, %v7220_v34  ;;  %v7322_v37 = vshrl.u32 %v7321_v16, 30 }
 0x3c4   :  { %v7224_v63 = vclz %v7716_v50  ;;  %v7323_v51 = vshll.u32 %v7322_v37, 30  ;;  %v7249_v50 = vadd.s32 3, %v7245_v3  ;;  %v7346_v39 = vsub.s32 4, %v7322_v37 }
 0x3c6   :  { %v7717_v28 = vadd.s32 4294967294, %v7224_v63  ;;  %v7324_v44 = vsub.s32 %v7320_v21, %v7323_v51  ;;  %v7250_v51 = vand.u32 3, %v7249_v50 }
 0x3c8   :  { %vm7718_vm15 = vcmp.lt.s32.totalorder %v7717_v28, 0  ;;  %v7326_v30 = vsub.s32 0, %v7324_v44  ;;  %vm7255_vm5 = vcmp.eq.s32.totalorder %v7250_v51, 2  ;;  %vm7252_vm6 = vcmp.eq.s32.totalorder %v7250_v51, 0 }
 0x3c9   :  { %v7227_v57 = vsel %vm7718_vm15, 0, %v7717_v28  ;;  %vm7251_vm7 = vcmp.lt.s32.totalorder %v7250_v51, 2 }
 0x3ca   :  { %v7228_v47 = vsub.s32 32, %v7227_v57  ;;  %v7232_v18 = vsub.s32 4294967266, %v7227_v57  ;;  %v7229_v52 = vshll.u32 %v7220_v34, %v7227_v57  ;;  %v7720_v61 = vmin.u32 %v7326_v30, %v7324_v44 }
 0x3cb   :  { %v7347_v57 = vsel %vm7262_vm3, %v7346_v39, %v7322_v37 }
 0x3cc   :  { %v7230_v19 = vshrl.u32 %v7212_v23, %v7228_v47  ;;  %v7233_v56 = vadd.s32 127, %v7232_v18  ;;  %v7328_v11 = vclz %v7720_v61  ;;  %v7349_v58 = vsel %vm13398_vm4, 0, %v7347_v57 }
 0x3cd   :  { %v7353_v61 = vadd.s32 3, %v7349_v58 }
 0x3ce   :  { %v7231_v4 = vor.u32 %v7230_v19, %v7229_v52  ;;  %v7234_v12 = vshll.u32 %v7233_v56, 23  ;;  %v7721_v7 = vadd.s32 4294967294, %v7328_v11  ;;  %v7515_v52 = vrot.slane %v13288_v26, %v15365_v35 }
 0x3cf   :  { %v7597_v19 = vrot.slane %v13291_v8, %v15365_v35 }
 0x3d0   :  { %v7235_v20 = vor.u32 4788187, %v7234_v12  ;;  %v7238_v48 = vcvt.s32.f32 %v7231_v4  ;;  %vm7722_vm0 = vcmp.lt.s32.totalorder %v7721_v7, 0  ;;  %v7547_v12 = vmul.f32 %v7515_v52, %v13311_v9 }
 0x3d1   :  { %v7331_v45 = vsel %vm7722_vm0, 0, %v7721_v7  ;;  %v15369_v7 = vld [vmem:[#allocation68_spill] sm:$0xff] }
 0x3d2   :  { %v7236_v49 = vand.u32 2147483647, %v7235_v20  ;;  %v7332_v10 = vsub.s32 32, %v7331_v45  ;;  %v7336_v60 = vsub.s32 4294967266, %v7331_v45  ;;  %v7333_v13 = vshll.u32 %v7324_v44, %v7331_v45  ;;  %v8164_v20 = vld [vmem:[#allocation7 + $0x8] sm:$0x1f] }
 0x3d4   :  { %v7239_v54 = vmul.f32 %v7238_v48, %v7236_v49  ;;  %v7334_v55 = vshrl.u32 %v7316_v14, %v7332_v10  ;;  %v7337_v59 = vadd.s32 127, %v7336_v60  ;;  %v331_v49 = vrot.slane %v8164_v20, %v15369_v7 }
 0x3d6   :  { %v7240_v33 = vxor.u32 2147483648, %v7239_v54  ;;  %v7335_v32 = vor.u32 %v7334_v55, %v7333_v13  ;;  %v7338_v40 = vshll.u32 %v7337_v59, 23  ;;  %v5563_v35 = vadd.f32 %v13364_v41, %v331_v49 }
 0x3d7   :  { %v13388_v25 = vpop.f32.mrf.mxu0 }
 0x3d8   :  { %v7241_v43 = vsel %vm7158_vm1, %v7240_v33, %v7239_v54  ;;  %v7339_v0 = vor.u32 4788187, %v7338_v40  ;;  %v7342_v15 = vcvt.s32.f32 %v7335_v32  ;;  %v7354_v54 = vand.u32 3, %v7353_v61 }
 0x3d9   :  { %v7933_v22 = vpop.f32.mrf.mxu0  ;;  %v7244_v53 = vsel %vm7157_vm2, %v13311_v9, %v7241_v43  ;;  %v7519_v33 = vrot.slane %v13288_v26, %v15366_v31  ;;  %v7601_v9 = vrot.slane %v13291_v8, %v15366_v31  ;;  %v5714_v59 = vadd.f32 %v13380_v24, %v5563_v35 }
 0x3da   :  { %8146 = vcosq.f32 %v7244_v53  ;;  %v7340_v34 = vand.u32 2147483647, %v7339_v0  ;;  %vm7359_vm9 = vcmp.eq.s32.totalorder %v7354_v54, 2  ;;  %vm7356_vm10 = vcmp.eq.s32.totalorder %v7354_v54, 0 }
 0x3db   :  { %8148 = vsinq.f32 %v7244_v53  ;;  %vm7355_vm11 = vcmp.lt.s32.totalorder %v7354_v54, 2  ;;  %v7548_v53 = vmul.f32 %v7519_v33, %v13315_v1  ;;  %v5818_v40 = vadd.f32 %v13388_v25, %v5714_v59 }
 0x3dc   :  { %v7343_v21 = vmul.f32 %v7342_v15, %v7340_v34 }
 0x3de   :  { %v7344_v16 = vxor.u32 2147483648, %v7343_v21 }
 0x3e0   :  { %v5906_v36 = vpop.f32.mrf.mxu1  ;;  %v7345_v29 = vsel %vm7262_vm3, %v7344_v16, %v7343_v21 }
 0x3e1   :  { %v7348_v28 = vsel %vm13398_vm4, %v13315_v1, %v7345_v29  ;;  %v5907_v0 = vadd.f32 %v5906_v36, %v5818_v40 }
 0x3e2   :  { %v7968_v2 = vpop.f32.mrf.mxu1  ;;  %8150 = vcosq.f32 %v7348_v28 }
 0x3e3   :  { %8152 = vsinq.f32 %v7348_v28 }
 0x3e7   :  { %v8147_v44 = vpop.eup %8146 }
 0x3e8   :  { %v8149_v23 = vpop.eup %8148  ;;  %v7256_v47 = vxor.u32 2147483648, %v8147_v44 }
 0x3e9   :  { %v7253_v18 = vxor.u32 2147483648, %v8149_v23 }
 0x3ea   :  { %v7257_v30 = vsel %vm7255_vm5, %v7256_v47, %v8149_v23 }
 0x3eb   :  { %v7254_v56 = vsel %vm7252_vm6, %v8147_v44, %v7253_v18 }
 0x3ec   :  { %v7258_v37 = vsel %vm7251_vm7, %v7254_v56, %v7257_v30 }
 0x3ed   :  { %v7259_v4 = vsel %vm7248_vm8, nan, %v7258_v37 }
 0x3ee   :  { %v7629_v11 = vmul.f32 %v7597_v19, %v7259_v4 }
 0x3ef   :  { %v8151_v45 = vpop.eup %8150 }
 0x3f0   :  { %v7642_v48 = vadd.f32 %v7629_v11, %v7547_v12  ;;  %v8153_v14 = vpop.eup %8152  ;;  %v7360_v10 = vxor.u32 2147483648, %v8151_v45 }
 0x3f1   :  { %v7357_v60 = vxor.u32 2147483648, %v8153_v14 }
 0x3f2   :  { %7655 = vst [vmem:[#allocation10 + $0x50] sm:$0xff] %v7642_v48  ;;  %v7361_v22 = vsel %vm7359_vm9, %v7360_v10, %v8153_v14 }
 0x3f3   :  { %v7358_v13 = vsel %vm7356_vm10, %v8151_v45, %v7357_v60 }
 0x3f4   :  { %v7362_v55 = vsel %vm7355_vm11, %v7358_v13, %v7361_v22 }
 0x3f5   :  { %v7363_v41 = vsel %vm7352_vm12, nan, %v7362_v55 }
 0x3f6   :  { %v7630_v32 = vmul.f32 %v7601_v9, %v7363_v41 }
 0x3f8   :  { %v7643_v27 = vadd.f32 %v7630_v32, %v7548_v53 }
 0x3f9   :  { %v6025_v17 = vpop.f32.mrf.mxu0 }
 0x3fa   :  { %7656 = vst [vmem:[#allocation10 + $0x58] sm:$0xff] %v7643_v27  ;;  %v6026_v34 = vadd.f32 %v6025_v17, %v5907_v0 }
 0x3fb   :  { %v8003_v43 = vpop.f32.mrf.mxu0 }
 0x401   :  { %v6112_v31 = vpop.f32.mrf.mxu1 }
 0x402   :  { %v13423_v15 = vadd.f32 %v6112_v31, %v6026_v34 }
 0x403   :  { %v8038_v3 = vpop.f32.mrf.mxu1 }
 0x404   :  { %v7367_v2 = vand.u32 2139095040, %v13423_v15  ;;  %v7364_v16 = vand.u32 2147483647, %v13423_v15  ;;  %vm7366_vm4 = vcmp.lt.s32.totalorder %v13423_v15, 0  ;;  %vm7456_vm9 = vweird.f32 %v13423_v15 }
 0x406   :  { %v7368_v21 = vshrl.u32 %v7367_v2, 23  ;;  %v7371_v25 = vand.u32 8388607, %v7364_v16  ;;  %vm7365_vm5 = vcmp.le.f32.partialorder %v7364_v16, 0.7853982  ;;  %v7605_v16 = vrot.slane %v13291_v8, %v15369_v7 }
 0x408   :  { %v7723_v50 = vadd.s32 4294967169, %v7368_v21  ;;  %v7372_v52 = vor.u32 8388608, %v7371_v25 }
 0x40a   :  { %v7374_v24 = vadd.s32 1, %v7723_v50 }
 0x40c   :  { %vm7375_vm13 = vcmp.gt.s32.totalorder %v7374_v24, 0 }
 0x40d   :  { %v7376_v1 = vsel %vm7375_vm13, %v7374_v24, 0 }
 0x40e   :  { %v7378_v39 = vand.u32 31, %v7376_v1  ;;  %v7377_v63 = vshrl.u32 %v7376_v1, 5 }
 0x410   :  { %v7379_v36 = vsub.s32 32, %v7378_v39  ;;  %v7381_v29 = vshll.u32 %v15307_v5, %v7378_v39  ;;  %v7384_v28 = vshll.u32 %v15309_v38, %v7378_v39  ;;  %v7387_v44 = vshll.u32 %v15310_v6, %v7378_v39 }
 0x411   :  { %v7390_v47 = vshll.u32 %v15311_v46, %v7378_v39  ;;  %v7393_v58 = vshll.u32 %v15312_v62, %v7378_v39  ;;  %vm7396_vm14 = vcmp.lt.s32.totalorder %v7377_v63, 1  ;;  %vm7399_vm15 = vcmp.lt.s32.totalorder %v7377_v63, 4 }
 0x412   :  { %v7382_v51 = vshrl.u32 %v15309_v38, %v7379_v36  ;;  %v7385_v57 = vshrl.u32 %v15310_v6, %v7379_v36  ;;  %v7388_v23 = vshrl.u32 %v15311_v46, %v7379_v36  ;;  %v7391_v18 = vshrl.u32 %v15312_v62, %v7379_v36 }
 0x413   :  { %v7394_v30 = vshrl.u32 %v15313_v42, %v7379_v36  ;;  %v7380_v11 = vshrl.u32 %v15307_v5, %v7379_v36  ;;  %vm7398_vm0 = vcmp.lt.s32.totalorder %v7377_v63, 3  ;;  %vm7397_vm1 = vcmp.lt.s32.totalorder %v7377_v63, 2 }
 0x414   :  { %v7383_v19 = vor.u32 %v7382_v51, %v7381_v29  ;;  %v7386_v56 = vor.u32 %v7385_v57, %v7384_v28  ;;  %v7389_v37 = vor.u32 %v7388_v23, %v7387_v44  ;;  %v7392_v61 = vor.u32 %v7391_v18, %v7390_v47 }
 0x415   :  { %v7395_v38 = vor.u32 %v7394_v30, %v7393_v58  ;;  %v7412_v42 = vshll.u32 %v7372_v52, 8 }
 0x416   :  { %v7401_v4 = vsel %vm7399_vm15, %v7389_v37, 2102212464  ;;  %v7404_v6 = vsel %vm7396_vm14, %v7383_v19, %v7386_v56  ;;  %v7408_v12 = vsel %vm7396_vm14, %v7386_v56, %v7389_v37  ;;  %v7405_v46 = vsel %vm7399_vm15, %v7392_v61, 920167782 }
 0x417   :  { %v7409_v20 = vsel %vm7399_vm15, %v7395_v38, 1326507024  ;;  %v7406_v62 = vsel %vm7398_vm0, %v7389_v37, %v7405_v46  ;;  %v7400_v48 = vsel %vm7396_vm14, %v7380_v11, %v7383_v19  ;;  %v7402_v54 = vsel %vm7398_vm0, %v7386_v56, %v7401_v4 }
 0x418   :  { %v7410_v49 = vsel %vm7398_vm0, %v7392_v61, %v7409_v20  ;;  %v7407_v45 = vsel %vm7397_vm1, %v7404_v6, %v7406_v62  ;;  %v7403_v33 = vsel %vm7397_vm1, %v7400_v48, %v7402_v54  ;;  %v7523_v37 = vrot.slane %v13288_v26, %v15369_v7 }
 0x419   :  { %v7411_v14 = vsel %vm7397_vm1, %v7408_v12, %v7410_v49  ;;  %v13443_v60 = vmul.u32.u64.low %v7412_v42, %v7407_v45  ;;  %v13444_v22 = vmul.u32.u64.high %v7412_v42, %v7407_v45, %v13443_v60  ;;  %v7419_v9 = vmul.u32 %v7412_v42, %v7403_v33 }
 0x41a   :  { %v13440_v10 = vmul.u32.u64.low %v7412_v42, %v7411_v14  ;;  %v13441_v35 = vmul.u32.u64.high %v7412_v42, %v7411_v14, %v13440_v10  ;;  %v7549_v6 = vmul.f32 %v7523_v37, %v13423_v15 }
 0x41b   :  { %v7422_v5 = vadd.s32 1, %v13444_v22 }
 0x41c   :  { %vm7421_vm2 = vc.u32 %v13441_v35, %v13443_v60  ;;  %v7420_v34 = vadd.s32 %v13443_v60, %v13441_v35 }
 0x41d   :  { %v7423_v17 = vsel %vm7421_vm2, %v7422_v5, %v13444_v22 }
 0x41e   :  { %v7424_v13 = vadd.s32 %v7423_v17, %v7419_v9 }
 0x420   :  { %v7425_v55 = vadd.s32 536870912, %v7424_v13 }
 0x422   :  { %v7426_v59 = vshrl.u32 %v7425_v55, 30 }
 0x424   :  { %v7427_v43 = vshll.u32 %v7426_v59, 30  ;;  %v7450_v28 = vsub.s32 4, %v7426_v59 }
 0x426   :  { %v7428_v41 = vsub.s32 %v7424_v13, %v7427_v43  ;;  %v7451_v44 = vsel %vm7366_vm4, %v7450_v28, %v7426_v59 }
 0x427   :  { %v7453_v23 = vsel %vm7365_vm5, 0, %v7451_v44 }
 0x428   :  { %v7430_v53 = vsub.s32 0, %v7428_v41  ;;  %v7457_v47 = vadd.s32 3, %v7453_v23 }
 0x42a   :  { %v7724_v32 = vmin.u32 %v7430_v53, %v7428_v41  ;;  %v7458_v18 = vand.u32 3, %v7457_v47 }
 0x42c   :  { %v7432_v40 = vclz %v7724_v32  ;;  %vm7463_vm6 = vcmp.eq.s32.totalorder %v7458_v18, 2  ;;  %vm7460_vm7 = vcmp.eq.s32.totalorder %v7458_v18, 0  ;;  %vm7459_vm8 = vcmp.lt.s32.totalorder %v7458_v18, 2 }
 0x42e   :  { %v7725_v27 = vadd.s32 4294967294, %v7432_v40 }
 0x430   :  { %vm7726_vm3 = vcmp.lt.s32.totalorder %v7725_v27, 0 }
 0x431   :  { %v7435_v0 = vsel %vm7726_vm3, 0, %v7725_v27 }
 0x432   :  { %v7436_v31 = vsub.s32 32, %v7435_v0  ;;  %v7440_v3 = vsub.s32 4294967266, %v7435_v0  ;;  %v7437_v2 = vshll.u32 %v7428_v41, %v7435_v0 }
 0x434   :  { %v7438_v21 = vshrl.u32 %v7420_v34, %v7436_v31  ;;  %v7441_v50 = vadd.s32 127, %v7440_v3 }
 0x436   :  { %v7439_v24 = vor.u32 %v7438_v21, %v7437_v2  ;;  %v7442_v1 = vshll.u32 %v7441_v50, 23 }
 0x438   :  { %v7443_v39 = vor.u32 4788187, %v7442_v1  ;;  %v7446_v36 = vcvt.s32.f32 %v7439_v24 }
 0x43a   :  { %v7444_v25 = vand.u32 2147483647, %v7443_v39 }
 0x43c   :  { %v7447_v63 = vmul.f32 %v7446_v36, %v7444_v25 }
 0x43e   :  { %v7448_v29 = vxor.u32 2147483648, %v7447_v63 }
 0x440   :  { %v7449_v51 = vsel %vm7366_vm4, %v7448_v29, %v7447_v63 }
 0x441   :  { %v7452_v57 = vsel %vm7365_vm5, %v13423_v15, %v7449_v51 }
 0x442   :  { %8154 = vcosq.f32 %v7452_v57 }
 0x443   :  { %8156 = vsinq.f32 %v7452_v57 }
 0x44f   :  { %v8155_v58 = vpop.eup %8154 }
 0x450   :  { %v8157_v30 = vpop.eup %8156  ;;  %v7464_v52 = vxor.u32 2147483648, %v8155_v58 }
 0x451   :  { %v7461_v19 = vxor.u32 2147483648, %v8157_v30 }
 0x452   :  { %v7465_v56 = vsel %vm7463_vm6, %v7464_v52, %v8157_v30 }
 0x453   :  { %v7462_v61 = vsel %vm7460_vm7, %v8155_v58, %v7461_v19 }
 0x454   :  { %v7466_v38 = vsel %vm7459_vm8, %v7462_v61, %v7465_v56 }
 0x455   :  { %v7467_v4 = vsel %vm7456_vm9, nan, %v7466_v38 }
 0x456   :  { %v7631_v12 = vmul.f32 %v7605_v16, %v7467_v4 }
 0x458   :  { %v7644_v11 = vadd.f32 %v7631_v12, %v7549_v6 }
 0x45a   :  { %7657 = vst [vmem:[#allocation10 + $0x60] sm:$0xff] %v7644_v11 }
 0x45b   :  { %8256 = shalt.err (!%p8253_p10)
}
 0x45c   :  { %7667 = dma.vmem_to_hbm [thread:$0]  %s7665_s3, 1664, %s13467_s4, [#allocation4]  }
 0x45d   :  { %8271 = dma.done.wait [#allocation4], 1664  }
 0x45e   :  { %8272 = vsyncadd [#allocation4], 4294965632 }
 0x45f   :  { %7671 = vsyncpa [#allocation3], 1 }
 0x460   :  { %7672 = vsyncpa [#allocation6], 1 }
 0x461   :  { %7673 = vsyncpa [#allocation9], 1 }
 0x462   :  { %7674 = vsyncpa [#allocation4], 1 }

</bundles_post_ra>
